<compile_context>
chip_gen: v7x
topology: tpu7x:2x2x1
jax: 0.10.0
libtpu: 0.0.40
codegen_flags: <defaults>
</compile_context>

<pallas_src>
import jax
import jax.numpy as jnp
from jax.experimental import pallas as pl
from jax.experimental.pallas import tpu as pltpu

_VMEM_LIMIT = 32 * 1024 * 1024  # explicit, > v5e's 16 MiB scoped default, safe everywhere


# ----------------------------------------------------------------------------
# Fused whole-network kernel (single pallas_call)
# ----------------------------------------------------------------------------
def _make_vgg_kernel(layers, n_batch, h0, w0, cin0):
    """Build the fused kernel body for the full feature stack + classifier.

    Activation layout: per conv layer a VMEM scratch of shape
    (n_batch*(H+2) + 2, W*Cin) bf16 holds the zero-padded rows of all images
    back-to-back (per-image block = [pad, H rows, pad]).  A 3x3 conv is then
    3 MXU dots: for tap kh the contiguous slab rows[kh : kh+M] is contracted
    against a block-banded (W*Cin, W*Cout) weight that already encodes the kw
    taps and the width zero padding.  Rows that straddle two images compute
    finite garbage and are simply never copied into the next layer's scratch.
    """
    n_conv = len(layers)
    n_pooled = sum(1 for lyr in layers if lyr['pooled'])

    def kernel(*refs):
        pos = 0
        x_ref = refs[pos]; pos += 1
        w_refs, s_refs = [], []
        for _ in range(n_conv):
            w_refs.append(refs[pos]); s_refs.append(refs[pos + 1]); pos += 2
        cw1, cb1, cw2, cb2, cw3, cb3 = refs[pos:pos + 6]; pos += 6
        o_ref = refs[pos]; pos += 1
        pad_refs = list(refs[pos:pos + n_conv]); pos += n_conv
        tmp_refs = list(refs[pos:pos + n_pooled])

        # ---- stage the (unpadded, f32) input into the first padded scratch ----
        H0, B0 = h0, h0 + 2
        pad0 = pad_refs[0]
        pad0[...] = jnp.zeros(pad0.shape, pad0.dtype)
        xin = x_ref[...].astype(jnp.bfloat16)                 # (N*H0, W0*Cin0)
        for n in range(n_batch):
            pad0[pl.ds(n * B0 + 1, H0), :] = xin[n * H0:(n + 1) * H0, :]

        tmp_i = 0
        feat = None
        feat_stride = 1
        for l, cfg in enumerate(layers):
            H, W = cfg['h'], cfg['w']
            Cin, Cout, pooled = cfg['cin'], cfg['cout'], cfg['pooled']
            B = H + 2
            M = n_batch * B
            pad = pad_refs[l]
            wr = w_refs[l]

            # 3 MXU pushes per layer: kw taps + width padding are inside wr[kh].
            acc = jnp.zeros((M, W * Cout), jnp.float32)
            for kh in range(3):
                slab = pad[pl.ds(kh, M), :]                   # (M, W*Cin) bf16
                acc = acc + jnp.dot(slab, wr[kh],
                                    preferred_element_type=jnp.float32)
            y = jnp.maximum(acc + s_refs[l][...], 0.0)        # folded-BN shift + ReLU

            if pooled:
                half = (W // 2) * Cout
                # width pool: output columns are packed [even w | odd w] in the weights
                yw = jnp.maximum(y[:, :half], y[:, half:])
                tmp = tmp_refs[tmp_i]; tmp_i += 1
                tmp[...] = yw
                ev = tmp[pl.ds(0, M // 2, stride=2), :]       # even conv rows
                od = tmp[pl.ds(1, M // 2, stride=2), :]       # odd conv rows
                out_rows = jnp.maximum(ev, od)                # (M//2, half)
                Hn, src_b = H // 2, B // 2
            else:
                out_rows = y
                Hn, src_b = H, B

            if l + 1 < n_conv:
                nxt = pad_refs[l + 1]
                nxt[...] = jnp.zeros(nxt.shape, nxt.dtype)    # zero pad rows
                Bn = Hn + 2
                for n in range(n_batch):                      # copy only valid rows
                    nxt[pl.ds(n * Bn + 1, Hn), :] = out_rows[
                        n * src_b:n * src_b + Hn, :].astype(jnp.bfloat16)
            else:
                feat = out_rows                               # final spatial is 1x1
                feat_stride = src_b

        # ---- classifier: Linear+ReLU -> Linear+ReLU -> Linear (Dropout=identity) ----
        # TODO(synk): train-mode Dropout masking not implemented (eval semantics).
        # Garbage inter-image rows flow through the dots and are simply not stored.
        h = jnp.dot(feat.astype(jnp.bfloat16), cw1[...],
                    preferred_element_type=jnp.float32) + cb1[...]
        h = jnp.maximum(h, 0.0).astype(jnp.bfloat16)
        h = jnp.dot(h, cw2[...], preferred_element_type=jnp.float32) + cb2[...]
        h = jnp.maximum(h, 0.0).astype(jnp.bfloat16)
        out = jnp.dot(h, cw3[...], preferred_element_type=jnp.float32) + cb3[...]
        for n in range(n_batch):
            o_ref[pl.ds(n, 1), :] = out[
                n * feat_stride:n * feat_stride + 1, :].astype(o_ref.dtype)

    return kernel


# ----------------------------------------------------------------------------
# One-time parameter packing (BN fold, bf16 cast, block-banded conv weights)
# ----------------------------------------------------------------------------
def _pack_conv_weight(w, scale, W, pooled):
    """(3,3,Cin,Cout) conv weight (BN scale folded) -> (3, W*Cin, W*Cout) bf16.

    Per kh tap a block-banded matrix: entry [p*Cin+i, q*Cout+o] = w[kh, p-q+1, i, o]
    when 0 <= p-q+1 <= 2, else 0 (width zero-padding is implicit in the band).
    For pooled layers the output spatial columns are permuted to [even w | odd w]
    so the 2x2 max-pool's width step is a max of the two lane halves.
    """
    ws = w * scale                                   # fold BN scale per output channel
    KH, KW, Cin, Cout = ws.shape
    p = jnp.arange(W)[:, None]                       # input (unpadded) column
    q = jnp.arange(W)[None, :]                       # output column
    kw = p - q + 1                                   # tap index: input col = q - 1 + kw
    valid = ((kw >= 0) & (kw <= 2)).astype(ws.dtype)
    tap = ws[:, jnp.clip(kw, 0, 2)]                  # (3, W, W, Cin, Cout) = [kh,p,q,i,o]
    band = tap * valid[None, :, :, None, None]
    band = jnp.transpose(band, (0, 1, 3, 2, 4))      # (3, W, Cin, W, Cout)
    if pooled:
        perm = jnp.concatenate([jnp.arange(0, W, 2), jnp.arange(1, W, 2)])
        band = band[:, :, :, perm, :]
    return band.reshape(3, W * Cin, W * Cout).astype(jnp.bfloat16)


def pack_params(params, spatial, eps=1e-5):
    feats = params['features']
    packed_feats = []
    s, i = spatial, 0
    while i < len(feats):
        kind, p = feats[i]
        assert kind == 'C'
        pooled = (i + 1 < len(feats)) and feats[i + 1][0] == 'M'
        w = p['w']
        cin, cout = w.shape[2], w.shape[3]
        scale = p['gamma'] / jnp.sqrt(p['var'] + eps)
        shift = p['beta'] + (p['b'] - p['mean']) * scale
        packed_feats.append(dict(
            w3=_pack_conv_weight(w, scale, s, pooled),
            shift=jnp.tile(shift.astype(jnp.float32), s).reshape(1, s * cout),
            cin=cin, cout=cout, h=s, w=s, pooled=pooled))
        if pooled:
            s //= 2
            i += 2
        else:
            i += 1
    packed_cls = [dict(w=c['w'].astype(jnp.bfloat16),
                       b=c['b'].astype(jnp.float32).reshape(1, -1))
                  for c in params['classifier']]
    return dict(features=packed_feats, classifier=packed_cls)


# ----------------------------------------------------------------------------
# Model (scaled-down VGG-16-BN: same topology, widths / 16, 32x32 input)
# ----------------------------------------------------------------------------
VGG16_CFG = [64, 64, 'M', 128, 128, 'M', 256, 256, 256, 'M',
             512, 512, 512, 'M', 512, 512, 512, 'M']


def init_params(key, in_ch, spatial, output_num, width_div=16):
    cfg = [c if c == 'M' else max(c // width_div, 1) for c in VGG16_CFG]
    features = []
    c_prev, s = in_ch, spatial
    for v in cfg:
        if v == 'M':
            features.append(('M', None))
            s //= 2
            continue
        key, k1, k2, k3, k4, k5, k6 = jax.random.split(key, 7)
        fan_in = 9 * c_prev
        features.append(('C', dict(
            w=jax.random.normal(k1, (3, 3, c_prev, v), jnp.float32) * (2.0 / fan_in) ** 0.5,
            b=0.01 * jax.random.normal(k2, (v,), jnp.float32),
            gamma=1.0 + 0.1 * jax.random.normal(k3, (v,), jnp.float32),
            beta=0.05 * jax.random.normal(k4, (v,), jnp.float32),
            mean=0.05 * jax.random.normal(k5, (v,), jnp.float32),
            var=jax.random.uniform(k6, (v,), jnp.float32, minval=0.5, maxval=1.5),
        )))
        c_prev = v
    flat = c_prev * s * s
    hidden = 4096 // width_div
    classifier = []
    for din, dout in [(flat, hidden), (hidden, hidden), (hidden, output_num)]:
        key, k1, k2 = jax.random.split(key, 3)
        classifier.append(dict(
            w=jax.random.normal(k1, (din, dout), jnp.float32) * (1.0 / din) ** 0.5,
            b=0.01 * jax.random.normal(k2, (dout,), jnp.float32),
        ))
    return dict(features=features, classifier=classifier)


# ----------------------------------------------------------------------------
# Forward wrapper: one pallas_call for the whole network
# ----------------------------------------------------------------------------
def vgg16_bn_forward(packed, x_nchw):
    layers = packed['features']
    cls = packed['classifier']
    N, Cin, H, W = x_nchw.shape
    assert Cin == layers[0]['cin'] and H == layers[0]['h'] and W == layers[0]['w']
    last = layers[-1]
    assert last['pooled'] and last['h'] == 2 and last['w'] == 2  # 1x1 before classifier

    # layout: NCHW -> NHWC -> (N*H, W*Cin); the bf16 cast happens inside the kernel.
    x2d = jnp.transpose(x_nchw, (0, 2, 3, 1)).reshape(N * H, W * Cin)

    inputs = [x2d]
    for lyr in layers:
        inputs += [lyr['w3'], lyr['shift']]
    inputs += [cls[0]['w'], cls[0]['b'], cls[1]['w'], cls[1]['b'],
               cls[2]['w'], cls[2]['b']]

    def _full_spec(arr):
        if arr.ndim == 2:
            return pl.BlockSpec(arr.shape, lambda i: (0, 0))
        return pl.BlockSpec(arr.shape, lambda i: (0, 0, 0))

    in_specs = [_full_spec(a) for a in inputs]

    scratch_shapes = []
    for lyr in layers:                           # padded activation scratches (bf16)
        rows = N * (lyr['h'] + 2) + 2
        scratch_shapes.append(pltpu.VMEM((rows, lyr['w'] * lyr['cin']), jnp.bfloat16))
    for lyr in layers:                           # pool staging scratches (f32)
        if lyr['pooled']:
            scratch_shapes.append(pltpu.VMEM(
                (N * (lyr['h'] + 2), (lyr['w'] // 2) * lyr['cout']), jnp.float32))

    out_dim = cls[2]['w'].shape[1]
    kernel = _make_vgg_kernel(layers, N, H, W, Cin)

    # honest (block-banded, as-executed) FLOP count for the scheduler hint
    flops = 0
    for lyr in layers:
        Ml = N * (lyr['h'] + 2)
        flops += 2 * Ml * 3 * (lyr['w'] * lyr['cin']) * (lyr['w'] * lyr['cout'])
    f1, h1 = cls[0]['w'].shape
    _, h2 = cls[1]['w'].shape
    flops += 2 * (N * 2) * (f1 * h1 + h1 * h2 + h2 * out_dim)
    bytes_accessed = int(x2d.size * 4
                         + sum(a.size * a.dtype.itemsize for a in inputs[1:])
                         + N * out_dim * 4)

    return pl.pallas_call(
        kernel,
        out_shape=jax.ShapeDtypeStruct((N, out_dim), jnp.float32),
        grid=(1,),
        in_specs=in_specs,
        out_specs=pl.BlockSpec((N, out_dim), lambda i: (0, 0)),
        scratch_shapes=scratch_shapes,
        compiler_params=pltpu.CompilerParams(
            dimension_semantics=("arbitrary",),
            vmem_limit_bytes=_VMEM_LIMIT),
        cost_estimate=pl.CostEstimate(flops=int(flops), transcendentals=0,
                                      bytes_accessed=bytes_accessed),
    )(*inputs)


if __name__ == "__main__":
    key = jax.random.PRNGKey(0)
    kx, kp = jax.random.split(key)
    # features[0] was replaced with Conv2d(1, 64, ...): 1 input channel.
    # Small test shapes: batch=2, 32x32 spatial (5 maxpools -> 1x1), widths scaled by 1/16.
    N, CIN, S, OUTPUT_NUM = 2, 1, 32, 10
    x = jax.random.normal(kx, (N, CIN, S, S), jnp.float32)
    params = init_params(kp, CIN, S, OUTPUT_NUM, width_div=16)

    packed = pack_params(params, S)                      # one-time weight prep / BN fold
    fwd = jax.jit(lambda inp: vgg16_bn_forward(packed, inp))
    out = jax.block_until_ready(fwd(x))
    assert out.shape == (N, OUTPUT_NUM)
    assert bool(jnp.all(jnp.isfinite(out)))
    print("KERNEL_OK")
</pallas_src>

<mosaic_0001>
module attributes {stable_mosaic.version = 11 : i64} {
  func.func @kernel(%arg0: i32, %arg1: memref<64x32xf32, #tpu.memory_space<vmem>>, %arg2: memref<3x32x128xbf16, #tpu.memory_space<vmem>>, %arg3: memref<1x128xf32, #tpu.memory_space<vmem>>, %arg4: memref<3x128x128xbf16, #tpu.memory_space<vmem>>, %arg5: memref<1x128xf32, #tpu.memory_space<vmem>>, %arg6: memref<3x64x128xbf16, #tpu.memory_space<vmem>>, %arg7: memref<1x128xf32, #tpu.memory_space<vmem>>, %arg8: memref<3x128x128xbf16, #tpu.memory_space<vmem>>, %arg9: memref<1x128xf32, #tpu.memory_space<vmem>>, %arg10: memref<3x64x128xbf16, #tpu.memory_space<vmem>>, %arg11: memref<1x128xf32, #tpu.memory_space<vmem>>, %arg12: memref<3x128x128xbf16, #tpu.memory_space<vmem>>, %arg13: memref<1x128xf32, #tpu.memory_space<vmem>>, %arg14: memref<3x128x128xbf16, #tpu.memory_space<vmem>>, %arg15: memref<1x128xf32, #tpu.memory_space<vmem>>, %arg16: memref<3x64x128xbf16, #tpu.memory_space<vmem>>, %arg17: memref<1x128xf32, #tpu.memory_space<vmem>>, %arg18: memref<3x128x128xbf16, #tpu.memory_space<vmem>>, %arg19: memref<1x128xf32, #tpu.memory_space<vmem>>, %arg20: memref<3x128x128xbf16, #tpu.memory_space<vmem>>, %arg21: memref<1x128xf32, #tpu.memory_space<vmem>>, %arg22: memref<3x64x64xbf16, #tpu.memory_space<vmem>>, %arg23: memref<1x64xf32, #tpu.memory_space<vmem>>, %arg24: memref<3x64x64xbf16, #tpu.memory_space<vmem>>, %arg25: memref<1x64xf32, #tpu.memory_space<vmem>>, %arg26: memref<3x64x64xbf16, #tpu.memory_space<vmem>>, %arg27: memref<1x64xf32, #tpu.memory_space<vmem>>, %arg28: memref<32x256xbf16, #tpu.memory_space<vmem>>, %arg29: memref<1x256xf32, #tpu.memory_space<vmem>>, %arg30: memref<256x256xbf16, #tpu.memory_space<vmem>>, %arg31: memref<1x256xf32, #tpu.memory_space<vmem>>, %arg32: memref<256x10xbf16, #tpu.memory_space<vmem>>, %arg33: memref<1x10xf32, #tpu.memory_space<vmem>>, %arg34: memref<2x10xf32, #tpu.memory_space<vmem>>, %arg35: memref<70x32xbf16, #tpu.memory_space<vmem>>, %arg36: memref<70x128xbf16, #tpu.memory_space<vmem>>, %arg37: memref<38x64xbf16, #tpu.memory_space<vmem>>, %arg38: memref<38x128xbf16, #tpu.memory_space<vmem>>, %arg39: memref<22x64xbf16, #tpu.memory_space<vmem>>, %arg40: memref<22x128xbf16, #tpu.memory_space<vmem>>, %arg41: memref<22x128xbf16, #tpu.memory_space<vmem>>, %arg42: memref<14x64xbf16, #tpu.memory_space<vmem>>, %arg43: memref<14x128xbf16, #tpu.memory_space<vmem>>, %arg44: memref<14x128xbf16, #tpu.memory_space<vmem>>, %arg45: memref<10x64xbf16, #tpu.memory_space<vmem>>, %arg46: memref<10x64xbf16, #tpu.memory_space<vmem>>, %arg47: memref<10x64xbf16, #tpu.memory_space<vmem>>, %arg48: memref<68x64xf32, #tpu.memory_space<vmem>>, %arg49: memref<36x64xf32, #tpu.memory_space<vmem>>, %arg50: memref<20x64xf32, #tpu.memory_space<vmem>>, %arg51: memref<12x64xf32, #tpu.memory_space<vmem>>, %arg52: memref<8x32xf32, #tpu.memory_space<vmem>>) attributes {dimension_semantics = [#tpu.dimension_semantics<arbitrary>], iteration_bounds = array<i64: 1>, scalar_prefetch = 0 : i64, scratch_operands = 18 : i64, tpu.core_type = #tpu.core_type<tc>, window_params = [{pipeline_mode = #tpu.pipeline_mode<synchronous>, transform_indices = @transform_0, window_bounds = array<i64: 64, 32>}, {pipeline_mode = #tpu.pipeline_mode<synchronous>, transform_indices = @transform_1, window_bounds = array<i64: 3, 32, 128>}, {pipeline_mode = #tpu.pipeline_mode<synchronous>, transform_indices = @transform_2, window_bounds = array<i64: 1, 128>}, {pipeline_mode = #tpu.pipeline_mode<synchronous>, transform_indices = @transform_3, window_bounds = array<i64: 3, 128, 128>}, {pipeline_mode = #tpu.pipeline_mode<synchronous>, transform_indices = @transform_4, window_bounds = array<i64: 1, 128>}, {pipeline_mode = #tpu.pipeline_mode<synchronous>, transform_indices = @transform_5, window_bounds = array<i64: 3, 64, 128>}, {pipeline_mode = #tpu.pipeline_mode<synchronous>, transform_indices = @transform_6, window_bounds = array<i64: 1, 128>}, {pipeline_mode = #tpu.pipeline_mode<synchronous>, transform_indices = @transform_7, window_bounds = array<i64: 3, 128, 128>}, {pipeline_mode = #tpu.pipeline_mode<synchronous>, transform_indices = @transform_8, window_bounds = array<i64: 1, 128>}, {pipeline_mode = #tpu.pipeline_mode<synchronous>, transform_indices = @transform_9, window_bounds = array<i64: 3, 64, 128>}, {pipeline_mode = #tpu.pipeline_mode<synchronous>, transform_indices = @transform_10, window_bounds = array<i64: 1, 128>}, {pipeline_mode = #tpu.pipeline_mode<synchronous>, transform_indices = @transform_11, window_bounds = array<i64: 3, 128, 128>}, {pipeline_mode = #tpu.pipeline_mode<synchronous>, transform_indices = @transform_12, window_bounds = array<i64: 1, 128>}, {pipeline_mode = #tpu.pipeline_mode<synchronous>, transform_indices = @transform_13, window_bounds = array<i64: 3, 128, 128>}, {pipeline_mode = #tpu.pipeline_mode<synchronous>, transform_indices = @transform_14, window_bounds = array<i64: 1, 128>}, {pipeline_mode = #tpu.pipeline_mode<synchronous>, transform_indices = @transform_15, window_bounds = array<i64: 3, 64, 128>}, {pipeline_mode = #tpu.pipeline_mode<synchronous>, transform_indices = @transform_16, window_bounds = array<i64: 1, 128>}, {pipeline_mode = #tpu.pipeline_mode<synchronous>, transform_indices = @transform_17, window_bounds = array<i64: 3, 128, 128>}, {pipeline_mode = #tpu.pipeline_mode<synchronous>, transform_indices = @transform_18, window_bounds = array<i64: 1, 128>}, {pipeline_mode = #tpu.pipeline_mode<synchronous>, transform_indices = @transform_19, window_bounds = array<i64: 3, 128, 128>}, {pipeline_mode = #tpu.pipeline_mode<synchronous>, transform_indices = @transform_20, window_bounds = array<i64: 1, 128>}, {pipeline_mode = #tpu.pipeline_mode<synchronous>, transform_indices = @transform_21, window_bounds = array<i64: 3, 64, 64>}, {pipeline_mode = #tpu.pipeline_mode<synchronous>, transform_indices = @transform_22, window_bounds = array<i64: 1, 64>}, {pipeline_mode = #tpu.pipeline_mode<synchronous>, transform_indices = @transform_23, window_bounds = array<i64: 3, 64, 64>}, {pipeline_mode = #tpu.pipeline_mode<synchronous>, transform_indices = @transform_24, window_bounds = array<i64: 1, 64>}, {pipeline_mode = #tpu.pipeline_mode<synchronous>, transform_indices = @transform_25, window_bounds = array<i64: 3, 64, 64>}, {pipeline_mode = #tpu.pipeline_mode<synchronous>, transform_indices = @transform_26, window_bounds = array<i64: 1, 64>}, {pipeline_mode = #tpu.pipeline_mode<synchronous>, transform_indices = @transform_27, window_bounds = array<i64: 32, 256>}, {pipeline_mode = #tpu.pipeline_mode<synchronous>, transform_indices = @transform_28, window_bounds = array<i64: 1, 256>}, {pipeline_mode = #tpu.pipeline_mode<synchronous>, transform_indices = @transform_29, window_bounds = array<i64: 256, 256>}, {pipeline_mode = #tpu.pipeline_mode<synchronous>, transform_indices = @transform_30, window_bounds = array<i64: 1, 256>}, {pipeline_mode = #tpu.pipeline_mode<synchronous>, transform_indices = @transform_31, window_bounds = array<i64: 256, 10>}, {pipeline_mode = #tpu.pipeline_mode<synchronous>, transform_indices = @transform_32, window_bounds = array<i64: 1, 10>}, {pipeline_mode = #tpu.pipeline_mode<synchronous>, transform_indices = @transform_33, window_bounds = array<i64: 2, 10>}]} {
    %cst = arith.constant 0.000000e+00 : bf16
    %0 = vector.broadcast %cst : bf16 to vector<70x32xbf16>
    %c0 = arith.constant 0 : index
    %c0_0 = arith.constant 0 : index
    %1 = vector.load %arg35[%c0, %c0_0] : memref<70x32xbf16, #tpu.memory_space<vmem>>, vector<70x32xbf16>
    tpu.vector_store %arg35[%c0, %c0_0], %0 {strides = array<i32>} : memref<70x32xbf16, #tpu.memory_space<vmem>>, vector<70x32xbf16>,
    %c0_1 = arith.constant 0 : index
    %c0_2 = arith.constant 0 : index
    %2 = vector.load %arg1[%c0_1, %c0_2] : memref<64x32xf32, #tpu.memory_space<vmem>>, vector<64x32xf32>
    %3 = arith.truncf %2 : vector<64x32xf32> to vector<64x32xbf16>
    %4 = vector.extract_strided_slice %3 {offsets = [0, 0], sizes = [32, 32], strides = [1, 1]} : vector<64x32xbf16> to vector<32x32xbf16>
    %c1 = arith.constant 1 : index
    %c0_3 = arith.constant 0 : index
    %5 = vector.load %arg35[%c1, %c0_3] : memref<70x32xbf16, #tpu.memory_space<vmem>>, vector<32x32xbf16>
    tpu.vector_store %arg35[%c1, %c0_3], %4 {strides = array<i32>} : memref<70x32xbf16, #tpu.memory_space<vmem>>, vector<32x32xbf16>,
    %6 = vector.extract_strided_slice %3 {offsets = [32, 0], sizes = [32, 32], strides = [1, 1]} : vector<64x32xbf16> to vector<32x32xbf16>
    %c35 = arith.constant 35 : index
    %c0_4 = arith.constant 0 : index
    %7 = vector.load %arg35[%c35, %c0_4] : memref<70x32xbf16, #tpu.memory_space<vmem>>, vector<32x32xbf16>
    tpu.vector_store %arg35[%c35, %c0_4], %6 {strides = array<i32>} : memref<70x32xbf16, #tpu.memory_space<vmem>>, vector<32x32xbf16>,
    %cst_5 = arith.constant 0.000000e+00 : f32
    %8 = vector.broadcast %cst_5 : f32 to vector<68x128xf32>
    %c0_6 = arith.constant 0 : index
    %c0_7 = arith.constant 0 : index
    %9 = vector.load %arg35[%c0_6, %c0_7] : memref<70x32xbf16, #tpu.memory_space<vmem>>, vector<68x32xbf16>
    %c0_8 = arith.constant 0 : index
    %c0_9 = arith.constant 0 : index
    %c0_10 = arith.constant 0 : index
    %10 = vector.load %arg2[%c0_8, %c0_9, %c0_10] : memref<3x32x128xbf16, #tpu.memory_space<vmem>>, vector<1x32x128xbf16>
    %11 = vector.shape_cast %10 : vector<1x32x128xbf16> to vector<32x128xbf16>
    %cst_11 = arith.constant dense<0.000000e+00> : vector<68x128xf32>
    %12 = tpu.matmul %9, %11, %cst_11 {dimension_numbers = #tpu.dot_dimension_numbers<[1], [0], [0], [1], [0, 0, 1, 1], [], []>} : vector<68x32xbf16>, vector<32x128xbf16>, vector<68x128xf32> -> vector<68x128xf32>
    %13 = arith.addf %8, %12 : vector<68x128xf32>
    %c1_12 = arith.constant 1 : index
    %c0_13 = arith.constant 0 : index
    %14 = vector.load %arg35[%c1_12, %c0_13] : memref<70x32xbf16, #tpu.memory_space<vmem>>, vector<68x32xbf16>
    %c1_14 = arith.constant 1 : index
    %c0_15 = arith.constant 0 : index
    %c0_16 = arith.constant 0 : index
    %15 = vector.load %arg2[%c1_14, %c0_15, %c0_16] : memref<3x32x128xbf16, #tpu.memory_space<vmem>>, vector<1x32x128xbf16>
    %16 = vector.shape_cast %15 : vector<1x32x128xbf16> to vector<32x128xbf16>
    %cst_17 = arith.constant dense<0.000000e+00> : vector<68x128xf32>
    %17 = tpu.matmul %14, %16, %cst_17 {dimension_numbers = #tpu.dot_dimension_numbers<[1], [0], [0], [1], [0, 0, 1, 1], [], []>} : vector<68x32xbf16>, vector<32x128xbf16>, vector<68x128xf32> -> vector<68x128xf32>
    %18 = arith.addf %13, %17 : vector<68x128xf32>
    %c2 = arith.constant 2 : index
    %c0_18 = arith.constant 0 : index
    %19 = vector.load %arg35[%c2, %c0_18] : memref<70x32xbf16, #tpu.memory_space<vmem>>, vector<68x32xbf16>
    %c2_19 = arith.constant 2 : index
    %c0_20 = arith.constant 0 : index
    %c0_21 = arith.constant 0 : index
    %20 = vector.load %arg2[%c2_19, %c0_20, %c0_21] : memref<3x32x128xbf16, #tpu.memory_space<vmem>>, vector<1x32x128xbf16>
    %21 = vector.shape_cast %20 : vector<1x32x128xbf16> to vector<32x128xbf16>
    %cst_22 = arith.constant dense<0.000000e+00> : vector<68x128xf32>
    %22 = tpu.matmul %19, %21, %cst_22 {dimension_numbers = #tpu.dot_dimension_numbers<[1], [0], [0], [1], [0, 0, 1, 1], [], []>} : vector<68x32xbf16>, vector<32x128xbf16>, vector<68x128xf32> -> vector<68x128xf32>
    %23 = arith.addf %18, %22 : vector<68x128xf32>
    %c0_23 = arith.constant 0 : index
    %c0_24 = arith.constant 0 : index
    %24 = vector.load %arg3[%c0_23, %c0_24] : memref<1x128xf32, #tpu.memory_space<vmem>>, vector<1x128xf32>
    %25 = vector.broadcast %24 : vector<1x128xf32> to vector<68x128xf32>
    %26 = arith.addf %23, %25 : vector<68x128xf32>
    %cst_25 = arith.constant 0.000000e+00 : f32
    %27 = vector.broadcast %cst_25 : f32 to vector<68x128xf32>
    %28 = arith.maximumf %26, %27 : vector<68x128xf32>
    %cst_26 = arith.constant 0.000000e+00 : bf16
    %29 = vector.broadcast %cst_26 : bf16 to vector<70x128xbf16>
    %c0_27 = arith.constant 0 : index
    %c0_28 = arith.constant 0 : index
    %30 = vector.load %arg36[%c0_27, %c0_28] : memref<70x128xbf16, #tpu.memory_space<vmem>>, vector<70x128xbf16>
    tpu.vector_store %arg36[%c0_27, %c0_28], %29 {strides = array<i32>} : memref<70x128xbf16, #tpu.memory_space<vmem>>, vector<70x128xbf16>,
    %31 = vector.extract_strided_slice %28 {offsets = [0, 0], sizes = [32, 128], strides = [1, 1]} : vector<68x128xf32> to vector<32x128xf32>
    %32 = arith.truncf %31 : vector<32x128xf32> to vector<32x128xbf16>
    %c1_29 = arith.constant 1 : index
    %c0_30 = arith.constant 0 : index
    %33 = vector.load %arg36[%c1_29, %c0_30] : memref<70x128xbf16, #tpu.memory_space<vmem>>, vector<32x128xbf16>
    tpu.vector_store %arg36[%c1_29, %c0_30], %32 {strides = array<i32>} : memref<70x128xbf16, #tpu.memory_space<vmem>>, vector<32x128xbf16>,
    %34 = vector.extract_strided_slice %28 {offsets = [34, 0], sizes = [32, 128], strides = [1, 1]} : vector<68x128xf32> to vector<32x128xf32>
    %35 = arith.truncf %34 : vector<32x128xf32> to vector<32x128xbf16>
    %c35_31 = arith.constant 35 : index
    %c0_32 = arith.constant 0 : index
    %36 = vector.load %arg36[%c35_31, %c0_32] : memref<70x128xbf16, #tpu.memory_space<vmem>>, vector<32x128xbf16>
    tpu.vector_store %arg36[%c35_31, %c0_32], %35 {strides = array<i32>} : memref<70x128xbf16, #tpu.memory_space<vmem>>, vector<32x128xbf16>,
    %cst_33 = arith.constant 0.000000e+00 : f32
    %37 = vector.broadcast %cst_33 : f32 to vector<68x128xf32>
    %c0_34 = arith.constant 0 : index
    %c0_35 = arith.constant 0 : index
    %38 = vector.load %arg36[%c0_34, %c0_35] : memref<70x128xbf16, #tpu.memory_space<vmem>>, vector<68x128xbf16>
    %c0_36 = arith.constant 0 : index
    %c0_37 = arith.constant 0 : index
    %c0_38 = arith.constant 0 : index
    %39 = vector.load %arg4[%c0_36, %c0_37, %c0_38] : memref<3x128x128xbf16, #tpu.memory_space<vmem>>, vector<1x128x128xbf16>
    %40 = vector.shape_cast %39 : vector<1x128x128xbf16> to vector<128x128xbf16>
    %cst_39 = arith.constant dense<0.000000e+00> : vector<68x128xf32>
    %41 = tpu.matmul %38, %40, %cst_39 {dimension_numbers = #tpu.dot_dimension_numbers<[1], [0], [0], [1], [0, 0, 1, 1], [], []>} : vector<68x128xbf16>, vector<128x128xbf16>, vector<68x128xf32> -> vector<68x128xf32>
    %42 = arith.addf %37, %41 : vector<68x128xf32>
    %c1_40 = arith.constant 1 : index
    %c0_41 = arith.constant 0 : index
    %43 = vector.load %arg36[%c1_40, %c0_41] : memref<70x128xbf16, #tpu.memory_space<vmem>>, vector<68x128xbf16>
    %c1_42 = arith.constant 1 : index
    %c0_43 = arith.constant 0 : index
    %c0_44 = arith.constant 0 : index
    %44 = vector.load %arg4[%c1_42, %c0_43, %c0_44] : memref<3x128x128xbf16, #tpu.memory_space<vmem>>, vector<1x128x128xbf16>
    %45 = vector.shape_cast %44 : vector<1x128x128xbf16> to vector<128x128xbf16>
    %cst_45 = arith.constant dense<0.000000e+00> : vector<68x128xf32>
    %46 = tpu.matmul %43, %45, %cst_45 {dimension_numbers = #tpu.dot_dimension_numbers<[1], [0], [0], [1], [0, 0, 1, 1], [], []>} : vector<68x128xbf16>, vector<128x128xbf16>, vector<68x128xf32> -> vector<68x128xf32>
    %47 = arith.addf %42, %46 : vector<68x128xf32>
    %c2_46 = arith.constant 2 : index
    %c0_47 = arith.constant 0 : index
    %48 = vector.load %arg36[%c2_46, %c0_47] : memref<70x128xbf16, #tpu.memory_space<vmem>>, vector<68x128xbf16>
    %c2_48 = arith.constant 2 : index
    %c0_49 = arith.constant 0 : index
    %c0_50 = arith.constant 0 : index
    %49 = vector.load %arg4[%c2_48, %c0_49, %c0_50] : memref<3x128x128xbf16, #tpu.memory_space<vmem>>, vector<1x128x128xbf16>
    %50 = vector.shape_cast %49 : vector<1x128x128xbf16> to vector<128x128xbf16>
    %cst_51 = arith.constant dense<0.000000e+00> : vector<68x128xf32>
    %51 = tpu.matmul %48, %50, %cst_51 {dimension_numbers = #tpu.dot_dimension_numbers<[1], [0], [0], [1], [0, 0, 1, 1], [], []>} : vector<68x128xbf16>, vector<128x128xbf16>, vector<68x128xf32> -> vector<68x128xf32>
    %52 = arith.addf %47, %51 : vector<68x128xf32>
    %c0_52 = arith.constant 0 : index
    %c0_53 = arith.constant 0 : index
    %53 = vector.load %arg5[%c0_52, %c0_53] : memref<1x128xf32, #tpu.memory_space<vmem>>, vector<1x128xf32>
    %54 = vector.broadcast %53 : vector<1x128xf32> to vector<68x128xf32>
    %55 = arith.addf %52, %54 : vector<68x128xf32>
    %cst_54 = arith.constant 0.000000e+00 : f32
    %56 = vector.broadcast %cst_54 : f32 to vector<68x128xf32>
    %57 = arith.maximumf %55, %56 : vector<68x128xf32>
    %58 = vector.extract_strided_slice %57 {offsets = [0, 0], sizes = [68, 64], strides = [1, 1]} : vector<68x128xf32> to vector<68x64xf32>
    %59 = vector.extract_strided_slice %57 {offsets = [0, 64], sizes = [68, 64], strides = [1, 1]} : vector<68x128xf32> to vector<68x64xf32>
    %60 = arith.maximumf %58, %59 : vector<68x64xf32>
    %c0_55 = arith.constant 0 : index
    %c0_56 = arith.constant 0 : index
    %61 = vector.load %arg48[%c0_55, %c0_56] : memref<68x64xf32, #tpu.memory_space<vmem>>, vector<68x64xf32>
    tpu.vector_store %arg48[%c0_55, %c0_56], %60 {strides = array<i32>} : memref<68x64xf32, #tpu.memory_space<vmem>>, vector<68x64xf32>,
    %c0_57 = arith.constant 0 : index
    %c0_58 = arith.constant 0 : index
    %62 = tpu.strided_load %arg48[%c0_57, %c0_58] {strides = array<i32: 2, 1>} : memref<68x64xf32, #tpu.memory_space<vmem>>, vector<34x64xf32>
    %c1_59 = arith.constant 1 : index
    %c0_60 = arith.constant 0 : index
    %63 = tpu.strided_load %arg48[%c1_59, %c0_60] {strides = array<i32: 2, 1>} : memref<68x64xf32, #tpu.memory_space<vmem>>, vector<34x64xf32>
    %64 = arith.maximumf %62, %63 : vector<34x64xf32>
    %cst_61 = arith.constant 0.000000e+00 : bf16
    %65 = vector.broadcast %cst_61 : bf16 to vector<38x64xbf16>
    %c0_62 = arith.constant 0 : index
    %c0_63 = arith.constant 0 : index
    %66 = vector.load %arg37[%c0_62, %c0_63] : memref<38x64xbf16, #tpu.memory_space<vmem>>, vector<38x64xbf16>
    tpu.vector_store %arg37[%c0_62, %c0_63], %65 {strides = array<i32>} : memref<38x64xbf16, #tpu.memory_space<vmem>>, vector<38x64xbf16>,
    %67 = vector.extract_strided_slice %64 {offsets = [0, 0], sizes = [16, 64], strides = [1, 1]} : vector<34x64xf32> to vector<16x64xf32>
    %68 = arith.truncf %67 : vector<16x64xf32> to vector<16x64xbf16>
    %c1_64 = arith.constant 1 : index
    %c0_65 = arith.constant 0 : index
    %69 = vector.load %arg37[%c1_64, %c0_65] : memref<38x64xbf16, #tpu.memory_space<vmem>>, vector<16x64xbf16>
    tpu.vector_store %arg37[%c1_64, %c0_65], %68 {strides = array<i32>} : memref<38x64xbf16, #tpu.memory_space<vmem>>, vector<16x64xbf16>,
    %70 = vector.extract_strided_slice %64 {offsets = [17, 0], sizes = [16, 64], strides = [1, 1]} : vector<34x64xf32> to vector<16x64xf32>
    %71 = arith.truncf %70 : vector<16x64xf32> to vector<16x64xbf16>
    %c19 = arith.constant 19 : index
    %c0_66 = arith.constant 0 : index
    %72 = vector.load %arg37[%c19, %c0_66] : memref<38x64xbf16, #tpu.memory_space<vmem>>, vector<16x64xbf16>
    tpu.vector_store %arg37[%c19, %c0_66], %71 {strides = array<i32>} : memref<38x64xbf16, #tpu.memory_space<vmem>>, vector<16x64xbf16>,
    %cst_67 = arith.constant 0.000000e+00 : f32
    %73 = vector.broadcast %cst_67 : f32 to vector<36x128xf32>
    %c0_68 = arith.constant 0 : index
    %c0_69 = arith.constant 0 : index
    %74 = vector.load %arg37[%c0_68, %c0_69] : memref<38x64xbf16, #tpu.memory_space<vmem>>, vector<36x64xbf16>
    %c0_70 = arith.constant 0 : index
    %c0_71 = arith.constant 0 : index
    %c0_72 = arith.constant 0 : index
    %75 = vector.load %arg6[%c0_70, %c0_71, %c0_72] : memref<3x64x128xbf16, #tpu.memory_space<vmem>>, vector<1x64x128xbf16>
    %76 = vector.shape_cast %75 : vector<1x64x128xbf16> to vector<64x128xbf16>
    %cst_73 = arith.constant dense<0.000000e+00> : vector<36x128xf32>
    %77 = tpu.matmul %74, %76, %cst_73 {dimension_numbers = #tpu.dot_dimension_numbers<[1], [0], [0], [1], [0, 0, 1, 1], [], []>} : vector<36x64xbf16>, vector<64x128xbf16>, vector<36x128xf32> -> vector<36x128xf32>
    %78 = arith.addf %73, %77 : vector<36x128xf32>
    %c1_74 = arith.constant 1 : index
    %c0_75 = arith.constant 0 : index
    %79 = vector.load %arg37[%c1_74, %c0_75] : memref<38x64xbf16, #tpu.memory_space<vmem>>, vector<36x64xbf16>
    %c1_76 = arith.constant 1 : index
    %c0_77 = arith.constant 0 : index
    %c0_78 = arith.constant 0 : index
    %80 = vector.load %arg6[%c1_76, %c0_77, %c0_78] : memref<3x64x128xbf16, #tpu.memory_space<vmem>>, vector<1x64x128xbf16>
    %81 = vector.shape_cast %80 : vector<1x64x128xbf16> to vector<64x128xbf16>
    %cst_79 = arith.constant dense<0.000000e+00> : vector<36x128xf32>
    %82 = tpu.matmul %79, %81, %cst_79 {dimension_numbers = #tpu.dot_dimension_numbers<[1], [0], [0], [1], [0, 0, 1, 1], [], []>} : vector<36x64xbf16>, vector<64x128xbf16>, vector<36x128xf32> -> vector<36x128xf32>
    %83 = arith.addf %78, %82 : vector<36x128xf32>
    %c2_80 = arith.constant 2 : index
    %c0_81 = arith.constant 0 : index
    %84 = vector.load %arg37[%c2_80, %c0_81] : memref<38x64xbf16, #tpu.memory_space<vmem>>, vector<36x64xbf16>
    %c2_82 = arith.constant 2 : index
    %c0_83 = arith.constant 0 : index
    %c0_84 = arith.constant 0 : index
    %85 = vector.load %arg6[%c2_82, %c0_83, %c0_84] : memref<3x64x128xbf16, #tpu.memory_space<vmem>>, vector<1x64x128xbf16>
    %86 = vector.shape_cast %85 : vector<1x64x128xbf16> to vector<64x128xbf16>
    %cst_85 = arith.constant dense<0.000000e+00> : vector<36x128xf32>
    %87 = tpu.matmul %84, %86, %cst_85 {dimension_numbers = #tpu.dot_dimension_numbers<[1], [0], [0], [1], [0, 0, 1, 1], [], []>} : vector<36x64xbf16>, vector<64x128xbf16>, vector<36x128xf32> -> vector<36x128xf32>
    %88 = arith.addf %83, %87 : vector<36x128xf32>
    %c0_86 = arith.constant 0 : index
    %c0_87 = arith.constant 0 : index
    %89 = vector.load %arg7[%c0_86, %c0_87] : memref<1x128xf32, #tpu.memory_space<vmem>>, vector<1x128xf32>
    %90 = vector.broadcast %89 : vector<1x128xf32> to vector<36x128xf32>
    %91 = arith.addf %88, %90 : vector<36x128xf32>
    %cst_88 = arith.constant 0.000000e+00 : f32
    %92 = vector.broadcast %cst_88 : f32 to vector<36x128xf32>
    %93 = arith.maximumf %91, %92 : vector<36x128xf32>
    %cst_89 = arith.constant 0.000000e+00 : bf16
    %94 = vector.broadcast %cst_89 : bf16 to vector<38x128xbf16>
    %c0_90 = arith.constant 0 : index
    %c0_91 = arith.constant 0 : index
    %95 = vector.load %arg38[%c0_90, %c0_91] : memref<38x128xbf16, #tpu.memory_space<vmem>>, vector<38x128xbf16>
    tpu.vector_store %arg38[%c0_90, %c0_91], %94 {strides = array<i32>} : memref<38x128xbf16, #tpu.memory_space<vmem>>, vector<38x128xbf16>,
    %96 = vector.extract_strided_slice %93 {offsets = [0, 0], sizes = [16, 128], strides = [1, 1]} : vector<36x128xf32> to vector<16x128xf32>
    %97 = arith.truncf %96 : vector<16x128xf32> to vector<16x128xbf16>
    %c1_92 = arith.constant 1 : index
    %c0_93 = arith.constant 0 : index
    %98 = vector.load %arg38[%c1_92, %c0_93] : memref<38x128xbf16, #tpu.memory_space<vmem>>, vector<16x128xbf16>
    tpu.vector_store %arg38[%c1_92, %c0_93], %97 {strides = array<i32>} : memref<38x128xbf16, #tpu.memory_space<vmem>>, vector<16x128xbf16>,
    %99 = vector.extract_strided_slice %93 {offsets = [18, 0], sizes = [16, 128], strides = [1, 1]} : vector<36x128xf32> to vector<16x128xf32>
    %100 = arith.truncf %99 : vector<16x128xf32> to vector<16x128xbf16>
    %c19_94 = arith.constant 19 : index
    %c0_95 = arith.constant 0 : index
    %101 = vector.load %arg38[%c19_94, %c0_95] : memref<38x128xbf16, #tpu.memory_space<vmem>>, vector<16x128xbf16>
    tpu.vector_store %arg38[%c19_94, %c0_95], %100 {strides = array<i32>} : memref<38x128xbf16, #tpu.memory_space<vmem>>, vector<16x128xbf16>,
    %cst_96 = arith.constant 0.000000e+00 : f32
    %102 = vector.broadcast %cst_96 : f32 to vector<36x128xf32>
    %c0_97 = arith.constant 0 : index
    %c0_98 = arith.constant 0 : index
    %103 = vector.load %arg38[%c0_97, %c0_98] : memref<38x128xbf16, #tpu.memory_space<vmem>>, vector<36x128xbf16>
    %c0_99 = arith.constant 0 : index
    %c0_100 = arith.constant 0 : index
    %c0_101 = arith.constant 0 : index
    %104 = vector.load %arg8[%c0_99, %c0_100, %c0_101] : memref<3x128x128xbf16, #tpu.memory_space<vmem>>, vector<1x128x128xbf16>
    %105 = vector.shape_cast %104 : vector<1x128x128xbf16> to vector<128x128xbf16>
    %cst_102 = arith.constant dense<0.000000e+00> : vector<36x128xf32>
    %106 = tpu.matmul %103, %105, %cst_102 {dimension_numbers = #tpu.dot_dimension_numbers<[1], [0], [0], [1], [0, 0, 1, 1], [], []>} : vector<36x128xbf16>, vector<128x128xbf16>, vector<36x128xf32> -> vector<36x128xf32>
    %107 = arith.addf %102, %106 : vector<36x128xf32>
    %c1_103 = arith.constant 1 : index
    %c0_104 = arith.constant 0 : index
    %108 = vector.load %arg38[%c1_103, %c0_104] : memref<38x128xbf16, #tpu.memory_space<vmem>>, vector<36x128xbf16>
    %c1_105 = arith.constant 1 : index
    %c0_106 = arith.constant 0 : index
    %c0_107 = arith.constant 0 : index
    %109 = vector.load %arg8[%c1_105, %c0_106, %c0_107] : memref<3x128x128xbf16, #tpu.memory_space<vmem>>, vector<1x128x128xbf16>
    %110 = vector.shape_cast %109 : vector<1x128x128xbf16> to vector<128x128xbf16>
    %cst_108 = arith.constant dense<0.000000e+00> : vector<36x128xf32>
    %111 = tpu.matmul %108, %110, %cst_108 {dimension_numbers = #tpu.dot_dimension_numbers<[1], [0], [0], [1], [0, 0, 1, 1], [], []>} : vector<36x128xbf16>, vector<128x128xbf16>, vector<36x128xf32> -> vector<36x128xf32>
    %112 = arith.addf %107, %111 : vector<36x128xf32>
    %c2_109 = arith.constant 2 : index
    %c0_110 = arith.constant 0 : index
    %113 = vector.load %arg38[%c2_109, %c0_110] : memref<38x128xbf16, #tpu.memory_space<vmem>>, vector<36x128xbf16>
    %c2_111 = arith.constant 2 : index
    %c0_112 = arith.constant 0 : index
    %c0_113 = arith.constant 0 : index
    %114 = vector.load %arg8[%c2_111, %c0_112, %c0_113] : memref<3x128x128xbf16, #tpu.memory_space<vmem>>, vector<1x128x128xbf16>
    %115 = vector.shape_cast %114 : vector<1x128x128xbf16> to vector<128x128xbf16>
    %cst_114 = arith.constant dense<0.000000e+00> : vector<36x128xf32>
    %116 = tpu.matmul %113, %115, %cst_114 {dimension_numbers = #tpu.dot_dimension_numbers<[1], [0], [0], [1], [0, 0, 1, 1], [], []>} : vector<36x128xbf16>, vector<128x128xbf16>, vector<36x128xf32> -> vector<36x128xf32>
    %117 = arith.addf %112, %116 : vector<36x128xf32>
    %c0_115 = arith.constant 0 : index
    %c0_116 = arith.constant 0 : index
    %118 = vector.load %arg9[%c0_115, %c0_116] : memref<1x128xf32, #tpu.memory_space<vmem>>, vector<1x128xf32>
    %119 = vector.broadcast %118 : vector<1x128xf32> to vector<36x128xf32>
    %120 = arith.addf %117, %119 : vector<36x128xf32>
    %cst_117 = arith.constant 0.000000e+00 : f32
    %121 = vector.broadcast %cst_117 : f32 to vector<36x128xf32>
    %122 = arith.maximumf %120, %121 : vector<36x128xf32>
    %123 = vector.extract_strided_slice %122 {offsets = [0, 0], sizes = [36, 64], strides = [1, 1]} : vector<36x128xf32> to vector<36x64xf32>
    %124 = vector.extract_strided_slice %122 {offsets = [0, 64], sizes = [36, 64], strides = [1, 1]} : vector<36x128xf32> to vector<36x64xf32>
    %125 = arith.maximumf %123, %124 : vector<36x64xf32>
    %c0_118 = arith.constant 0 : index
    %c0_119 = arith.constant 0 : index
    %126 = vector.load %arg49[%c0_118, %c0_119] : memref<36x64xf32, #tpu.memory_space<vmem>>, vector<36x64xf32>
    tpu.vector_store %arg49[%c0_118, %c0_119], %125 {strides = array<i32>} : memref<36x64xf32, #tpu.memory_space<vmem>>, vector<36x64xf32>,
    %c0_120 = arith.constant 0 : index
    %c0_121 = arith.constant 0 : index
    %127 = tpu.strided_load %arg49[%c0_120, %c0_121] {strides = array<i32: 2, 1>} : memref<36x64xf32, #tpu.memory_space<vmem>>, vector<18x64xf32>
    %c1_122 = arith.constant 1 : index
    %c0_123 = arith.constant 0 : index
    %128 = tpu.strided_load %arg49[%c1_122, %c0_123] {strides = array<i32: 2, 1>} : memref<36x64xf32, #tpu.memory_space<vmem>>, vector<18x64xf32>
    %129 = arith.maximumf %127, %128 : vector<18x64xf32>
    %cst_124 = arith.constant 0.000000e+00 : bf16
    %130 = vector.broadcast %cst_124 : bf16 to vector<22x64xbf16>
    %c0_125 = arith.constant 0 : index
    %c0_126 = arith.constant 0 : index
    %131 = vector.load %arg39[%c0_125, %c0_126] : memref<22x64xbf16, #tpu.memory_space<vmem>>, vector<22x64xbf16>
    tpu.vector_store %arg39[%c0_125, %c0_126], %130 {strides = array<i32>} : memref<22x64xbf16, #tpu.memory_space<vmem>>, vector<22x64xbf16>,
    %132 = vector.extract_strided_slice %129 {offsets = [0, 0], sizes = [8, 64], strides = [1, 1]} : vector<18x64xf32> to vector<8x64xf32>
    %133 = arith.truncf %132 : vector<8x64xf32> to vector<8x64xbf16>
    %c1_127 = arith.constant 1 : index
    %c0_128 = arith.constant 0 : index
    %134 = vector.load %arg39[%c1_127, %c0_128] : memref<22x64xbf16, #tpu.memory_space<vmem>>, vector<8x64xbf16>
    tpu.vector_store %arg39[%c1_127, %c0_128], %133 {strides = array<i32>} : memref<22x64xbf16, #tpu.memory_space<vmem>>, vector<8x64xbf16>,
    %135 = vector.extract_strided_slice %129 {offsets = [9, 0], sizes = [8, 64], strides = [1, 1]} : vector<18x64xf32> to vector<8x64xf32>
    %136 = arith.truncf %135 : vector<8x64xf32> to vector<8x64xbf16>
    %c11 = arith.constant 11 : index
    %c0_129 = arith.constant 0 : index
    %137 = vector.load %arg39[%c11, %c0_129] : memref<22x64xbf16, #tpu.memory_space<vmem>>, vector<8x64xbf16>
    tpu.vector_store %arg39[%c11, %c0_129], %136 {strides = array<i32>} : memref<22x64xbf16, #tpu.memory_space<vmem>>, vector<8x64xbf16>,
    %cst_130 = arith.constant 0.000000e+00 : f32
    %138 = vector.broadcast %cst_130 : f32 to vector<20x128xf32>
    %c0_131 = arith.constant 0 : index
    %c0_132 = arith.constant 0 : index
    %139 = vector.load %arg39[%c0_131, %c0_132] : memref<22x64xbf16, #tpu.memory_space<vmem>>, vector<20x64xbf16>
    %c0_133 = arith.constant 0 : index
    %c0_134 = arith.constant 0 : index
    %c0_135 = arith.constant 0 : index
    %140 = vector.load %arg10[%c0_133, %c0_134, %c0_135] : memref<3x64x128xbf16, #tpu.memory_space<vmem>>, vector<1x64x128xbf16>
    %141 = vector.shape_cast %140 : vector<1x64x128xbf16> to vector<64x128xbf16>
    %cst_136 = arith.constant dense<0.000000e+00> : vector<20x128xf32>
    %142 = tpu.matmul %139, %141, %cst_136 {dimension_numbers = #tpu.dot_dimension_numbers<[1], [0], [0], [1], [0, 0, 1, 1], [], []>} : vector<20x64xbf16>, vector<64x128xbf16>, vector<20x128xf32> -> vector<20x128xf32>
    %143 = arith.addf %138, %142 : vector<20x128xf32>
    %c1_137 = arith.constant 1 : index
    %c0_138 = arith.constant 0 : index
    %144 = vector.load %arg39[%c1_137, %c0_138] : memref<22x64xbf16, #tpu.memory_space<vmem>>, vector<20x64xbf16>
    %c1_139 = arith.constant 1 : index
    %c0_140 = arith.constant 0 : index
    %c0_141 = arith.constant 0 : index
    %145 = vector.load %arg10[%c1_139, %c0_140, %c0_141] : memref<3x64x128xbf16, #tpu.memory_space<vmem>>, vector<1x64x128xbf16>
    %146 = vector.shape_cast %145 : vector<1x64x128xbf16> to vector<64x128xbf16>
    %cst_142 = arith.constant dense<0.000000e+00> : vector<20x128xf32>
    %147 = tpu.matmul %144, %146, %cst_142 {dimension_numbers = #tpu.dot_dimension_numbers<[1], [0], [0], [1], [0, 0, 1, 1], [], []>} : vector<20x64xbf16>, vector<64x128xbf16>, vector<20x128xf32> -> vector<20x128xf32>
    %148 = arith.addf %143, %147 : vector<20x128xf32>
    %c2_143 = arith.constant 2 : index
    %c0_144 = arith.constant 0 : index
    %149 = vector.load %arg39[%c2_143, %c0_144] : memref<22x64xbf16, #tpu.memory_space<vmem>>, vector<20x64xbf16>
    %c2_145 = arith.constant 2 : index
    %c0_146 = arith.constant 0 : index
    %c0_147 = arith.constant 0 : index
    %150 = vector.load %arg10[%c2_145, %c0_146, %c0_147] : memref<3x64x128xbf16, #tpu.memory_space<vmem>>, vector<1x64x128xbf16>
    %151 = vector.shape_cast %150 : vector<1x64x128xbf16> to vector<64x128xbf16>
    %cst_148 = arith.constant dense<0.000000e+00> : vector<20x128xf32>
    %152 = tpu.matmul %149, %151, %cst_148 {dimension_numbers = #tpu.dot_dimension_numbers<[1], [0], [0], [1], [0, 0, 1, 1], [], []>} : vector<20x64xbf16>, vector<64x128xbf16>, vector<20x128xf32> -> vector<20x128xf32>
    %153 = arith.addf %148, %152 : vector<20x128xf32>
    %c0_149 = arith.constant 0 : index
    %c0_150 = arith.constant 0 : index
    %154 = vector.load %arg11[%c0_149, %c0_150] : memref<1x128xf32, #tpu.memory_space<vmem>>, vector<1x128xf32>
    %155 = vector.broadcast %154 : vector<1x128xf32> to vector<20x128xf32>
    %156 = arith.addf %153, %155 : vector<20x128xf32>
    %cst_151 = arith.constant 0.000000e+00 : f32
    %157 = vector.broadcast %cst_151 : f32 to vector<20x128xf32>
    %158 = arith.maximumf %156, %157 : vector<20x128xf32>
    %cst_152 = arith.constant 0.000000e+00 : bf16
    %159 = vector.broadcast %cst_152 : bf16 to vector<22x128xbf16>
    %c0_153 = arith.constant 0 : index
    %c0_154 = arith.constant 0 : index
    %160 = vector.load %arg40[%c0_153, %c0_154] : memref<22x128xbf16, #tpu.memory_space<vmem>>, vector<22x128xbf16>
    tpu.vector_store %arg40[%c0_153, %c0_154], %159 {strides = array<i32>} : memref<22x128xbf16, #tpu.memory_space<vmem>>, vector<22x128xbf16>,
    %161 = vector.extract_strided_slice %158 {offsets = [0, 0], sizes = [8, 128], strides = [1, 1]} : vector<20x128xf32> to vector<8x128xf32>
    %162 = arith.truncf %161 : vector<8x128xf32> to vector<8x128xbf16>
    %c1_155 = arith.constant 1 : index
    %c0_156 = arith.constant 0 : index
    %163 = vector.load %arg40[%c1_155, %c0_156] : memref<22x128xbf16, #tpu.memory_space<vmem>>, vector<8x128xbf16>
    tpu.vector_store %arg40[%c1_155, %c0_156], %162 {strides = array<i32>} : memref<22x128xbf16, #tpu.memory_space<vmem>>, vector<8x128xbf16>,
    %164 = vector.extract_strided_slice %158 {offsets = [10, 0], sizes = [8, 128], strides = [1, 1]} : vector<20x128xf32> to vector<8x128xf32>
    %165 = arith.truncf %164 : vector<8x128xf32> to vector<8x128xbf16>
    %c11_157 = arith.constant 11 : index
    %c0_158 = arith.constant 0 : index
    %166 = vector.load %arg40[%c11_157, %c0_158] : memref<22x128xbf16, #tpu.memory_space<vmem>>, vector<8x128xbf16>
    tpu.vector_store %arg40[%c11_157, %c0_158], %165 {strides = array<i32>} : memref<22x128xbf16, #tpu.memory_space<vmem>>, vector<8x128xbf16>,
    %cst_159 = arith.constant 0.000000e+00 : f32
    %167 = vector.broadcast %cst_159 : f32 to vector<20x128xf32>
    %c0_160 = arith.constant 0 : index
    %c0_161 = arith.constant 0 : index
    %168 = vector.load %arg40[%c0_160, %c0_161] : memref<22x128xbf16, #tpu.memory_space<vmem>>, vector<20x128xbf16>
    %c0_162 = arith.constant 0 : index
    %c0_163 = arith.constant 0 : index
    %c0_164 = arith.constant 0 : index
    %169 = vector.load %arg12[%c0_162, %c0_163, %c0_164] : memref<3x128x128xbf16, #tpu.memory_space<vmem>>, vector<1x128x128xbf16>
    %170 = vector.shape_cast %169 : vector<1x128x128xbf16> to vector<128x128xbf16>
    %cst_165 = arith.constant dense<0.000000e+00> : vector<20x128xf32>
    %171 = tpu.matmul %168, %170, %cst_165 {dimension_numbers = #tpu.dot_dimension_numbers<[1], [0], [0], [1], [0, 0, 1, 1], [], []>} : vector<20x128xbf16>, vector<128x128xbf16>, vector<20x128xf32> -> vector<20x128xf32>
    %172 = arith.addf %167, %171 : vector<20x128xf32>
    %c1_166 = arith.constant 1 : index
    %c0_167 = arith.constant 0 : index
    %173 = vector.load %arg40[%c1_166, %c0_167] : memref<22x128xbf16, #tpu.memory_space<vmem>>, vector<20x128xbf16>
    %c1_168 = arith.constant 1 : index
    %c0_169 = arith.constant 0 : index
    %c0_170 = arith.constant 0 : index
    %174 = vector.load %arg12[%c1_168, %c0_169, %c0_170] : memref<3x128x128xbf16, #tpu.memory_space<vmem>>, vector<1x128x128xbf16>
    %175 = vector.shape_cast %174 : vector<1x128x128xbf16> to vector<128x128xbf16>
    %cst_171 = arith.constant dense<0.000000e+00> : vector<20x128xf32>
    %176 = tpu.matmul %173, %175, %cst_171 {dimension_numbers = #tpu.dot_dimension_numbers<[1], [0], [0], [1], [0, 0, 1, 1], [], []>} : vector<20x128xbf16>, vector<128x128xbf16>, vector<20x128xf32> -> vector<20x128xf32>
    %177 = arith.addf %172, %176 : vector<20x128xf32>
    %c2_172 = arith.constant 2 : index
    %c0_173 = arith.constant 0 : index
    %178 = vector.load %arg40[%c2_172, %c0_173] : memref<22x128xbf16, #tpu.memory_space<vmem>>, vector<20x128xbf16>
    %c2_174 = arith.constant 2 : index
    %c0_175 = arith.constant 0 : index
    %c0_176 = arith.constant 0 : index
    %179 = vector.load %arg12[%c2_174, %c0_175, %c0_176] : memref<3x128x128xbf16, #tpu.memory_space<vmem>>, vector<1x128x128xbf16>
    %180 = vector.shape_cast %179 : vector<1x128x128xbf16> to vector<128x128xbf16>
    %cst_177 = arith.constant dense<0.000000e+00> : vector<20x128xf32>
    %181 = tpu.matmul %178, %180, %cst_177 {dimension_numbers = #tpu.dot_dimension_numbers<[1], [0], [0], [1], [0, 0, 1, 1], [], []>} : vector<20x128xbf16>, vector<128x128xbf16>, vector<20x128xf32> -> vector<20x128xf32>
    %182 = arith.addf %177, %181 : vector<20x128xf32>
    %c0_178 = arith.constant 0 : index
    %c0_179 = arith.constant 0 : index
    %183 = vector.load %arg13[%c0_178, %c0_179] : memref<1x128xf32, #tpu.memory_space<vmem>>, vector<1x128xf32>
    %184 = vector.broadcast %183 : vector<1x128xf32> to vector<20x128xf32>
    %185 = arith.addf %182, %184 : vector<20x128xf32>
    %cst_180 = arith.constant 0.000000e+00 : f32
    %186 = vector.broadcast %cst_180 : f32 to vector<20x128xf32>
    %187 = arith.maximumf %185, %186 : vector<20x128xf32>
    %cst_181 = arith.constant 0.000000e+00 : bf16
    %188 = vector.broadcast %cst_181 : bf16 to vector<22x128xbf16>
    %c0_182 = arith.constant 0 : index
    %c0_183 = arith.constant 0 : index
    %189 = vector.load %arg41[%c0_182, %c0_183] : memref<22x128xbf16, #tpu.memory_space<vmem>>, vector<22x128xbf16>
    tpu.vector_store %arg41[%c0_182, %c0_183], %188 {strides = array<i32>} : memref<22x128xbf16, #tpu.memory_space<vmem>>, vector<22x128xbf16>,
    %190 = vector.extract_strided_slice %187 {offsets = [0, 0], sizes = [8, 128], strides = [1, 1]} : vector<20x128xf32> to vector<8x128xf32>
    %191 = arith.truncf %190 : vector<8x128xf32> to vector<8x128xbf16>
    %c1_184 = arith.constant 1 : index
    %c0_185 = arith.constant 0 : index
    %192 = vector.load %arg41[%c1_184, %c0_185] : memref<22x128xbf16, #tpu.memory_space<vmem>>, vector<8x128xbf16>
    tpu.vector_store %arg41[%c1_184, %c0_185], %191 {strides = array<i32>} : memref<22x128xbf16, #tpu.memory_space<vmem>>, vector<8x128xbf16>,
    %193 = vector.extract_strided_slice %187 {offsets = [10, 0], sizes = [8, 128], strides = [1, 1]} : vector<20x128xf32> to vector<8x128xf32>
    %194 = arith.truncf %193 : vector<8x128xf32> to vector<8x128xbf16>
    %c11_186 = arith.constant 11 : index
    %c0_187 = arith.constant 0 : index
    %195 = vector.load %arg41[%c11_186, %c0_187] : memref<22x128xbf16, #tpu.memory_space<vmem>>, vector<8x128xbf16>
    tpu.vector_store %arg41[%c11_186, %c0_187], %194 {strides = array<i32>} : memref<22x128xbf16, #tpu.memory_space<vmem>>, vector<8x128xbf16>,
    %cst_188 = arith.constant 0.000000e+00 : f32
    %196 = vector.broadcast %cst_188 : f32 to vector<20x128xf32>
    %c0_189 = arith.constant 0 : index
    %c0_190 = arith.constant 0 : index
    %197 = vector.load %arg41[%c0_189, %c0_190] : memref<22x128xbf16, #tpu.memory_space<vmem>>, vector<20x128xbf16>
    %c0_191 = arith.constant 0 : index
    %c0_192 = arith.constant 0 : index
    %c0_193 = arith.constant 0 : index
    %198 = vector.load %arg14[%c0_191, %c0_192, %c0_193] : memref<3x128x128xbf16, #tpu.memory_space<vmem>>, vector<1x128x128xbf16>
    %199 = vector.shape_cast %198 : vector<1x128x128xbf16> to vector<128x128xbf16>
    %cst_194 = arith.constant dense<0.000000e+00> : vector<20x128xf32>
    %200 = tpu.matmul %197, %199, %cst_194 {dimension_numbers = #tpu.dot_dimension_numbers<[1], [0], [0], [1], [0, 0, 1, 1], [], []>} : vector<20x128xbf16>, vector<128x128xbf16>, vector<20x128xf32> -> vector<20x128xf32>
    %201 = arith.addf %196, %200 : vector<20x128xf32>
    %c1_195 = arith.constant 1 : index
    %c0_196 = arith.constant 0 : index
    %202 = vector.load %arg41[%c1_195, %c0_196] : memref<22x128xbf16, #tpu.memory_space<vmem>>, vector<20x128xbf16>
    %c1_197 = arith.constant 1 : index
    %c0_198 = arith.constant 0 : index
    %c0_199 = arith.constant 0 : index
    %203 = vector.load %arg14[%c1_197, %c0_198, %c0_199] : memref<3x128x128xbf16, #tpu.memory_space<vmem>>, vector<1x128x128xbf16>
    %204 = vector.shape_cast %203 : vector<1x128x128xbf16> to vector<128x128xbf16>
    %cst_200 = arith.constant dense<0.000000e+00> : vector<20x128xf32>
    %205 = tpu.matmul %202, %204, %cst_200 {dimension_numbers = #tpu.dot_dimension_numbers<[1], [0], [0], [1], [0, 0, 1, 1], [], []>} : vector<20x128xbf16>, vector<128x128xbf16>, vector<20x128xf32> -> vector<20x128xf32>
    %206 = arith.addf %201, %205 : vector<20x128xf32>
    %c2_201 = arith.constant 2 : index
    %c0_202 = arith.constant 0 : index
    %207 = vector.load %arg41[%c2_201, %c0_202] : memref<22x128xbf16, #tpu.memory_space<vmem>>, vector<20x128xbf16>
    %c2_203 = arith.constant 2 : index
    %c0_204 = arith.constant 0 : index
    %c0_205 = arith.constant 0 : index
    %208 = vector.load %arg14[%c2_203, %c0_204, %c0_205] : memref<3x128x128xbf16, #tpu.memory_space<vmem>>, vector<1x128x128xbf16>
    %209 = vector.shape_cast %208 : vector<1x128x128xbf16> to vector<128x128xbf16>
    %cst_206 = arith.constant dense<0.000000e+00> : vector<20x128xf32>
    %210 = tpu.matmul %207, %209, %cst_206 {dimension_numbers = #tpu.dot_dimension_numbers<[1], [0], [0], [1], [0, 0, 1, 1], [], []>} : vector<20x128xbf16>, vector<128x128xbf16>, vector<20x128xf32> -> vector<20x128xf32>
    %211 = arith.addf %206, %210 : vector<20x128xf32>
    %c0_207 = arith.constant 0 : index
    %c0_208 = arith.constant 0 : index
    %212 = vector.load %arg15[%c0_207, %c0_208] : memref<1x128xf32, #tpu.memory_space<vmem>>, vector<1x128xf32>
    %213 = vector.broadcast %212 : vector<1x128xf32> to vector<20x128xf32>
    %214 = arith.addf %211, %213 : vector<20x128xf32>
    %cst_209 = arith.constant 0.000000e+00 : f32
    %215 = vector.broadcast %cst_209 : f32 to vector<20x128xf32>
    %216 = arith.maximumf %214, %215 : vector<20x128xf32>
    %217 = vector.extract_strided_slice %216 {offsets = [0, 0], sizes = [20, 64], strides = [1, 1]} : vector<20x128xf32> to vector<20x64xf32>
    %218 = vector.extract_strided_slice %216 {offsets = [0, 64], sizes = [20, 64], strides = [1, 1]} : vector<20x128xf32> to vector<20x64xf32>
    %219 = arith.maximumf %217, %218 : vector<20x64xf32>
    %c0_210 = arith.constant 0 : index
    %c0_211 = arith.constant 0 : index
    %220 = vector.load %arg50[%c0_210, %c0_211] : memref<20x64xf32, #tpu.memory_space<vmem>>, vector<20x64xf32>
    tpu.vector_store %arg50[%c0_210, %c0_211], %219 {strides = array<i32>} : memref<20x64xf32, #tpu.memory_space<vmem>>, vector<20x64xf32>,
    %c0_212 = arith.constant 0 : index
    %c0_213 = arith.constant 0 : index
    %221 = tpu.strided_load %arg50[%c0_212, %c0_213] {strides = array<i32: 2, 1>} : memref<20x64xf32, #tpu.memory_space<vmem>>, vector<10x64xf32>
    %c1_214 = arith.constant 1 : index
    %c0_215 = arith.constant 0 : index
    %222 = tpu.strided_load %arg50[%c1_214, %c0_215] {strides = array<i32: 2, 1>} : memref<20x64xf32, #tpu.memory_space<vmem>>, vector<10x64xf32>
    %223 = arith.maximumf %221, %222 : vector<10x64xf32>
    %cst_216 = arith.constant 0.000000e+00 : bf16
    %224 = vector.broadcast %cst_216 : bf16 to vector<14x64xbf16>
    %c0_217 = arith.constant 0 : index
    %c0_218 = arith.constant 0 : index
    %225 = vector.load %arg42[%c0_217, %c0_218] : memref<14x64xbf16, #tpu.memory_space<vmem>>, vector<14x64xbf16>
    tpu.vector_store %arg42[%c0_217, %c0_218], %224 {strides = array<i32>} : memref<14x64xbf16, #tpu.memory_space<vmem>>, vector<14x64xbf16>,
    %226 = vector.extract_strided_slice %223 {offsets = [0, 0], sizes = [4, 64], strides = [1, 1]} : vector<10x64xf32> to vector<4x64xf32>
    %227 = arith.truncf %226 : vector<4x64xf32> to vector<4x64xbf16>
    %c1_219 = arith.constant 1 : index
    %c0_220 = arith.constant 0 : index
    %228 = vector.load %arg42[%c1_219, %c0_220] : memref<14x64xbf16, #tpu.memory_space<vmem>>, vector<4x64xbf16>
    tpu.vector_store %arg42[%c1_219, %c0_220], %227 {strides = array<i32>} : memref<14x64xbf16, #tpu.memory_space<vmem>>, vector<4x64xbf16>,
    %229 = vector.extract_strided_slice %223 {offsets = [5, 0], sizes = [4, 64], strides = [1, 1]} : vector<10x64xf32> to vector<4x64xf32>
    %230 = arith.truncf %229 : vector<4x64xf32> to vector<4x64xbf16>
    %c7 = arith.constant 7 : index
    %c0_221 = arith.constant 0 : index
    %231 = vector.load %arg42[%c7, %c0_221] : memref<14x64xbf16, #tpu.memory_space<vmem>>, vector<4x64xbf16>
    tpu.vector_store %arg42[%c7, %c0_221], %230 {strides = array<i32>} : memref<14x64xbf16, #tpu.memory_space<vmem>>, vector<4x64xbf16>,
    %cst_222 = arith.constant 0.000000e+00 : f32
    %232 = vector.broadcast %cst_222 : f32 to vector<12x128xf32>
    %c0_223 = arith.constant 0 : index
    %c0_224 = arith.constant 0 : index
    %233 = vector.load %arg42[%c0_223, %c0_224] : memref<14x64xbf16, #tpu.memory_space<vmem>>, vector<12x64xbf16>
    %c0_225 = arith.constant 0 : index
    %c0_226 = arith.constant 0 : index
    %c0_227 = arith.constant 0 : index
    %234 = vector.load %arg16[%c0_225, %c0_226, %c0_227] : memref<3x64x128xbf16, #tpu.memory_space<vmem>>, vector<1x64x128xbf16>
    %235 = vector.shape_cast %234 : vector<1x64x128xbf16> to vector<64x128xbf16>
    %cst_228 = arith.constant dense<0.000000e+00> : vector<12x128xf32>
    %236 = tpu.matmul %233, %235, %cst_228 {dimension_numbers = #tpu.dot_dimension_numbers<[1], [0], [0], [1], [0, 0, 1, 1], [], []>} : vector<12x64xbf16>, vector<64x128xbf16>, vector<12x128xf32> -> vector<12x128xf32>
    %237 = arith.addf %232, %236 : vector<12x128xf32>
    %c1_229 = arith.constant 1 : index
    %c0_230 = arith.constant 0 : index
    %238 = vector.load %arg42[%c1_229, %c0_230] : memref<14x64xbf16, #tpu.memory_space<vmem>>, vector<12x64xbf16>
    %c1_231 = arith.constant 1 : index
    %c0_232 = arith.constant 0 : index
    %c0_233 = arith.constant 0 : index
    %239 = vector.load %arg16[%c1_231, %c0_232, %c0_233] : memref<3x64x128xbf16, #tpu.memory_space<vmem>>, vector<1x64x128xbf16>
    %240 = vector.shape_cast %239 : vector<1x64x128xbf16> to vector<64x128xbf16>
    %cst_234 = arith.constant dense<0.000000e+00> : vector<12x128xf32>
    %241 = tpu.matmul %238, %240, %cst_234 {dimension_numbers = #tpu.dot_dimension_numbers<[1], [0], [0], [1], [0, 0, 1, 1], [], []>} : vector<12x64xbf16>, vector<64x128xbf16>, vector<12x128xf32> -> vector<12x128xf32>
    %242 = arith.addf %237, %241 : vector<12x128xf32>
    %c2_235 = arith.constant 2 : index
    %c0_236 = arith.constant 0 : index
    %243 = vector.load %arg42[%c2_235, %c0_236] : memref<14x64xbf16, #tpu.memory_space<vmem>>, vector<12x64xbf16>
    %c2_237 = arith.constant 2 : index
    %c0_238 = arith.constant 0 : index
    %c0_239 = arith.constant 0 : index
    %244 = vector.load %arg16[%c2_237, %c0_238, %c0_239] : memref<3x64x128xbf16, #tpu.memory_space<vmem>>, vector<1x64x128xbf16>
    %245 = vector.shape_cast %244 : vector<1x64x128xbf16> to vector<64x128xbf16>
    %cst_240 = arith.constant dense<0.000000e+00> : vector<12x128xf32>
    %246 = tpu.matmul %243, %245, %cst_240 {dimension_numbers = #tpu.dot_dimension_numbers<[1], [0], [0], [1], [0, 0, 1, 1], [], []>} : vector<12x64xbf16>, vector<64x128xbf16>, vector<12x128xf32> -> vector<12x128xf32>
    %247 = arith.addf %242, %246 : vector<12x128xf32>
    %c0_241 = arith.constant 0 : index
    %c0_242 = arith.constant 0 : index
    %248 = vector.load %arg17[%c0_241, %c0_242] : memref<1x128xf32, #tpu.memory_space<vmem>>, vector<1x128xf32>
    %249 = vector.broadcast %248 : vector<1x128xf32> to vector<12x128xf32>
    %250 = arith.addf %247, %249 : vector<12x128xf32>
    %cst_243 = arith.constant 0.000000e+00 : f32
    %251 = vector.broadcast %cst_243 : f32 to vector<12x128xf32>
    %252 = arith.maximumf %250, %251 : vector<12x128xf32>
    %cst_244 = arith.constant 0.000000e+00 : bf16
    %253 = vector.broadcast %cst_244 : bf16 to vector<14x128xbf16>
    %c0_245 = arith.constant 0 : index
    %c0_246 = arith.constant 0 : index
    %254 = vector.load %arg43[%c0_245, %c0_246] : memref<14x128xbf16, #tpu.memory_space<vmem>>, vector<14x128xbf16>
    tpu.vector_store %arg43[%c0_245, %c0_246], %253 {strides = array<i32>} : memref<14x128xbf16, #tpu.memory_space<vmem>>, vector<14x128xbf16>,
    %255 = vector.extract_strided_slice %252 {offsets = [0, 0], sizes = [4, 128], strides = [1, 1]} : vector<12x128xf32> to vector<4x128xf32>
    %256 = arith.truncf %255 : vector<4x128xf32> to vector<4x128xbf16>
    %c1_247 = arith.constant 1 : index
    %c0_248 = arith.constant 0 : index
    %257 = vector.load %arg43[%c1_247, %c0_248] : memref<14x128xbf16, #tpu.memory_space<vmem>>, vector<4x128xbf16>
    tpu.vector_store %arg43[%c1_247, %c0_248], %256 {strides = array<i32>} : memref<14x128xbf16, #tpu.memory_space<vmem>>, vector<4x128xbf16>,
    %258 = vector.extract_strided_slice %252 {offsets = [6, 0], sizes = [4, 128], strides = [1, 1]} : vector<12x128xf32> to vector<4x128xf32>
    %259 = arith.truncf %258 : vector<4x128xf32> to vector<4x128xbf16>
    %c7_249 = arith.constant 7 : index
    %c0_250 = arith.constant 0 : index
    %260 = vector.load %arg43[%c7_249, %c0_250] : memref<14x128xbf16, #tpu.memory_space<vmem>>, vector<4x128xbf16>
    tpu.vector_store %arg43[%c7_249, %c0_250], %259 {strides = array<i32>} : memref<14x128xbf16, #tpu.memory_space<vmem>>, vector<4x128xbf16>,
    %cst_251 = arith.constant 0.000000e+00 : f32
    %261 = vector.broadcast %cst_251 : f32 to vector<12x128xf32>
    %c0_252 = arith.constant 0 : index
    %c0_253 = arith.constant 0 : index
    %262 = vector.load %arg43[%c0_252, %c0_253] : memref<14x128xbf16, #tpu.memory_space<vmem>>, vector<12x128xbf16>
    %c0_254 = arith.constant 0 : index
    %c0_255 = arith.constant 0 : index
    %c0_256 = arith.constant 0 : index
    %263 = vector.load %arg18[%c0_254, %c0_255, %c0_256] : memref<3x128x128xbf16, #tpu.memory_space<vmem>>, vector<1x128x128xbf16>
    %264 = vector.shape_cast %263 : vector<1x128x128xbf16> to vector<128x128xbf16>
    %cst_257 = arith.constant dense<0.000000e+00> : vector<12x128xf32>
    %265 = tpu.matmul %262, %264, %cst_257 {dimension_numbers = #tpu.dot_dimension_numbers<[1], [0], [0], [1], [0, 0, 1, 1], [], []>} : vector<12x128xbf16>, vector<128x128xbf16>, vector<12x128xf32> -> vector<12x128xf32>
    %266 = arith.addf %261, %265 : vector<12x128xf32>
    %c1_258 = arith.constant 1 : index
    %c0_259 = arith.constant 0 : index
    %267 = vector.load %arg43[%c1_258, %c0_259] : memref<14x128xbf16, #tpu.memory_space<vmem>>, vector<12x128xbf16>
    %c1_260 = arith.constant 1 : index
    %c0_261 = arith.constant 0 : index
    %c0_262 = arith.constant 0 : index
    %268 = vector.load %arg18[%c1_260, %c0_261, %c0_262] : memref<3x128x128xbf16, #tpu.memory_space<vmem>>, vector<1x128x128xbf16>
    %269 = vector.shape_cast %268 : vector<1x128x128xbf16> to vector<128x128xbf16>
    %cst_263 = arith.constant dense<0.000000e+00> : vector<12x128xf32>
    %270 = tpu.matmul %267, %269, %cst_263 {dimension_numbers = #tpu.dot_dimension_numbers<[1], [0], [0], [1], [0, 0, 1, 1], [], []>} : vector<12x128xbf16>, vector<128x128xbf16>, vector<12x128xf32> -> vector<12x128xf32>
    %271 = arith.addf %266, %270 : vector<12x128xf32>
    %c2_264 = arith.constant 2 : index
    %c0_265 = arith.constant 0 : index
    %272 = vector.load %arg43[%c2_264, %c0_265] : memref<14x128xbf16, #tpu.memory_space<vmem>>, vector<12x128xbf16>
    %c2_266 = arith.constant 2 : index
    %c0_267 = arith.constant 0 : index
    %c0_268 = arith.constant 0 : index
    %273 = vector.load %arg18[%c2_266, %c0_267, %c0_268] : memref<3x128x128xbf16, #tpu.memory_space<vmem>>, vector<1x128x128xbf16>
    %274 = vector.shape_cast %273 : vector<1x128x128xbf16> to vector<128x128xbf16>
    %cst_269 = arith.constant dense<0.000000e+00> : vector<12x128xf32>
    %275 = tpu.matmul %272, %274, %cst_269 {dimension_numbers = #tpu.dot_dimension_numbers<[1], [0], [0], [1], [0, 0, 1, 1], [], []>} : vector<12x128xbf16>, vector<128x128xbf16>, vector<12x128xf32> -> vector<12x128xf32>
    %276 = arith.addf %271, %275 : vector<12x128xf32>
    %c0_270 = arith.constant 0 : index
    %c0_271 = arith.constant 0 : index
    %277 = vector.load %arg19[%c0_270, %c0_271] : memref<1x128xf32, #tpu.memory_space<vmem>>, vector<1x128xf32>
    %278 = vector.broadcast %277 : vector<1x128xf32> to vector<12x128xf32>
    %279 = arith.addf %276, %278 : vector<12x128xf32>
    %cst_272 = arith.constant 0.000000e+00 : f32
    %280 = vector.broadcast %cst_272 : f32 to vector<12x128xf32>
    %281 = arith.maximumf %279, %280 : vector<12x128xf32>
    %cst_273 = arith.constant 0.000000e+00 : bf16
    %282 = vector.broadcast %cst_273 : bf16 to vector<14x128xbf16>
    %c0_274 = arith.constant 0 : index
    %c0_275 = arith.constant 0 : index
    %283 = vector.load %arg44[%c0_274, %c0_275] : memref<14x128xbf16, #tpu.memory_space<vmem>>, vector<14x128xbf16>
    tpu.vector_store %arg44[%c0_274, %c0_275], %282 {strides = array<i32>} : memref<14x128xbf16, #tpu.memory_space<vmem>>, vector<14x128xbf16>,
    %284 = vector.extract_strided_slice %281 {offsets = [0, 0], sizes = [4, 128], strides = [1, 1]} : vector<12x128xf32> to vector<4x128xf32>
    %285 = arith.truncf %284 : vector<4x128xf32> to vector<4x128xbf16>
    %c1_276 = arith.constant 1 : index
    %c0_277 = arith.constant 0 : index
    %286 = vector.load %arg44[%c1_276, %c0_277] : memref<14x128xbf16, #tpu.memory_space<vmem>>, vector<4x128xbf16>
    tpu.vector_store %arg44[%c1_276, %c0_277], %285 {strides = array<i32>} : memref<14x128xbf16, #tpu.memory_space<vmem>>, vector<4x128xbf16>,
    %287 = vector.extract_strided_slice %281 {offsets = [6, 0], sizes = [4, 128], strides = [1, 1]} : vector<12x128xf32> to vector<4x128xf32>
    %288 = arith.truncf %287 : vector<4x128xf32> to vector<4x128xbf16>
    %c7_278 = arith.constant 7 : index
    %c0_279 = arith.constant 0 : index
    %289 = vector.load %arg44[%c7_278, %c0_279] : memref<14x128xbf16, #tpu.memory_space<vmem>>, vector<4x128xbf16>
    tpu.vector_store %arg44[%c7_278, %c0_279], %288 {strides = array<i32>} : memref<14x128xbf16, #tpu.memory_space<vmem>>, vector<4x128xbf16>,
    %cst_280 = arith.constant 0.000000e+00 : f32
    %290 = vector.broadcast %cst_280 : f32 to vector<12x128xf32>
    %c0_281 = arith.constant 0 : index
    %c0_282 = arith.constant 0 : index
    %291 = vector.load %arg44[%c0_281, %c0_282] : memref<14x128xbf16, #tpu.memory_space<vmem>>, vector<12x128xbf16>
    %c0_283 = arith.constant 0 : index
    %c0_284 = arith.constant 0 : index
    %c0_285 = arith.constant 0 : index
    %292 = vector.load %arg20[%c0_283, %c0_284, %c0_285] : memref<3x128x128xbf16, #tpu.memory_space<vmem>>, vector<1x128x128xbf16>
    %293 = vector.shape_cast %292 : vector<1x128x128xbf16> to vector<128x128xbf16>
    %cst_286 = arith.constant dense<0.000000e+00> : vector<12x128xf32>
    %294 = tpu.matmul %291, %293, %cst_286 {dimension_numbers = #tpu.dot_dimension_numbers<[1], [0], [0], [1], [0, 0, 1, 1], [], []>} : vector<12x128xbf16>, vector<128x128xbf16>, vector<12x128xf32> -> vector<12x128xf32>
    %295 = arith.addf %290, %294 : vector<12x128xf32>
    %c1_287 = arith.constant 1 : index
    %c0_288 = arith.constant 0 : index
    %296 = vector.load %arg44[%c1_287, %c0_288] : memref<14x128xbf16, #tpu.memory_space<vmem>>, vector<12x128xbf16>
    %c1_289 = arith.constant 1 : index
    %c0_290 = arith.constant 0 : index
    %c0_291 = arith.constant 0 : index
    %297 = vector.load %arg20[%c1_289, %c0_290, %c0_291] : memref<3x128x128xbf16, #tpu.memory_space<vmem>>, vector<1x128x128xbf16>
    %298 = vector.shape_cast %297 : vector<1x128x128xbf16> to vector<128x128xbf16>
    %cst_292 = arith.constant dense<0.000000e+00> : vector<12x128xf32>
    %299 = tpu.matmul %296, %298, %cst_292 {dimension_numbers = #tpu.dot_dimension_numbers<[1], [0], [0], [1], [0, 0, 1, 1], [], []>} : vector<12x128xbf16>, vector<128x128xbf16>, vector<12x128xf32> -> vector<12x128xf32>
    %300 = arith.addf %295, %299 : vector<12x128xf32>
    %c2_293 = arith.constant 2 : index
    %c0_294 = arith.constant 0 : index
    %301 = vector.load %arg44[%c2_293, %c0_294] : memref<14x128xbf16, #tpu.memory_space<vmem>>, vector<12x128xbf16>
    %c2_295 = arith.constant 2 : index
    %c0_296 = arith.constant 0 : index
    %c0_297 = arith.constant 0 : index
    %302 = vector.load %arg20[%c2_295, %c0_296, %c0_297] : memref<3x128x128xbf16, #tpu.memory_space<vmem>>, vector<1x128x128xbf16>
    %303 = vector.shape_cast %302 : vector<1x128x128xbf16> to vector<128x128xbf16>
    %cst_298 = arith.constant dense<0.000000e+00> : vector<12x128xf32>
    %304 = tpu.matmul %301, %303, %cst_298 {dimension_numbers = #tpu.dot_dimension_numbers<[1], [0], [0], [1], [0, 0, 1, 1], [], []>} : vector<12x128xbf16>, vector<128x128xbf16>, vector<12x128xf32> -> vector<12x128xf32>
    %305 = arith.addf %300, %304 : vector<12x128xf32>
    %c0_299 = arith.constant 0 : index
    %c0_300 = arith.constant 0 : index
    %306 = vector.load %arg21[%c0_299, %c0_300] : memref<1x128xf32, #tpu.memory_space<vmem>>, vector<1x128xf32>
    %307 = vector.broadcast %306 : vector<1x128xf32> to vector<12x128xf32>
    %308 = arith.addf %305, %307 : vector<12x128xf32>
    %cst_301 = arith.constant 0.000000e+00 : f32
    %309 = vector.broadcast %cst_301 : f32 to vector<12x128xf32>
    %310 = arith.maximumf %308, %309 : vector<12x128xf32>
    %311 = vector.extract_strided_slice %310 {offsets = [0, 0], sizes = [12, 64], strides = [1, 1]} : vector<12x128xf32> to vector<12x64xf32>
    %312 = vector.extract_strided_slice %310 {offsets = [0, 64], sizes = [12, 64], strides = [1, 1]} : vector<12x128xf32> to vector<12x64xf32>
    %313 = arith.maximumf %311, %312 : vector<12x64xf32>
    %c0_302 = arith.constant 0 : index
    %c0_303 = arith.constant 0 : index
    %314 = vector.load %arg51[%c0_302, %c0_303] : memref<12x64xf32, #tpu.memory_space<vmem>>, vector<12x64xf32>
    tpu.vector_store %arg51[%c0_302, %c0_303], %313 {strides = array<i32>} : memref<12x64xf32, #tpu.memory_space<vmem>>, vector<12x64xf32>,
    %c0_304 = arith.constant 0 : index
    %c0_305 = arith.constant 0 : index
    %315 = tpu.strided_load %arg51[%c0_304, %c0_305] {strides = array<i32: 2, 1>} : memref<12x64xf32, #tpu.memory_space<vmem>>, vector<6x64xf32>
    %c1_306 = arith.constant 1 : index
    %c0_307 = arith.constant 0 : index
    %316 = tpu.strided_load %arg51[%c1_306, %c0_307] {strides = array<i32: 2, 1>} : memref<12x64xf32, #tpu.memory_space<vmem>>, vector<6x64xf32>
    %317 = arith.maximumf %315, %316 : vector<6x64xf32>
    %cst_308 = arith.constant 0.000000e+00 : bf16
    %318 = vector.broadcast %cst_308 : bf16 to vector<10x64xbf16>
    %c0_309 = arith.constant 0 : index
    %c0_310 = arith.constant 0 : index
    %319 = vector.load %arg45[%c0_309, %c0_310] : memref<10x64xbf16, #tpu.memory_space<vmem>>, vector<10x64xbf16>
    tpu.vector_store %arg45[%c0_309, %c0_310], %318 {strides = array<i32>} : memref<10x64xbf16, #tpu.memory_space<vmem>>, vector<10x64xbf16>,
    %320 = vector.extract_strided_slice %317 {offsets = [0, 0], sizes = [2, 64], strides = [1, 1]} : vector<6x64xf32> to vector<2x64xf32>
    %321 = arith.truncf %320 : vector<2x64xf32> to vector<2x64xbf16>
    %c1_311 = arith.constant 1 : index
    %c0_312 = arith.constant 0 : index
    %322 = vector.load %arg45[%c1_311, %c0_312] : memref<10x64xbf16, #tpu.memory_space<vmem>>, vector<2x64xbf16>
    tpu.vector_store %arg45[%c1_311, %c0_312], %321 {strides = array<i32>} : memref<10x64xbf16, #tpu.memory_space<vmem>>, vector<2x64xbf16>,
    %323 = vector.extract_strided_slice %317 {offsets = [3, 0], sizes = [2, 64], strides = [1, 1]} : vector<6x64xf32> to vector<2x64xf32>
    %324 = arith.truncf %323 : vector<2x64xf32> to vector<2x64xbf16>
    %c5 = arith.constant 5 : index
    %c0_313 = arith.constant 0 : index
    %325 = vector.load %arg45[%c5, %c0_313] : memref<10x64xbf16, #tpu.memory_space<vmem>>, vector<2x64xbf16>
    tpu.vector_store %arg45[%c5, %c0_313], %324 {strides = array<i32>} : memref<10x64xbf16, #tpu.memory_space<vmem>>, vector<2x64xbf16>,
    %cst_314 = arith.constant 0.000000e+00 : f32
    %326 = vector.broadcast %cst_314 : f32 to vector<8x64xf32>
    %c0_315 = arith.constant 0 : index
    %c0_316 = arith.constant 0 : index
    %327 = vector.load %arg45[%c0_315, %c0_316] : memref<10x64xbf16, #tpu.memory_space<vmem>>, vector<8x64xbf16>
    %c0_317 = arith.constant 0 : index
    %c0_318 = arith.constant 0 : index
    %c0_319 = arith.constant 0 : index
    %328 = vector.load %arg22[%c0_317, %c0_318, %c0_319] : memref<3x64x64xbf16, #tpu.memory_space<vmem>>, vector<1x64x64xbf16>
    %329 = vector.shape_cast %328 : vector<1x64x64xbf16> to vector<64x64xbf16>
    %cst_320 = arith.constant dense<0.000000e+00> : vector<8x64xf32>
    %330 = tpu.matmul %327, %329, %cst_320 {dimension_numbers = #tpu.dot_dimension_numbers<[1], [0], [0], [1], [0, 0, 1, 1], [], []>} : vector<8x64xbf16>, vector<64x64xbf16>, vector<8x64xf32> -> vector<8x64xf32>
    %331 = arith.addf %326, %330 : vector<8x64xf32>
    %c1_321 = arith.constant 1 : index
    %c0_322 = arith.constant 0 : index
    %332 = vector.load %arg45[%c1_321, %c0_322] : memref<10x64xbf16, #tpu.memory_space<vmem>>, vector<8x64xbf16>
    %c1_323 = arith.constant 1 : index
    %c0_324 = arith.constant 0 : index
    %c0_325 = arith.constant 0 : index
    %333 = vector.load %arg22[%c1_323, %c0_324, %c0_325] : memref<3x64x64xbf16, #tpu.memory_space<vmem>>, vector<1x64x64xbf16>
    %334 = vector.shape_cast %333 : vector<1x64x64xbf16> to vector<64x64xbf16>
    %cst_326 = arith.constant dense<0.000000e+00> : vector<8x64xf32>
    %335 = tpu.matmul %332, %334, %cst_326 {dimension_numbers = #tpu.dot_dimension_numbers<[1], [0], [0], [1], [0, 0, 1, 1], [], []>} : vector<8x64xbf16>, vector<64x64xbf16>, vector<8x64xf32> -> vector<8x64xf32>
    %336 = arith.addf %331, %335 : vector<8x64xf32>
    %c2_327 = arith.constant 2 : index
    %c0_328 = arith.constant 0 : index
    %337 = vector.load %arg45[%c2_327, %c0_328] : memref<10x64xbf16, #tpu.memory_space<vmem>>, vector<8x64xbf16>
    %c2_329 = arith.constant 2 : index
    %c0_330 = arith.constant 0 : index
    %c0_331 = arith.constant 0 : index
    %338 = vector.load %arg22[%c2_329, %c0_330, %c0_331] : memref<3x64x64xbf16, #tpu.memory_space<vmem>>, vector<1x64x64xbf16>
    %339 = vector.shape_cast %338 : vector<1x64x64xbf16> to vector<64x64xbf16>
    %cst_332 = arith.constant dense<0.000000e+00> : vector<8x64xf32>
    %340 = tpu.matmul %337, %339, %cst_332 {dimension_numbers = #tpu.dot_dimension_numbers<[1], [0], [0], [1], [0, 0, 1, 1], [], []>} : vector<8x64xbf16>, vector<64x64xbf16>, vector<8x64xf32> -> vector<8x64xf32>
    %341 = arith.addf %336, %340 : vector<8x64xf32>
    %c0_333 = arith.constant 0 : index
    %c0_334 = arith.constant 0 : index
    %342 = vector.load %arg23[%c0_333, %c0_334] : memref<1x64xf32, #tpu.memory_space<vmem>>, vector<1x64xf32>
    %343 = vector.broadcast %342 : vector<1x64xf32> to vector<8x64xf32>
    %344 = arith.addf %341, %343 : vector<8x64xf32>
    %cst_335 = arith.constant 0.000000e+00 : f32
    %345 = vector.broadcast %cst_335 : f32 to vector<8x64xf32>
    %346 = arith.maximumf %344, %345 : vector<8x64xf32>
    %cst_336 = arith.constant 0.000000e+00 : bf16
    %347 = vector.broadcast %cst_336 : bf16 to vector<10x64xbf16>
    %c0_337 = arith.constant 0 : index
    %c0_338 = arith.constant 0 : index
    %348 = vector.load %arg46[%c0_337, %c0_338] : memref<10x64xbf16, #tpu.memory_space<vmem>>, vector<10x64xbf16>
    tpu.vector_store %arg46[%c0_337, %c0_338], %347 {strides = array<i32>} : memref<10x64xbf16, #tpu.memory_space<vmem>>, vector<10x64xbf16>,
    %349 = vector.extract_strided_slice %346 {offsets = [0, 0], sizes = [2, 64], strides = [1, 1]} : vector<8x64xf32> to vector<2x64xf32>
    %350 = arith.truncf %349 : vector<2x64xf32> to vector<2x64xbf16>
    %c1_339 = arith.constant 1 : index
    %c0_340 = arith.constant 0 : index
    %351 = vector.load %arg46[%c1_339, %c0_340] : memref<10x64xbf16, #tpu.memory_space<vmem>>, vector<2x64xbf16>
    tpu.vector_store %arg46[%c1_339, %c0_340], %350 {strides = array<i32>} : memref<10x64xbf16, #tpu.memory_space<vmem>>, vector<2x64xbf16>,
    %352 = vector.extract_strided_slice %346 {offsets = [4, 0], sizes = [2, 64], strides = [1, 1]} : vector<8x64xf32> to vector<2x64xf32>
    %353 = arith.truncf %352 : vector<2x64xf32> to vector<2x64xbf16>
    %c5_341 = arith.constant 5 : index
    %c0_342 = arith.constant 0 : index
    %354 = vector.load %arg46[%c5_341, %c0_342] : memref<10x64xbf16, #tpu.memory_space<vmem>>, vector<2x64xbf16>
    tpu.vector_store %arg46[%c5_341, %c0_342], %353 {strides = array<i32>} : memref<10x64xbf16, #tpu.memory_space<vmem>>, vector<2x64xbf16>,
    %cst_343 = arith.constant 0.000000e+00 : f32
    %355 = vector.broadcast %cst_343 : f32 to vector<8x64xf32>
    %c0_344 = arith.constant 0 : index
    %c0_345 = arith.constant 0 : index
    %356 = vector.load %arg46[%c0_344, %c0_345] : memref<10x64xbf16, #tpu.memory_space<vmem>>, vector<8x64xbf16>
    %c0_346 = arith.constant 0 : index
    %c0_347 = arith.constant 0 : index
    %c0_348 = arith.constant 0 : index
    %357 = vector.load %arg24[%c0_346, %c0_347, %c0_348] : memref<3x64x64xbf16, #tpu.memory_space<vmem>>, vector<1x64x64xbf16>
    %358 = vector.shape_cast %357 : vector<1x64x64xbf16> to vector<64x64xbf16>
    %cst_349 = arith.constant dense<0.000000e+00> : vector<8x64xf32>
    %359 = tpu.matmul %356, %358, %cst_349 {dimension_numbers = #tpu.dot_dimension_numbers<[1], [0], [0], [1], [0, 0, 1, 1], [], []>} : vector<8x64xbf16>, vector<64x64xbf16>, vector<8x64xf32> -> vector<8x64xf32>
    %360 = arith.addf %355, %359 : vector<8x64xf32>
    %c1_350 = arith.constant 1 : index
    %c0_351 = arith.constant 0 : index
    %361 = vector.load %arg46[%c1_350, %c0_351] : memref<10x64xbf16, #tpu.memory_space<vmem>>, vector<8x64xbf16>
    %c1_352 = arith.constant 1 : index
    %c0_353 = arith.constant 0 : index
    %c0_354 = arith.constant 0 : index
    %362 = vector.load %arg24[%c1_352, %c0_353, %c0_354] : memref<3x64x64xbf16, #tpu.memory_space<vmem>>, vector<1x64x64xbf16>
    %363 = vector.shape_cast %362 : vector<1x64x64xbf16> to vector<64x64xbf16>
    %cst_355 = arith.constant dense<0.000000e+00> : vector<8x64xf32>
    %364 = tpu.matmul %361, %363, %cst_355 {dimension_numbers = #tpu.dot_dimension_numbers<[1], [0], [0], [1], [0, 0, 1, 1], [], []>} : vector<8x64xbf16>, vector<64x64xbf16>, vector<8x64xf32> -> vector<8x64xf32>
    %365 = arith.addf %360, %364 : vector<8x64xf32>
    %c2_356 = arith.constant 2 : index
    %c0_357 = arith.constant 0 : index
    %366 = vector.load %arg46[%c2_356, %c0_357] : memref<10x64xbf16, #tpu.memory_space<vmem>>, vector<8x64xbf16>
    %c2_358 = arith.constant 2 : index
    %c0_359 = arith.constant 0 : index
    %c0_360 = arith.constant 0 : index
    %367 = vector.load %arg24[%c2_358, %c0_359, %c0_360] : memref<3x64x64xbf16, #tpu.memory_space<vmem>>, vector<1x64x64xbf16>
    %368 = vector.shape_cast %367 : vector<1x64x64xbf16> to vector<64x64xbf16>
    %cst_361 = arith.constant dense<0.000000e+00> : vector<8x64xf32>
    %369 = tpu.matmul %366, %368, %cst_361 {dimension_numbers = #tpu.dot_dimension_numbers<[1], [0], [0], [1], [0, 0, 1, 1], [], []>} : vector<8x64xbf16>, vector<64x64xbf16>, vector<8x64xf32> -> vector<8x64xf32>
    %370 = arith.addf %365, %369 : vector<8x64xf32>
    %c0_362 = arith.constant 0 : index
    %c0_363 = arith.constant 0 : index
    %371 = vector.load %arg25[%c0_362, %c0_363] : memref<1x64xf32, #tpu.memory_space<vmem>>, vector<1x64xf32>
    %372 = vector.broadcast %371 : vector<1x64xf32> to vector<8x64xf32>
    %373 = arith.addf %370, %372 : vector<8x64xf32>
    %cst_364 = arith.constant 0.000000e+00 : f32
    %374 = vector.broadcast %cst_364 : f32 to vector<8x64xf32>
    %375 = arith.maximumf %373, %374 : vector<8x64xf32>
    %cst_365 = arith.constant 0.000000e+00 : bf16
    %376 = vector.broadcast %cst_365 : bf16 to vector<10x64xbf16>
    %c0_366 = arith.constant 0 : index
    %c0_367 = arith.constant 0 : index
    %377 = vector.load %arg47[%c0_366, %c0_367] : memref<10x64xbf16, #tpu.memory_space<vmem>>, vector<10x64xbf16>
    tpu.vector_store %arg47[%c0_366, %c0_367], %376 {strides = array<i32>} : memref<10x64xbf16, #tpu.memory_space<vmem>>, vector<10x64xbf16>,
    %378 = vector.extract_strided_slice %375 {offsets = [0, 0], sizes = [2, 64], strides = [1, 1]} : vector<8x64xf32> to vector<2x64xf32>
    %379 = arith.truncf %378 : vector<2x64xf32> to vector<2x64xbf16>
    %c1_368 = arith.constant 1 : index
    %c0_369 = arith.constant 0 : index
    %380 = vector.load %arg47[%c1_368, %c0_369] : memref<10x64xbf16, #tpu.memory_space<vmem>>, vector<2x64xbf16>
    tpu.vector_store %arg47[%c1_368, %c0_369], %379 {strides = array<i32>} : memref<10x64xbf16, #tpu.memory_space<vmem>>, vector<2x64xbf16>,
    %381 = vector.extract_strided_slice %375 {offsets = [4, 0], sizes = [2, 64], strides = [1, 1]} : vector<8x64xf32> to vector<2x64xf32>
    %382 = arith.truncf %381 : vector<2x64xf32> to vector<2x64xbf16>
    %c5_370 = arith.constant 5 : index
    %c0_371 = arith.constant 0 : index
    %383 = vector.load %arg47[%c5_370, %c0_371] : memref<10x64xbf16, #tpu.memory_space<vmem>>, vector<2x64xbf16>
    tpu.vector_store %arg47[%c5_370, %c0_371], %382 {strides = array<i32>} : memref<10x64xbf16, #tpu.memory_space<vmem>>, vector<2x64xbf16>,
    %cst_372 = arith.constant 0.000000e+00 : f32
    %384 = vector.broadcast %cst_372 : f32 to vector<8x64xf32>
    %c0_373 = arith.constant 0 : index
    %c0_374 = arith.constant 0 : index
    %385 = vector.load %arg47[%c0_373, %c0_374] : memref<10x64xbf16, #tpu.memory_space<vmem>>, vector<8x64xbf16>
    %c0_375 = arith.constant 0 : index
    %c0_376 = arith.constant 0 : index
    %c0_377 = arith.constant 0 : index
    %386 = vector.load %arg26[%c0_375, %c0_376, %c0_377] : memref<3x64x64xbf16, #tpu.memory_space<vmem>>, vector<1x64x64xbf16>
    %387 = vector.shape_cast %386 : vector<1x64x64xbf16> to vector<64x64xbf16>
    %cst_378 = arith.constant dense<0.000000e+00> : vector<8x64xf32>
    %388 = tpu.matmul %385, %387, %cst_378 {dimension_numbers = #tpu.dot_dimension_numbers<[1], [0], [0], [1], [0, 0, 1, 1], [], []>} : vector<8x64xbf16>, vector<64x64xbf16>, vector<8x64xf32> -> vector<8x64xf32>
    %389 = arith.addf %384, %388 : vector<8x64xf32>
    %c1_379 = arith.constant 1 : index
    %c0_380 = arith.constant 0 : index
    %390 = vector.load %arg47[%c1_379, %c0_380] : memref<10x64xbf16, #tpu.memory_space<vmem>>, vector<8x64xbf16>
    %c1_381 = arith.constant 1 : index
    %c0_382 = arith.constant 0 : index
    %c0_383 = arith.constant 0 : index
    %391 = vector.load %arg26[%c1_381, %c0_382, %c0_383] : memref<3x64x64xbf16, #tpu.memory_space<vmem>>, vector<1x64x64xbf16>
    %392 = vector.shape_cast %391 : vector<1x64x64xbf16> to vector<64x64xbf16>
    %cst_384 = arith.constant dense<0.000000e+00> : vector<8x64xf32>
    %393 = tpu.matmul %390, %392, %cst_384 {dimension_numbers = #tpu.dot_dimension_numbers<[1], [0], [0], [1], [0, 0, 1, 1], [], []>} : vector<8x64xbf16>, vector<64x64xbf16>, vector<8x64xf32> -> vector<8x64xf32>
    %394 = arith.addf %389, %393 : vector<8x64xf32>
    %c2_385 = arith.constant 2 : index
    %c0_386 = arith.constant 0 : index
    %395 = vector.load %arg47[%c2_385, %c0_386] : memref<10x64xbf16, #tpu.memory_space<vmem>>, vector<8x64xbf16>
    %c2_387 = arith.constant 2 : index
    %c0_388 = arith.constant 0 : index
    %c0_389 = arith.constant 0 : index
    %396 = vector.load %arg26[%c2_387, %c0_388, %c0_389] : memref<3x64x64xbf16, #tpu.memory_space<vmem>>, vector<1x64x64xbf16>
    %397 = vector.shape_cast %396 : vector<1x64x64xbf16> to vector<64x64xbf16>
    %cst_390 = arith.constant dense<0.000000e+00> : vector<8x64xf32>
    %398 = tpu.matmul %395, %397, %cst_390 {dimension_numbers = #tpu.dot_dimension_numbers<[1], [0], [0], [1], [0, 0, 1, 1], [], []>} : vector<8x64xbf16>, vector<64x64xbf16>, vector<8x64xf32> -> vector<8x64xf32>
    %399 = arith.addf %394, %398 : vector<8x64xf32>
    %c0_391 = arith.constant 0 : index
    %c0_392 = arith.constant 0 : index
    %400 = vector.load %arg27[%c0_391, %c0_392] : memref<1x64xf32, #tpu.memory_space<vmem>>, vector<1x64xf32>
    %401 = vector.broadcast %400 : vector<1x64xf32> to vector<8x64xf32>
    %402 = arith.addf %399, %401 : vector<8x64xf32>
    %cst_393 = arith.constant 0.000000e+00 : f32
    %403 = vector.broadcast %cst_393 : f32 to vector<8x64xf32>
    %404 = arith.maximumf %402, %403 : vector<8x64xf32>
    %405 = vector.extract_strided_slice %404 {offsets = [0, 0], sizes = [8, 32], strides = [1, 1]} : vector<8x64xf32> to vector<8x32xf32>
    %406 = vector.extract_strided_slice %404 {offsets = [0, 32], sizes = [8, 32], strides = [1, 1]} : vector<8x64xf32> to vector<8x32xf32>
    %407 = arith.maximumf %405, %406 : vector<8x32xf32>
    %c0_394 = arith.constant 0 : index
    %c0_395 = arith.constant 0 : index
    %408 = vector.load %arg52[%c0_394, %c0_395] : memref<8x32xf32, #tpu.memory_space<vmem>>, vector<8x32xf32>
    tpu.vector_store %arg52[%c0_394, %c0_395], %407 {strides = array<i32>} : memref<8x32xf32, #tpu.memory_space<vmem>>, vector<8x32xf32>,
    %c0_396 = arith.constant 0 : index
    %c0_397 = arith.constant 0 : index
    %409 = tpu.strided_load %arg52[%c0_396, %c0_397] {strides = array<i32: 2, 1>} : memref<8x32xf32, #tpu.memory_space<vmem>>, vector<4x32xf32>
    %c1_398 = arith.constant 1 : index
    %c0_399 = arith.constant 0 : index
    %410 = tpu.strided_load %arg52[%c1_398, %c0_399] {strides = array<i32: 2, 1>} : memref<8x32xf32, #tpu.memory_space<vmem>>, vector<4x32xf32>
    %411 = arith.maximumf %409, %410 : vector<4x32xf32>
    %412 = arith.truncf %411 : vector<4x32xf32> to vector<4x32xbf16>
    %c0_400 = arith.constant 0 : index
    %c0_401 = arith.constant 0 : index
    %413 = vector.load %arg28[%c0_400, %c0_401] : memref<32x256xbf16, #tpu.memory_space<vmem>>, vector<32x256xbf16>
    %cst_402 = arith.constant dense<0.000000e+00> : vector<4x256xf32>
    %414 = tpu.matmul %412, %413, %cst_402 {dimension_numbers = #tpu.dot_dimension_numbers<[1], [0], [0], [1], [0, 0, 1, 1], [], []>} : vector<4x32xbf16>, vector<32x256xbf16>, vector<4x256xf32> -> vector<4x256xf32>
    %c0_403 = arith.constant 0 : index
    %c0_404 = arith.constant 0 : index
    %415 = vector.load %arg29[%c0_403, %c0_404] : memref<1x256xf32, #tpu.memory_space<vmem>>, vector<1x256xf32>
    %416 = vector.broadcast %415 : vector<1x256xf32> to vector<4x256xf32>
    %417 = arith.addf %414, %416 : vector<4x256xf32>
    %cst_405 = arith.constant 0.000000e+00 : f32
    %418 = vector.broadcast %cst_405 : f32 to vector<4x256xf32>
    %419 = arith.maximumf %417, %418 : vector<4x256xf32>
    %420 = arith.truncf %419 : vector<4x256xf32> to vector<4x256xbf16>
    %c0_406 = arith.constant 0 : index
    %c0_407 = arith.constant 0 : index
    %421 = vector.load %arg30[%c0_406, %c0_407] : memref<256x256xbf16, #tpu.memory_space<vmem>>, vector<256x256xbf16>
    %cst_408 = arith.constant dense<0.000000e+00> : vector<4x256xf32>
    %422 = tpu.matmul %420, %421, %cst_408 {dimension_numbers = #tpu.dot_dimension_numbers<[1], [0], [0], [1], [0, 0, 1, 1], [], []>} : vector<4x256xbf16>, vector<256x256xbf16>, vector<4x256xf32> -> vector<4x256xf32>
    %c0_409 = arith.constant 0 : index
    %c0_410 = arith.constant 0 : index
    %423 = vector.load %arg31[%c0_409, %c0_410] : memref<1x256xf32, #tpu.memory_space<vmem>>, vector<1x256xf32>
    %424 = vector.broadcast %423 : vector<1x256xf32> to vector<4x256xf32>
    %425 = arith.addf %422, %424 : vector<4x256xf32>
    %cst_411 = arith.constant 0.000000e+00 : f32
    %426 = vector.broadcast %cst_411 : f32 to vector<4x256xf32>
    %427 = arith.maximumf %425, %426 : vector<4x256xf32>
    %428 = arith.truncf %427 : vector<4x256xf32> to vector<4x256xbf16>
    %c0_412 = arith.constant 0 : index
    %c0_413 = arith.constant 0 : index
    %429 = vector.load %arg32[%c0_412, %c0_413] : memref<256x10xbf16, #tpu.memory_space<vmem>>, vector<256x10xbf16>
    %cst_414 = arith.constant dense<0.000000e+00> : vector<4x10xf32>
    %430 = tpu.matmul %428, %429, %cst_414 {dimension_numbers = #tpu.dot_dimension_numbers<[1], [0], [0], [1], [0, 0, 1, 1], [], []>} : vector<4x256xbf16>, vector<256x10xbf16>, vector<4x10xf32> -> vector<4x10xf32>
    %c0_415 = arith.constant 0 : index
    %c0_416 = arith.constant 0 : index
    %431 = vector.load %arg33[%c0_415, %c0_416] : memref<1x10xf32, #tpu.memory_space<vmem>>, vector<1x10xf32>
    %432 = vector.broadcast %431 : vector<1x10xf32> to vector<4x10xf32>
    %433 = arith.addf %430, %432 : vector<4x10xf32>
    %434 = vector.extract_strided_slice %433 {offsets = [0, 0], sizes = [1, 10], strides = [1, 1]} : vector<4x10xf32> to vector<1x10xf32>
    %c0_417 = arith.constant 0 : index
    %c0_418 = arith.constant 0 : index
    %435 = vector.load %arg34[%c0_417, %c0_418] : memref<2x10xf32, #tpu.memory_space<vmem>>, vector<1x10xf32>
    tpu.vector_store %arg34[%c0_417, %c0_418], %434 {strides = array<i32>} : memref<2x10xf32, #tpu.memory_space<vmem>>, vector<1x10xf32>,
    %436 = vector.extract_strided_slice %433 {offsets = [2, 0], sizes = [1, 10], strides = [1, 1]} : vector<4x10xf32> to vector<1x10xf32>
    %c1_419 = arith.constant 1 : index
    %c0_420 = arith.constant 0 : index
    %437 = vector.load %arg34[%c1_419, %c0_420] : memref<2x10xf32, #tpu.memory_space<vmem>>, vector<1x10xf32>
    tpu.vector_store %arg34[%c1_419, %c0_420], %436 {strides = array<i32>} : memref<2x10xf32, #tpu.memory_space<vmem>>, vector<1x10xf32>,
    return
  }
  func.func @transform_0(%arg0: i32) -> (i32, i32) {
    %c0_i32 = arith.constant 0 : i32
    %c0_i32_0 = arith.constant 0 : i32
    %c0_i32_1 = arith.constant 0 : i32
    return %c0_i32, %c0_i32_0 : i32, i32
  }
  func.func @transform_1(%arg0: i32) -> (i32, i32, i32) {
    %c0_i32 = arith.constant 0 : i32
    %c0_i32_0 = arith.constant 0 : i32
    %c0_i32_1 = arith.constant 0 : i32
    %c0_i32_2 = arith.constant 0 : i32
    return %c0_i32, %c0_i32_0, %c0_i32_1 : i32, i32, i32
  }
  func.func @transform_2(%arg0: i32) -> (i32, i32) {
    %c0_i32 = arith.constant 0 : i32
    %c0_i32_0 = arith.constant 0 : i32
    %c0_i32_1 = arith.constant 0 : i32
    return %c0_i32, %c0_i32_0 : i32, i32
  }
  func.func @transform_3(%arg0: i32) -> (i32, i32, i32) {
    %c0_i32 = arith.constant 0 : i32
    %c0_i32_0 = arith.constant 0 : i32
    %c0_i32_1 = arith.constant 0 : i32
    %c0_i32_2 = arith.constant 0 : i32
    return %c0_i32, %c0_i32_0, %c0_i32_1 : i32, i32, i32
  }
  func.func @transform_4(%arg0: i32) -> (i32, i32) {
    %c0_i32 = arith.constant 0 : i32
    %c0_i32_0 = arith.constant 0 : i32
    %c0_i32_1 = arith.constant 0 : i32
    return %c0_i32, %c0_i32_0 : i32, i32
  }
  func.func @transform_5(%arg0: i32) -> (i32, i32, i32) {
    %c0_i32 = arith.constant 0 : i32
    %c0_i32_0 = arith.constant 0 : i32
    %c0_i32_1 = arith.constant 0 : i32
    %c0_i32_2 = arith.constant 0 : i32
    return %c0_i32, %c0_i32_0, %c0_i32_1 : i32, i32, i32
  }
  func.func @transform_6(%arg0: i32) -> (i32, i32) {
    %c0_i32 = arith.constant 0 : i32
    %c0_i32_0 = arith.constant 0 : i32
    %c0_i32_1 = arith.constant 0 : i32
    return %c0_i32, %c0_i32_0 : i32, i32
  }
  func.func @transform_7(%arg0: i32) -> (i32, i32, i32) {
    %c0_i32 = arith.constant 0 : i32
    %c0_i32_0 = arith.constant 0 : i32
    %c0_i32_1 = arith.constant 0 : i32
    %c0_i32_2 = arith.constant 0 : i32
    return %c0_i32, %c0_i32_0, %c0_i32_1 : i32, i32, i32
  }
  func.func @transform_8(%arg0: i32) -> (i32, i32) {
    %c0_i32 = arith.constant 0 : i32
    %c0_i32_0 = arith.constant 0 : i32
    %c0_i32_1 = arith.constant 0 : i32
    return %c0_i32, %c0_i32_0 : i32, i32
  }
  func.func @transform_9(%arg0: i32) -> (i32, i32, i32) {
    %c0_i32 = arith.constant 0 : i32
    %c0_i32_0 = arith.constant 0 : i32
    %c0_i32_1 = arith.constant 0 : i32
    %c0_i32_2 = arith.constant 0 : i32
    return %c0_i32, %c0_i32_0, %c0_i32_1 : i32, i32, i32
  }
  func.func @transform_10(%arg0: i32) -> (i32, i32) {
    %c0_i32 = arith.constant 0 : i32
    %c0_i32_0 = arith.constant 0 : i32
    %c0_i32_1 = arith.constant 0 : i32
    return %c0_i32, %c0_i32_0 : i32, i32
  }
  func.func @transform_11(%arg0: i32) -> (i32, i32, i32) {
    %c0_i32 = arith.constant 0 : i32
    %c0_i32_0 = arith.constant 0 : i32
    %c0_i32_1 = arith.constant 0 : i32
    %c0_i32_2 = arith.constant 0 : i32
    return %c0_i32, %c0_i32_0, %c0_i32_1 : i32, i32, i32
  }
  func.func @transform_12(%arg0: i32) -> (i32, i32) {
    %c0_i32 = arith.constant 0 : i32
    %c0_i32_0 = arith.constant 0 : i32
    %c0_i32_1 = arith.constant 0 : i32
    return %c0_i32, %c0_i32_0 : i32, i32
  }
  func.func @transform_13(%arg0: i32) -> (i32, i32, i32) {
    %c0_i32 = arith.constant 0 : i32
    %c0_i32_0 = arith.constant 0 : i32
    %c0_i32_1 = arith.constant 0 : i32
    %c0_i32_2 = arith.constant 0 : i32
    return %c0_i32, %c0_i32_0, %c0_i32_1 : i32, i32, i32
  }
  func.func @transform_14(%arg0: i32) -> (i32, i32) {
    %c0_i32 = arith.constant 0 : i32
    %c0_i32_0 = arith.constant 0 : i32
    %c0_i32_1 = arith.constant 0 : i32
    return %c0_i32, %c0_i32_0 : i32, i32
  }
  func.func @transform_15(%arg0: i32) -> (i32, i32, i32) {
    %c0_i32 = arith.constant 0 : i32
    %c0_i32_0 = arith.constant 0 : i32
    %c0_i32_1 = arith.constant 0 : i32
    %c0_i32_2 = arith.constant 0 : i32
    return %c0_i32, %c0_i32_0, %c0_i32_1 : i32, i32, i32
  }
  func.func @transform_16(%arg0: i32) -> (i32, i32) {
    %c0_i32 = arith.constant 0 : i32
    %c0_i32_0 = arith.constant 0 : i32
    %c0_i32_1 = arith.constant 0 : i32
    return %c0_i32, %c0_i32_0 : i32, i32
  }
  func.func @transform_17(%arg0: i32) -> (i32, i32, i32) {
    %c0_i32 = arith.constant 0 : i32
    %c0_i32_0 = arith.constant 0 : i32
    %c0_i32_1 = arith.constant 0 : i32
    %c0_i32_2 = arith.constant 0 : i32
    return %c0_i32, %c0_i32_0, %c0_i32_1 : i32, i32, i32
  }
  func.func @transform_18(%arg0: i32) -> (i32, i32) {
    %c0_i32 = arith.constant 0 : i32
    %c0_i32_0 = arith.constant 0 : i32
    %c0_i32_1 = arith.constant 0 : i32
    return %c0_i32, %c0_i32_0 : i32, i32
  }
  func.func @transform_19(%arg0: i32) -> (i32, i32, i32) {
    %c0_i32 = arith.constant 0 : i32
    %c0_i32_0 = arith.constant 0 : i32
    %c0_i32_1 = arith.constant 0 : i32
    %c0_i32_2 = arith.constant 0 : i32
    return %c0_i32, %c0_i32_0, %c0_i32_1 : i32, i32, i32
  }
  func.func @transform_20(%arg0: i32) -> (i32, i32) {
    %c0_i32 = arith.constant 0 : i32
    %c0_i32_0 = arith.constant 0 : i32
    %c0_i32_1 = arith.constant 0 : i32
    return %c0_i32, %c0_i32_0 : i32, i32
  }
  func.func @transform_21(%arg0: i32) -> (i32, i32, i32) {
    %c0_i32 = arith.constant 0 : i32
    %c0_i32_0 = arith.constant 0 : i32
    %c0_i32_1 = arith.constant 0 : i32
    %c0_i32_2 = arith.constant 0 : i32
    return %c0_i32, %c0_i32_0, %c0_i32_1 : i32, i32, i32
  }
  func.func @transform_22(%arg0: i32) -> (i32, i32) {
    %c0_i32 = arith.constant 0 : i32
    %c0_i32_0 = arith.constant 0 : i32
    %c0_i32_1 = arith.constant 0 : i32
    return %c0_i32, %c0_i32_0 : i32, i32
  }
  func.func @transform_23(%arg0: i32) -> (i32, i32, i32) {
    %c0_i32 = arith.constant 0 : i32
    %c0_i32_0 = arith.constant 0 : i32
    %c0_i32_1 = arith.constant 0 : i32
    %c0_i32_2 = arith.constant 0 : i32
    return %c0_i32, %c0_i32_0, %c0_i32_1 : i32, i32, i32
  }
  func.func @transform_24(%arg0: i32) -> (i32, i32) {
    %c0_i32 = arith.constant 0 : i32
    %c0_i32_0 = arith.constant 0 : i32
    %c0_i32_1 = arith.constant 0 : i32
    return %c0_i32, %c0_i32_0 : i32, i32
  }
  func.func @transform_25(%arg0: i32) -> (i32, i32, i32) {
    %c0_i32 = arith.constant 0 : i32
    %c0_i32_0 = arith.constant 0 : i32
    %c0_i32_1 = arith.constant 0 : i32
    %c0_i32_2 = arith.constant 0 : i32
    return %c0_i32, %c0_i32_0, %c0_i32_1 : i32, i32, i32
  }
  func.func @transform_26(%arg0: i32) -> (i32, i32) {
    %c0_i32 = arith.constant 0 : i32
    %c0_i32_0 = arith.constant 0 : i32
    %c0_i32_1 = arith.constant 0 : i32
    return %c0_i32, %c0_i32_0 : i32, i32
  }
  func.func @transform_27(%arg0: i32) -> (i32, i32) {
    %c0_i32 = arith.constant 0 : i32
    %c0_i32_0 = arith.constant 0 : i32
    %c0_i32_1 = arith.constant 0 : i32
    return %c0_i32, %c0_i32_0 : i32, i32
  }
  func.func @transform_28(%arg0: i32) -> (i32, i32) {
    %c0_i32 = arith.constant 0 : i32
    %c0_i32_0 = arith.constant 0 : i32
    %c0_i32_1 = arith.constant 0 : i32
    return %c0_i32, %c0_i32_0 : i32, i32
  }
  func.func @transform_29(%arg0: i32) -> (i32, i32) {
    %c0_i32 = arith.constant 0 : i32
    %c0_i32_0 = arith.constant 0 : i32
    %c0_i32_1 = arith.constant 0 : i32
    return %c0_i32, %c0_i32_0 : i32, i32
  }
  func.func @transform_30(%arg0: i32) -> (i32, i32) {
    %c0_i32 = arith.constant 0 : i32
    %c0_i32_0 = arith.constant 0 : i32
    %c0_i32_1 = arith.constant 0 : i32
    return %c0_i32, %c0_i32_0 : i32, i32
  }
  func.func @transform_31(%arg0: i32) -> (i32, i32) {
    %c0_i32 = arith.constant 0 : i32
    %c0_i32_0 = arith.constant 0 : i32
    %c0_i32_1 = arith.constant 0 : i32
    return %c0_i32, %c0_i32_0 : i32, i32
  }
  func.func @transform_32(%arg0: i32) -> (i32, i32) {
    %c0_i32 = arith.constant 0 : i32
    %c0_i32_0 = arith.constant 0 : i32
    %c0_i32_1 = arith.constant 0 : i32
    return %c0_i32, %c0_i32_0 : i32, i32
  }
  func.func @transform_33(%arg0: i32) -> (i32, i32) {
    %c0_i32 = arith.constant 0 : i32
    %c0_i32_0 = arith.constant 0 : i32
    %c0_i32_1 = arith.constant 0 : i32
    return %c0_i32, %c0_i32_0 : i32, i32
  }
}

</mosaic_0001>

<bundles_post_ra>
// kernel: _lambda_.1
= control target key start
LH: loop header
LB: loop body
LE: loop exit
PB: predicated region body
PF: predicated region fallthrough
CT: control target
= control target key end

     0   :  { %s9400_s6 = smov 1   ;;  %s9401_s10 = smov 2   ;;  %s10795_s0 = inlined_call_operand.smem [shape: u32[34], index: -1, kind: input, shape index: {}] }
   0x1   :  { %s9477_s5 = sld [smem:[%s10795_s0]]   ;;  %s9402_s14 = smov 3  }
   0x2   :  { %s9482_s9 = sld [smem:[%s10795_s0 + %s9400_s6]]   ;;  %s9403_s18 = smov 4  }
   0x3   :  { %s9487_s13 = sld [smem:[%s10795_s0 + %s9401_s10]]   ;;  %s9404_s22 = smov 5  }
   0x4   :  { %s9492_s17 = sld [smem:[%s10795_s0 + %s9402_s14]]   ;;  %s9405_s26 = smov 6  }
   0x5   :  { %s9497_s21 = sld [smem:[%s10795_s0 + %s9403_s18]]   ;;  %s9406_s30 = smov 7  }
   0x6   :  { %s9502_s25 = sld [smem:[%s10795_s0 + %s9404_s22]]   ;;  %s9407_s4 = smov 8  }
   0x7   :  { %s9507_s29 = sld [smem:[%s10795_s0 + %s9405_s26]]   ;;  %s9408_s10 = smov 9  }
   0x8   :  { %s9512_s3 = sld [smem:[%s10795_s0 + %s9406_s30]]   ;;  %s9409_s15 = smov 10  }
   0x9   :  { %s9517_s8 = sld [smem:[%s10795_s0 + %s9407_s4]]   ;;  %s9410_s20 = smov 11  }
   0xa   :  { %s9522_s14 = sld [smem:[%s10795_s0 + %s9408_s10]]   ;;  %s9411_s26 = smov 12  }
   0xb   :  { %10817 = sst [smem:[#allocation78_spill]] %s9497_s21  ;;  %s9412_s1 = smov 13  }
   0xc   :  { %s9527_s19 = sld [smem:[%s10795_s0 + %s9409_s15]]   ;;  %s9413_s7 = smov 14  }
   0xd   :  { %10818 = sst [smem:[#allocation79_spill]] %s9507_s29  ;;  %s9414_s15 = smov 15  }
   0xe   :  { %s9532_s24 = sld [smem:[%s10795_s0 + %s9410_s20]]   ;;  %s9415_s22 = smov 16  }
   0xf   :  { %10819 = sst [smem:[#allocation80_spill]] %s9517_s8  ;;  %s9416_s28 = smov 17  }
  0x10   :  { %s9537_s30 = sld [smem:[%s10795_s0 + %s9411_s26]]  }
  0x11   :  { %s9542_s6 = sld [smem:[%s10795_s0 + %s9412_s1]]  }
  0x12   :  { %10820 = sst [smem:[#allocation81_spill]] %s9527_s19 }
  0x13   :  { %s9547_s12 = sld [smem:[%s10795_s0 + %s9413_s7]]   ;;  %s9417_s7 = smov 18  }
  0x14   :  { %s9552_s20 = sld [smem:[%s10795_s0 + %s9414_s15]]   ;;  %s9418_s15 = smov 19  }
  0x15   :  { %s9557_s27 = sld [smem:[%s10795_s0 + %s9415_s22]]   ;;  %s9419_s22 = smov 20  }
  0x16   :  { %10821 = sst [smem:[#allocation82_spill]] %s9537_s30 }
  0x17   :  { %10822 = sst [smem:[#allocation83_spill]] %s9542_s6 }
  0x18   :  { %s9562_s4 = sld [smem:[%s10795_s0 + %s9416_s28]]   ;;  %s9420_s28 = smov 21  }
  0x19   :  { %s9567_s6 = sld [smem:[%s10795_s0 + %s9417_s7]]   ;;  %s9421_s7 = smov 22  }
  0x1a   :  { %10823 = sst [smem:[#allocation84_spill]] %s9552_s20 }
  0x1b   :  { %s9572_s20 = sld [smem:[%s10795_s0 + %s9418_s15]]   ;;  %s9422_s15 = smov 23  }
  0x1c   :  { %s9577_s30 = sld [smem:[%s10795_s0 + %s9419_s22]]   ;;  %s9423_s22 = smov 24  }
  0x1d   :  { %s9597_s19 = sld [smem:[%s10795_s0 + %s9423_s22]]   ;;  %s9427_s22 = smov 28  }
  0x1e   :  { %10824 = sst [smem:[#allocation85_spill]] %s9562_s4 }
  0x1f   :  { %10825 = sst [smem:[#allocation86_spill]] %s9567_s6 }
  0x20   :  { %s9582_s4 = sld [smem:[%s10795_s0 + %s9420_s28]]   ;;  %s9424_s28 = smov 25  }
  0x21   :  { %10826 = sst [smem:[#allocation87_spill]] %s9572_s20 }
  0x22   :  { %s9587_s6 = sld [smem:[%s10795_s0 + %s9421_s7]]   ;;  %s9425_s7 = smov 26  }
  0x23   :  { %s9592_s20 = sld [smem:[%s10795_s0 + %s9422_s15]]   ;;  %s9426_s15 = smov 27  }
  0x24   :  { %s9607_s8 = sld [smem:[%s10795_s0 + %s9425_s7]]   ;;  %s9429_s7 = smov 30  }
  0x25   :  { %s9617_s29 = sld [smem:[%s10795_s0 + %s9427_s22]]   ;;  %s9431_s22 = smov 32  }
  0x26   :  { %10827 = sst [smem:[#allocation88_spill]] %s9582_s4 }
  0x27   :  { %s9602_s4 = sld [smem:[%s10795_s0 + %s9424_s28]]   ;;  %s9428_s28 = smov 29  }
  0x28   :  { %s9627_s21 = sld [smem:[%s10795_s0 + %s9429_s7]]  }
  0x29   :  { %10828 = sst [smem:[#allocation89_spill]] %s9592_s20 }
  0x2a   :  { %s9612_s20 = sld [smem:[%s10795_s0 + %s9426_s15]]   ;;  %s9430_s15 = smov 31  }
  0x2b   :  { %10831 = sst [smem:[#allocation92_spill]] %s9617_s29 }
  0x2c   :  { %s9637_s29 = sld [smem:[%s10795_s0 + %s9431_s22]]  }
  0x2d   :  { %10829 = sst [smem:[#allocation90_spill]] %s9602_s4 }
  0x2e   :  { %s9622_s4 = sld [smem:[%s10795_s0 + %s9428_s28]]   ;;  %s9432_s28 = smov 33  }
  0x30   :  { %10830 = sst [smem:[#allocation91_spill]] %s9612_s20 }
  0x31   :  { %s9632_s20 = sld [smem:[%s10795_s0 + %s9430_s15]]  }
  0x34   :  { %10832 = sst [smem:[#allocation93_spill]] %s9622_s4 }
  0x35   :  { %s9642_s4 = sld [smem:[%s10795_s0 + %s9432_s28]]  }
  0x36   :  { %72 = vsyncpa [#allocation21], 0 }
  0x37   :  { %73 = vsyncpa [#allocation24], 0 }
  0x38   :  { %74 = vsyncpa [#allocation27], 0 }
  0x39   :  { %75 = vsyncpa [#allocation30], 0 }
  0x3a   :  { %76 = vsyncpa [#allocation33], 0 }
  0x3b   :  { %77 = vsyncpa [#allocation36], 0 }
  0x3c   :  { %78 = vsyncpa [#allocation39], 0 }
  0x3d   :  { %79 = vsyncpa [#allocation42], 0 }
  0x3e   :  { %80 = vsyncpa [#allocation45], 0 }
  0x3f   :  { %81 = vsyncpa [#allocation48], 0 }
  0x40   :  { %82 = vsyncpa [#allocation51], 0 }
  0x41   :  { %83 = vsyncpa [#allocation54], 0 }
  0x42   :  { %84 = vsyncpa [#allocation57], 0 }
  0x43   :  { %85 = vsyncpa [#allocation60], 0 }
  0x44   :  { %86 = vsyncpa [#allocation22], 0  ;;  %s9433_s0 = smov [#allocation23]   ;;  %s8754_s10 = scalar_lea.hbm %s9482_s9, 768 }
  0x45   :  { %s104_s7 = sshll.u32 %s9433_s0, 4  ;;  %p8755_p0 = scmp.ne.s32.totalorder %s9482_s9, %s8754_s10  ;;  %s105_s7 = int_to_ptr.vmem [resolvable:$true] %s104_s7 }
  0x46   :  { %p8758_p1 = scmp.lt.u32.totalorder %s8754_s10, %s9482_s9 }
  0x48   :  { %p8760_p2 = pnand %p8758_p1, %p8755_p0 }
  0x4a   :  { %8763 = shalt.err (!%p8760_p2)
}
  0x4b   :  { %s8764_s11 = scalar_lea.vmem %s105_s7, 768  ;;  %p8769_p4 = scmp.lt.s32.totalorder %s105_s7, %s105_s7 }
  0x4c   :  { %p8765_p3 = scmp.ne.s32.totalorder %s105_s7, %s8764_s11  ;;  %p8770_p5 = scmp.lt.s32.totalorder %s8764_s11, %s8764_s11 }
  0x4e   :  { %p8771_p6 = por %p8770_p5, %p8769_p4 }
  0x50   :  { %p8772_p7 = pnand %p8771_p6, %p8765_p3 }
  0x52   :  { %8775 = shalt.err (!%p8772_p7)
}
  0x53   :  { %s9434_s15 = smov 64   ;;  %s9435_s16 = smov 4  }
  0x54   :  { %110 = dma.hbm_to_vmem [thread:$0]  %s9482_s9, 768, %s105_s7, [#allocation24], %s9434_s15, %s9434_s15, %s9435_s16  }
  0x55   :  { %s9436_s18 = smov [#allocation26]   ;;  %s9437_s23 = smov [#allocation29]  }
  0x56   :  { %s126_s22 = sshll.u32 %s9436_s18, 4  ;;  %s148_s26 = sshll.u32 %s9437_s23, 4  ;;  %s127_s22 = int_to_ptr.vmem [resolvable:$true] %s126_s22  ;;  %s149_s26 = int_to_ptr.vmem [resolvable:$true] %s148_s26 }
  0x57   :  { %s8776_s28 = scalar_lea.hbm %s9492_s17, 3072 }
  0x58   :  { %p8777_p8 = scmp.ne.s32.totalorder %s9492_s17, %s8776_s28  ;;  %p8780_p9 = scmp.lt.u32.totalorder %s8776_s28, %s9492_s17 }
  0x5a   :  { %p8782_p10 = pnand %p8780_p9, %p8777_p8 }
  0x5c   :  { %8785 = shalt.err (!%p8782_p10)
}
  0x5d   :  { %s8786_s1 = scalar_lea.vmem %s127_s22, 3072  ;;  %p8791_p12 = scmp.lt.s32.totalorder %s127_s22, %s127_s22 }
  0x5e   :  { %p8787_p11 = scmp.ne.s32.totalorder %s127_s22, %s8786_s1  ;;  %p8792_p13 = scmp.lt.s32.totalorder %s8786_s1, %s8786_s1 }
  0x60   :  { %p8793_p0 = por %p8792_p13, %p8791_p12 }
  0x62   :  { %p8794_p1 = pnand %p8793_p0, %p8787_p11 }
  0x64   :  { %8797 = shalt.err (!%p8794_p1)
}
  0x65   :  { %132 = dma.hbm_to_vmem [thread:$0]  %s9492_s17, 3072, %s127_s22, [#allocation27], %s9434_s15, %s9434_s15, %s9435_s16  }
  0x66   :  { %s8798_s9 = scalar_lea.hbm %s9502_s25, 1536 }
  0x67   :  { %p8799_p2 = scmp.ne.s32.totalorder %s9502_s25, %s8798_s9  ;;  %p8802_p3 = scmp.lt.u32.totalorder %s8798_s9, %s9502_s25 }
  0x69   :  { %p8804_p4 = pnand %p8802_p3, %p8799_p2 }
  0x6b   :  { %8807 = shalt.err (!%p8804_p4)
}
  0x6c   :  { %s8808_s2 = scalar_lea.vmem %s149_s26, 1536  ;;  %p8813_p6 = scmp.lt.s32.totalorder %s149_s26, %s149_s26 }
  0x6d   :  { %p8809_p5 = scmp.ne.s32.totalorder %s149_s26, %s8808_s2  ;;  %p8814_p7 = scmp.lt.s32.totalorder %s8808_s2, %s8808_s2 }
  0x6f   :  { %p8815_p8 = por %p8814_p7, %p8813_p6 }
  0x71   :  { %p8816_p9 = pnand %p8815_p8, %p8809_p5 }
  0x73   :  { %8819 = shalt.err (!%p8816_p9)
}
  0x74   :  { %154 = dma.hbm_to_vmem [thread:$0]  %s9502_s25, 1536, %s149_s26, [#allocation30], %s9434_s15, %s9434_s15, %s9435_s16  }
  0x75   :  { %s9438_s17 = smov [#allocation32]   ;;  %s9439_s7 = smov [#allocation35]  }
  0x76   :  { %s170_s0 = sshll.u32 %s9438_s17, 4  ;;  %s192_s10 = sshll.u32 %s9439_s7, 4  ;;  %s171_s0 = int_to_ptr.vmem [resolvable:$true] %s170_s0  ;;  %s193_s10 = int_to_ptr.vmem [resolvable:$true] %s192_s10 }
  0x77   :  { %s8820_s11 = scalar_lea.hbm %s9512_s3, 3072 }
  0x78   :  { %p8821_p10 = scmp.ne.s32.totalorder %s9512_s3, %s8820_s11  ;;  %p8824_p11 = scmp.lt.u32.totalorder %s8820_s11, %s9512_s3 }
  0x7a   :  { %p8826_p12 = pnand %p8824_p11, %p8821_p10 }
  0x7c   :  { %8829 = shalt.err (!%p8826_p12)
}
  0x7d   :  { %s8830_s18 = scalar_lea.vmem %s171_s0, 3072  ;;  %p8835_p0 = scmp.lt.s32.totalorder %s171_s0, %s171_s0 }
  0x7e   :  { %p8831_p13 = scmp.ne.s32.totalorder %s171_s0, %s8830_s18  ;;  %p8836_p1 = scmp.lt.s32.totalorder %s8830_s18, %s8830_s18 }
  0x80   :  { %p8837_p2 = por %p8836_p1, %p8835_p0 }
  0x82   :  { %p8838_p3 = pnand %p8837_p2, %p8831_p13 }
  0x84   :  { %8841 = shalt.err (!%p8838_p3)
}
  0x85   :  { %176 = dma.hbm_to_vmem [thread:$0]  %s9512_s3, 3072, %s171_s0, [#allocation33], %s9434_s15, %s9434_s15, %s9435_s16  }
  0x86   :  { %s8842_s25 = scalar_lea.hbm %s9522_s14, 1536 }
  0x87   :  { %p8843_p4 = scmp.ne.s32.totalorder %s9522_s14, %s8842_s25  ;;  %p8846_p5 = scmp.lt.u32.totalorder %s8842_s25, %s9522_s14 }
  0x89   :  { %p8848_p6 = pnand %p8846_p5, %p8843_p4 }
  0x8b   :  { %8851 = shalt.err (!%p8848_p6)
}
  0x8c   :  { %s8852_s22 = scalar_lea.vmem %s193_s10, 1536  ;;  %p8857_p8 = scmp.lt.s32.totalorder %s193_s10, %s193_s10 }
  0x8d   :  { %p8853_p7 = scmp.ne.s32.totalorder %s193_s10, %s8852_s22  ;;  %p8858_p9 = scmp.lt.s32.totalorder %s8852_s22, %s8852_s22 }
  0x8f   :  { %p8859_p10 = por %p8858_p9, %p8857_p8 }
  0x91   :  { %p8860_p11 = pnand %p8859_p10, %p8853_p7 }
  0x93   :  { %8863 = shalt.err (!%p8860_p11)
}
  0x94   :  { %198 = dma.hbm_to_vmem [thread:$0]  %s9522_s14, 1536, %s193_s10, [#allocation36], %s9434_s15, %s9434_s15, %s9435_s16  }
  0x95   :  { %s9440_s3 = smov [#allocation38]   ;;  %s9441_s26 = smov [#allocation41]  }
  0x96   :  { %s214_s23 = sshll.u32 %s9440_s3, 4  ;;  %s239_s28 = sshll.u32 %s9441_s26, 4  ;;  %s215_s23 = int_to_ptr.vmem [resolvable:$true] %s214_s23  ;;  %s240_s28 = int_to_ptr.vmem [resolvable:$true] %s239_s28 }
  0x97   :  { %s8864_s1 = scalar_lea.hbm %s9532_s24, 3072 }
  0x98   :  { %p8865_p12 = scmp.ne.s32.totalorder %s9532_s24, %s8864_s1  ;;  %p8868_p13 = scmp.lt.u32.totalorder %s8864_s1, %s9532_s24 }
  0x9a   :  { %p8870_p0 = pnand %p8868_p13, %p8865_p12 }
  0x9c   :  { %8873 = shalt.err (!%p8870_p0)
}
  0x9d   :  { %s8874_s9 = scalar_lea.vmem %s215_s23, 3072  ;;  %p8879_p2 = scmp.lt.s32.totalorder %s215_s23, %s215_s23 }
  0x9e   :  { %p8875_p1 = scmp.ne.s32.totalorder %s215_s23, %s8874_s9  ;;  %p8880_p3 = scmp.lt.s32.totalorder %s8874_s9, %s8874_s9 }
  0xa0   :  { %p8881_p4 = por %p8880_p3, %p8879_p2 }
  0xa2   :  { %p8882_p5 = pnand %p8881_p4, %p8875_p1 }
  0xa4   :  { %8885 = shalt.err (!%p8882_p5)
}
  0xa5   :  { %220 = dma.hbm_to_vmem [thread:$0]  %s9532_s24, 3072, %s215_s23, [#allocation39], %s9434_s15, %s9434_s15, %s9435_s16  }
  0xa6   :  { %s8886_s14 = scalar_lea.hbm %s9547_s12, 16 }
  0xa7   :  { %p8887_p6 = scmp.ne.s32.totalorder %s9547_s12, %s8886_s14  ;;  %p8890_p7 = scmp.lt.u32.totalorder %s8886_s14, %s9547_s12 }
  0xa9   :  { %p8892_p8 = pnand %p8890_p7, %p8887_p6 }
  0xab   :  { %8895 = shalt.err (!%p8892_p8)
}
  0xac   :  { %s8896_s2 = scalar_lea.vmem %s240_s28, 16  ;;  %s8900_s17 = scalar_lea.vmem %s240_s28, 32 }
  0xad   :  { %p8897_p9 = scmp.ne.s32.totalorder %s240_s28, %s8896_s2  ;;  %p8901_p10 = scmp.lt.s32.totalorder %s240_s28, %s240_s28 }
  0xae   :  { %p8902_p11 = scmp.lt.s32.totalorder %s8900_s17, %s8896_s2 }
  0xb0   :  { %p8903_p12 = por %p8902_p11, %p8901_p10 }
  0xb2   :  { %p8904_p13 = pnand %p8903_p12, %p8897_p9 }
  0xb4   :  { %8907 = shalt.err (!%p8904_p13)
}
  0xb5   :  { %242 = dma.hbm_to_vmem [thread:$0]  %s9547_s12, 16, %s240_s28, [#allocation42]  }
  0xb6   :  { %s9442_s24 = smov [#allocation44]   ;;  %s9443_s7 = smov [#allocation47]  }
  0xb7   :  { %s261_s0 = sshll.u32 %s9442_s24, 4  ;;  %s285_s10 = sshll.u32 %s9443_s7, 4  ;;  %s262_s0 = int_to_ptr.vmem [resolvable:$true] %s261_s0  ;;  %s286_s10 = int_to_ptr.vmem [resolvable:$true] %s285_s10 }
  0xb8   :  { %s8908_s11 = scalar_lea.hbm %s9557_s27, 16 }
  0xb9   :  { %p8909_p0 = scmp.ne.s32.totalorder %s9557_s27, %s8908_s11  ;;  %p8912_p1 = scmp.lt.u32.totalorder %s8908_s11, %s9557_s27 }
  0xbb   :  { %p8914_p2 = pnand %p8912_p1, %p8909_p0 }
  0xbd   :  { %8917 = shalt.err (!%p8914_p2)
}
  0xbe   :  { %s8918_s18 = scalar_lea.vmem %s262_s0, 16  ;;  %s8922_s25 = scalar_lea.vmem %s262_s0, 32 }
  0xbf   :  { %p8919_p3 = scmp.ne.s32.totalorder %s262_s0, %s8918_s18  ;;  %p8923_p4 = scmp.lt.s32.totalorder %s262_s0, %s262_s0 }
  0xc0   :  { %p8924_p5 = scmp.lt.s32.totalorder %s8922_s25, %s8918_s18 }
  0xc2   :  { %p8925_p6 = por %p8924_p5, %p8923_p4 }
  0xc4   :  { %p8926_p7 = pnand %p8925_p6, %p8919_p3 }
  0xc6   :  { %8929 = shalt.err (!%p8926_p7)
}
  0xc7   :  { %264 = dma.hbm_to_vmem [thread:$0]  %s9557_s27, 16, %s262_s0, [#allocation45]  }
  0xc8   :  { %s8930_s12 = scalar_lea.hbm %s9577_s30, 16 }
  0xc9   :  { %p8931_p8 = scmp.ne.s32.totalorder %s9577_s30, %s8930_s12  ;;  %p8934_p9 = scmp.lt.u32.totalorder %s8930_s12, %s9577_s30 }
  0xcb   :  { %p8936_p10 = pnand %p8934_p9, %p8931_p8 }
  0xcd   :  { %8939 = shalt.err (!%p8936_p10)
}
  0xce   :  { %s8940_s22 = scalar_lea.vmem %s286_s10, 16  ;;  %s8944_s3 = scalar_lea.vmem %s286_s10, 32 }
  0xcf   :  { %p8941_p11 = scmp.ne.s32.totalorder %s286_s10, %s8940_s22  ;;  %p8945_p12 = scmp.lt.s32.totalorder %s286_s10, %s286_s10 }
  0xd0   :  { %p8946_p13 = scmp.lt.s32.totalorder %s8944_s3, %s8940_s22 }
  0xd2   :  { %p8947_p0 = por %p8946_p13, %p8945_p12 }
  0xd4   :  { %p8948_p1 = pnand %p8947_p0, %p8941_p11 }
  0xd6   :  { %8951 = shalt.err (!%p8948_p1)
}
  0xd7   :  { %288 = dma.hbm_to_vmem [thread:$0]  %s9577_s30, 16, %s286_s10, [#allocation48]  }
  0xd8   :  { %s9444_s27 = smov [#allocation50]   ;;  %s9445_s26 = smov [#allocation53]  }
  0xd9   :  { %s307_s23 = sshll.u32 %s9444_s27, 4  ;;  %s329_s28 = sshll.u32 %s9445_s26, 4  ;;  %s308_s23 = int_to_ptr.vmem [resolvable:$true] %s307_s23  ;;  %s330_s28 = int_to_ptr.vmem [resolvable:$true] %s329_s28 }
  0xda   :  { %s8952_s1 = scalar_lea.hbm %s9587_s6, 16 }
  0xdb   :  { %p8953_p2 = scmp.ne.s32.totalorder %s9587_s6, %s8952_s1  ;;  %p8956_p3 = scmp.lt.u32.totalorder %s8952_s1, %s9587_s6 }
  0xdd   :  { %p8958_p4 = pnand %p8956_p3, %p8953_p2 }
  0xdf   :  { %8961 = shalt.err (!%p8958_p4)
}
  0xe0   :  { %s8962_s9 = scalar_lea.vmem %s308_s23, 16  ;;  %s8966_s14 = scalar_lea.vmem %s308_s23, 32 }
  0xe1   :  { %p8963_p5 = scmp.ne.s32.totalorder %s308_s23, %s8962_s9  ;;  %p8967_p6 = scmp.lt.s32.totalorder %s308_s23, %s308_s23 }
  0xe2   :  { %p8968_p7 = scmp.lt.s32.totalorder %s8966_s14, %s8962_s9 }
  0xe4   :  { %p8969_p8 = por %p8968_p7, %p8967_p6 }
  0xe6   :  { %p8970_p9 = pnand %p8969_p8, %p8963_p5 }
  0xe8   :  { %8973 = shalt.err (!%p8970_p9)
}
  0xe9   :  { %310 = dma.hbm_to_vmem [thread:$0]  %s9587_s6, 16, %s308_s23, [#allocation51]  }
  0xea   :  { %s8974_s30 = scalar_lea.hbm %s9597_s19, 16 }
  0xeb   :  { %p8975_p10 = scmp.ne.s32.totalorder %s9597_s19, %s8974_s30  ;;  %p8978_p11 = scmp.lt.u32.totalorder %s8974_s30, %s9597_s19 }
  0xed   :  { %p8980_p12 = pnand %p8978_p11, %p8975_p10 }
  0xef   :  { %8983 = shalt.err (!%p8980_p12)
}
  0xf0   :  { %s8984_s2 = scalar_lea.vmem %s330_s28, 16  ;;  %s8988_s17 = scalar_lea.vmem %s330_s28, 32 }
  0xf1   :  { %p8985_p13 = scmp.ne.s32.totalorder %s330_s28, %s8984_s2  ;;  %p8989_p0 = scmp.lt.s32.totalorder %s330_s28, %s330_s28 }
  0xf2   :  { %p8990_p1 = scmp.lt.s32.totalorder %s8988_s17, %s8984_s2 }
  0xf4   :  { %p8991_p2 = por %p8990_p1, %p8989_p0 }
  0xf6   :  { %p8992_p3 = pnand %p8991_p2, %p8985_p13 }
  0xf8   :  { %8995 = shalt.err (!%p8992_p3)
}
  0xf9   :  { %332 = dma.hbm_to_vmem [thread:$0]  %s9597_s19, 16, %s330_s28, [#allocation54]  }
  0xfa   :  { %s9446_s6 = smov [#allocation56]   ;;  %s9447_s0 = smov [#allocation59]  }
  0xfb   :  { %s351_s24 = sshll.u32 %s9446_s6, 4  ;;  %s375_s7 = sshll.u32 %s9447_s0, 4  ;;  %s352_s24 = int_to_ptr.vmem [resolvable:$true] %s351_s24  ;;  %s376_s7 = int_to_ptr.vmem [resolvable:$true] %s375_s7 }
  0xfc   :  { %s8996_s10 = scalar_lea.hbm %s9607_s8, 16 }
  0xfd   :  { %p8997_p4 = scmp.ne.s32.totalorder %s9607_s8, %s8996_s10  ;;  %p9000_p5 = scmp.lt.u32.totalorder %s8996_s10, %s9607_s8 }
  0xff   :  { %p9002_p6 = pnand %p9000_p5, %p8997_p4 }
 0x101   :  { %9005 = shalt.err (!%p9002_p6)
}
 0x102   :  { %s9006_s11 = scalar_lea.vmem %s352_s24, 16  ;;  %s9010_s18 = scalar_lea.vmem %s352_s24, 32 }
 0x103   :  { %p9007_p7 = scmp.ne.s32.totalorder %s352_s24, %s9006_s11  ;;  %p9011_p8 = scmp.lt.s32.totalorder %s352_s24, %s352_s24 }
 0x104   :  { %p9012_p9 = scmp.lt.s32.totalorder %s9010_s18, %s9006_s11 }
 0x106   :  { %p9013_p10 = por %p9012_p9, %p9011_p8 }
 0x108   :  { %p9014_p11 = pnand %p9013_p10, %p9007_p7 }
 0x10a   :  { %9017 = shalt.err (!%p9014_p11)
}
 0x10b   :  { %354 = dma.hbm_to_vmem [thread:$0]  %s9607_s8, 16, %s352_s24, [#allocation57]  }
 0x10c   :  { %s9018_s19 = scalar_lea.hbm %s9627_s21, 32 }
 0x10d   :  { %p9019_p12 = scmp.ne.s32.totalorder %s9627_s21, %s9018_s19  ;;  %p9022_p13 = scmp.lt.u32.totalorder %s9018_s19, %s9627_s21 }
 0x10f   :  { %p9024_p0 = pnand %p9022_p13, %p9019_p12 }
 0x111   :  { %9027 = shalt.err (!%p9024_p0)
}
 0x112   :  { %s9028_s25 = scalar_lea.vmem %s376_s7, 32  ;;  %p9033_p2 = scmp.lt.s32.totalorder %s376_s7, %s376_s7 }
 0x113   :  { %p9029_p1 = scmp.ne.s32.totalorder %s376_s7, %s9028_s25  ;;  %p9034_p3 = scmp.lt.s32.totalorder %s9028_s25, %s9028_s25 }
 0x115   :  { %p9035_p4 = por %p9034_p3, %p9033_p2 }
 0x117   :  { %p9036_p5 = pnand %p9035_p4, %p9029_p1 }
 0x119   :  { %9039 = shalt.err (!%p9036_p5)
}
 0x11a   :  { %378 = dma.hbm_to_vmem [thread:$0]  %s9627_s21, 32, %s376_s7, [#allocation60]  }
 0x11b   :  { %s9448_s12 = smov [#allocation20]   ;;  %s9040_s22 = scalar_lea.hbm %s9477_s5, 1024 }
 0x11c   :  { %s92_s8 = sshll.u32 %s9448_s12, 4  ;;  %p9041_p6 = scmp.ne.s32.totalorder %s9477_s5, %s9040_s22  ;;  %s93_s8 = int_to_ptr.vmem [resolvable:$true] %s92_s8 }
 0x11d   :  { %p9044_p7 = scmp.lt.u32.totalorder %s9040_s22, %s9477_s5 }
 0x11f   :  { %p9046_p8 = pnand %p9044_p7, %p9041_p6 }
 0x121   :  { %9049 = shalt.err (!%p9046_p8)
}
 0x122   :  { %s9050_s3 = scalar_lea.vmem %s93_s8, 1024  ;;  %p9055_p10 = scmp.lt.s32.totalorder %s93_s8, %s93_s8 }
 0x123   :  { %p9051_p9 = scmp.ne.s32.totalorder %s93_s8, %s9050_s3  ;;  %p9056_p11 = scmp.lt.s32.totalorder %s9050_s3, %s9050_s3 }
 0x125   :  { %p9057_p12 = por %p9056_p11, %p9055_p10 }
 0x127   :  { %p9058_p13 = pnand %p9057_p12, %p9051_p9 }
 0x129   :  { %9061 = shalt.err (!%p9058_p13)
}
 0x12a   :  { %s9449_s27 = smov 128   ;;  %s9450_s21 = smov 8  }
 0x12b   :  { %98 = dma.hbm_to_vmem [thread:$0]  %s9477_s5, 1024, %s93_s8, [#allocation21], %s9449_s27, %s9449_s27, %s9450_s21  }
 0x12c   :  { %s9451_s23 = smov [#allocation25]   ;;  %s9452_s28 = smov [#allocation28]  }
 0x12d   :  { %s117_s26 = sshll.u32 %s9451_s23, 4  ;;  %s139_s1 = sshll.u32 %s9452_s28, 4  ;;  %s118_s26 = int_to_ptr.vmem [resolvable:$true] %s117_s26  ;;  %s140_s1 = int_to_ptr.vmem [resolvable:$true] %s139_s1 }
 0x12e   :  { %s9062_s9 = scalar_lea.hbm %s9487_s13, 16 }
 0x12f   :  { %p9063_p0 = scmp.ne.s32.totalorder %s9487_s13, %s9062_s9  ;;  %p9066_p1 = scmp.lt.u32.totalorder %s9062_s9, %s9487_s13 }
 0x131   :  { %p9068_p2 = pnand %p9066_p1, %p9063_p0 }
 0x133   :  { %9071 = shalt.err (!%p9068_p2)
}
 0x134   :  { %s9072_s14 = scalar_lea.vmem %s118_s26, 16  ;;  %s9076_s30 = scalar_lea.vmem %s118_s26, 32 }
 0x135   :  { %p9073_p3 = scmp.ne.s32.totalorder %s118_s26, %s9072_s14  ;;  %p9077_p4 = scmp.lt.s32.totalorder %s118_s26, %s118_s26 }
 0x136   :  { %p9078_p5 = scmp.lt.s32.totalorder %s9076_s30, %s9072_s14 }
 0x138   :  { %p9079_p6 = por %p9078_p5, %p9077_p4 }
 0x13a   :  { %p9080_p7 = pnand %p9079_p6, %p9073_p3 }
 0x13c   :  { %9083 = shalt.err (!%p9080_p7)
}
 0x13d   :  { %s10833_s5 = sld [smem:[#allocation78_spill]] }
 0x13e   :  { %120 = dma.hbm_to_vmem [thread:$0]  %s9487_s13, 16, %s118_s26, [#allocation24]  }
 0x143   :  { %s9084_s2 = scalar_lea.hbm %s10833_s5, 16 }
 0x144   :  { %p9085_p8 = scmp.ne.s32.totalorder %s10833_s5, %s9084_s2  ;;  %p9088_p9 = scmp.lt.u32.totalorder %s9084_s2, %s10833_s5 }
 0x146   :  { %p9090_p10 = pnand %p9088_p9, %p9085_p8 }
 0x148   :  { %9093 = shalt.err (!%p9090_p10)
}
 0x149   :  { %s9094_s17 = scalar_lea.vmem %s140_s1, 16  ;;  %s9098_s6 = scalar_lea.vmem %s140_s1, 32 }
 0x14a   :  { %p9095_p11 = scmp.ne.s32.totalorder %s140_s1, %s9094_s17  ;;  %p9099_p12 = scmp.lt.s32.totalorder %s140_s1, %s140_s1 }
 0x14b   :  { %p9100_p13 = scmp.lt.s32.totalorder %s9098_s6, %s9094_s17 }
 0x14d   :  { %p9101_p0 = por %p9100_p13, %p9099_p12 }
 0x14f   :  { %p9102_p1 = pnand %p9101_p0, %p9095_p11 }
 0x151   :  { %9105 = shalt.err (!%p9102_p1)
}
 0x152   :  { %s10834_s24 = sld [smem:[#allocation79_spill]]  ;;  %s9453_s0 = smov [#allocation31]  }
 0x153   :  { %142 = dma.hbm_to_vmem [thread:$0]  %s10833_s5, 16, %s140_s1, [#allocation27]  }
 0x154   :  { %s161_s13 = sshll.u32 %s9453_s0, 4  ;;  %s9454_s7 = smov [#allocation34]   ;;  %s162_s13 = int_to_ptr.vmem [resolvable:$true] %s161_s13 }
 0x155   :  { %s183_s10 = sshll.u32 %s9454_s7, 4  ;;  %s184_s10 = int_to_ptr.vmem [resolvable:$true] %s183_s10 }
 0x158   :  { %s9106_s11 = scalar_lea.hbm %s10834_s24, 16 }
 0x159   :  { %p9107_p2 = scmp.ne.s32.totalorder %s10834_s24, %s9106_s11  ;;  %p9110_p3 = scmp.lt.u32.totalorder %s9106_s11, %s10834_s24 }
 0x15b   :  { %p9112_p4 = pnand %p9110_p3, %p9107_p2 }
 0x15d   :  { %9115 = shalt.err (!%p9112_p4)
}
 0x15e   :  { %s9116_s18 = scalar_lea.vmem %s162_s13, 16  ;;  %s9120_s19 = scalar_lea.vmem %s162_s13, 32 }
 0x15f   :  { %p9117_p5 = scmp.ne.s32.totalorder %s162_s13, %s9116_s18  ;;  %p9121_p6 = scmp.lt.s32.totalorder %s162_s13, %s162_s13 }
 0x160   :  { %p9122_p7 = scmp.lt.s32.totalorder %s9120_s19, %s9116_s18 }
 0x162   :  { %p9123_p8 = por %p9122_p7, %p9121_p6 }
 0x164   :  { %p9124_p9 = pnand %p9123_p8, %p9117_p5 }
 0x166   :  { %9127 = shalt.err (!%p9124_p9)
}
 0x167   :  { %s10835_s25 = sld [smem:[#allocation80_spill]] }
 0x168   :  { %164 = dma.hbm_to_vmem [thread:$0]  %s10834_s24, 16, %s162_s13, [#allocation30]  }
 0x16d   :  { %s9128_s12 = scalar_lea.hbm %s10835_s25, 16 }
 0x16e   :  { %p9129_p10 = scmp.ne.s32.totalorder %s10835_s25, %s9128_s12  ;;  %p9132_p11 = scmp.lt.u32.totalorder %s9128_s12, %s10835_s25 }
 0x170   :  { %p9134_p12 = pnand %p9132_p11, %p9129_p10 }
 0x172   :  { %9137 = shalt.err (!%p9134_p12)
}
 0x173   :  { %s9138_s8 = scalar_lea.vmem %s184_s10, 16  ;;  %s9142_s22 = scalar_lea.vmem %s184_s10, 32 }
 0x174   :  { %p9139_p13 = scmp.ne.s32.totalorder %s184_s10, %s9138_s8  ;;  %p9143_p0 = scmp.lt.s32.totalorder %s184_s10, %s184_s10 }
 0x175   :  { %p9144_p1 = scmp.lt.s32.totalorder %s9142_s22, %s9138_s8 }
 0x177   :  { %p9145_p2 = por %p9144_p1, %p9143_p0 }
 0x179   :  { %p9146_p3 = pnand %p9145_p2, %p9139_p13 }
 0x17b   :  { %9149 = shalt.err (!%p9146_p3)
}
 0x17c   :  { %s10836_s3 = sld [smem:[#allocation81_spill]]  ;;  %s9455_s27 = smov [#allocation37]  }
 0x17d   :  { %186 = dma.hbm_to_vmem [thread:$0]  %s10835_s25, 16, %s184_s10, [#allocation33]  }
 0x17e   :  { %s205_s21 = sshll.u32 %s9455_s27, 4  ;;  %s9456_s23 = smov [#allocation40]   ;;  %s206_s21 = int_to_ptr.vmem [resolvable:$true] %s205_s21 }
 0x17f   :  { %s227_s26 = sshll.u32 %s9456_s23, 4  ;;  %s228_s26 = int_to_ptr.vmem [resolvable:$true] %s227_s26 }
 0x182   :  { %s9150_s28 = scalar_lea.hbm %s10836_s3, 16 }
 0x183   :  { %p9151_p4 = scmp.ne.s32.totalorder %s10836_s3, %s9150_s28  ;;  %p9154_p5 = scmp.lt.u32.totalorder %s9150_s28, %s10836_s3 }
 0x185   :  { %p9156_p6 = pnand %p9154_p5, %p9151_p4 }
 0x187   :  { %9159 = shalt.err (!%p9156_p6)
}
 0x188   :  { %s9160_s1 = scalar_lea.vmem %s206_s21, 16  ;;  %s9164_s9 = scalar_lea.vmem %s206_s21, 32 }
 0x189   :  { %p9161_p7 = scmp.ne.s32.totalorder %s206_s21, %s9160_s1  ;;  %p9165_p8 = scmp.lt.s32.totalorder %s206_s21, %s206_s21 }
 0x18a   :  { %p9166_p9 = scmp.lt.s32.totalorder %s9164_s9, %s9160_s1 }
 0x18c   :  { %p9167_p10 = por %p9166_p9, %p9165_p8 }
 0x18e   :  { %p9168_p11 = pnand %p9167_p10, %p9161_p7 }
 0x190   :  { %9171 = shalt.err (!%p9168_p11)
}
 0x191   :  { %s10837_s14 = sld [smem:[#allocation82_spill]] }
 0x192   :  { %208 = dma.hbm_to_vmem [thread:$0]  %s10836_s3, 16, %s206_s21, [#allocation36]  }
 0x197   :  { %s9172_s30 = scalar_lea.hbm %s10837_s14, 16 }
 0x198   :  { %p9173_p12 = scmp.ne.s32.totalorder %s10837_s14, %s9172_s30  ;;  %p9176_p13 = scmp.lt.u32.totalorder %s9172_s30, %s10837_s14 }
 0x19a   :  { %p9178_p0 = pnand %p9176_p13, %p9173_p12 }
 0x19c   :  { %9181 = shalt.err (!%p9178_p0)
}
 0x19d   :  { %s9182_s5 = scalar_lea.vmem %s228_s26, 16  ;;  %s9186_s2 = scalar_lea.vmem %s228_s26, 32 }
 0x19e   :  { %p9183_p1 = scmp.ne.s32.totalorder %s228_s26, %s9182_s5  ;;  %p9187_p2 = scmp.lt.s32.totalorder %s228_s26, %s228_s26 }
 0x19f   :  { %p9188_p3 = scmp.lt.s32.totalorder %s9186_s2, %s9182_s5 }
 0x1a1   :  { %p9189_p4 = por %p9188_p3, %p9187_p2 }
 0x1a3   :  { %p9190_p5 = pnand %p9189_p4, %p9183_p1 }
 0x1a5   :  { %9193 = shalt.err (!%p9190_p5)
}
 0x1a6   :  { %s10838_s17 = sld [smem:[#allocation84_spill]]  ;;  %s9457_s6 = smov [#allocation43]  }
 0x1a7   :  { %230 = dma.hbm_to_vmem [thread:$0]  %s10837_s14, 16, %s228_s26, [#allocation39]  }
 0x1a8   :  { %s248_s24 = sshll.u32 %s9457_s6, 4  ;;  %s9458_s0 = smov [#allocation46]   ;;  %s249_s24 = int_to_ptr.vmem [resolvable:$true] %s248_s24 }
 0x1a9   :  { %s273_s13 = sshll.u32 %s9458_s0, 4  ;;  %s274_s13 = int_to_ptr.vmem [resolvable:$true] %s273_s13 }
 0x1ac   :  { %s9194_s7 = scalar_lea.hbm %s10838_s17, 1536 }
 0x1ad   :  { %p9195_p6 = scmp.ne.s32.totalorder %s10838_s17, %s9194_s7  ;;  %p9198_p7 = scmp.lt.u32.totalorder %s9194_s7, %s10838_s17 }
 0x1af   :  { %p9200_p8 = pnand %p9198_p7, %p9195_p6 }
 0x1b1   :  { %9203 = shalt.err (!%p9200_p8)
}
 0x1b2   :  { %s9204_s10 = scalar_lea.vmem %s249_s24, 1536  ;;  %p9209_p10 = scmp.lt.s32.totalorder %s249_s24, %s249_s24 }
 0x1b3   :  { %p9205_p9 = scmp.ne.s32.totalorder %s249_s24, %s9204_s10  ;;  %p9210_p11 = scmp.lt.s32.totalorder %s9204_s10, %s9204_s10 }
 0x1b5   :  { %p9211_p12 = por %p9210_p11, %p9209_p10 }
 0x1b7   :  { %p9212_p13 = pnand %p9211_p12, %p9205_p9 }
 0x1b9   :  { %9215 = shalt.err (!%p9212_p13)
}
 0x1ba   :  { %s10839_s11 = sld [smem:[#allocation86_spill]] }
 0x1bb   :  { %254 = dma.hbm_to_vmem [thread:$0]  %s10838_s17, 1536, %s249_s24, [#allocation42], %s9434_s15, %s9434_s15, %s9435_s16  }
 0x1c0   :  { %s9216_s18 = scalar_lea.hbm %s10839_s11, 16 }
 0x1c1   :  { %p9217_p0 = scmp.ne.s32.totalorder %s10839_s11, %s9216_s18  ;;  %p9220_p1 = scmp.lt.u32.totalorder %s9216_s18, %s10839_s11 }
 0x1c3   :  { %p9222_p2 = pnand %p9220_p1, %p9217_p0 }
 0x1c5   :  { %9225 = shalt.err (!%p9222_p2)
}
 0x1c6   :  { %s9226_s19 = scalar_lea.vmem %s274_s13, 16  ;;  %s9230_s25 = scalar_lea.vmem %s274_s13, 32 }
 0x1c7   :  { %p9227_p3 = scmp.ne.s32.totalorder %s274_s13, %s9226_s19  ;;  %p9231_p4 = scmp.lt.s32.totalorder %s274_s13, %s274_s13 }
 0x1c8   :  { %p9232_p5 = scmp.lt.s32.totalorder %s9230_s25, %s9226_s19 }
 0x1ca   :  { %p9233_p6 = por %p9232_p5, %p9231_p4 }
 0x1cc   :  { %p9234_p7 = pnand %p9233_p6, %p9227_p3 }
 0x1ce   :  { %9237 = shalt.err (!%p9234_p7)
}
 0x1cf   :  { %s10840_s12 = sld [smem:[#allocation88_spill]]  ;;  %s9459_s8 = smov [#allocation49]  }
 0x1d0   :  { %276 = dma.hbm_to_vmem [thread:$0]  %s10839_s11, 16, %s274_s13, [#allocation45]  }
 0x1d1   :  { %s294_s22 = sshll.u32 %s9459_s8, 4  ;;  %s9460_s3 = smov [#allocation52]   ;;  %s295_s22 = int_to_ptr.vmem [resolvable:$true] %s294_s22 }
 0x1d2   :  { %s316_s27 = sshll.u32 %s9460_s3, 4  ;;  %s9753_s27 = int_to_ptr.vmem [resolvable:$true] %s316_s27 }
 0x1d5   :  { %s9238_s21 = scalar_lea.hbm %s10840_s12, 1536 }
 0x1d6   :  { %p9239_p8 = scmp.ne.s32.totalorder %s10840_s12, %s9238_s21  ;;  %p9242_p9 = scmp.lt.u32.totalorder %s9238_s21, %s10840_s12 }
 0x1d8   :  { %p9244_p10 = pnand %p9242_p9, %p9239_p8 }
 0x1da   :  { %9247 = shalt.err (!%p9244_p10)
}
 0x1db   :  { %s9248_s23 = scalar_lea.vmem %s295_s22, 1536  ;;  %p9253_p12 = scmp.lt.s32.totalorder %s295_s22, %s295_s22 }
 0x1dc   :  { %p9249_p11 = scmp.ne.s32.totalorder %s295_s22, %s9248_s23  ;;  %p9254_p13 = scmp.lt.s32.totalorder %s9248_s23, %s9248_s23 }
 0x1de   :  { %p9255_p0 = por %p9254_p13, %p9253_p12 }
 0x1e0   :  { %p9256_p1 = pnand %p9255_p0, %p9249_p11 }
 0x1e2   :  { %9259 = shalt.err (!%p9256_p1)
}
 0x1e3   :  { %s10841_s26 = sld [smem:[#allocation89_spill]] }
 0x1e4   :  { %300 = dma.hbm_to_vmem [thread:$0]  %s10840_s12, 1536, %s295_s22, [#allocation48], %s9434_s15, %s9434_s15, %s9435_s16  }
 0x1e9   :  { %s9260_s28 = scalar_lea.hbm %s10841_s26, 1536 }
 0x1ea   :  { %p9261_p2 = scmp.ne.s32.totalorder %s10841_s26, %s9260_s28  ;;  %p9264_p3 = scmp.lt.u32.totalorder %s9260_s28, %s10841_s26 }
 0x1ec   :  { %p9266_p4 = pnand %p9264_p3, %p9261_p2 }
 0x1ee   :  { %9269 = shalt.err (!%p9266_p4)
}
 0x1ef   :  { %s9270_s1 = scalar_lea.vmem %s9753_s27, 1536  ;;  %p9275_p6 = scmp.lt.s32.totalorder %s9753_s27, %s9753_s27 }
 0x1f0   :  { %p9271_p5 = scmp.ne.s32.totalorder %s9753_s27, %s9270_s1  ;;  %p9276_p7 = scmp.lt.s32.totalorder %s9270_s1, %s9270_s1 }
 0x1f2   :  { %p9277_p8 = por %p9276_p7, %p9275_p6 }
 0x1f4   :  { %p9278_p9 = pnand %p9277_p8, %p9271_p5 }
 0x1f6   :  { %9281 = shalt.err (!%p9278_p9)
}
 0x1f7   :  { %s10842_s9 = sld [smem:[#allocation90_spill]]  ;;  %s9461_s14 = smov [#allocation55]  }
 0x1f8   :  { %322 = dma.hbm_to_vmem [thread:$0]  %s10841_s26, 1536, %s9753_s27, [#allocation51], %s9434_s15, %s9434_s15, %s9435_s16  }
 0x1f9   :  { %s338_s30 = sshll.u32 %s9461_s14, 4  ;;  %s9462_s5 = smov [#allocation58]   ;;  %s339_s30 = int_to_ptr.vmem [resolvable:$true] %s338_s30 }
 0x1fa   :  { %s363_s2 = sshll.u32 %s9462_s5, 4  ;;  %s364_s2 = int_to_ptr.vmem [resolvable:$true] %s363_s2 }
 0x1fd   :  { %s9282_s17 = scalar_lea.hbm %s10842_s9, 1536 }
 0x1fe   :  { %p9283_p10 = scmp.ne.s32.totalorder %s10842_s9, %s9282_s17  ;;  %p9286_p11 = scmp.lt.u32.totalorder %s9282_s17, %s10842_s9 }
 0x200   :  { %p9288_p12 = pnand %p9286_p11, %p9283_p10 }
 0x202   :  { %9291 = shalt.err (!%p9288_p12)
}
 0x203   :  { %s9292_s6 = scalar_lea.vmem %s339_s30, 1536  ;;  %p9297_p0 = scmp.lt.s32.totalorder %s339_s30, %s339_s30 }
 0x204   :  { %p9293_p13 = scmp.ne.s32.totalorder %s339_s30, %s9292_s6  ;;  %p9298_p1 = scmp.lt.s32.totalorder %s9292_s6, %s9292_s6 }
 0x206   :  { %p9299_p2 = por %p9298_p1, %p9297_p0 }
 0x208   :  { %p9300_p3 = pnand %p9299_p2, %p9293_p13 }
 0x20a   :  { %9303 = shalt.err (!%p9300_p3)
}
 0x20b   :  { %s10843_s24 = sld [smem:[#allocation92_spill]] }
 0x20c   :  { %344 = dma.hbm_to_vmem [thread:$0]  %s10842_s9, 1536, %s339_s30, [#allocation54], %s9434_s15, %s9434_s15, %s9435_s16  }
 0x211   :  { %s9304_s0 = scalar_lea.hbm %s10843_s24, 32 }
 0x212   :  { %p9305_p4 = scmp.ne.s32.totalorder %s10843_s24, %s9304_s0  ;;  %p9308_p5 = scmp.lt.u32.totalorder %s9304_s0, %s10843_s24 }
 0x214   :  { %p9310_p6 = pnand %p9308_p5, %p9305_p4 }
 0x216   :  { %9313 = shalt.err (!%p9310_p6)
}
 0x217   :  { %s9314_s13 = scalar_lea.vmem %s364_s2, 32  ;;  %p9319_p8 = scmp.lt.s32.totalorder %s364_s2, %s364_s2 }
 0x218   :  { %p9315_p7 = scmp.ne.s32.totalorder %s364_s2, %s9314_s13  ;;  %p9320_p9 = scmp.lt.s32.totalorder %s9314_s13, %s9314_s13 }
 0x21a   :  { %p9321_p10 = por %p9320_p9, %p9319_p8 }
 0x21c   :  { %p9322_p11 = pnand %p9321_p10, %p9315_p7 }
 0x21e   :  { %9325 = shalt.err (!%p9322_p11)
}
 0x21f   :  { %366 = dma.hbm_to_vmem [thread:$0]  %s10843_s24, 32, %s364_s2, [#allocation57]  }
 0x220   :  { %s9463_s7 = smov [#allocation61]   ;;  %s9326_s16 = scalar_lea.hbm %s9637_s29, 16 }
 0x221   :  { %s387_s10 = sshll.u32 %s9463_s7, 4  ;;  %p9327_p12 = scmp.ne.s32.totalorder %s9637_s29, %s9326_s16  ;;  %s388_s10 = int_to_ptr.vmem [resolvable:$true] %s387_s10 }
 0x222   :  { %p9330_p13 = scmp.lt.u32.totalorder %s9326_s16, %s9637_s29 }
 0x224   :  { %p9332_p0 = pnand %p9330_p13, %p9327_p12 }
 0x226   :  { %9335 = shalt.err (!%p9332_p0)
}
 0x227   :  { %s9336_s11 = scalar_lea.vmem %s388_s10, 16  ;;  %s9340_s18 = scalar_lea.vmem %s388_s10, 32 }
 0x228   :  { %p9337_p1 = scmp.ne.s32.totalorder %s388_s10, %s9336_s11  ;;  %p9341_p2 = scmp.lt.s32.totalorder %s388_s10, %s388_s10 }
 0x229   :  { %p9342_p3 = scmp.lt.s32.totalorder %s9340_s18, %s9336_s11 }
 0x22b   :  { %p9343_p4 = por %p9342_p3, %p9341_p2 }
 0x22d   :  { %p9344_p5 = pnand %p9343_p4, %p9337_p1 }
 0x22f   :  { %9347 = shalt.err (!%p9344_p5)
}
 0x230   :  { %390 = dma.hbm_to_vmem [thread:$0]  %s9637_s29, 16, %s388_s10, [#allocation60]  }
 0x231   :  { %9370 = dma.done.wait [#allocation21], 1024  }
 0x232   :  { %9371 = vsyncadd [#allocation21], 4294966272 }
 0x233   :  { %9372 = dma.done.wait [#allocation24], 784  }
 0x234   :  { %9373 = vsyncadd [#allocation24], 4294966512 }
 0x235   :  { %9374 = dma.done.wait [#allocation27], 3088  }
 0x236   :  { %9375 = vsyncadd [#allocation27], 4294964208 }
 0x237   :  { %9376 = dma.done.wait [#allocation30], 1552  }
 0x238   :  { %9377 = vsyncadd [#allocation30], 4294965744 }
 0x239   :  { %9378 = dma.done.wait [#allocation33], 3088  }
 0x23a   :  { %9379 = vsyncadd [#allocation33], 4294964208 }
 0x23b   :  { %9380 = dma.done.wait [#allocation36], 1552  }
 0x23c   :  { %9381 = vsyncadd [#allocation36], 4294965744 }
 0x23d   :  { %9382 = dma.done.wait [#allocation39], 3088  }
 0x23e   :  { %9383 = vsyncadd [#allocation39], 4294964208 }
 0x23f   :  { %9384 = dma.done.wait [#allocation42], 1552  }
 0x240   :  { %9385 = vsyncadd [#allocation42], 4294965744 }
 0x241   :  { %9386 = dma.done.wait [#allocation45], 32  }
 0x242   :  { %9387 = vsyncadd [#allocation45], 4294967264 }
 0x243   :  { %9388 = dma.done.wait [#allocation48], 1552  }
 0x244   :  { %9389 = vsyncadd [#allocation48], 4294965744 }
 0x245   :  { %9390 = dma.done.wait [#allocation51], 1552  }
 0x246   :  { %9391 = vsyncadd [#allocation51], 4294965744 }
 0x247   :  { %9392 = dma.done.wait [#allocation54], 1552  }
 0x248   :  { %9393 = vsyncadd [#allocation54], 4294965744 }
 0x249   :  { %9394 = dma.done.wait [#allocation57], 48  }
 0x24a   :  { %9395 = vsyncadd [#allocation57], 4294967248 }
 0x24b   :  { %9396 = dma.done.wait [#allocation60], 48  }
 0x24c   :  { %9397 = vsyncadd [#allocation60], 4294967248  ;;  %vm473_vm0 = vcmask 257024   ;;  %v9464_v0 = vmov 0.0   ;;  %v9465_v1 = vmov 0   ;;  %vm9466_vm1 = vmmov 0  }
 0x24d   :  { %7596 = vmatprep.subr.bf16.mxu0 %v9464_v0  ;;  %8340 = vmatprep.subr.bf16.mxu1 %v9464_v0  ;;  %474 = vst.msk [vmem:[#allocation2] sm:$0xf] %vm473_vm0, %v9465_v1  ;;  %475 = vst.msk [vmem:[#allocation2 + $0x4] sm:$0xf] %vm473_vm0, %v9465_v1  ;;  %vm482_vm2 = vcmask 256000   ;;  %v8413_v2 = vld [vmem:[#allocation23 + $0x10] sm:$0xff]  }
 0x24e   :  { %476 = vst.msk [vmem:[#allocation2 + $0x8] sm:$0xf] %vm473_vm0, %v9465_v1  ;;  %477 = vst.msk [vmem:[#allocation2 + $0xc] sm:$0xf] %vm473_vm0, %v9465_v1  ;;  %7600 = vmatprep.mubr.msk.bf16.mxu0 %vm9466_vm1, %v9464_v0  ;;  %7612 = vmatprep.mubr.msk.bf16.mxu1 %vm9466_vm1, %v9464_v0  ;;  %vm506_vm3 = vsmask.f32 256 }
 0x24f   :  { %478 = vst.msk [vmem:[#allocation2 + $0x10] sm:$0xf] %vm473_vm0, %v9465_v1  ;;  %479 = vst.msk [vmem:[#allocation2 + $0x14] sm:$0xf] %vm473_vm0, %v9465_v1  ;;  %v8414_v3 = vld [vmem:[#allocation23 + $0x18] sm:$0xff]   ;;  %7597 = vmatpush3.bf16.msra.mxu0 %v8413_v2  ;;  %8342 = vmatpush3.bf16.msra.mxu1 %v8413_v2  ;;  %v484_v4 = vld [vmem:[#allocation20] sm:$0xff] }
 0x250   :  { %480 = vst.msk [vmem:[#allocation2 + $0x18] sm:$0xf] %vm473_vm0, %v9465_v1  ;;  %481 = vst.msk [vmem:[#allocation2 + $0x1c] sm:$0xf] %vm473_vm0, %v9465_v1  ;;  %v485_v5 = vld [vmem:[#allocation20 + $0x8] sm:$0xff]  ;;  %v486_v6 = vld [vmem:[#allocation20 + $0x10] sm:$0xff]  ;;  %7598 = vmatprep.subr.bf16.mxu0 %v9464_v0  ;;  %8341 = vmatprep.subr.bf16.mxu1 %v9464_v0  ;;  %v7220_v8 = vpack.c.bf16 %v484_v4, %v484_v4 }
 0x251   :  { %1066 = vst [vmem:[#allocation3] sm:$0xf] %v9465_v1  ;;  %1067 = vst [vmem:[#allocation3 + $0x4] sm:$0xf] %v9465_v1  ;;  %vm507_vm4 = vsmask.f32 4368  ;;  %v7221_v9 = vpack.c.bf16 %v485_v5, %v485_v5  ;;  %v7222_v10 = vpack.c.bf16 %v486_v6, %v486_v6 }
 0x252   :  { %1068 = vst [vmem:[#allocation3 + $0x8] sm:$0xf] %v9465_v1  ;;  %1069 = vst [vmem:[#allocation3 + $0xc] sm:$0xf] %v9465_v1  ;;  %v487_v7 = vld [vmem:[#allocation20 + $0x18] sm:$0xff]  ;;  %v489_v12 = vld [vmem:[#allocation20 + $0x28] sm:$0xff] }
 0x253   :  { %1070 = vst [vmem:[#allocation3 + $0x10] sm:$0xf] %v9465_v1  ;;  %1071 = vst [vmem:[#allocation3 + $0x14] sm:$0xf] %v9465_v1  ;;  %vm550_vm5 = vsmask.f32 7938  ;;  %v7223_v11 = vpack.c.bf16 %v487_v7, %v487_v7  ;;  %7599 = vmatpush3.bf16.msra.mxu0 %v8414_v3  ;;  %8343 = vmatpush3.bf16.msra.mxu1 %v8414_v3  ;;  %v7225_v26 = vpack.c.bf16 %v489_v12, %v489_v12 }
 0x254   :  { %1072 = vst [vmem:[#allocation3 + $0x18] sm:$0xf] %v9465_v1  ;;  %1073 = vst [vmem:[#allocation3 + $0x1c] sm:$0xf] %v9465_v1  ;;  %vm10816_vm6 = vsmask.f32 1280  ;;  %7644 = vmatprep.subr.bf16.mxu0 %v9464_v0  ;;  %7620 = vmatprep.subr.bf16.mxu1 %v9464_v0 }
 0x255   :  { %1074 = vst [vmem:[#allocation3 + $0x20] sm:$0x7] %v9465_v1  ;;  %2287 = vst [vmem:[#allocation5] sm:$0xf] %v9465_v1  ;;  %vm574_vm7 = vsmask.f32 5392 }
 0x256   :  { %2288 = vst [vmem:[#allocation5 + $0x4] sm:$0xf] %v9465_v1  ;;  %2289 = vst [vmem:[#allocation5 + $0x8] sm:$0xf] %v9465_v1  ;;  %vm558_vm8 = vcmask 253952   ;;  %v510_v13 = vshrl.u32 %v7220_v8, 16 }
 0x257   :  { %2290 = vst [vmem:[#allocation5 + $0xc] sm:$0xf] %v9465_v1  ;;  %2291 = vst [vmem:[#allocation5 + $0x10] sm:$0x7] %v9465_v1  ;;  %v513_v14 = vshll.u32 %v7220_v8, 16  ;;  %v518_v15 = vshrl.u32 %v7221_v9, 16 }
 0x258   :  { %3214 = vst [vmem:[#allocation7] sm:$0xf] %v9465_v1  ;;  %3215 = vst [vmem:[#allocation7 + $0x4] sm:$0xf] %v9465_v1  ;;  %v521_v16 = vshll.u32 %v7221_v9, 16  ;;  %v490_v17 = vld [vmem:[#allocation20 + $0x30] sm:$0xff] }
 0x259   :  { %3216 = vst [vmem:[#allocation7 + $0x8] sm:$0x7] %v9465_v1  ;;  %3664 = vst [vmem:[#allocation8] sm:$0xf] %v9465_v1  ;;  %v491_v18 = vld [vmem:[#allocation20 + $0x38] sm:$0xff]  ;;  %vm629_vm9 = vcmask 254976   ;;  %v7226_v27 = vpack.c.bf16 %v490_v17, %v490_v17 }
 0x25a   :  { %3665 = vst [vmem:[#allocation8 + $0x4] sm:$0xf] %v9465_v1  ;;  %3666 = vst [vmem:[#allocation8 + $0x8] sm:$0x7] %v9465_v1  ;;  %v527_v19 = vshrl.u32 %v7222_v10, 16  ;;  %v530_v20 = vshll.u32 %v7222_v10, 16  ;;  %v7227_v32 = vpack.c.bf16 %v491_v18, %v491_v18 }
 0x25b   :  { %4448 = vst [vmem:[#allocation10] sm:$0xf] %v9465_v1  ;;  %4449 = vst [vmem:[#allocation10 + $0x4] sm:$0x7] %v9465_v1  ;;  %v536_v21 = vshrl.u32 %v7223_v11, 16  ;;  %v539_v22 = vshll.u32 %v7223_v11, 16 }
 0x25c   :  { %4854 = vst [vmem:[#allocation11] sm:$0xf] %v9465_v1  ;;  %4855 = vst [vmem:[#allocation11 + $0x4] sm:$0x7] %v9465_v1  ;;  %v512_v24 = vrot.slane %v510_v13, 7  ;;  %v520_v25 = vrot.slane %v518_v15, 7 }
 0x25d   :  { %483 = vst.msk [vmem:[#allocation2 + $0x20] sm:$0x7] %vm482_vm2, %v9465_v1  ;;  %vm9841_vm10 = vmor %vm506_vm3, %vm507_vm4  ;;  %vm620_vm11 = vcmask 257025   ;;  %v529_v28 = vrot.slane %v527_v19, 7  ;;  %v538_v29 = vrot.slane %v536_v21, 7  ;;  %v586_v40 = vshrl.u32 %v7225_v26, 16 }
 0x25e   :  { %vm9848_vm12 = vmand %vm473_vm0, %vm550_vm5  ;;  %v552_v31 = vld [vmem:[#allocation2] sm:$0xf]  ;;  %vm621_vm13 = vsmask.f32 7942  ;;  %v515_v33 = vor.u32 %v513_v14, %v512_v24  ;;  %v516_v34 = vrot.slane %v512_v24, 4  ;;  %v523_v35 = vor.u32 %v521_v16, %v520_v25  ;;  %v488_v41 = vld [vmem:[#allocation20 + $0x20] sm:$0xff] }
 0x25f   :  { %v525_v36 = vrot.slane %v520_v25, 4  ;;  %v532_v37 = vor.u32 %v530_v20, %v529_v28  ;;  %v534_v38 = vrot.slane %v529_v28, 4  ;;  %v541_v39 = vor.u32 %v539_v22, %v538_v29  ;;  %v560_v46 = vld [vmem:[#allocation2 + $0x10] sm:$0x1]  ;;  %vm559_vm14 = vmand %vm558_vm8, %vm506_vm3  ;;  %v623_v12 = vld [vmem:[#allocation2 + $0x10] sm:$0xe] }
 0x260   :  { %v524_v42 = vsel %vm9841_vm10, %v516_v34, %v523_v35  ;;  %v553_v43 = vsel %vm9848_vm12, %v515_v33, %v552_v31  ;;  %v589_v44 = vshll.u32 %v7225_v26, 16  ;;  %v596_v45 = vshrl.u32 %v7226_v27, 16  ;;  %vm9867_vm15 = vmor %vm10816_vm6, %vm574_vm7  ;;  %v8417_v31 = vld [vmem:[#allocation23 + $0x20] sm:$0xff]   ;;  %v8430_v11 = vld [vmem:[#allocation26 + $0x18] sm:$0xff]   ;;  %s10884_s29 = sld [smem:[#allocation83_spill]]  ;;  %s10888_s19 = sld [smem:[#allocation85_spill]] }
 0x261   :  { %v533_v47 = vsel %vm9841_vm10, %v525_v36, %v532_v37  ;;  %v542_v48 = vsel %vm9841_vm10, %v534_v38, %v541_v39  ;;  %554 = vst [vmem:[#allocation2] sm:$0xf] %v553_v43  ;;  %555 = vst.msk [vmem:[#allocation2 + $0x4] sm:$0xf] %vm473_vm0, %v524_v42  ;;  %v588_v49 = vrot.slane %v586_v40, 6  ;;  %v599_v50 = vshll.u32 %v7226_v27, 16 }
 0x262   :  { %556 = vst.msk [vmem:[#allocation2 + $0x8] sm:$0xf] %vm473_vm0, %v533_v47  ;;  %557 = vst.msk [vmem:[#allocation2 + $0xc] sm:$0xf] %vm473_vm0, %v542_v48  ;;  %v591_v51 = vrot.slane %v589_v44, 7  ;;  %v598_v52 = vrot.slane %v596_v45, 6  ;;  %v7224_v57 = vpack.c.bf16 %v488_v41, %v488_v41 }
 0x263   :  { %v606_v53 = vshrl.u32 %v7227_v32, 16  ;;  %v609_v54 = vshll.u32 %v7227_v32, 16  ;;  %v601_v55 = vrot.slane %v599_v50, 7  ;;  %v543_v56 = vrot.slane %v538_v29, 4  ;;  %vm9873_vm2 = vmand %vm629_vm9, %vm10816_vm6  ;;  %v8422_v41 = vld [vmem:[#allocation23 + $0x28] sm:$0xff]   ;;  %s10893_s25 = sld [smem:[#allocation87_spill]] }
 0x264   :  { %v592_v59 = vor.u32 %v591_v51, %v588_v49  ;;  %v631_v2 = vld [vmem:[#allocation2 + $0x20] sm:$0x3]  ;;  %v577_v4 = vshrl.u32 %v7224_v57, 16  ;;  %v580_v5 = vshll.u32 %v7224_v57, 16  ;;  %vm9879_vm4 = vmand %vm620_vm11, %vm621_vm13  ;;  %vm10815_vm7 = vsmask.f32 7424 }
 0x265   :  { %v608_v60 = vrot.slane %v606_v53, 6  ;;  %v611_v61 = vrot.slane %v609_v54, 7  ;;  %v602_v62 = vor.u32 %v601_v55, %v598_v52  ;;  %v561_v3 = vsel %vm559_vm14, %v543_v56, %v560_v46  ;;  %v8420_v46 = vld [vmem:[#allocation23] sm:$0xff]   ;;  %s10899_s12 = sld [smem:[#allocation93_spill]]  ;;  %s9467_s8 = smov 96  }
 0x266   :  { %v594_v6 = vrot.slane %v592_v59, 4  ;;  %562 = vst [vmem:[#allocation2 + $0x10] sm:$0x1] %v561_v3  ;;  %v579_v9 = vrot.slane %v577_v4, 6  ;;  %v582_v10 = vrot.slane %v580_v5, 7  ;;  %vm10812_vm8 = vcmask 261120  }
 0x267   :  { %v612_v7 = vor.u32 %v611_v61, %v608_v60  ;;  %v604_v8 = vrot.slane %v602_v62, 4  ;;  %vm1127_vm9 = vcmask 1043456   ;;  %vm1135_vm12 = vcmask 1040384  }
 0x268   :  { %v634_v13 = vld [vmem:[#allocation2] sm:$0xf]  ;;  %v635_v14 = vld [vmem:[#allocation2 + $0x4] sm:$0xf]  ;;  %v603_v15 = vsel %vm9867_vm15, %v594_v6, %v602_v62  ;;  %v583_v20 = vor.u32 %v582_v10, %v579_v9  ;;  %v8426_v10 = vld [vmem:[#allocation26 + $0x40] sm:$0xff]  }
 0x269   :  { %v614_v16 = vrot.slane %v612_v7, 4  ;;  %v9885_v17 = vcombine.low %v634_v13, %v635_v14  ;;  %v9887_v18 = vld [vmem:[#allocation2 + $0x8] sm:$0xff]   ;;  %v613_v19 = vsel %vm9867_vm15, %v604_v8, %v612_v7  ;;  %627 = vst.msk [vmem:[#allocation2 + $0x18] sm:$0xf] %vm473_vm0, %v603_v15  ;;  %v914_v28 = vld [vmem:[#allocation2] sm:$0xe]  ;;  %vm10002_vm11 = vmand %vm1127_vm9, %vm550_vm5 }
 0x26a   :  { %628 = vst.msk [vmem:[#allocation2 + $0x1c] sm:$0xf] %vm473_vm0, %v613_v19  ;;  %v685_v25 = vshll.u32 %v9887_v18, 16  ;;  %v584_v26 = vrot.slane %v583_v20, 4  ;;  %v624_v27 = vsel %vm9879_vm4, %v583_v20, %v623_v12  ;;  %v6720_v34 = vcombine.low %v914_v28, %v635_v14  ;;  %v8425_v7 = vld [vmem:[#allocation26] sm:$0xff]   ;;  %v8427_v8 = vld [vmem:[#allocation26 + $0x8] sm:$0xff]   ;;  %vm10016_vm14 = vmand %vm1135_vm12, %vm506_vm3 }
 0x26b   :  { %v632_v21 = vsel %vm9873_vm2, %v614_v16, %v631_v2  ;;  %v678_v22 = vshrl.u32 %v9885_v17, 16  ;;  %v680_v24 = vshll.u32 %v9885_v17, 16  ;;  %625 = vst [vmem:[#allocation2 + $0x10] sm:$0xe] %v624_v27  ;;  %v689_v37 = vshrl.u32 %v9887_v18, 16  ;;  %v8428_v9 = vld [vmem:[#allocation26 + $0x10] sm:$0xff]  }
 0x26c   :  { %633 = vst [vmem:[#allocation2 + $0x20] sm:$0x3] %v632_v21  ;;  %v687_v30 = vrot.slane %v685_v25, 1  ;;  %v593_v32 = vsel %vm9867_vm15, %v584_v26, %v592_v59  ;;  %v924_v43 = vrot.slane %v6720_v34, 1  ;;  %v925_v44 = vrot.slane %v9887_v18, 1  ;;  %v8423_v59 = vld [vmem:[#allocation23 + $0x8] sm:$0xff]  }
 0x26d   :  { %v682_v29 = vrot.slane %v680_v24, 1  ;;  %626 = vst.msk [vmem:[#allocation2 + $0x14] sm:$0xf] %vm473_vm0, %v593_v32  ;;  %vm10813_vm0 = vcmask 1046528   ;;  %v8429_v12 = vld [vmem:[#allocation26 + $0x48] sm:$0xff]   ;;  %v8432_v13 = vld [vmem:[#allocation26 + $0x20] sm:$0xff]  }
 0x26e   :  { %v691_v48 = vor.u32 %v689_v37, %v687_v30  ;;  %v926_v2 = vsel %vm10813_vm0, %v924_v43, %v925_v44  ;;  %v8431_v14 = vld [vmem:[#allocation26 + $0x50] sm:$0xff]   ;;  %v8434_v15 = vld [vmem:[#allocation26 + $0x28] sm:$0xff]   ;;  %v8433_v16 = vld [vmem:[#allocation26 + $0x58] sm:$0xff]   ;;  %vm1204_vm15 = vcmask 1043457   ;;  %vm1212_vm4 = vcmask 1041408  }
 0x26f   :  { %v683_v33 = vor.u32 %v682_v29, %v678_v22  ;;  %v8437_v19 = vld [vmem:[#allocation26 + $0x38] sm:$0xff]   ;;  %v8438_v20 = vld [vmem:[#allocation26 + $0x68] sm:$0xff]   ;;  %v8440_v21 = vld [vmem:[#allocation26 + $0x70] sm:$0xff]  }
 0x270   :  { %v8441_v22 = vld [vmem:[#allocation26 + $0x78] sm:$0xff]   ;;  %vm10033_vm2 = vmand %vm1204_vm15, %vm621_vm13  ;;  %vm1818_vm15 = vcmask 519168  }
 0x271   :  { %v688_v35 = vsel %vm10815_vm7, %v683_v33, %v687_v30  ;;  %v9904_v36 = vld [vmem:[#allocation2 + $0x18] sm:$0xff]   ;;  %vm10067_vm9 = vmand %vm1212_vm4, %vm10816_vm6  ;;  %1844 = vst.msk [vmem:[#allocation4] sm:$0xf] %vm1818_vm15, %v9465_v1  ;;  %vm1882_vm4 = vcmask 516096  }
 0x272   :  { %7601 = vmatmul.mubr.msk.bf16.vlgmr.msra.gmra.mrb[0].mxu0 %vm10812_vm8, %v688_v35  ;;  %v701_v39 = vshll.u32 %v9904_v36, 16  ;;  %v705_v40 = vshrl.u32 %v9904_v36, 16  ;;  %v929_v51 = vrot.slane %v9904_v36, 1  ;;  %1845 = vst.msk [vmem:[#allocation4 + $0x4] sm:$0xf] %vm1818_vm15, %v9465_v1 }
 0x273   :  { %v9908_v38 = vld [vmem:[#allocation2 + $0x20] ss:$0 sps:$4 sm:$0x77]   ;;  %7645 = vmatpush3.bf16.msra.mxu0 %v8417_v31  ;;  %7604 = vmatprep.mubr.msk.bf16.mxu0 %vm9466_vm1, %v9464_v0  ;;  %1846 = vst.msk [vmem:[#allocation4 + $0x8] sm:$0xf] %vm1818_vm15, %v9465_v1 }
 0x274   :  { %v709_v42 = vshll.u32 %v9908_v38, 16  ;;  %7646 = vmatprep.subr.bf16.mxu0 %v9464_v0  ;;  %v703_v45 = vrot.slane %v701_v39, 1  ;;  %v8421_v47 = vld [vmem:[#allocation2 + $0x10] sm:$0xff]   ;;  %v713_v50 = vshrl.u32 %v9908_v38, 16  ;;  %v931_v52 = vrot.slane %v9908_v38, 1 }
 0x275   :  { %v693_v54 = vshll.u32 %v8421_v47, 16  ;;  %v697_v55 = vshrl.u32 %v8421_v47, 16  ;;  %v927_v56 = vrot.slane %v8421_v47, 1  ;;  %v8424_v6 = vld [vmem:[#allocation2 + $0x20] ss:$0 sps:$4 sm:$0x33]  }
 0x276   :  { %v711_v49 = vrot.slane %v709_v42, 1  ;;  %v707_v53 = vor.u32 %v705_v40, %v703_v45  ;;  %v932_v5 = vsel %vm10813_vm0, %v929_v51, %v931_v52  ;;  %1847 = vst.msk [vmem:[#allocation4 + $0xc] sm:$0xf] %vm1818_vm15, %v9465_v1  ;;  %2861 = vst.msk [vmem:[#allocation6] sm:$0xf] %vm1818_vm15, %v9465_v1 }
 0x277   :  { %7647 = vmatpush3.bf16.msra.mxu0 %v8422_v41  ;;  %v695_v58 = vrot.slane %v693_v54, 1  ;;  %v928_v3 = vsel %vm10813_vm0, %v925_v44, %v927_v56  ;;  %v930_v4 = vsel %vm10813_vm0, %v927_v56, %v929_v51  ;;  %2862 = vst.msk [vmem:[#allocation6 + $0x4] sm:$0xf] %vm1818_vm15, %v9465_v1  ;;  %4141 = vst.msk [vmem:[#allocation9] sm:$0xf] %vm1818_vm15, %v9465_v1 }
 0x278   :  { %7704 = vmatprep.subr.bf16.mxu0 %v9464_v0  ;;  %v712_v57 = vsel %vm10815_vm7, %v707_v53, %v711_v49  ;;  %v715_v62 = vor.u32 %v713_v50, %v711_v49  ;;  %v9997_v49 = vld [vmem:[#allocation25] ss:$0 sm:$0xff]  ;;  %5272 = vst.msk [vmem:[#allocation12] sm:$0xf] %vm1818_vm15, %v9465_v1  ;;  %5556 = vst.msk [vmem:[#allocation13] sm:$0xf] %vm1818_vm15, %v9465_v1 }
 0x279   :  { %7613 = vmatmul.mubr.msk.bf16.vlgmr.msra.gmra.mrb[0].mxu1 %vm10812_vm8, %v712_v57  ;;  %v696_v60 = vsel %vm10815_vm7, %v691_v48, %v695_v58  ;;  %v699_v61 = vor.u32 %v697_v55, %v695_v58  ;;  %5832 = vst.msk [vmem:[#allocation14] sm:$0xf] %vm1818_vm15, %v9465_v1 }
 0x27a   :  { %7621 = vmatpush3.bf16.msra.mxu1 %v8420_v46  ;;  %7616 = vmatprep.mubr.msk.bf16.mxu1 %vm9466_vm1, %v9464_v0  ;;  %5274 = vst.msk [vmem:[#allocation12 + $0x4] sm:$0x1] %vm1882_vm4, %v9465_v1  ;;  %5557 = vst.msk [vmem:[#allocation13 + $0x4] sm:$0x1] %vm1882_vm4, %v9465_v1 }
 0x27b   :  { %7605 = vmatmul.mubr.msk.bf16.gmra.mrb[4].mxu0 %vm10812_vm8, %v696_v60  ;;  %7622 = vmatprep.subr.bf16.mxu1 %v9464_v0  ;;  %v704_v63 = vsel %vm10815_vm7, %v699_v61, %v703_v45  ;;  %5833 = vst.msk [vmem:[#allocation14 + $0x4] sm:$0x1] %vm1882_vm4, %v9465_v1 }
 0x27c   :  { %7608 = vmatprep.mubr.msk.bf16.mxu0 %vm9466_vm1, %v9464_v0 }
 0x27e   :  { %7623 = vmatpush3.bf16.msra.mxu1 %v8423_v59 }
 0x27f   :  { %7668 = vmatprep.subr.bf16.mxu1 %v9464_v0 }
 0x281   :  { %7617 = vmatmul.mubr.msk.bf16.gmra.mrb[4].mxu1 %vm10812_vm8, %v715_v62 }
 0x282   :  { %7624 = vmatprep.mubr.msk.bf16.mxu1 %vm9466_vm1, %v9464_v0 }
 0x283   :  { %7609 = vmatmul.mubr.msk.bf16.gmra.mrb[8].mxu0 %vm10812_vm8, %v704_v63 }
 0x284   :  { %7648 = vmatprep.mubr.msk.bf16.mxu0 %vm9466_vm1, %v9464_v0 }
 0x289   :  { %7625 = vmatmul.mubr.msk.bf16.vlgmr.msra.gmra.mrb[8].mxu1 %vm10812_vm8, %v9885_v17  ;;  %v8436_v17 = vld [vmem:[#allocation26 + $0x30] sm:$0xff]  }
 0x28a   :  { %7628 = vmatprep.mubr.msk.bf16.mxu1 %vm9466_vm1, %v9464_v0  ;;  %7669 = vmatpush3.bf16.msra.mxu1 %v8426_v10 }
 0x28b   :  { %7649 = vmatmul.mubr.msk.bf16.vlgmr.msra.gmra.mrb[12].mxu0 %vm10812_vm8, %v926_v2  ;;  %7670 = vmatprep.subr.bf16.mxu1 %v9464_v0 }
 0x28c   :  { %7652 = vmatprep.mubr.msk.bf16.mxu0 %vm9466_vm1, %v9464_v0  ;;  %7705 = vmatpush3.bf16.msra.mxu0 %v8425_v7 }
 0x28d   :  { %7706 = vmatprep.subr.bf16.mxu0 %v9464_v0 }
 0x28e   :  { %7671 = vmatpush3.bf16.msra.mxu1 %v8429_v12 }
 0x28f   :  { %7672 = vmatprep.subr.bf16.mxu1 %v9464_v0 }
 0x290   :  { %7707 = vmatpush3.bf16.msra.mxu0 %v8427_v8 }
 0x291   :  { %7629 = vmatmul.mubr.msk.bf16.gmra.mrb[12].mxu1 %vm10812_vm8, %v9887_v18  ;;  %7708 = vmatprep.subr.bf16.mxu0 %v9464_v0  ;;  %v8435_v18 = vld [vmem:[#allocation26 + $0x60] sm:$0xff]  }
 0x292   :  { %7632 = vmatprep.mubr.msk.bf16.mxu1 %vm9466_vm1, %v9464_v0  ;;  %7673 = vmatpush3.bf16.msra.mxu1 %v8431_v14 }
 0x293   :  { %7653 = vmatmul.mubr.msk.bf16.gmra.mrb[16].mxu0 %vm10812_vm8, %v928_v3  ;;  %7674 = vmatprep.subr.bf16.mxu1 %v9464_v0 }
 0x294   :  { %7656 = vmatprep.mubr.msk.bf16.mxu0 %vm9466_vm1, %v9464_v0  ;;  %7709 = vmatpush3.bf16.msra.mxu0 %v8428_v9 }
 0x295   :  { %7710 = vmatprep.subr.bf16.mxu0 %v9464_v0 }
 0x296   :  { %7675 = vmatpush3.bf16.msra.mxu1 %v8433_v16 }
 0x297   :  { %7676 = vmatprep.subr.bf16.mxu1 %v9464_v0 }
 0x298   :  { %7711 = vmatpush3.bf16.msra.mxu0 %v8430_v11 }
 0x299   :  { %7633 = vmatmul.mubr.msk.bf16.gmra.mrb[16].mxu1 %vm10812_vm8, %v8421_v47  ;;  %7712 = vmatprep.subr.bf16.mxu0 %v9464_v0 }
 0x29a   :  { %7636 = vmatprep.mubr.msk.bf16.mxu1 %vm9466_vm1, %v9464_v0  ;;  %7677 = vmatpush3.bf16.msra.mxu1 %v8435_v18  ;;  %v1129_v18 = vld [vmem:[#allocation3] sm:$0xf] }
 0x29b   :  { %7657 = vmatmul.mubr.msk.bf16.gmra.mrb[20].mxu0 %vm10812_vm8, %v930_v4  ;;  %7678 = vmatprep.subr.bf16.mxu1 %v9464_v0 }
 0x29c   :  { %7660 = vmatprep.mubr.msk.bf16.mxu0 %vm9466_vm1, %v9464_v0  ;;  %7713 = vmatpush3.bf16.msra.mxu0 %v8432_v13 }
 0x29d   :  { %7714 = vmatprep.subr.bf16.mxu0 %v9464_v0 }
 0x29e   :  { %7679 = vmatpush3.bf16.msra.mxu1 %v8438_v20 }
 0x29f   :  { %7680 = vmatprep.subr.bf16.mxu1 %v9464_v0 }
 0x2a0   :  { %7715 = vmatpush3.bf16.msra.mxu0 %v8434_v15 }
 0x2a1   :  { %7637 = vmatmul.mubr.msk.bf16.gmra.mrb[20].mxu1 %vm10812_vm8, %v9904_v36  ;;  %7716 = vmatprep.subr.bf16.mxu0 %v9464_v0 }
 0x2a2   :  { %7640 = vmatprep.mubr.msk.bf16.mxu1 %vm9466_vm1, %v9464_v0  ;;  %7681 = vmatpush3.bf16.msra.mxu1 %v8440_v21 }
 0x2a3   :  { %7661 = vmatmul.mubr.msk.bf16.gmra.mrb[24].mxu0 %vm10812_vm8, %v932_v5  ;;  %7682 = vmatprep.subr.bf16.mxu1 %v9464_v0 }
 0x2a4   :  { %7664 = vmatprep.mubr.msk.bf16.mxu0 %vm9466_vm1, %v9464_v0  ;;  %7717 = vmatpush3.bf16.msra.mxu0 %v8436_v17 }
 0x2a5   :  { %7718 = vmatprep.subr.bf16.mxu0 %v9464_v0 }
 0x2a6   :  { %7683 = vmatpush3.bf16.msra.mxu1 %v8441_v22 }
 0x2a7   :  { %7740 = vmatprep.subr.bf16.mxu1 %v9464_v0 }
 0x2a8   :  { %7719 = vmatpush3.bf16.msra.mxu0 %v8437_v19 }
 0x2a9   :  { %7641 = vmatmul.mubr.msk.bf16.gmra.mrb[24].mxu1 %vm10812_vm8, %v8424_v6  ;;  %7776 = vmatprep.subr.bf16.mxu0 %v9464_v0 }
 0x2aa   :  { %7684 = vmatprep.mubr.msk.bf16.mxu1 %vm9466_vm1, %v9464_v0 }
 0x2ab   :  { %7665 = vmatmul.mubr.msk.bf16.gmra.mrb[28].mxu0 %vm10812_vm8, %v931_v52  ;;  %vm10814_vm8 = vcmask 518144  }
 0x2ac   :  { %7720 = vmatprep.mubr.msk.bf16.mxu0 %vm9466_vm1, %v9464_v0  ;;  %1849 = vst.msk [vmem:[#allocation4 + $0x10] sm:$0x7] %vm10814_vm8, %v9465_v1  ;;  %2863 = vst.msk [vmem:[#allocation6 + $0x8] sm:$0x7] %vm10814_vm8, %v9465_v1 }
 0x2ad   :  { %4142 = vst.msk [vmem:[#allocation9 + $0x4] sm:$0x7] %vm10814_vm8, %v9465_v1  ;;  %vm10244_vm8 = vmand %vm1818_vm15, %vm550_vm5  ;;  %vm1909_vm5 = vcmask 519169  }
 0x2ae   :  { %vm10264_vm6 = vmand %vm1909_vm5, %vm621_vm13 }
 0x345   :  { %v778_v24 = vpop.f32.mrb[0].mxu0 }
 0x346   :  { %v7602_v25 = vpop.f32.mrb[1].mxu0 }
 0x347   :  { %v781_v26 = vpop.f32.mrb[2].mxu0 }
 0x348   :  { %v7603_v27 = vpop.f32.mrb[3].mxu0 }
 0x34c   :  { %v9991_v28 = vpop.f32.mrb[0].mxu1 }
 0x34d   :  { %v7614_v29 = vpop.f32.mrb[1].mxu1 }
 0x34e   :  { %v9993_v30 = vpop.f32.mrb[2].mxu1  ;;  %v786_v31 = vpop.f32.mrb[4].mxu0 }
 0x34f   :  { %v7615_v32 = vpop.f32.mrb[3].mxu1  ;;  %v7606_v33 = vpop.f32.mrb[5].mxu0 }
 0x350   :  { %v789_v34 = vpop.f32.mrb[6].mxu0 }
 0x351   :  { %v7607_v35 = vpop.f32.mrb[7].mxu0 }
 0x354   :  { %v9995_v36 = vpop.f32.mrb[4].mxu1 }
 0x355   :  { %v7618_v37 = vpop.f32.mrb[5].mxu1 }
 0x356   :  { %v813_v38 = vpop.f32.mrb[6].mxu1  ;;  %v794_v39 = vpop.f32.mrb[8].mxu0 }
 0x357   :  { %v7619_v40 = vpop.f32.mrb[7].mxu1  ;;  %v7610_v41 = vpop.f32.mrb[9].mxu0 }
 0x358   :  { %v797_v42 = vpop.f32.mrb[10].mxu0 }
 0x359   :  { %v7611_v43 = vpop.f32.mrb[11].mxu0 }
 0x35c   :  { %v876_v44 = vpop.f32.mrb[8].mxu1 }
 0x35d   :  { %v877_v45 = vadd.f32 %v876_v44, %v778_v24  ;;  %v7626_v46 = vpop.f32.mrb[9].mxu1 }
 0x35e   :  { %v879_v47 = vpop.f32.mrb[10].mxu1  ;;  %v994_v48 = vpop.f32.mrb[12].mxu0 }
 0x35f   :  { %v880_v50 = vadd.f32 %v879_v47, %v781_v26  ;;  %v7627_v51 = vpop.f32.mrb[11].mxu1  ;;  %v1032_v52 = vadd.f32 %v994_v48, %v877_v45  ;;  %v7650_v53 = vpop.f32.mrb[13].mxu0 }
 0x360   :  { %v997_v54 = vpop.f32.mrb[14].mxu0 }
 0x361   :  { %v1048_v55 = vadd.f32 %v9997_v49, %v1032_v52  ;;  %v1033_v56 = vadd.f32 %v997_v54, %v880_v50  ;;  %v7651_v57 = vpop.f32.mrb[15].mxu0 }
 0x363   :  { %v1057_v58 = vmax.f32 %v1048_v55, 0.0  ;;  %v1049_v59 = vadd.f32 %v9997_v49, %v1033_v56 }
 0x364   :  { %v884_v60 = vpop.f32.mrb[12].mxu1 }
 0x365   :  { %v7228_v61 = vpack.c.bf16 %v1057_v58, %v1057_v58  ;;  %v885_v62 = vadd.f32 %v884_v60, %v786_v31  ;;  %v1058_v63 = vmax.f32 %v1049_v59, 0.0  ;;  %v7630_v2 = vpop.f32.mrb[13].mxu1 }
 0x366   :  { %v887_v3 = vpop.f32.mrb[14].mxu1  ;;  %v1002_v4 = vpop.f32.mrb[16].mxu0 }
 0x367   :  { %v1088_v5 = vshrl.u32 %v7228_v61, 16  ;;  %v7229_v6 = vpack.c.bf16 %v1058_v63, %v1058_v63  ;;  %v888_v7 = vadd.f32 %v887_v3, %v789_v34  ;;  %v7631_v8 = vpop.f32.mrb[15].mxu1  ;;  %v7654_v9 = vpop.f32.mrb[17].mxu0  ;;  %v1034_v10 = vadd.f32 %v1002_v4, %v885_v62  ;;  %v1137_v62 = vld [vmem:[#allocation3 + $0x10] sm:$0x1] }
 0x368   :  { %v1005_v11 = vpop.f32.mrb[18].mxu0  ;;  %v1091_v13 = vshll.u32 %v7228_v61, 16 }
 0x369   :  { %v1090_v12 = vrot.slane %v1088_v5, 7  ;;  %v1096_v14 = vshrl.u32 %v7229_v6, 16  ;;  %v1035_v15 = vadd.f32 %v1005_v11, %v888_v7  ;;  %v7655_v16 = vpop.f32.mrb[19].mxu0  ;;  %v1050_v19 = vadd.f32 %v9997_v49, %v1034_v10 }
 0x36a   :  { %v1099_v22 = vshll.u32 %v7229_v6, 16 }
 0x36b   :  { %v1093_v20 = vor.u32 %v1091_v13, %v1090_v12  ;;  %v1098_v21 = vrot.slane %v1096_v14, 7  ;;  %v1051_v24 = vadd.f32 %v9997_v49, %v1035_v15  ;;  %v1059_v25 = vmax.f32 %v1050_v19, 0.0 }
 0x36c   :  { %v892_v26 = vpop.f32.mrb[16].mxu1  ;;  %v1094_v27 = vrot.slane %v1090_v12, 4 }
 0x36d   :  { %v1130_v29 = vsel %vm10002_vm11, %v1093_v20, %v1129_v18  ;;  %v1101_v31 = vor.u32 %v1099_v22, %v1098_v21  ;;  %v893_v32 = vadd.f32 %v892_v26, %v794_v39  ;;  %v7634_v33 = vpop.f32.mrb[17].mxu1  ;;  %v7230_v34 = vpack.c.bf16 %v1059_v25, %v1059_v25 }
 0x36e   :  { %1131 = vst [vmem:[#allocation3] sm:$0xf] %v1130_v29  ;;  %v1060_v35 = vmax.f32 %v1051_v24, 0.0  ;;  %v895_v37 = vpop.f32.mrb[18].mxu1  ;;  %v1010_v38 = vpop.f32.mrb[20].mxu0  ;;  %v1103_v57 = vrot.slane %v1098_v21, 4 }
 0x36f   :  { %v1102_v40 = vsel %vm9841_vm10, %v1094_v27, %v1101_v31  ;;  %v896_v41 = vadd.f32 %v895_v37, %v797_v42  ;;  %v7635_v43 = vpop.f32.mrb[19].mxu1  ;;  %v1036_v44 = vadd.f32 %v1010_v38, %v893_v32  ;;  %v7658_v45 = vpop.f32.mrb[21].mxu0  ;;  %v1105_v46 = vshrl.u32 %v7230_v34, 16  ;;  %v1206_v31 = vld [vmem:[#allocation3 + $0x10] sm:$0xe] }
 0x370   :  { %1132 = vst [vmem:[#allocation3 + $0x4] sm:$0xf] %v1102_v40  ;;  %v7231_v47 = vpack.c.bf16 %v1060_v35, %v1060_v35  ;;  %v1013_v48 = vpop.f32.mrb[22].mxu0  ;;  %v1108_v53 = vshll.u32 %v7230_v34, 16 }
 0x371   :  { %v1052_v50 = vadd.f32 %v9997_v49, %v1036_v44  ;;  %v1037_v39 = vadd.f32 %v1013_v48, %v896_v41  ;;  %v7659_v51 = vpop.f32.mrb[23].mxu0  ;;  %v1107_v52 = vrot.slane %v1105_v46, 7 }
 0x372   :  { %v1114_v54 = vshrl.u32 %v7231_v47, 16  ;;  %v1117_v59 = vshll.u32 %v7231_v47, 16 }
 0x373   :  { %v1061_v55 = vmax.f32 %v1052_v50, 0.0  ;;  %v1053_v56 = vadd.f32 %v9997_v49, %v1037_v39  ;;  %v1110_v42 = vor.u32 %v1108_v53, %v1107_v52  ;;  %v1112_v6 = vrot.slane %v1107_v52, 4 }
 0x374   :  { %v1116_v58 = vrot.slane %v1114_v54, 7  ;;  %v900_v60 = vpop.f32.mrb[20].mxu1 }
 0x375   :  { %v7232_v63 = vpack.c.bf16 %v1061_v55, %v1061_v55  ;;  %v901_v2 = vadd.f32 %v900_v60, %v9991_v28  ;;  %v1062_v3 = vmax.f32 %v1053_v56, 0.0  ;;  %v7638_v4 = vpop.f32.mrb[21].mxu1  ;;  %v1111_v5 = vsel %vm9841_vm10, %v1103_v57, %v1110_v42  ;;  %v1217_v11 = vld [vmem:[#allocation3] sm:$0xf] }
 0x376   :  { %v1119_v7 = vor.u32 %v1117_v59, %v1116_v58  ;;  %v1121_v8 = vrot.slane %v1116_v58, 4  ;;  %v903_v9 = vpop.f32.mrb[22].mxu1  ;;  %v1018_v10 = vpop.f32.mrb[24].mxu0  ;;  %1133 = vst [vmem:[#allocation3 + $0x8] sm:$0xf] %v1111_v5 }
 0x377   :  { %v1157_v12 = vshrl.u32 %v7232_v63, 16  ;;  %v7233_v13 = vpack.c.bf16 %v1062_v3, %v1062_v3  ;;  %v904_v14 = vadd.f32 %v903_v9, %v9993_v30  ;;  %v7639_v15 = vpop.f32.mrb[23].mxu1  ;;  %v7662_v16 = vpop.f32.mrb[25].mxu0  ;;  %v10024_v28 = vld [vmem:[#allocation3 + $0x4] sm:$0xf]  ;;  %v1038_v20 = vadd.f32 %v1018_v10, %v901_v2 }
 0x378   :  { %v1120_v18 = vsel %vm9841_vm10, %v1112_v6, %v1119_v7  ;;  %v1138_v19 = vsel %vm10016_vm14, %v1121_v8, %v1137_v62  ;;  %v1021_v21 = vpop.f32.mrb[26].mxu0  ;;  %v6738_v22 = vcombine.low %v1217_v11, %v10024_v28  ;;  %v1160_v25 = vshll.u32 %v7232_v63, 16 }
 0x379   :  { %1134 = vst [vmem:[#allocation3 + $0xc] sm:$0xf] %v1120_v18  ;;  %1139 = vst [vmem:[#allocation3 + $0x10] sm:$0x1] %v1138_v19  ;;  %v1159_v24 = vrot.slane %v1157_v12, 7  ;;  %v1165_v26 = vshrl.u32 %v7233_v13, 16  ;;  %v1039_v30 = vadd.f32 %v1021_v21, %v904_v14  ;;  %v1054_v33 = vadd.f32 %v9997_v49, %v1038_v20 }
 0x37a   :  { %v7663_v27 = vpop.f32.mrb[27].mxu0  ;;  %v1168_v32 = vshll.u32 %v7233_v13, 16  ;;  %7721 = vmatmul.mubr.bf16.vlgmr.msra.gmra.mrb[32].mxu0 %v6738_v22  ;;  %v1286_v38 = vshll.u32 %v6738_v22, 16  ;;  %v1284_v62 = vshrl.u32 %v6738_v22, 16  ;;  %v8445_v21 = vld [vmem:[#allocation26 + $0x88] sm:$0xff]  }
 0x37b   :  { %v1162_v34 = vor.u32 %v1160_v25, %v1159_v24  ;;  %v1167_v35 = vrot.slane %v1165_v26, 7  ;;  %v1055_v37 = vadd.f32 %v9997_v49, %v1039_v30  ;;  %7724 = vmatprep.mubr.msk.bf16.mxu0 %vm9466_vm1, %v9464_v0  ;;  %v1063_v40 = vmax.f32 %v1054_v33, 0.0 }
 0x37c   :  { %v908_v41 = vpop.f32.mrb[24].mxu1  ;;  %v1163_v43 = vrot.slane %v1159_v24, 4  ;;  %v1288_v56 = vrot.slane %v1286_v38, 1 }
 0x37d   :  { %v1207_v44 = vsel %vm10033_vm2, %v1162_v34, %v1206_v31  ;;  %v1170_v45 = vor.u32 %v1168_v32, %v1167_v35  ;;  %v909_v46 = vadd.f32 %v908_v41, %v9995_v36  ;;  %v7642_v47 = vpop.f32.mrb[25].mxu1  ;;  %v7234_v48 = vpack.c.bf16 %v1063_v40, %v1063_v40  ;;  %v1214_v32 = vld [vmem:[#allocation3 + $0x20] sm:$0x3] }
 0x37e   :  { %1208 = vst [vmem:[#allocation3 + $0x10] sm:$0xe] %v1207_v44  ;;  %v1064_v50 = vmax.f32 %v1055_v37, 0.0  ;;  %v911_v39 = vpop.f32.mrb[26].mxu1  ;;  %v1026_v51 = vpop.f32.mrb[28].mxu0  ;;  %v1172_v5 = vrot.slane %v1167_v35, 4  ;;  %v1289_v7 = vor.u32 %v1288_v56, %v1284_v62 }
 0x37f   :  { %v1171_v52 = vsel %vm9841_vm10, %v1163_v43, %v1170_v45  ;;  %v7643_v53 = vpop.f32.mrb[27].mxu1  ;;  %v1040_v54 = vadd.f32 %v1026_v51, %v909_v46  ;;  %v7666_v55 = vpop.f32.mrb[29].mxu0  ;;  %v1174_v57 = vshrl.u32 %v7234_v48, 16  ;;  %v1177_v2 = vshll.u32 %v7234_v48, 16  ;;  %v8446_v35 = vld [vmem:[#allocation26 + $0x90] sm:$0xff]   ;;  %v8448_v43 = vld [vmem:[#allocation26 + $0x98] sm:$0xff]  }
 0x380   :  { %1209 = vst [vmem:[#allocation3 + $0x14] sm:$0xf] %v1171_v52  ;;  %v7235_v42 = vpack.c.bf16 %v1064_v50, %v1064_v50  ;;  %v1029_v58 = vpop.f32.mrb[30].mxu0  ;;  %v10046_v59 = vld [vmem:[#allocation3 + $0x8] sm:$0xff]   ;;  %v8450_v48 = vld [vmem:[#allocation26 + $0xa0] sm:$0xff]   ;;  %v8452_v52 = vld [vmem:[#allocation26 + $0xa8] sm:$0xff]  }
 0x381   :  { %v1056_v36 = vadd.f32 %v9997_v49, %v1040_v54  ;;  %v7667_v60 = vpop.f32.mrb[31].mxu0  ;;  %v1176_v63 = vrot.slane %v1174_v57, 7  ;;  %v1291_v4 = vshll.u32 %v10046_v59, 16  ;;  %v8443_v49 = vld [vmem:[#allocation26 + $0x80] sm:$0xff]   ;;  %v1295_v25 = vshrl.u32 %v10046_v59, 16  ;;  %v8453_v57 = vld [vmem:[#allocation26 + $0xb0] sm:$0xff]  }
 0x382   :  { %v1183_v3 = vshrl.u32 %v7235_v42, 16  ;;  %7725 = vmatmul.mubr.bf16.gmra.mrb[36].mxu0 %v10046_v59  ;;  %v1186_v10 = vshll.u32 %v7235_v42, 16  ;;  %v8454_v58 = vld [vmem:[#allocation26 + $0xb8] sm:$0xff]   ;;  %v1575_v62 = vld [vmem:[#allocation3] sm:$0xe] }
 0x383   :  { %v1065_v6 = vmax.f32 %v1056_v36, 0.0  ;;  %7728 = vmatprep.mubr.msk.bf16.mxu0 %vm9466_vm1, %v9464_v0  ;;  %v1179_v8 = vor.u32 %v1177_v2, %v1176_v63  ;;  %v1293_v11 = vrot.slane %v1291_v4, 1  ;;  %v1181_v14 = vrot.slane %v1176_v63, 4 }
 0x384   :  { %v1185_v9 = vrot.slane %v1183_v3, 7  ;;  %v6760_v63 = vcombine.low %v1575_v62, %v10024_v28  ;;  %v1597_v2 = vrot.slane %v10046_v59, 1 }
 0x385   :  { %v7236_v12 = vpack.c.bf16 %v1065_v6, %v1065_v6  ;;  %v1180_v13 = vsel %vm9841_vm10, %v1172_v5, %v1179_v8  ;;  %v1294_v16 = vsel %vm10815_vm7, %v1289_v7, %v1293_v11  ;;  %v1297_v33 = vor.u32 %v1295_v25, %v1293_v11 }
 0x386   :  { %v1188_v15 = vor.u32 %v1186_v10, %v1185_v9  ;;  %1210 = vst [vmem:[#allocation3 + $0x18] sm:$0xf] %v1180_v13  ;;  %7685 = vmatmul.mubr.bf16.vlgmr.msra.gmra.mrb[28].mxu1 %v1294_v16  ;;  %v1190_v30 = vrot.slane %v1185_v9, 4  ;;  %v1596_v3 = vrot.slane %v6760_v63, 1 }
 0x387   :  { %v1192_v18 = vshrl.u32 %v7236_v12, 16  ;;  %v10056_v19 = vld [vmem:[#allocation3 + $0x10] sm:$0xff]   ;;  %7741 = vmatpush3.bf16.msra.mxu1 %v8443_v49  ;;  %7688 = vmatprep.mubr.msk.bf16.mxu1 %vm9466_vm1, %v9464_v0  ;;  %v1195_v24 = vshll.u32 %v7236_v12, 16 }
 0x388   :  { %v1189_v20 = vsel %vm9841_vm10, %v1181_v14, %v1188_v15  ;;  %7742 = vmatprep.subr.bf16.mxu1 %v9464_v0  ;;  %v1299_v26 = vshll.u32 %v10056_v19, 16  ;;  %v1303_v44 = vshrl.u32 %v10056_v19, 16  ;;  %v1598_v4 = vsel %vm10813_vm0, %v1596_v3, %v1597_v2 }
 0x389   :  { %1211 = vst [vmem:[#allocation3 + $0x1c] sm:$0xf] %v1189_v20  ;;  %v1194_v22 = vrot.slane %v1192_v18, 7  ;;  %v1599_v5 = vrot.slane %v10056_v19, 1 }
 0x38a   :  { %7729 = vmatmul.mubr.bf16.gmra.mrb[40].mxu0 %v10056_v19  ;;  %v1301_v34 = vrot.slane %v1299_v26, 1 }
 0x38b   :  { %v1197_v27 = vor.u32 %v1195_v24, %v1194_v22  ;;  %7732 = vmatprep.mubr.msk.bf16.mxu0 %vm9466_vm1, %v9464_v0  ;;  %7743 = vmatpush3.bf16.msra.mxu1 %v8445_v21  ;;  %v1600_v6 = vsel %vm10813_vm0, %v1597_v2, %v1599_v5 }
 0x38c   :  { %v1302_v38 = vsel %vm10815_vm7, %v1297_v33, %v1301_v34  ;;  %7744 = vmatprep.subr.bf16.mxu1 %v9464_v0  ;;  %v1305_v46 = vor.u32 %v1303_v44, %v1301_v34 }
 0x38d   :  { %v1198_v37 = vsel %vm9841_vm10, %v1190_v30, %v1197_v27 }
 0x38e   :  { %v1215_v40 = vsel %vm10067_vm9, %v1198_v37, %v1214_v32  ;;  %7689 = vmatmul.mubr.bf16.gmra.mrb[32].mxu1 %v1302_v38 }
 0x38f   :  { %1216 = vst [vmem:[#allocation3 + $0x20] sm:$0x3] %v1215_v40  ;;  %7745 = vmatpush3.bf16.msra.mxu1 %v8446_v35  ;;  %7692 = vmatprep.mubr.msk.bf16.mxu1 %vm9466_vm1, %v9464_v0 }
 0x390   :  { %v8447_v41 = vld [vmem:[#allocation3 + $0x18] sm:$0xff]   ;;  %7746 = vmatprep.subr.bf16.mxu1 %v9464_v0 }
 0x391   :  { %v1307_v45 = vshll.u32 %v8447_v41, 16  ;;  %v1311_v53 = vshrl.u32 %v8447_v41, 16  ;;  %v1601_v7 = vrot.slane %v8447_v41, 1 }
 0x392   :  { %7733 = vmatmul.mubr.bf16.gmra.mrb[44].mxu0 %v8447_v41 }
 0x393   :  { %7736 = vmatprep.mubr.msk.bf16.mxu0 %vm9466_vm1, %v9464_v0  ;;  %7747 = vmatpush3.bf16.msra.mxu1 %v8448_v43  ;;  %v1309_v47 = vrot.slane %v1307_v45, 1  ;;  %v1602_v28 = vsel %vm10813_vm0, %v1599_v5, %v1601_v7 }
 0x394   :  { %7748 = vmatprep.subr.bf16.mxu1 %v9464_v0 }
 0x395   :  { %v1310_v50 = vsel %vm10815_vm7, %v1305_v46, %v1309_v47  ;;  %v1313_v55 = vor.u32 %v1311_v53, %v1309_v47 }
 0x396   :  { %7693 = vmatmul.mubr.bf16.gmra.mrb[36].mxu1 %v1310_v50  ;;  %v8451_v39 = vld [vmem:[#allocation3 + $0x20] ss:$0 sps:$4 sm:$0x77]  }
 0x397   :  { %v8449_v51 = vld [vmem:[#allocation3 + $0x20] ss:$0 sps:$4 sm:$0x33]   ;;  %7749 = vmatpush3.bf16.msra.mxu1 %v8450_v48  ;;  %7696 = vmatprep.mubr.msk.bf16.mxu1 %vm9466_vm1, %v9464_v0  ;;  %v1315_v54 = vshll.u32 %v8451_v39, 16  ;;  %v1319_v36 = vshrl.u32 %v8451_v39, 16  ;;  %v1603_v59 = vrot.slane %v8451_v39, 1 }
 0x398   :  { %7750 = vmatprep.subr.bf16.mxu1 %v9464_v0 }
 0x399   :  { %v1317_v56 = vrot.slane %v1315_v54, 1  ;;  %v1604_v8 = vsel %vm10813_vm0, %v1601_v7, %v1603_v59  ;;  %vm1809_vm0 = vcmask 523264  }
 0x39a   :  { %7737 = vmatmul.mubr.bf16.gmra.mrb[48].mxu0 %v8449_v51 }
 0x39b   :  { %7784 = vmatprep.mubr.msk.bf16.mxu0 %vm9466_vm1, %v9464_v0  ;;  %7751 = vmatpush3.bf16.msra.mxu1 %v8452_v52  ;;  %v1318_v42 = vsel %vm10815_vm7, %v1313_v55, %v1317_v56  ;;  %v1321_v60 = vor.u32 %v1319_v36, %v1317_v56  ;;  %vm10259_vm7 = vmand %vm1882_vm4, %vm506_vm3  ;;  %vm1897_vm3 = vcmask 1044484   ;;  %vm1915_vm4 = vcmask 517120  }
 0x39c   :  { %7752 = vmatprep.subr.bf16.mxu1 %v9464_v0  ;;  %vm10279_vm13 = vmor %vm1135_vm12, %vm1897_vm3  ;;  %vm10870_vm12 = vsmask.f32 1280  ;;  %vm10873_vm3 = vsmask.f32 7424 }
 0x39d   :  { %vm10291_vm5 = vmand %vm1915_vm4, %vm10870_vm12 }
 0x39e   :  { %7697 = vmatmul.mubr.bf16.gmra.mrb[40].mxu1 %v1318_v42  ;;  %vm10874_vm12 = vmmov %vm10873_vm3 }
 0x39f   :  { %7753 = vmatpush3.bf16.msra.mxu1 %v8453_v57  ;;  %7700 = vmatprep.mubr.msk.bf16.mxu1 %vm9466_vm1, %v9464_v0 }
 0x3a0   :  { %7754 = vmatprep.subr.bf16.mxu1 %v9464_v0 }
 0x3a3   :  { %7755 = vmatpush3.bf16.msra.mxu1 %v8454_v58 }
 0x3a4   :  { %7796 = vmatprep.subr.bf16.mxu1 %v9464_v0 }
 0x3a6   :  { %7701 = vmatmul.mubr.bf16.gmra.mrb[44].mxu1 %v1321_v60 }
 0x3a7   :  { %7756 = vmatprep.mubr.msk.bf16.mxu1 %vm9466_vm1, %v9464_v0 }
 0x3ae   :  { %7757 = vmatmul.mubr.bf16.vlgmr.msra.gmra.mrb[48].mxu1 %v1598_v4  ;;  %v10139_v4 = vld [vmem:[#allocation28] ss:$0 sm:$0xff] }
 0x3af   :  { %7760 = vmatprep.mubr.msk.bf16.mxu1 %vm9466_vm1, %v9464_v0 }
 0x3b6   :  { %7761 = vmatmul.mubr.bf16.gmra.mrb[52].mxu1 %v1600_v6 }
 0x3b7   :  { %7764 = vmatprep.mubr.msk.bf16.mxu1 %vm9466_vm1, %v9464_v0 }
 0x3be   :  { %7765 = vmatmul.mubr.bf16.gmra.mrb[56].mxu1 %v1602_v28 }
 0x3bf   :  { %7768 = vmatprep.mubr.msk.bf16.mxu1 %vm9466_vm1, %v9464_v0 }
 0x3c6   :  { %7769 = vmatmul.mubr.bf16.gmra.mrb[60].mxu1 %v1604_v8 }
 0x3c7   :  { %7772 = vmatprep.mubr.msk.bf16.mxu1 %vm9466_vm1, %v9464_v0 }
 0x3ce   :  { %7773 = vmatmul.mubr.bf16.gmra.mrb[64].mxu1 %v1603_v59 }
 0x3cf   :  { %7804 = vmatprep.mubr.msk.bf16.mxu1 %vm9466_vm1, %v9464_v0 }
 0x44d   :  { %v1537_v9 = vpop.f32.mrb[32].mxu0 }
 0x44e   :  { %v7722_v10 = vpop.f32.mrb[33].mxu0 }
 0x44f   :  { %v1540_v11 = vpop.f32.mrb[34].mxu0 }
 0x450   :  { %v7723_v49 = vpop.f32.mrb[35].mxu0 }
 0x455   :  { %v1545_v12 = vpop.f32.mrb[36].mxu0 }
 0x456   :  { %v7726_v13 = vpop.f32.mrb[37].mxu0 }
 0x457   :  { %v1548_v14 = vpop.f32.mrb[38].mxu0 }
 0x458   :  { %v7727_v15 = vpop.f32.mrb[39].mxu0 }
 0x459   :  { %v1409_v16 = vpop.f32.mrb[28].mxu1 }
 0x45a   :  { %v1538_v18 = vadd.f32 %v1537_v9, %v1409_v16  ;;  %v7686_v19 = vpop.f32.mrb[29].mxu1 }
 0x45b   :  { %v1412_v20 = vpop.f32.mrb[30].mxu1 }
 0x45c   :  { %v1541_v21 = vadd.f32 %v1540_v11, %v1412_v20  ;;  %v7687_v22 = vpop.f32.mrb[31].mxu1 }
 0x45d   :  { %v1553_v24 = vpop.f32.mrb[40].mxu0 }
 0x45e   :  { %v7730_v25 = vpop.f32.mrb[41].mxu0 }
 0x45f   :  { %v1556_v26 = vpop.f32.mrb[42].mxu0 }
 0x460   :  { %v7731_v30 = vpop.f32.mrb[43].mxu0 }
 0x461   :  { %v1417_v27 = vpop.f32.mrb[32].mxu1 }
 0x462   :  { %v1546_v32 = vadd.f32 %v1545_v12, %v1417_v27  ;;  %v7690_v33 = vpop.f32.mrb[33].mxu1 }
 0x463   :  { %v1420_v34 = vpop.f32.mrb[34].mxu1 }
 0x464   :  { %v1549_v35 = vadd.f32 %v1548_v14, %v1420_v34  ;;  %v7691_v37 = vpop.f32.mrb[35].mxu1 }
 0x465   :  { %v1561_v38 = vpop.f32.mrb[44].mxu0 }
 0x466   :  { %v7734_v40 = vpop.f32.mrb[45].mxu0 }
 0x467   :  { %v1564_v41 = vpop.f32.mrb[46].mxu0 }
 0x468   :  { %v7735_v43 = vpop.f32.mrb[47].mxu0 }
 0x469   :  { %v1425_v44 = vpop.f32.mrb[36].mxu1 }
 0x46a   :  { %v1554_v45 = vadd.f32 %v1553_v24, %v1425_v44  ;;  %v7694_v46 = vpop.f32.mrb[37].mxu1 }
 0x46b   :  { %v1428_v47 = vpop.f32.mrb[38].mxu1 }
 0x46c   :  { %v1557_v48 = vadd.f32 %v1556_v26, %v1428_v47  ;;  %v7695_v50 = vpop.f32.mrb[39].mxu1  ;;  %v8459_v47 = vld [vmem:[#allocation29 + $0x8] sm:$0xff]  }
 0x46d   :  { %v1569_v39 = vpop.f32.mrb[48].mxu0 }
 0x46e   :  { %v7738_v51 = vpop.f32.mrb[49].mxu0 }
 0x46f   :  { %v1572_v52 = vpop.f32.mrb[50].mxu0 }
 0x470   :  { %v7739_v53 = vpop.f32.mrb[51].mxu0 }
 0x471   :  { %v1433_v54 = vpop.f32.mrb[40].mxu1  ;;  %v8460_v53 = vld [vmem:[#allocation29 + $0x10] sm:$0xff]  }
 0x472   :  { %v1562_v55 = vadd.f32 %v1561_v38, %v1433_v54  ;;  %v7698_v56 = vpop.f32.mrb[41].mxu1  ;;  %v8458_v38 = vld [vmem:[#allocation29] sm:$0xff]  }
 0x473   :  { %v1436_v57 = vpop.f32.mrb[42].mxu1  ;;  %7797 = vmatpush3.bf16.msra.mxu1 %v8458_v38 }
 0x474   :  { %v1565_v42 = vadd.f32 %v1564_v41, %v1436_v57  ;;  %v7699_v58 = vpop.f32.mrb[43].mxu1  ;;  %7798 = vmatprep.subr.bf16.mxu1 %v9464_v0 }
 0x475   :  { %v8462_v58 = vld [vmem:[#allocation29 + $0x18] sm:$0xff]  }
 0x477   :  { %7799 = vmatpush3.bf16.msra.mxu1 %v8459_v47 }
 0x478   :  { %7800 = vmatprep.subr.bf16.mxu1 %v9464_v0 }
 0x479   :  { %v1441_v36 = vpop.f32.mrb[44].mxu1 }
 0x47a   :  { %v10117_v60 = vadd.f32 %v1569_v39, %v1441_v36  ;;  %v7702_v62 = vpop.f32.mrb[45].mxu1  ;;  %v8456_v39 = vld [vmem:[#allocation29 + $0x20] sm:$0xff]  }
 0x47b   :  { %v1444_v63 = vpop.f32.mrb[46].mxu1  ;;  %7777 = vmatpush3.bf16.msra.mxu0 %v8456_v39  ;;  %7801 = vmatpush3.bf16.msra.mxu1 %v8460_v53  ;;  %v8457_v62 = vld [vmem:[#allocation29 + $0x28] sm:$0xff]  }
 0x47c   :  { %v7703_v2 = vpop.f32.mrb[47].mxu1  ;;  %7778 = vmatprep.subr.bf16.mxu0 %v9464_v0  ;;  %7802 = vmatprep.subr.bf16.mxu1 %v9464_v0  ;;  %v8464_v63 = vld [vmem:[#allocation29 + $0x38] sm:$0xff]  }
 0x47f   :  { %7803 = vmatpush3.bf16.msra.mxu1 %v8462_v58  ;;  %7779 = vmatpush3.bf16.msra.mxu0 %v8457_v62 }
 0x480   :  { %7780 = vmatprep.subr.bf16.mxu0 %v9464_v0  ;;  %7836 = vmatprep.subr.bf16.mxu1 %v9464_v0 }
 0x481   :  { %v1692_v3 = vpop.f32.mrb[48].mxu1 }
 0x482   :  { %v1730_v5 = vadd.f32 %v1692_v3, %v1538_v18  ;;  %v7758_v6 = vpop.f32.mrb[49].mxu1 }
 0x483   :  { %v1695_v7 = vpop.f32.mrb[50].mxu1 }
 0x484   :  { %v1731_v28 = vadd.f32 %v1695_v7, %v1541_v21  ;;  %v7759_v59 = vpop.f32.mrb[51].mxu1  ;;  %v10142_v8 = vadd.f32 %v10139_v4, %v1730_v5 }
 0x486   :  { %v1755_v9 = vmax.f32 %v10142_v8, 0.0  ;;  %v10146_v10 = vadd.f32 %v10139_v4, %v1731_v28 }
 0x488   :  { %1773 = vrot.lane.b32.xlu0 %v1755_v9, %s9434_s15  ;;  %v1756_v13 = vmax.f32 %v10146_v10, 0.0 }
 0x489   :  { %v1700_v11 = vpop.f32.mrb[52].mxu1 }
 0x48a   :  { %v1732_v49 = vadd.f32 %v1700_v11, %v1546_v32  ;;  %v7762_v12 = vpop.f32.mrb[53].mxu1 }
 0x48b   :  { %v1703_v14 = vpop.f32.mrb[54].mxu1 }
 0x48c   :  { %v1733_v15 = vadd.f32 %v1703_v14, %v1549_v35  ;;  %v7763_v16 = vpop.f32.mrb[55].mxu1  ;;  %1775 = vrot.lane.b32.xlu0 %v1756_v13, %s9434_s15  ;;  %v10156_v18 = vadd.f32 %v10139_v4, %v1732_v49 }
 0x48e   :  { %v1757_v19 = vmax.f32 %v10156_v18, 0.0  ;;  %v10160_v20 = vadd.f32 %v10139_v4, %v1733_v15 }
 0x490   :  { %1777 = vrot.lane.b32.xlu1 %v1757_v19, %s9434_s15  ;;  %v1758_v25 = vmax.f32 %v10160_v20, 0.0  ;;  %v1878_v20 = vld [vmem:[#allocation4] sm:$0xf] }
 0x491   :  { %v1708_v21 = vpop.f32.mrb[56].mxu1 }
 0x492   :  { %v1734_v22 = vadd.f32 %v1708_v21, %v1554_v45  ;;  %v7766_v24 = vpop.f32.mrb[57].mxu1 }
 0x493   :  { %v1711_v26 = vpop.f32.mrb[58].mxu1 }
 0x494   :  { %v1735_v30 = vadd.f32 %v1711_v26, %v1557_v48  ;;  %v7767_v27 = vpop.f32.mrb[59].mxu1  ;;  %1779 = vrot.lane.b32.xlu1 %v1758_v25, %s9434_s15  ;;  %v10170_v32 = vadd.f32 %v10139_v4, %v1734_v22 }
 0x496   :  { %v1759_v33 = vmax.f32 %v10170_v32, 0.0  ;;  %v10174_v34 = vadd.f32 %v10139_v4, %v1735_v30 }
 0x498   :  { %1781 = vrot.lane.b32.xlu0 %v1759_v33, %s9434_s15  ;;  %v1760_v35 = vmax.f32 %v10174_v34, 0.0 }
 0x499   :  { %v1716_v37 = vpop.f32.mrb[60].mxu1 }
 0x49a   :  { %v1736_v40 = vadd.f32 %v1716_v37, %v1562_v55  ;;  %v7770_v41 = vpop.f32.mrb[61].mxu1  ;;  %1783 = vrot.lane.b32.xlu1 %v1760_v35, %s9434_s15 }
 0x49b   :  { %v1719_v43 = vpop.f32.mrb[62].mxu1 }
 0x49c   :  { %v1737_v44 = vadd.f32 %v1719_v43, %v1565_v42  ;;  %v7771_v45 = vpop.f32.mrb[63].mxu1  ;;  %v10184_v46 = vadd.f32 %v10139_v4, %v1736_v40 }
 0x49d   :  { %v1884_v45 = vld [vmem:[#allocation4 + $0x8] sm:$0x1] }
 0x49e   :  { %v1761_v48 = vmax.f32 %v10184_v46, 0.0  ;;  %v10189_v50 = vadd.f32 %v10139_v4, %v1737_v44 }
 0x4a0   :  { %1785 = vrot.lane.b32.xlu0 %v1761_v48, %s9434_s15  ;;  %v1762_v51 = vmax.f32 %v10189_v50, 0.0 }
 0x4a1   :  { %v1724_v52 = vpop.f32.mrb[64].mxu1 }
 0x4a2   :  { %v1738_v54 = vadd.f32 %v1724_v52, %v10117_v60  ;;  %v7774_v55 = vpop.f32.mrb[65].mxu1  ;;  %1787 = vrot.lane.b32.xlu1 %v1762_v51, %s9434_s15  ;;  %v8461_v60 = vld [vmem:[#allocation29 + $0x30] sm:$0xff]  }
 0x4a3   :  { %v1727_v56 = vpop.f32.mrb[66].mxu1  ;;  %7781 = vmatpush3.bf16.msra.mxu0 %v8461_v60 }
 0x4a4   :  { %v7775_v57 = vpop.f32.mrb[67].mxu1  ;;  %v10208_v42 = vadd.f32 %v10139_v4, %v1738_v54  ;;  %7782 = vmatprep.subr.bf16.mxu0 %v9464_v0 }
 0x4a6   :  { %v1763_v36 = vmax.f32 %v10208_v42, 0.0 }
 0x4a7   :  { %7783 = vmatpush3.bf16.msra.mxu0 %v8464_v63 }
 0x4a8   :  { %1789 = vrot.lane.b32.xlu0 %v1763_v36, %s9434_s15  ;;  %7816 = vmatprep.subr.bf16.mxu0 %v9464_v0 }
 0x4fa   :  { %v1774_v2 = vpop.permute.xlu0 %1773 }
 0x4fb   :  { %v1800_v3 = vmax.f32 %v1755_v9, %v1774_v2 }
 0x4fd   :  { %1810 = vst.msk [vmem:[#allocation15] sm:$0xff] %vm1809_vm0, %v1800_v3 }
 0x4fe   :  { %v1776_v4 = vpop.permute.xlu0 %1775 }
 0x4ff   :  { %v1801_v5 = vmax.f32 %v1756_v13, %v1776_v4 }
 0x501   :  { %1811 = vst.msk [vmem:[#allocation15 + $0x8] sm:$0xff] %vm1809_vm0, %v1801_v5 }
 0x502   :  { %v1778_v6 = vpop.permute.xlu1 %1777 }
 0x503   :  { %v1802_v7 = vmax.f32 %v1757_v19, %v1778_v6 }
 0x505   :  { %1812 = vst.msk [vmem:[#allocation15 + $0x10] sm:$0xff] %vm1809_vm0, %v1802_v7 }
 0x506   :  { %v1780_v28 = vpop.permute.xlu1 %1779 }
 0x507   :  { %v1803_v59 = vmax.f32 %v1758_v25, %v1780_v28 }
 0x508   :  { %v1820_v8 = vld [vmem:[#allocation15] ss:$2 sm:$0xff]  ;;  %v1830_v9 = vld [vmem:[#allocation15 + $0x1] ss:$2 sm:$0xff] }
 0x509   :  { %v1839_v11 = vmax.f32 %v1820_v8, %v1830_v9  ;;  %1813 = vst.msk [vmem:[#allocation15 + $0x18] sm:$0xff] %vm1809_vm0, %v1803_v59 }
 0x50a   :  { %v1782_v49 = vpop.permute.xlu0 %1781 }
 0x50b   :  { %v7237_v10 = vpack.c.bf16 %v1839_v11, %v1839_v11  ;;  %v1804_v12 = vmax.f32 %v1759_v33, %v1782_v49 }
 0x50c   :  { %v1784_v13 = vpop.permute.xlu1 %1783 }
 0x50d   :  { %v1857_v14 = vshrl.u32 %v7237_v10, 16  ;;  %1814 = vst.msk [vmem:[#allocation15 + $0x20] sm:$0xff] %vm1809_vm0, %v1804_v12  ;;  %v1805_v15 = vmax.f32 %v1760_v35, %v1784_v13  ;;  %v1860_v19 = vshll.u32 %v7237_v10, 16  ;;  %v1917_v12 = vld [vmem:[#allocation4 + $0x10] sm:$0x3]  ;;  %v8584_v10 = vld [vmem:[#allocation43 + $0x48] sm:$0xff]  }
 0x50f   :  { %v1859_v18 = vrot.slane %v1857_v14, 7  ;;  %1815 = vst.msk [vmem:[#allocation15 + $0x28] sm:$0xff] %vm1809_vm0, %v1805_v15 }
 0x510   :  { %v1822_v21 = vld [vmem:[#allocation15 + $0x10] ss:$2 sm:$0xff]  ;;  %v1832_v22 = vld [vmem:[#allocation15 + $0x11] ss:$2 sm:$0xff] }
 0x511   :  { %v1862_v24 = vor.u32 %v1860_v19, %v1859_v18  ;;  %v1840_v25 = vmax.f32 %v1822_v21, %v1832_v22  ;;  %v1863_v46 = vrot.slane %v1859_v18, 4 }
 0x512   :  { %v1786_v26 = vpop.permute.xlu0 %1785 }
 0x513   :  { %v1879_v30 = vsel %vm10244_vm8, %v1862_v24, %v1878_v20  ;;  %v7238_v27 = vpack.c.bf16 %v1840_v25, %v1840_v25  ;;  %v1806_v32 = vmax.f32 %v1761_v48, %v1786_v26  ;;  %v8466_v24 = vld [vmem:[#allocation29 + $0x40] sm:$0xff]  }
 0x514   :  { %1880 = vst [vmem:[#allocation4] sm:$0xf] %v1879_v30  ;;  %v1788_v33 = vpop.permute.xlu1 %1787  ;;  %v8468_v30 = vld [vmem:[#allocation29 + $0x48] sm:$0xff]  }
 0x515   :  { %v1865_v34 = vshrl.u32 %v7238_v27, 16  ;;  %1816 = vst.msk [vmem:[#allocation15 + $0x30] sm:$0xff] %vm1809_vm0, %v1806_v32  ;;  %v1807_v35 = vmax.f32 %v1762_v51, %v1788_v33  ;;  %v1868_v41 = vshll.u32 %v7238_v27, 16  ;;  %v1911_v51 = vld [vmem:[#allocation4 + $0x8] sm:$0xe] }
 0x516   :  { %v1824_v37 = vld [vmem:[#allocation15 + $0x20] ss:$2 sm:$0xff]  ;;  %v1834_v38 = vld [vmem:[#allocation15 + $0x21] ss:$2 sm:$0xff] }
 0x517   :  { %v1867_v40 = vrot.slane %v1865_v34, 7  ;;  %v1841_v43 = vmax.f32 %v1824_v37, %v1834_v38  ;;  %1817 = vst.msk [vmem:[#allocation15 + $0x38] sm:$0xff] %vm1809_vm0, %v1807_v35  ;;  %v8470_v37 = vld [vmem:[#allocation29 + $0x50] sm:$0xff]  }
 0x519   :  { %v1870_v47 = vor.u32 %v1868_v41, %v1867_v40  ;;  %v1872_v48 = vrot.slane %v1867_v40, 4  ;;  %v7239_v50 = vpack.c.bf16 %v1841_v43, %v1841_v43  ;;  %v8471_v40 = vld [vmem:[#allocation29 + $0x58] sm:$0xff]  }
 0x51a   :  { %v1790_v52 = vpop.permute.xlu0 %1789 }
 0x51b   :  { %v1871_v53 = vsel %vm9841_vm10, %v1863_v46, %v1870_v47  ;;  %v1899_v54 = vrot.slane %v7239_v50, 7  ;;  %v1808_v55 = vmax.f32 %v1763_v36, %v1790_v52  ;;  %v1885_v56 = vsel %vm10259_vm7, %v1872_v48, %v1884_v45  ;;  %v1920_v3 = vld [vmem:[#allocation4] sm:$0xf] }
 0x51c   :  { %1881 = vst.msk [vmem:[#allocation4 + $0x4] sm:$0xf] %vm1818_vm15, %v1871_v53  ;;  %1886 = vst [vmem:[#allocation4 + $0x8] sm:$0x1] %v1885_v56  ;;  %v2158_v45 = vld [vmem:[#allocation4] sm:$0xe] }
 0x51d   :  { %v1912_v57 = vsel %vm10264_vm6, %v1899_v54, %v1911_v51  ;;  %1819 = vst.msk [vmem:[#allocation15 + $0x40] sm:$0xf] %vm1818_vm15, %v1808_v55  ;;  %v1900_v36 = vrot.slane %v1899_v54, 4  ;;  %v8472_v53 = vld [vmem:[#allocation32] sm:$0xff]   ;;  %v8473_v54 = vld [vmem:[#allocation32 + $0x8] sm:$0xff]   ;;  %v8474_v55 = vld [vmem:[#allocation32 + $0x10] sm:$0xff]  }
 0x51e   :  { %1913 = vst [vmem:[#allocation4 + $0x8] sm:$0xe] %v1912_v57  ;;  %v1826_v58 = vld [vmem:[#allocation15 + $0x30] ss:$2 sm:$0xff]  ;;  %v1836_v62 = vld [vmem:[#allocation15 + $0x31] ss:$2 sm:$0xff] }
 0x51f   :  { %v1842_v60 = vmax.f32 %v1826_v58, %v1836_v62  ;;  %v8475_v56 = vld [vmem:[#allocation32 + $0x40] sm:$0xff]   ;;  %v8476_v57 = vld [vmem:[#allocation32 + $0x18] sm:$0xff]   ;;  %v8477_v58 = vld [vmem:[#allocation32 + $0x48] sm:$0xff]  }
 0x520   :  { %v8478_v62 = vld [vmem:[#allocation32 + $0x20] sm:$0xff]  }
 0x521   :  { %v7240_v63 = vpack.c.bf16 %v1842_v60, %v1842_v60  ;;  %v8479_v60 = vld [vmem:[#allocation32 + $0x50] sm:$0xff]  }
 0x523   :  { %v1901_v2 = vrot.slane %v7240_v63, 7  ;;  %v1921_v4 = vld [vmem:[#allocation4 + $0x4] sm:$0xf]  ;;  %v8480_v63 = vld [vmem:[#allocation32 + $0x28] sm:$0xff]  }
 0x524   :  { %v1828_v5 = vld [vmem:[#allocation15 + $0x40] ss:$2 sm:$0x3]  ;;  %v1838_v6 = vld [vmem:[#allocation15 + $0x41] ss:$2 sm:$0x3]  ;;  %v6775_v7 = vcombine.low %v1920_v3, %v1921_v4  ;;  %v6793_v46 = vcombine.low %v2158_v45, %v1921_v4 }
 0x525   :  { %v1902_v28 = vsel %vm10279_vm13, %v1900_v36, %v1901_v2  ;;  %v1843_v59 = vmax.f32 %v1828_v5, %v1838_v6  ;;  %v1903_v9 = vrot.slane %v1901_v2, 4  ;;  %v8481_v36 = vld [vmem:[#allocation32 + $0x58] sm:$0xff]   ;;  %v8482_v2 = vld [vmem:[#allocation32 + $0x30] sm:$0xff]   ;;  %v8483_v3 = vld [vmem:[#allocation32 + $0x60] sm:$0xff]  }
 0x526   :  { %1914 = vst.msk [vmem:[#allocation4 + $0xc] sm:$0xf] %vm1818_vm15, %v1902_v28  ;;  %7805 = vmatmul.mubr.msk.bf16.vlgmr.msra.gmra.mrb[68].mxu1 %vm1809_vm0, %v6775_v7  ;;  %v1959_v49 = vshll.u32 %v6775_v7, 16  ;;  %v1957_v19 = vshrl.u32 %v6775_v7, 16  ;;  %v2171_v48 = vrot.slane %v6793_v46, 1  ;;  %v8484_v4 = vld [vmem:[#allocation32 + $0x38] sm:$0xff]  }
 0x527   :  { %v7241_v8 = vpack.c.bf16 %v1843_v59, %v1843_v59  ;;  %7808 = vmatprep.mubr.msk.bf16.mxu1 %vm9466_vm1, %v9464_v0  ;;  %7837 = vmatpush3.bf16.msra.mxu1 %v8475_v56  ;;  %v8486_v5 = vld [vmem:[#allocation32 + $0x68] sm:$0xff]   ;;  %v8487_v6 = vld [vmem:[#allocation32 + $0x70] sm:$0xff]   ;;  %v8489_v7 = vld [vmem:[#allocation32 + $0x78] sm:$0xff]  }
 0x528   :  { %v1961_v18 = vrot.slane %v1959_v49, 1  ;;  %7838 = vmatprep.subr.bf16.mxu1 %v9464_v0  ;;  %v6801_v46 = vld [vmem:[#allocation31] ss:$0 sm:$0xff] }
 0x529   :  { %v1904_v11 = vrot.slane %v7241_v8, 7 }
 0x52a   :  { %v1962_v21 = vor.u32 %v1961_v18, %v1957_v19 }
 0x52b   :  { %v1905_v13 = vsel %vm10279_vm13, %v1903_v9, %v1904_v11  ;;  %7839 = vmatpush3.bf16.msra.mxu1 %v8477_v58 }
 0x52c   :  { %v1918_v14 = vsel %vm10291_vm5, %v1905_v13, %v1917_v12  ;;  %7840 = vmatprep.subr.bf16.mxu1 %v9464_v0 }
 0x52d   :  { %v8465_v15 = vld [vmem:[#allocation4 + $0x8] sm:$0xff]   ;;  %1919 = vst [vmem:[#allocation4 + $0x10] sm:$0x3] %v1918_v14 }
 0x52e   :  { %7809 = vmatmul.mubr.msk.bf16.gmra.mrb[72].mxu1 %vm1809_vm0, %v8465_v15  ;;  %v1964_v20 = vshll.u32 %v8465_v15, 16  ;;  %v1968_v32 = vshrl.u32 %v8465_v15, 16  ;;  %v2172_v47 = vrot.slane %v8465_v15, 1 }
 0x52f   :  { %7812 = vmatprep.mubr.msk.bf16.mxu1 %vm9466_vm1, %v9464_v0  ;;  %7841 = vmatpush3.bf16.msra.mxu1 %v8479_v60 }
 0x530   :  { %v1966_v22 = vrot.slane %v1964_v20, 1  ;;  %7842 = vmatprep.subr.bf16.mxu1 %v9464_v0 }
 0x532   :  { %v1967_v25 = vsel %vm10873_vm3, %v1962_v21, %v1966_v22  ;;  %v1970_v34 = vor.u32 %v1968_v32, %v1966_v22  ;;  %vm10875_vm3 = vcmask 1046528  }
 0x533   :  { %7785 = vmatmul.mubr.msk.bf16.vlgmr.msra.gmra.mrb[52].mxu0 %vm1809_vm0, %v1967_v25  ;;  %v2173_v50 = vsel %vm10875_vm3, %v2171_v48, %v2172_v47  ;;  %7843 = vmatpush3.bf16.msra.mxu1 %v8481_v36 }
 0x534   :  { %v8467_v26 = vld [vmem:[#allocation4 + $0x10] ss:$0 sps:$4 sm:$0x33]   ;;  %7817 = vmatpush3.bf16.msra.mxu0 %v8466_v24  ;;  %7788 = vmatprep.mubr.msk.bf16.mxu0 %vm9466_vm1, %v9464_v0 }
 0x535   :  { %v8469_v27 = vld [vmem:[#allocation4 + $0x10] ss:$0 sps:$4 sm:$0x77]   ;;  %7818 = vmatprep.subr.bf16.mxu0 %v9464_v0  ;;  %7844 = vmatprep.subr.bf16.mxu1 %v9464_v0 }
 0x536   :  { %7813 = vmatmul.mubr.msk.bf16.gmra.mrb[76].mxu1 %vm1809_vm0, %v8467_v26  ;;  %v1972_v33 = vshll.u32 %v8469_v27, 16  ;;  %v1976_v41 = vshrl.u32 %v8469_v27, 16  ;;  %v2174_v51 = vrot.slane %v8469_v27, 1 }
 0x537   :  { %7852 = vmatprep.mubr.msk.bf16.mxu1 %vm9466_vm1, %v9464_v0  ;;  %7845 = vmatpush3.bf16.msra.mxu1 %v8483_v3 }
 0x538   :  { %7819 = vmatpush3.bf16.msra.mxu0 %v8468_v30  ;;  %v1974_v35 = vrot.slane %v1972_v33, 1  ;;  %7846 = vmatprep.subr.bf16.mxu1 %v9464_v0 }
 0x539   :  { %7820 = vmatprep.subr.bf16.mxu0 %v9464_v0 }
 0x53a   :  { %v1975_v38 = vsel %vm10874_vm12, %v1970_v34, %v1974_v35  ;;  %v1978_v43 = vor.u32 %v1976_v41, %v1974_v35  ;;  %vm10876_vm12 = vmmov %vm10875_vm3  ;;  %vm10877_vm3 = vsmask.f32 7424 }
 0x53b   :  { %7789 = vmatmul.mubr.msk.bf16.gmra.mrb[56].mxu0 %vm1809_vm0, %v1975_v38  ;;  %v2175_v52 = vsel %vm10876_vm12, %v2172_v47, %v2174_v51  ;;  %7847 = vmatpush3.bf16.msra.mxu1 %v8486_v5  ;;  %vm10878_vm12 = vmmov %vm10877_vm3 }
 0x53c   :  { %7821 = vmatpush3.bf16.msra.mxu0 %v8470_v37  ;;  %7792 = vmatprep.mubr.msk.bf16.mxu0 %vm9466_vm1, %v9464_v0 }
 0x53d   :  { %7822 = vmatprep.subr.bf16.mxu0 %v9464_v0  ;;  %7848 = vmatprep.subr.bf16.mxu1 %v9464_v0 }
 0x53f   :  { %7849 = vmatpush3.bf16.msra.mxu1 %v8487_v6 }
 0x540   :  { %7823 = vmatpush3.bf16.msra.mxu0 %v8471_v40  ;;  %7850 = vmatprep.subr.bf16.mxu1 %v9464_v0 }
 0x541   :  { %7864 = vmatprep.subr.bf16.mxu0 %v9464_v0 }
 0x543   :  { %7793 = vmatmul.mubr.msk.bf16.gmra.mrb[60].mxu0 %vm1809_vm0, %v1978_v43  ;;  %7851 = vmatpush3.bf16.msra.mxu1 %v8489_v7 }
 0x544   :  { %7824 = vmatprep.mubr.msk.bf16.mxu0 %vm9466_vm1, %v9464_v0  ;;  %7892 = vmatprep.subr.bf16.mxu1 %v9464_v0 }
 0x54b   :  { %7825 = vmatmul.mubr.msk.bf16.vlgmr.msra.gmra.mrb[64].mxu0 %vm1809_vm0, %v2173_v50 }
 0x54c   :  { %7828 = vmatprep.mubr.msk.bf16.mxu0 %vm9466_vm1, %v9464_v0  ;;  %7865 = vmatpush3.bf16.msra.mxu0 %v8472_v53 }
 0x54d   :  { %7866 = vmatprep.subr.bf16.mxu0 %v9464_v0 }
 0x550   :  { %7867 = vmatpush3.bf16.msra.mxu0 %v8473_v54 }
 0x551   :  { %7868 = vmatprep.subr.bf16.mxu0 %v9464_v0 }
 0x553   :  { %7829 = vmatmul.mubr.msk.bf16.gmra.mrb[68].mxu0 %vm1809_vm0, %v2175_v52 }
 0x554   :  { %7832 = vmatprep.mubr.msk.bf16.mxu0 %vm9466_vm1, %v9464_v0  ;;  %7869 = vmatpush3.bf16.msra.mxu0 %v8474_v55 }
 0x555   :  { %7870 = vmatprep.subr.bf16.mxu0 %v9464_v0 }
 0x558   :  { %7871 = vmatpush3.bf16.msra.mxu0 %v8476_v57 }
 0x559   :  { %7872 = vmatprep.subr.bf16.mxu0 %v9464_v0 }
 0x55b   :  { %7833 = vmatmul.mubr.msk.bf16.gmra.mrb[72].mxu0 %vm1809_vm0, %v2174_v51 }
 0x55c   :  { %7880 = vmatprep.mubr.msk.bf16.mxu0 %vm9466_vm1, %v9464_v0  ;;  %7873 = vmatpush3.bf16.msra.mxu0 %v8478_v62 }
 0x55d   :  { %7874 = vmatprep.subr.bf16.mxu0 %v9464_v0 }
 0x560   :  { %7875 = vmatpush3.bf16.msra.mxu0 %v8480_v63 }
 0x561   :  { %7876 = vmatprep.subr.bf16.mxu0 %v9464_v0 }
 0x564   :  { %7877 = vmatpush3.bf16.msra.mxu0 %v8482_v2 }
 0x565   :  { %7878 = vmatprep.subr.bf16.mxu0 %v9464_v0 }
 0x568   :  { %7879 = vmatpush3.bf16.msra.mxu0 %v8484_v4 }
 0x5f9   :  { %v2136_v28 = vpop.f32.mrb[68].mxu1 }
 0x5fa   :  { %v7806_v59 = vpop.f32.mrb[69].mxu1 }
 0x5fb   :  { %v2139_v8 = vpop.f32.mrb[70].mxu1 }
 0x5fc   :  { %v7807_v9 = vpop.f32.mrb[71].mxu1 }
 0x601   :  { %v2144_v11 = vpop.f32.mrb[72].mxu1 }
 0x602   :  { %v7810_v49 = vpop.f32.mrb[73].mxu1 }
 0x603   :  { %v2147_v12 = vpop.f32.mrb[74].mxu1 }
 0x604   :  { %v7811_v13 = vpop.f32.mrb[75].mxu1 }
 0x605   :  { %v2322_v13 = vld [vmem:[#allocation5 + $0x8] sm:$0x1] }
 0x606   :  { %v2046_v14 = vpop.f32.mrb[52].mxu0 }
 0x607   :  { %v2137_v15 = vadd.f32 %v2136_v28, %v2046_v14  ;;  %v7786_v18 = vpop.f32.mrb[53].mxu0  ;;  %v2318_v28 = vld [vmem:[#allocation5] sm:$0xf] }
 0x608   :  { %v2049_v19 = vpop.f32.mrb[54].mxu0 }
 0x609   :  { %v2140_v20 = vadd.f32 %v2139_v8, %v2049_v19  ;;  %v7787_v21 = vpop.f32.mrb[55].mxu0  ;;  %v2152_v22 = vpop.f32.mrb[76].mxu1 }
 0x60a   :  { %v7814_v24 = vpop.f32.mrb[77].mxu1 }
 0x60b   :  { %v2155_v25 = vpop.f32.mrb[78].mxu1 }
 0x60c   :  { %v7815_v26 = vpop.f32.mrb[79].mxu1 }
 0x60e   :  { %v2054_v30 = vpop.f32.mrb[56].mxu0 }
 0x60f   :  { %v2145_v27 = vadd.f32 %v2144_v11, %v2054_v30  ;;  %v7790_v32 = vpop.f32.mrb[57].mxu0 }
 0x610   :  { %v2057_v33 = vpop.f32.mrb[58].mxu0 }
 0x611   :  { %v2148_v34 = vadd.f32 %v2147_v12, %v2057_v33  ;;  %v7791_v35 = vpop.f32.mrb[59].mxu0 }
 0x616   :  { %v2062_v37 = vpop.f32.mrb[60].mxu0 }
 0x617   :  { %v2153_v38 = vadd.f32 %v2152_v22, %v2062_v37  ;;  %v7794_v40 = vpop.f32.mrb[61].mxu0 }
 0x618   :  { %v2065_v41 = vpop.f32.mrb[62].mxu0  ;;  %v2363_v40 = vld [vmem:[#allocation5 + $0x8] sm:$0xe] }
 0x619   :  { %v7795_v43 = vpop.f32.mrb[63].mxu0 }
 0x61e   :  { %v2243_v45 = vpop.f32.mrb[64].mxu0 }
 0x61f   :  { %v2265_v47 = vadd.f32 %v2243_v45, %v2137_v15  ;;  %v7826_v48 = vpop.f32.mrb[65].mxu0 }
 0x620   :  { %v2246_v50 = vpop.f32.mrb[66].mxu0 }
 0x621   :  { %v2277_v51 = vadd.f32 %v6801_v46, %v2265_v47  ;;  %v2266_v52 = vadd.f32 %v2246_v50, %v2140_v20  ;;  %v7827_v53 = vpop.f32.mrb[67].mxu0 }
 0x623   :  { %v2282_v54 = vmax.f32 %v2277_v51, 0.0  ;;  %v2278_v55 = vadd.f32 %v6801_v46, %v2266_v52 }
 0x625   :  { %v7242_v56 = vpack.c.bf16 %v2282_v54, %v2282_v54  ;;  %v2283_v57 = vmax.f32 %v2278_v55, 0.0 }
 0x626   :  { %v2251_v58 = vpop.f32.mrb[68].mxu0 }
 0x627   :  { %v2299_v62 = vshrl.u32 %v7242_v56, 16  ;;  %v7243_v60 = vpack.c.bf16 %v2283_v57, %v2283_v57  ;;  %v2267_v63 = vadd.f32 %v2251_v58, %v2145_v27  ;;  %v7830_v36 = vpop.f32.mrb[69].mxu0  ;;  %v2302_v4 = vshll.u32 %v7242_v56, 16 }
 0x628   :  { %v2254_v2 = vpop.f32.mrb[70].mxu0  ;;  %v2367_v36 = vld [vmem:[#allocation5 + $0x10] sm:$0x3] }
 0x629   :  { %v2301_v3 = vrot.slane %v2299_v62, 7  ;;  %v2307_v5 = vshrl.u32 %v7243_v60, 16  ;;  %v2279_v6 = vadd.f32 %v6801_v46, %v2267_v63  ;;  %v7831_v7 = vpop.f32.mrb[71].mxu0  ;;  %v2268_v59 = vadd.f32 %v2254_v2, %v2148_v34 }
 0x62a   :  { %v2310_v11 = vshll.u32 %v7243_v60, 16 }
 0x62b   :  { %v2304_v8 = vor.u32 %v2302_v4, %v2301_v3  ;;  %v2309_v9 = vrot.slane %v2307_v5, 7  ;;  %v2284_v49 = vmax.f32 %v2279_v6, 0.0  ;;  %v2305_v12 = vrot.slane %v2301_v3, 4 }
 0x62c   :  { %v2280_v14 = vadd.f32 %v6801_v46, %v2268_v59 }
 0x62d   :  { %v2319_v15 = vsel %vm10002_vm11, %v2304_v8, %v2318_v28  ;;  %v2312_v18 = vor.u32 %v2310_v11, %v2309_v9  ;;  %v2314_v19 = vrot.slane %v2309_v9, 4  ;;  %v7244_v20 = vpack.c.bf16 %v2284_v49, %v2284_v49  ;;  %v8490_v9 = vld [vmem:[#allocation32 + $0x80] sm:$0xff]  }
 0x62e   :  { %2320 = vst [vmem:[#allocation5] sm:$0xf] %v2319_v15  ;;  %v2285_v21 = vmax.f32 %v2280_v14, 0.0  ;;  %v2259_v22 = vpop.f32.mrb[72].mxu0 }
 0x62f   :  { %v2313_v24 = vsel %vm9841_vm10, %v2305_v12, %v2312_v18  ;;  %v2323_v25 = vsel %vm10016_vm14, %v2314_v19, %v2322_v13  ;;  %v2336_v26 = vshrl.u32 %v7244_v20, 16  ;;  %v7834_v30 = vpop.f32.mrb[73].mxu0  ;;  %v2269_v32 = vadd.f32 %v2259_v22, %v2153_v38  ;;  %v8492_v12 = vld [vmem:[#allocation32 + $0x88] sm:$0xff]   ;;  %v8495_v22 = vld [vmem:[#allocation32 + $0x98] sm:$0xff]  }
 0x630   :  { %2321 = vst [vmem:[#allocation5 + $0x4] sm:$0xf] %v2313_v24  ;;  %2324 = vst [vmem:[#allocation5 + $0x8] sm:$0x1] %v2323_v25  ;;  %v7245_v27 = vpack.c.bf16 %v2285_v21, %v2285_v21  ;;  %v2262_v33 = vpop.f32.mrb[74].mxu0  ;;  %v2339_v35 = vshll.u32 %v7244_v20, 16 }
 0x631   :  { %v2338_v34 = vrot.slane %v2336_v26, 7  ;;  %v7835_v37 = vpop.f32.mrb[75].mxu0  ;;  %v2281_v43 = vadd.f32 %v6801_v46, %v2269_v32  ;;  %v8494_v20 = vld [vmem:[#allocation32 + $0x90] sm:$0xff]   ;;  %v8496_v25 = vld [vmem:[#allocation32 + $0xa0] sm:$0xff]   ;;  %v8497_v30 = vld [vmem:[#allocation32 + $0xa8] sm:$0xff]  }
 0x632   :  { %v2344_v41 = vshrl.u32 %v7245_v27, 16  ;;  %v2347_v48 = vshll.u32 %v7245_v27, 16  ;;  %v8498_v27 = vld [vmem:[#allocation32 + $0xb0] sm:$0xff]   ;;  %v8499_v33 = vld [vmem:[#allocation32 + $0xb8] sm:$0xff]  }
 0x633   :  { %v2341_v45 = vor.u32 %v2339_v35, %v2338_v34  ;;  %v2286_v50 = vmax.f32 %v2281_v43, 0.0  ;;  %v2342_v52 = vrot.slane %v2338_v34, 4 }
 0x634   :  { %v2346_v47 = vrot.slane %v2344_v41, 7 }
 0x635   :  { %v2364_v51 = vsel %vm10033_vm2, %v2341_v45, %v2363_v40  ;;  %v7246_v54 = vpack.c.bf16 %v2286_v50, %v2286_v50  ;;  %v2370_v55 = vld [vmem:[#allocation5] sm:$0xf] }
 0x636   :  { %2365 = vst [vmem:[#allocation5 + $0x8] sm:$0xe] %v2364_v51  ;;  %v2349_v53 = vor.u32 %v2347_v48, %v2346_v47  ;;  %v2351_v60 = vrot.slane %v2346_v47, 4  ;;  %v2662_v32 = vld [vmem:[#allocation5] sm:$0xe] }
 0x637   :  { %v10354_v38 = vld [vmem:[#allocation5 + $0x4] sm:$0xf]  ;;  %v2353_v57 = vshrl.u32 %v7246_v54, 16  ;;  %v2356_v62 = vshll.u32 %v7246_v54, 16 }
 0x638   :  { %v2350_v56 = vsel %vm9841_vm10, %v2342_v52, %v2349_v53  ;;  %v6807_v46 = vcombine.low %v2370_v55, %v10354_v38  ;;  %v6827_v34 = vcombine.low %v2662_v32, %v10354_v38 }
 0x639   :  { %2366 = vst [vmem:[#allocation5 + $0xc] sm:$0xf] %v2350_v56  ;;  %v2355_v58 = vrot.slane %v2353_v57, 7 }
 0x63a   :  { %7881 = vmatmul.mubr.bf16.vlgmr.msra.gmra.mrb[76].mxu0 %v6807_v46  ;;  %v2425_v2 = vshll.u32 %v6807_v46, 16  ;;  %v2423_v7 = vshrl.u32 %v6807_v46, 16  ;;  %v2683_v37 = vrot.slane %v6827_v34, 1 }
 0x63b   :  { %7884 = vmatprep.mubr.msk.bf16.mxu0 %vm9466_vm1, %v9464_v0  ;;  %v2358_v63 = vor.u32 %v2356_v62, %v2355_v58 }
 0x63c   :  { %v2427_v6 = vrot.slane %v2425_v2, 1 }
 0x63d   :  { %v2359_v3 = vsel %vm9841_vm10, %v2351_v60, %v2358_v63 }
 0x63e   :  { %v2368_v4 = vsel %vm10067_vm9, %v2359_v3, %v2367_v36  ;;  %v2428_v59 = vor.u32 %v2427_v6, %v2423_v7 }
 0x63f   :  { %2369 = vst [vmem:[#allocation5 + $0x10] sm:$0x3] %v2368_v4 }
 0x640   :  { %v8488_v5 = vld [vmem:[#allocation5 + $0x8] sm:$0xff]  }
 0x641   :  { %v2430_v28 = vshll.u32 %v8488_v5, 16  ;;  %v2434_v14 = vshrl.u32 %v8488_v5, 16  ;;  %v2684_v35 = vrot.slane %v8488_v5, 1 }
 0x642   :  { %7885 = vmatmul.mubr.bf16.gmra.mrb[80].mxu0 %v8488_v5 }
 0x643   :  { %7888 = vmatprep.mubr.msk.bf16.mxu0 %vm9466_vm1, %v9464_v0  ;;  %v2432_v8 = vrot.slane %v2430_v28, 1 }
 0x645   :  { %v2433_v11 = vsel %vm10877_vm3, %v2428_v59, %v2432_v8  ;;  %v2436_v18 = vor.u32 %v2434_v14, %v2432_v8  ;;  %vm10879_vm3 = vcmask 1046528  }
 0x646   :  { %7853 = vmatmul.mubr.bf16.vlgmr.msra.gmra.mrb[80].mxu1 %v2433_v11  ;;  %v8491_v49 = vld [vmem:[#allocation5 + $0x10] ss:$0 sps:$4 sm:$0x33]   ;;  %v2685_v40 = vsel %vm10879_vm3, %v2683_v37, %v2684_v35 }
 0x647   :  { %7893 = vmatpush3.bf16.msra.mxu1 %v8490_v9  ;;  %7856 = vmatprep.mubr.msk.bf16.mxu1 %vm9466_vm1, %v9464_v0  ;;  %v8493_v13 = vld [vmem:[#allocation5 + $0x10] ss:$0 sps:$4 sm:$0x77]  }
 0x648   :  { %7894 = vmatprep.subr.bf16.mxu1 %v9464_v0  ;;  %v2438_v15 = vshll.u32 %v8493_v13, 16  ;;  %v2442_v24 = vshrl.u32 %v8493_v13, 16  ;;  %v2686_v41 = vrot.slane %v8493_v13, 1 }
 0x64a   :  { %7889 = vmatmul.mubr.bf16.gmra.mrb[84].mxu0 %v8491_v49  ;;  %v2440_v19 = vrot.slane %v2438_v15, 1 }
 0x64b   :  { %7895 = vmatpush3.bf16.msra.mxu1 %v8492_v12  ;;  %v6836_v12 = vld [vmem:[#allocation34] ss:$0 sm:$0xff] }
 0x64c   :  { %7896 = vmatprep.subr.bf16.mxu1 %v9464_v0  ;;  %v2441_v21 = vsel %vm10878_vm12, %v2436_v18, %v2440_v19  ;;  %v2444_v26 = vor.u32 %v2442_v24, %v2440_v19  ;;  %vm10880_vm12 = vmmov %vm10879_vm3 }
 0x64d   :  { %v2687_v43 = vsel %vm10880_vm12, %v2684_v35, %v2686_v41  ;;  %vm4174_vm12 = vsmask.f32 7950 }
 0x64e   :  { %7857 = vmatmul.mubr.bf16.gmra.mrb[84].mxu1 %v2441_v21 }
 0x64f   :  { %7897 = vmatpush3.bf16.msra.mxu1 %v8494_v20  ;;  %7860 = vmatprep.mubr.msk.bf16.mxu1 %vm9466_vm1, %v9464_v0 }
 0x650   :  { %7898 = vmatprep.subr.bf16.mxu1 %v9464_v0 }
 0x653   :  { %7899 = vmatpush3.bf16.msra.mxu1 %v8495_v22 }
 0x654   :  { %7900 = vmatprep.subr.bf16.mxu1 %v9464_v0 }
 0x656   :  { %7861 = vmatmul.mubr.bf16.gmra.mrb[88].mxu1 %v2444_v26 }
 0x657   :  { %7901 = vmatpush3.bf16.msra.mxu1 %v8496_v25  ;;  %7908 = vmatprep.mubr.msk.bf16.mxu1 %vm9466_vm1, %v9464_v0 }
 0x658   :  { %7902 = vmatprep.subr.bf16.mxu1 %v9464_v0 }
 0x65b   :  { %7903 = vmatpush3.bf16.msra.mxu1 %v8497_v30 }
 0x65c   :  { %7904 = vmatprep.subr.bf16.mxu1 %v9464_v0 }
 0x65f   :  { %7905 = vmatpush3.bf16.msra.mxu1 %v8498_v27 }
 0x660   :  { %7906 = vmatprep.subr.bf16.mxu1 %v9464_v0 }
 0x663   :  { %7907 = vmatpush3.bf16.msra.mxu1 %v8499_v33 }
 0x666   :  { %7909 = vmatmul.mubr.bf16.vlgmr.msra.gmra.mrb[92].mxu1 %v2685_v40 }
 0x667   :  { %7912 = vmatprep.mubr.msk.bf16.mxu1 %vm9466_vm1, %v9464_v0 }
 0x66e   :  { %7913 = vmatmul.mubr.bf16.gmra.mrb[96].mxu1 %v2687_v43 }
 0x66f   :  { %7916 = vmatprep.mubr.msk.bf16.mxu1 %vm9466_vm1, %v9464_v0 }
 0x676   :  { %7917 = vmatmul.mubr.bf16.gmra.mrb[100].mxu1 %v2686_v41 }
 0x70d   :  { %v2640_v45 = vpop.f32.mrb[76].mxu0 }
 0x70e   :  { %v7882_v47 = vpop.f32.mrb[77].mxu0 }
 0x70f   :  { %v2643_v48 = vpop.f32.mrb[78].mxu0 }
 0x710   :  { %v7883_v50 = vpop.f32.mrb[79].mxu0 }
 0x715   :  { %v2648_v51 = vpop.f32.mrb[80].mxu0 }
 0x716   :  { %v7886_v52 = vpop.f32.mrb[81].mxu0 }
 0x717   :  { %v2651_v53 = vpop.f32.mrb[82].mxu0  ;;  %v8502_v52 = vld [vmem:[#allocation35] sm:$0xff]  }
 0x718   :  { %v7887_v54 = vpop.f32.mrb[83].mxu0  ;;  %7932 = vmatprep.subr.bf16.mxu1 %v8502_v52 }
 0x719   :  { %v2530_v55 = vpop.f32.mrb[80].mxu1  ;;  %7933 = vmatpush3.bf16.msra.mxu1 %v8502_v52  ;;  %v8501_v54 = vld [vmem:[#allocation35 + $0x20] sm:$0xff]  }
 0x71a   :  { %v2641_v38 = vadd.f32 %v2640_v45, %v2530_v55  ;;  %v7854_v56 = vpop.f32.mrb[81].mxu1  ;;  %7920 = vmatprep.subr.bf16.mxu0 %v8501_v54  ;;  %v8503_v55 = vld [vmem:[#allocation35 + $0x28] sm:$0xff]  }
 0x71b   :  { %v2533_v57 = vpop.f32.mrb[82].mxu1  ;;  %7921 = vmatpush3.bf16.msra.mxu0 %v8501_v54  ;;  %v8506_v56 = vld [vmem:[#allocation35 + $0x30] sm:$0xff]  }
 0x71c   :  { %v2644_v46 = vadd.f32 %v2643_v48, %v2533_v57  ;;  %v7855_v58 = vpop.f32.mrb[83].mxu1  ;;  %7922 = vmatprep.subr.bf16.mxu0 %v8503_v55  ;;  %v8508_v57 = vld [vmem:[#allocation35 + $0x18] sm:$0xff]  }
 0x71d   :  { %v2656_v62 = vpop.f32.mrb[84].mxu0  ;;  %v10394_v58 = vld [vmem:[#allocation35 + $0x40] sm:$0xff]  }
 0x71e   :  { %v7890_v60 = vpop.f32.mrb[85].mxu0 }
 0x71f   :  { %v2659_v63 = vpop.f32.mrb[86].mxu0  ;;  %7923 = vmatpush3.bf16.msra.mxu0 %v8503_v55 }
 0x720   :  { %v7891_v36 = vpop.f32.mrb[87].mxu0  ;;  %7924 = vmatprep.subr.bf16.mxu0 %v8506_v56 }
 0x721   :  { %v2538_v2 = vpop.f32.mrb[84].mxu1 }
 0x722   :  { %v2649_v3 = vadd.f32 %v2648_v51, %v2538_v2  ;;  %v7858_v4 = vpop.f32.mrb[85].mxu1 }
 0x723   :  { %v2541_v5 = vpop.f32.mrb[86].mxu1  ;;  %7925 = vmatpush3.bf16.msra.mxu0 %v8506_v56 }
 0x724   :  { %v2652_v6 = vadd.f32 %v2651_v53, %v2541_v5  ;;  %v7859_v7 = vpop.f32.mrb[87].mxu1  ;;  %v8504_v53 = vld [vmem:[#allocation35 + $0x8] sm:$0xff]  }
 0x725   :  { %7934 = vmatprep.subr.bf16.mxu1 %v8504_v53 }
 0x726   :  { %7935 = vmatpush3.bf16.msra.mxu1 %v8504_v53 }
 0x729   :  { %v2546_v28 = vpop.f32.mrb[88].mxu1 }
 0x72a   :  { %v2657_v59 = vadd.f32 %v2656_v62, %v2546_v28  ;;  %v7862_v8 = vpop.f32.mrb[89].mxu1 }
 0x72b   :  { %v2549_v9 = vpop.f32.mrb[90].mxu1 }
 0x72c   :  { %v7863_v11 = vpop.f32.mrb[91].mxu1 }
 0x739   :  { %v2773_v49 = vpop.f32.mrb[92].mxu1 }
 0x73a   :  { %v2795_v13 = vadd.f32 %v2773_v49, %v2641_v38  ;;  %v7910_v14 = vpop.f32.mrb[93].mxu1  ;;  %v8505_v38 = vld [vmem:[#allocation35 + $0x10] sm:$0xff]  }
 0x73b   :  { %v2776_v15 = vpop.f32.mrb[94].mxu1  ;;  %7936 = vmatprep.subr.bf16.mxu1 %v8505_v38 }
 0x73c   :  { %v2796_v18 = vadd.f32 %v2776_v15, %v2644_v46  ;;  %v7911_v19 = vpop.f32.mrb[95].mxu1  ;;  %v2807_v20 = vadd.f32 %v6836_v12, %v2795_v13  ;;  %7937 = vmatpush3.bf16.msra.mxu1 %v8505_v38  ;;  %v8509_v46 = vld [vmem:[#allocation35 + $0x38] sm:$0xff]   ;;  %v2878_v13 = vld [vmem:[#allocation6] sm:$0xf] }
 0x73d   :  { %7938 = vmatprep.subr.bf16.mxu1 %v8508_v57  ;;  %7926 = vmatprep.subr.bf16.mxu0 %v8509_v46 }
 0x73e   :  { %v2812_v21 = vmax.f32 %v2807_v20, 0.0  ;;  %v2808_v22 = vadd.f32 %v6836_v12, %v2796_v18  ;;  %7927 = vmatpush3.bf16.msra.mxu0 %v8509_v46  ;;  %v2881_v18 = vld [vmem:[#allocation6 + $0x4] sm:$0x1] }
 0x73f   :  { %7944 = vmatprep.subr.bf16.mxu0 %v10394_v58 }
 0x740   :  { %2822 = vrot.lane.b32.xlu1 %v2812_v21, %s9434_s15  ;;  %v2813_v24 = vmax.f32 %v2808_v22, 0.0  ;;  %7939 = vmatpush3.bf16.msra.mxu1 %v8508_v57 }
 0x741   :  { %v2781_v25 = vpop.f32.mrb[96].mxu1 }
 0x742   :  { %v2797_v26 = vadd.f32 %v2781_v25, %v2649_v3  ;;  %v7914_v30 = vpop.f32.mrb[97].mxu1  ;;  %2824 = vrot.lane.b32.xlu0 %v2813_v24, %s9434_s15 }
 0x743   :  { %v2784_v27 = vpop.f32.mrb[98].mxu1 }
 0x744   :  { %v2798_v32 = vadd.f32 %v2784_v27, %v2652_v6  ;;  %v7915_v33 = vpop.f32.mrb[99].mxu1  ;;  %v2809_v34 = vadd.f32 %v6836_v12, %v2797_v26  ;;  %v2896_v26 = vld [vmem:[#allocation6 + $0x4] sm:$0xe] }
 0x746   :  { %v2814_v35 = vmax.f32 %v2809_v34, 0.0  ;;  %v2810_v37 = vadd.f32 %v6836_v12, %v2798_v32 }
 0x748   :  { %2826 = vrot.lane.b32.xlu1 %v2814_v35, %s9434_s15  ;;  %v2815_v40 = vmax.f32 %v2810_v37, 0.0 }
 0x749   :  { %v2789_v41 = vpop.f32.mrb[100].mxu1 }
 0x74a   :  { %v2799_v43 = vadd.f32 %v2789_v41, %v2657_v59  ;;  %v7918_v45 = vpop.f32.mrb[101].mxu1  ;;  %2828 = vrot.lane.b32.xlu0 %v2815_v40, %s9434_s15 }
 0x74b   :  { %v2792_v47 = vpop.f32.mrb[102].mxu1 }
 0x74c   :  { %v7919_v48 = vpop.f32.mrb[103].mxu1  ;;  %v2811_v50 = vadd.f32 %v6836_v12, %v2799_v43 }
 0x74e   :  { %v2816_v51 = vmax.f32 %v2811_v50, 0.0 }
 0x750   :  { %2830 = vrot.lane.b32.xlu1 %v2816_v51, %s9434_s15 }
 0x7b2   :  { %v2823_v62 = vpop.permute.xlu1 %2822 }
 0x7b3   :  { %v2837_v60 = vmax.f32 %v2812_v21, %v2823_v62 }
 0x7b4   :  { %v2825_v63 = vpop.permute.xlu0 %2824 }
 0x7b5   :  { %2842 = vst.msk [vmem:[#allocation16] sm:$0xff] %vm1809_vm0, %v2837_v60  ;;  %v2838_v36 = vmax.f32 %v2813_v24, %v2825_v63 }
 0x7b7   :  { %2843 = vst.msk [vmem:[#allocation16 + $0x8] sm:$0xff] %vm1809_vm0, %v2838_v36  ;;  %v8514_v36 = vld [vmem:[#allocation35 + $0x48] sm:$0xff]  }
 0x7ba   :  { %v2827_v2 = vpop.permute.xlu1 %2826 }
 0x7bb   :  { %v2839_v3 = vmax.f32 %v2814_v35, %v2827_v2 }
 0x7bc   :  { %v2829_v4 = vpop.permute.xlu0 %2828 }
 0x7bd   :  { %2844 = vst.msk [vmem:[#allocation16 + $0x10] sm:$0xff] %vm1809_vm0, %v2839_v3  ;;  %v2840_v5 = vmax.f32 %v2815_v40, %v2829_v4  ;;  %v2899_v40 = vld [vmem:[#allocation6 + $0x8] sm:$0x3]  ;;  %v8515_v3 = vld [vmem:[#allocation35 + $0x50] sm:$0xff]  }
 0x7be   :  { %v2847_v6 = vld [vmem:[#allocation16] ss:$2 sm:$0xff]  ;;  %v2853_v7 = vld [vmem:[#allocation16 + $0x1] ss:$2 sm:$0xff] }
 0x7bf   :  { %v2858_v28 = vmax.f32 %v2847_v6, %v2853_v7  ;;  %2845 = vst.msk [vmem:[#allocation16 + $0x18] sm:$0xff] %vm1809_vm0, %v2840_v5  ;;  %v8516_v4 = vld [vmem:[#allocation35 + $0x58] sm:$0xff]   ;;  %v8517_v5 = vld [vmem:[#allocation38] sm:$0xff]   ;;  %v8518_v6 = vld [vmem:[#allocation38 + $0x8] sm:$0xff]  }
 0x7c0   :  { %v8519_v7 = vld [vmem:[#allocation38 + $0x40] sm:$0xff]  }
 0x7c1   :  { %v7247_v59 = vpack.c.bf16 %v2858_v28, %v2858_v28  ;;  %7956 = vmatprep.subr.bf16.mxu1 %v8519_v7  ;;  %v8521_v28 = vld [vmem:[#allocation38 + $0x48] sm:$0xff]  }
 0x7c2   :  { %v2831_v8 = vpop.permute.xlu1 %2830 }
 0x7c3   :  { %v2869_v9 = vshrl.u32 %v7247_v59, 16  ;;  %v2841_v11 = vmax.f32 %v2816_v51, %v2831_v8  ;;  %v2872_v12 = vshll.u32 %v7247_v59, 16  ;;  %v8522_v59 = vld [vmem:[#allocation38 + $0x18] sm:$0xff]   ;;  %v8523_v8 = vld [vmem:[#allocation38 + $0x50] sm:$0xff]  }
 0x7c5   :  { %v2871_v49 = vrot.slane %v2869_v9, 7  ;;  %2846 = vst.msk [vmem:[#allocation16 + $0x20] sm:$0xf] %vm1818_vm15, %v2841_v11  ;;  %v8524_v9 = vld [vmem:[#allocation38 + $0x20] sm:$0xff]   ;;  %v8525_v11 = vld [vmem:[#allocation38 + $0x58] sm:$0xff]  }
 0x7c6   :  { %v2849_v14 = vld [vmem:[#allocation16 + $0x10] ss:$2 sm:$0xff]  ;;  %v2855_v15 = vld [vmem:[#allocation16 + $0x11] ss:$2 sm:$0xff] }
 0x7c7   :  { %v2874_v19 = vor.u32 %v2872_v12, %v2871_v49  ;;  %v2875_v20 = vrot.slane %v2871_v49, 4  ;;  %v2859_v21 = vmax.f32 %v2849_v14, %v2855_v15  ;;  %v8526_v49 = vld [vmem:[#allocation38 + $0x28] sm:$0xff]   ;;  %v8527_v12 = vld [vmem:[#allocation38 + $0x60] sm:$0xff]   ;;  %v8530_v15 = vld [vmem:[#allocation38 + $0x38] sm:$0xff]  }
 0x7c8   :  { %v8529_v14 = vld [vmem:[#allocation38 + $0x68] sm:$0xff]  }
 0x7c9   :  { %v7248_v22 = vpack.c.bf16 %v2859_v21, %v2859_v21  ;;  %v2879_v24 = vsel %vm10244_vm8, %v2874_v19, %v2878_v13  ;;  %v2882_v25 = vsel %vm10259_vm7, %v2875_v20, %v2881_v18  ;;  %vm10882_vm7 = vmmov %vm10879_vm3  ;;  %v8528_v13 = vld [vmem:[#allocation38 + $0x30] sm:$0xff]   ;;  %v8535_v19 = vld [vmem:[#allocation38 + $0x78] sm:$0xff]  }
 0x7ca   :  { %2880 = vst [vmem:[#allocation6] sm:$0xf] %v2879_v24  ;;  %2883 = vst [vmem:[#allocation6 + $0x4] sm:$0x1] %v2882_v25  ;;  %v8531_v18 = vld [vmem:[#allocation38 + $0x70] sm:$0xff]   ;;  %v10421_v20 = vld [vmem:[#allocation38 + $0x80] sm:$0xff]  }
 0x7cb   :  { %v2890_v30 = vrot.slane %v7248_v22, 7 }
 0x7cc   :  { %v2851_v27 = vld [vmem:[#allocation16 + $0x20] ss:$2 sm:$0x3]  ;;  %v2857_v32 = vld [vmem:[#allocation16 + $0x21] ss:$2 sm:$0x3] }
 0x7cd   :  { %v2897_v33 = vsel %vm10264_vm6, %v2890_v30, %v2896_v26  ;;  %v2860_v34 = vmax.f32 %v2851_v27, %v2857_v32  ;;  %v2891_v37 = vrot.slane %v2890_v30, 4  ;;  %vm10881_vm6 = vsmask.f32 7424 }
 0x7ce   :  { %2898 = vst [vmem:[#allocation6 + $0x4] sm:$0xe] %v2897_v33  ;;  %vm10883_vm8 = vmmov %vm10881_vm6 }
 0x7cf   :  { %v7249_v35 = vpack.c.bf16 %v2860_v34, %v2860_v34 }
 0x7d1   :  { %v2892_v41 = vrot.slane %v7249_v35, 7  ;;  %v2902_v43 = vld [vmem:[#allocation6] sm:$0xf] }
 0x7d2   :  { %v3104_v52 = vld [vmem:[#allocation6] sm:$0xe] }
 0x7d3   :  { %v2893_v16 = vsel %vm10279_vm13, %v2891_v37, %v2892_v41 }
 0x7d4   :  { %v2900_v44 = vsel %vm10291_vm5, %v2893_v16, %v2899_v40  ;;  %v6862_v40 = vld [vmem:[#allocation37] ss:$0 sm:$0xff] }
 0x7d5   :  { %2901 = vst [vmem:[#allocation6 + $0x8] sm:$0x3] %v2900_v44  ;;  %v2903_v45 = vld [vmem:[#allocation6 + $0x4] sm:$0xf] }
 0x7d6   :  { %v6840_v47 = vcombine.low %v2902_v43, %v2903_v45  ;;  %v6855_v55 = vcombine.low %v3104_v52, %v2903_v45 }
 0x7d8   :  { %7940 = vmatprep.mubr.msk.bf16.mxu1 %vm1809_vm0, %v6840_v47  ;;  %v2934_v39 = vshll.u32 %v6840_v47, 16  ;;  %v2932_v53 = vshrl.u32 %v6840_v47, 16  ;;  %v3117_v63 = vrot.slane %v6855_v55, 1 }
 0x7da   :  { %v2936_v51 = vrot.slane %v2934_v39, 1 }
 0x7dc   :  { %v8510_v48 = vld [vmem:[#allocation6 + $0x8] ss:$0 sps:$4 sm:$0x33]   ;;  %v2937_v38 = vor.u32 %v2936_v51, %v2932_v53 }
 0x7dd   :  { %v8511_v50 = vld [vmem:[#allocation6 + $0x8] ss:$0 sps:$4 sm:$0x77]   ;;  %7941 = vmatmul.mubr.msk.bf16.vlgmr.msra.gmra.mrb[104].mxu1 %vm1809_vm0, %v8510_v48 }
 0x7de   :  { %v2939_v54 = vshll.u32 %v8511_v50, 16  ;;  %v2943_v57 = vshrl.u32 %v8511_v50, 16  ;;  %v3118_v46 = vrot.slane %v8511_v50, 1  ;;  %7957 = vmatpush3.bf16.msra.mxu1 %v8519_v7 }
 0x7df   :  { %7958 = vmatprep.subr.bf16.mxu1 %v8521_v28 }
 0x7e0   :  { %v2941_v56 = vrot.slane %v2939_v54, 1  ;;  %v3119_v2 = vsel %vm10882_vm7, %v3117_v63, %v3118_v46  ;;  %vm4156_vm7 = vsmask.f32 2306 }
 0x7e2   :  { %v2942_v62 = vsel %vm10881_vm6, %v2937_v38, %v2941_v56  ;;  %v2945_v60 = vor.u32 %v2943_v57, %v2941_v56  ;;  %7959 = vmatpush3.bf16.msra.mxu1 %v8521_v28  ;;  %v3261_v28 = vld [vmem:[#allocation7 + $0x4] sm:$0xe] }
 0x7e3   :  { %7928 = vmatprep.mubr.msk.bf16.mxu0 %vm1809_vm0, %v2942_v62  ;;  %7960 = vmatprep.subr.bf16.mxu1 %v8523_v8 }
 0x7e4   :  { %7929 = vmatmul.mubr.msk.bf16.vlgmr.msra.gmra.mrb[88].mxu0 %vm1809_vm0, %v2945_v60 }
 0x7e5   :  { %7945 = vmatpush3.bf16.msra.mxu0 %v10394_v58  ;;  %7952 = vmatprep.mubr.msk.bf16.mxu0 %vm1809_vm0, %v3119_v2  ;;  %v8520_v58 = vld [vmem:[#allocation38 + $0x10] sm:$0xff]   ;;  %v3231_v2 = vld [vmem:[#allocation7] sm:$0xf] }
 0x7e6   :  { %7946 = vmatprep.subr.bf16.mxu0 %v8514_v36  ;;  %7961 = vmatpush3.bf16.msra.mxu1 %v8523_v8 }
 0x7e7   :  { %7962 = vmatprep.subr.bf16.mxu1 %v8525_v11 }
 0x7e9   :  { %7947 = vmatpush3.bf16.msra.mxu0 %v8514_v36 }
 0x7ea   :  { %7948 = vmatprep.subr.bf16.mxu0 %v8515_v3  ;;  %7963 = vmatpush3.bf16.msra.mxu1 %v8525_v11 }
 0x7eb   :  { %7964 = vmatprep.subr.bf16.mxu1 %v8527_v12 }
 0x7ed   :  { %7949 = vmatpush3.bf16.msra.mxu0 %v8515_v3  ;;  %v3234_v3 = vld [vmem:[#allocation7 + $0x4] sm:$0x1] }
 0x7ee   :  { %7950 = vmatprep.subr.bf16.mxu0 %v8516_v4  ;;  %7965 = vmatpush3.bf16.msra.mxu1 %v8527_v12 }
 0x7ef   :  { %7966 = vmatprep.subr.bf16.mxu1 %v8529_v14 }
 0x7f1   :  { %7951 = vmatpush3.bf16.msra.mxu0 %v8516_v4 }
 0x7f2   :  { %7976 = vmatprep.subr.bf16.mxu0 %v8517_v5  ;;  %7967 = vmatpush3.bf16.msra.mxu1 %v8529_v14 }
 0x7f3   :  { %7968 = vmatprep.subr.bf16.mxu1 %v8531_v18 }
 0x7f4   :  { %7953 = vmatmul.mubr.msk.bf16.vlgmr.msra.gmra.mrb[92].mxu0 %vm1809_vm0, %v3118_v46 }
 0x7f5   :  { %7977 = vmatpush3.bf16.msra.mxu0 %v8517_v5 }
 0x7f6   :  { %7978 = vmatprep.subr.bf16.mxu0 %v8518_v6  ;;  %7969 = vmatpush3.bf16.msra.mxu1 %v8531_v18 }
 0x7f7   :  { %7970 = vmatprep.subr.bf16.mxu1 %v8535_v19 }
 0x7f9   :  { %7979 = vmatpush3.bf16.msra.mxu0 %v8518_v6 }
 0x7fa   :  { %7980 = vmatprep.subr.bf16.mxu0 %v8520_v58  ;;  %7971 = vmatpush3.bf16.msra.mxu1 %v8535_v19 }
 0x7fb   :  { %7996 = vmatprep.subr.bf16.mxu1 %v10421_v20 }
 0x7fd   :  { %7981 = vmatpush3.bf16.msra.mxu0 %v8520_v58 }
 0x7fe   :  { %7982 = vmatprep.subr.bf16.mxu0 %v8522_v59 }
 0x801   :  { %7983 = vmatpush3.bf16.msra.mxu0 %v8522_v59 }
 0x802   :  { %7984 = vmatprep.subr.bf16.mxu0 %v8524_v9 }
 0x805   :  { %7985 = vmatpush3.bf16.msra.mxu0 %v8524_v9 }
 0x806   :  { %7986 = vmatprep.subr.bf16.mxu0 %v8526_v49 }
 0x809   :  { %7987 = vmatpush3.bf16.msra.mxu0 %v8526_v49  ;;  %v3264_v49 = vld [vmem:[#allocation7 + $0x8] sm:$0x3] }
 0x80a   :  { %7988 = vmatprep.subr.bf16.mxu0 %v8528_v13 }
 0x80d   :  { %7989 = vmatpush3.bf16.msra.mxu0 %v8528_v13 }
 0x80e   :  { %7990 = vmatprep.subr.bf16.mxu0 %v8530_v15 }
 0x811   :  { %7991 = vmatpush3.bf16.msra.mxu0 %v8530_v15 }
 0x8b0   :  { %v7942_v21 = vpop.f32.mrb[104].mxu1 }
 0x8b1   :  { %v3090_v22 = vpop.f32.mrb[105].mxu1 }
 0x8b2   :  { %v7943_v24 = vpop.f32.mrb[106].mxu1 }
 0x8b3   :  { %v3093_v25 = vpop.f32.mrb[107].mxu1 }
 0x8b7   :  { %v7930_v26 = vpop.f32.mrb[88].mxu0 }
 0x8b8   :  { %v3099_v30 = vadd.f32 %v7942_v21, %v7930_v26  ;;  %v3010_v27 = vpop.f32.mrb[89].mxu0 }
 0x8b9   :  { %v3091_v32 = vadd.f32 %v3090_v22, %v3010_v27  ;;  %v7931_v33 = vpop.f32.mrb[90].mxu0 }
 0x8ba   :  { %v3013_v34 = vpop.f32.mrb[91].mxu0 }
 0x8bb   :  { %v3094_v35 = vadd.f32 %v3093_v25, %v3013_v34 }
 0x8c7   :  { %v7954_v37 = vpop.f32.mrb[92].mxu0 }
 0x8c8   :  { %v3200_v41 = vadd.f32 %v7954_v37, %v3099_v30  ;;  %v3184_v16 = vpop.f32.mrb[93].mxu0 }
 0x8c9   :  { %v3198_v44 = vadd.f32 %v3184_v16, %v3091_v32  ;;  %v7955_v43 = vpop.f32.mrb[94].mxu0 }
 0x8ca   :  { %v3210_v45 = vadd.f32 %v6862_v40, %v3200_v41  ;;  %v3187_v47 = vpop.f32.mrb[95].mxu0 }
 0x8cb   :  { %v3208_v39 = vadd.f32 %v6862_v40, %v3198_v44  ;;  %v3199_v48 = vadd.f32 %v3187_v47, %v3094_v35  ;;  %v8538_v44 = vld [vmem:[#allocation38 + $0x88] sm:$0xff]   ;;  %v8540_v47 = vld [vmem:[#allocation38 + $0x98] sm:$0xff]  }
 0x8cc   :  { %v3213_v50 = vmax.f32 %v3210_v45, 0.0  ;;  %v8539_v45 = vld [vmem:[#allocation38 + $0x90] sm:$0xff]  }
 0x8cd   :  { %v3211_v51 = vmax.f32 %v3208_v39, 0.0  ;;  %v3209_v52 = vadd.f32 %v6862_v40, %v3199_v48  ;;  %v8541_v39 = vld [vmem:[#allocation38 + $0xa0] sm:$0xff]   ;;  %v8542_v48 = vld [vmem:[#allocation38 + $0xa8] sm:$0xff]  }
 0x8ce   :  { %v7252_v53 = vpack.c.bf16 %v3213_v50, %v3213_v50  ;;  %v8543_v50 = vld [vmem:[#allocation38 + $0xb0] sm:$0xff]  }
 0x8cf   :  { %v7250_v54 = vpack.c.bf16 %v3211_v51, %v3211_v51  ;;  %v3212_v55 = vmax.f32 %v3209_v52, 0.0  ;;  %v8545_v51 = vld [vmem:[%s10884_s29] sm:$0xff]   ;;  %v8546_v52 = vld [vmem:[%s10884_s29 + $0x8] sm:$0xff]  }
 0x8d0   :  { %v3252_v38 = vshrl.u32 %v7252_v53, 16  ;;  %v3255_v36 = vshll.u32 %v7252_v53, 16  ;;  %v8547_v53 = vld [vmem:[%s10884_s29 + $0x40] sm:$0xff]  }
 0x8d1   :  { %v3222_v56 = vshrl.u32 %v7250_v54, 16  ;;  %v7251_v57 = vpack.c.bf16 %v3212_v55, %v3212_v55  ;;  %v3225_v60 = vshll.u32 %v7250_v54, 16  ;;  %8016 = vmatprep.subr.bf16.mxu0 %v8547_v53  ;;  %v8548_v54 = vld [vmem:[%s10884_s29 + $0x10] sm:$0xff]   ;;  %v8549_v55 = vld [vmem:[%s10884_s29 + $0x48] sm:$0xff]  }
 0x8d2   :  { %v3254_v46 = vrot.slane %v3252_v38, 7  ;;  %v8550_v38 = vld [vmem:[%s10884_s29 + $0x18] sm:$0xff]  }
 0x8d3   :  { %v3224_v62 = vrot.slane %v3222_v56, 7  ;;  %v3244_v63 = vshrl.u32 %v7251_v57, 16  ;;  %v3247_v7 = vshll.u32 %v7251_v57, 16  ;;  %v8551_v56 = vld [vmem:[%s10884_s29 + $0x50] sm:$0xff]   ;;  %v8552_v57 = vld [vmem:[%s10884_s29 + $0x20] sm:$0xff]  }
 0x8d4   :  { %v3257_v58 = vor.u32 %v3255_v36, %v3254_v46  ;;  %v8553_v46 = vld [vmem:[%s10884_s29 + $0x58] sm:$0xff]   ;;  %v8557_v36 = vld [vmem:[%s10884_s29 + $0x68] sm:$0xff]  }
 0x8d5   :  { %v3227_v4 = vor.u32 %v3225_v60, %v3224_v62  ;;  %v3228_v5 = vrot.slane %v3224_v62, 4  ;;  %v3246_v6 = vrot.slane %v3244_v63, 7  ;;  %v8554_v62 = vld [vmem:[%s10884_s29 + $0x28] sm:$0xff]   ;;  %v8555_v60 = vld [vmem:[%s10884_s29 + $0x60] sm:$0xff]   ;;  %v8556_v63 = vld [vmem:[%s10884_s29 + $0x30] sm:$0xff]  }
 0x8d7   :  { %v3232_v59 = vsel %vm10002_vm11, %v3227_v4, %v3231_v2  ;;  %v3235_v8 = vsel %vm10016_vm14, %v3228_v5, %v3234_v3  ;;  %v3249_v9 = vor.u32 %v3247_v7, %v3246_v6  ;;  %v3250_v11 = vrot.slane %v3246_v6, 4  ;;  %v8558_v2 = vld [vmem:[%s10884_s29 + $0x38] sm:$0xff]   ;;  %v8559_v3 = vld [vmem:[%s10884_s29 + $0x70] sm:$0xff]   ;;  %v10455_v5 = vld [vmem:[%s10884_s29 + $0x80] sm:$0xff]  }
 0x8d8   :  { %3233 = vst [vmem:[#allocation7] sm:$0xf] %v3232_v59  ;;  %3236 = vst [vmem:[#allocation7 + $0x4] sm:$0x1] %v3235_v8  ;;  %v8563_v4 = vld [vmem:[%s10884_s29 + $0x78] sm:$0xff]  }
 0x8d9   :  { %v3258_v12 = vsel %vm9841_vm10, %v3250_v11, %v3257_v58  ;;  %v3262_v13 = vsel %vm10033_vm2, %v3249_v9, %v3261_v28 }
 0x8da   :  { %3263 = vst [vmem:[#allocation7 + $0x4] sm:$0xe] %v3262_v13  ;;  %v3265_v14 = vsel %vm10067_vm9, %v3258_v12, %v3264_v49 }
 0x8db   :  { %3266 = vst [vmem:[#allocation7 + $0x8] sm:$0x3] %v3265_v14 }
 0x8df   :  { %v3267_v15 = vld [vmem:[#allocation7] sm:$0xf] }
 0x8e0   :  { %v3526_v19 = vld [vmem:[#allocation7] sm:$0xe] }
 0x8e1   :  { %v3268_v18 = vld [vmem:[#allocation7 + $0x4] sm:$0xf] }
 0x8e2   :  { %v6866_v21 = vcombine.low %v3267_v15, %v3268_v18  ;;  %v8534_v22 = vld [vmem:[#allocation7 + $0x8] ss:$0 sps:$4 sm:$0x33]   ;;  %v6885_v26 = vcombine.low %v3526_v19, %v3268_v18  ;;  %v6894_v15 = vld [vmem:[#allocation40] ss:$0 sm:$0xff] }
 0x8e3   :  { %v8536_v24 = vld [vmem:[#allocation7 + $0x8] ss:$0 sps:$4 sm:$0x77]  }
 0x8e4   :  { %v3315_v25 = vshll.u32 %v6866_v21, 16  ;;  %7992 = vmatprep.mubr.bf16.mxu0 %v6866_v21  ;;  %v3320_v30 = vshll.u32 %v8536_v24, 16  ;;  %v3313_v27 = vshrl.u32 %v6866_v21, 16  ;;  %v3324_v35 = vshrl.u32 %v8536_v24, 16 }
 0x8e5   :  { %7993 = vmatmul.mubr.bf16.vlgmr.msra.gmra.mrb[96].mxu0 %v8534_v22  ;;  %v3547_v37 = vrot.slane %v6885_v26, 1  ;;  %v3548_v40 = vrot.slane %v8536_v24, 1 }
 0x8e6   :  { %v3317_v32 = vrot.slane %v3315_v25, 1  ;;  %v3322_v33 = vrot.slane %v3320_v30, 1  ;;  %8017 = vmatpush3.bf16.msra.mxu0 %v8547_v53 }
 0x8e7   :  { %v3549_v43 = vsel %vm10879_vm3, %v3547_v37, %v3548_v40  ;;  %8018 = vmatprep.subr.bf16.mxu0 %v8549_v55 }
 0x8e8   :  { %v3318_v34 = vor.u32 %v3317_v32, %v3313_v27  ;;  %v3326_v16 = vor.u32 %v3324_v35, %v3322_v33 }
 0x8ea   :  { %v3323_v41 = vsel %vm10883_vm8, %v3318_v34, %v3322_v33  ;;  %8019 = vmatpush3.bf16.msra.mxu0 %v8549_v55  ;;  %v3711_v55 = vld [vmem:[#allocation8 + $0x4] sm:$0xe]  ;;  %vm10887_vm8 = vcmask 518144  }
 0x8eb   :  { %7972 = vmatprep.mubr.bf16.mxu1 %v3323_v41  ;;  %8020 = vmatprep.subr.bf16.mxu0 %v8551_v56 }
 0x8ec   :  { %7973 = vmatmul.mubr.bf16.vlgmr.msra.gmra.mrb[108].mxu1 %v3326_v16 }
 0x8ed   :  { %7997 = vmatpush3.bf16.msra.mxu1 %v10421_v20  ;;  %8012 = vmatprep.mubr.bf16.mxu1 %v3549_v43  ;;  %v8544_v20 = vld [vmem:[#allocation38 + $0xb8] sm:$0xff]  }
 0x8ee   :  { %7998 = vmatprep.subr.bf16.mxu1 %v8538_v44  ;;  %8021 = vmatpush3.bf16.msra.mxu0 %v8551_v56 }
 0x8ef   :  { %8022 = vmatprep.subr.bf16.mxu0 %v8553_v46 }
 0x8f1   :  { %7999 = vmatpush3.bf16.msra.mxu1 %v8538_v44 }
 0x8f2   :  { %8000 = vmatprep.subr.bf16.mxu1 %v8539_v45  ;;  %8023 = vmatpush3.bf16.msra.mxu0 %v8553_v46 }
 0x8f3   :  { %8024 = vmatprep.subr.bf16.mxu0 %v8555_v60 }
 0x8f5   :  { %8001 = vmatpush3.bf16.msra.mxu1 %v8539_v45 }
 0x8f6   :  { %8002 = vmatprep.subr.bf16.mxu1 %v8540_v47  ;;  %8025 = vmatpush3.bf16.msra.mxu0 %v8555_v60 }
 0x8f7   :  { %8026 = vmatprep.subr.bf16.mxu0 %v8557_v36 }
 0x8f9   :  { %8003 = vmatpush3.bf16.msra.mxu1 %v8540_v47 }
 0x8fa   :  { %8004 = vmatprep.subr.bf16.mxu1 %v8541_v39  ;;  %8027 = vmatpush3.bf16.msra.mxu0 %v8557_v36 }
 0x8fb   :  { %8028 = vmatprep.subr.bf16.mxu0 %v8559_v3 }
 0x8fd   :  { %8005 = vmatpush3.bf16.msra.mxu1 %v8541_v39 }
 0x8fe   :  { %8006 = vmatprep.subr.bf16.mxu1 %v8542_v48  ;;  %8029 = vmatpush3.bf16.msra.mxu0 %v8559_v3 }
 0x8ff   :  { %8030 = vmatprep.subr.bf16.mxu0 %v8563_v4 }
 0x901   :  { %8007 = vmatpush3.bf16.msra.mxu1 %v8542_v48  ;;  %v3681_v48 = vld [vmem:[#allocation8] sm:$0xf] }
 0x902   :  { %8008 = vmatprep.subr.bf16.mxu1 %v8543_v50  ;;  %8031 = vmatpush3.bf16.msra.mxu0 %v8563_v4 }
 0x903   :  { %8056 = vmatprep.subr.bf16.mxu0 %v10455_v5 }
 0x905   :  { %8009 = vmatpush3.bf16.msra.mxu1 %v8543_v50  ;;  %v3684_v50 = vld [vmem:[#allocation8 + $0x4] sm:$0x1] }
 0x906   :  { %8010 = vmatprep.subr.bf16.mxu1 %v8544_v20 }
 0x909   :  { %8011 = vmatpush3.bf16.msra.mxu1 %v8544_v20 }
 0x90a   :  { %8036 = vmatprep.subr.bf16.mxu1 %v8545_v51 }
 0x90c   :  { %8013 = vmatmul.mubr.bf16.vlgmr.msra.gmra.mrb[112].mxu1 %v3548_v40 }
 0x90d   :  { %8037 = vmatpush3.bf16.msra.mxu1 %v8545_v51 }
 0x90e   :  { %8038 = vmatprep.subr.bf16.mxu1 %v8546_v52 }
 0x911   :  { %8039 = vmatpush3.bf16.msra.mxu1 %v8546_v52 }
 0x912   :  { %8040 = vmatprep.subr.bf16.mxu1 %v8548_v54 }
 0x915   :  { %8041 = vmatpush3.bf16.msra.mxu1 %v8548_v54 }
 0x916   :  { %8042 = vmatprep.subr.bf16.mxu1 %v8550_v38 }
 0x919   :  { %8043 = vmatpush3.bf16.msra.mxu1 %v8550_v38 }
 0x91a   :  { %8044 = vmatprep.subr.bf16.mxu1 %v8552_v57 }
 0x91d   :  { %8045 = vmatpush3.bf16.msra.mxu1 %v8552_v57 }
 0x91e   :  { %8046 = vmatprep.subr.bf16.mxu1 %v8554_v62 }
 0x921   :  { %8047 = vmatpush3.bf16.msra.mxu1 %v8554_v62  ;;  %v3714_v62 = vld [vmem:[#allocation8 + $0x8] sm:$0x3] }
 0x922   :  { %8048 = vmatprep.subr.bf16.mxu1 %v8556_v63 }
 0x925   :  { %8049 = vmatpush3.bf16.msra.mxu1 %v8556_v63 }
 0x926   :  { %8050 = vmatprep.subr.bf16.mxu1 %v8558_v2 }
 0x929   :  { %8051 = vmatpush3.bf16.msra.mxu1 %v8558_v2 }
 0x92a   :  { %8076 = vmatprep.subr.bf16.mxu1 %v9464_v0 }
 0x9b8   :  { %v7994_v6 = vpop.f32.mrb[96].mxu0 }
 0x9b9   :  { %v3512_v7 = vpop.f32.mrb[97].mxu0 }
 0x9ba   :  { %v7995_v58 = vpop.f32.mrb[98].mxu0 }
 0x9bb   :  { %v3515_v28 = vpop.f32.mrb[99].mxu0 }
 0x9bf   :  { %v7974_v59 = vpop.f32.mrb[108].mxu1 }
 0x9c0   :  { %v3521_v8 = vadd.f32 %v7994_v6, %v7974_v59  ;;  %v3411_v9 = vpop.f32.mrb[109].mxu1 }
 0x9c1   :  { %v3513_v11 = vadd.f32 %v3512_v7, %v3411_v9  ;;  %v7975_v49 = vpop.f32.mrb[110].mxu1 }
 0x9c2   :  { %v3414_v12 = vpop.f32.mrb[111].mxu1 }
 0x9c3   :  { %v3516_v13 = vadd.f32 %v3515_v28, %v3414_v12 }
 0x9df   :  { %v8014_v14 = vpop.f32.mrb[112].mxu1 }
 0x9e0   :  { %v3650_v18 = vadd.f32 %v8014_v14, %v3521_v8  ;;  %v3634_v19 = vpop.f32.mrb[113].mxu1 }
 0x9e1   :  { %v3648_v21 = vadd.f32 %v3634_v19, %v3513_v11  ;;  %v8015_v22 = vpop.f32.mrb[114].mxu1  ;;  %v8567_v19 = vld [vmem:[%s10884_s29 + $0x90] sm:$0xff]  }
 0x9e2   :  { %v3660_v24 = vadd.f32 %v6894_v15, %v3650_v18  ;;  %v3637_v25 = vpop.f32.mrb[115].mxu1  ;;  %v8569_v22 = vld [vmem:[%s10884_s29 + $0xa0] sm:$0xff]  }
 0x9e3   :  { %v3658_v26 = vadd.f32 %v6894_v15, %v3648_v21  ;;  %v3649_v30 = vadd.f32 %v3637_v25, %v3516_v13  ;;  %v8568_v21 = vld [vmem:[%s10884_s29 + $0x98] sm:$0xff]   ;;  %v8571_v25 = vld [vmem:[%s10884_s29 + $0xb0] sm:$0xff]  }
 0x9e4   :  { %v3663_v27 = vmax.f32 %v3660_v24, 0.0  ;;  %v8570_v24 = vld [vmem:[%s10884_s29 + $0xa8] sm:$0xff]  }
 0x9e5   :  { %v3661_v32 = vmax.f32 %v3658_v26, 0.0  ;;  %v3659_v33 = vadd.f32 %v6894_v15, %v3649_v30  ;;  %v8566_v15 = vld [vmem:[%s10884_s29 + $0x88] sm:$0xff]   ;;  %v8572_v26 = vld [vmem:[%s10884_s29 + $0xb8] sm:$0xff]  }
 0x9e6   :  { %v7255_v34 = vpack.c.bf16 %v3663_v27, %v3663_v27 }
 0x9e7   :  { %v7253_v35 = vpack.c.bf16 %v3661_v32, %v3661_v32  ;;  %v3662_v37 = vmax.f32 %v3659_v33, 0.0 }
 0x9e8   :  { %v3702_v40 = vshrl.u32 %v7255_v34, 16  ;;  %v3705_v39 = vshll.u32 %v7255_v34, 16 }
 0x9e9   :  { %v3672_v41 = vshrl.u32 %v7253_v35, 16  ;;  %v7254_v16 = vpack.c.bf16 %v3662_v37, %v3662_v37  ;;  %v3675_v45 = vshll.u32 %v7253_v35, 16 }
 0x9ea   :  { %v3704_v44 = vrot.slane %v3702_v40, 7 }
 0x9eb   :  { %v3674_v43 = vrot.slane %v3672_v41, 7  ;;  %v3694_v47 = vshrl.u32 %v7254_v16, 16  ;;  %v3697_v53 = vshll.u32 %v7254_v16, 16 }
 0x9ec   :  { %v3707_v54 = vor.u32 %v3705_v39, %v3704_v44 }
 0x9ed   :  { %v3677_v20 = vor.u32 %v3675_v45, %v3674_v43  ;;  %v3678_v51 = vrot.slane %v3674_v43, 4  ;;  %v3696_v52 = vrot.slane %v3694_v47, 7  ;;  %v6958_v47 = vld [vmem:[#allocation41] ss:$0 sm:$0xff] }
 0x9ef   :  { %v3682_v38 = vsel %vm10002_vm11, %v3677_v20, %v3681_v48  ;;  %v3685_v56 = vsel %vm10016_vm14, %v3678_v51, %v3684_v50  ;;  %v3699_v57 = vor.u32 %v3697_v53, %v3696_v52  ;;  %v3700_v46 = vrot.slane %v3696_v52, 4  ;;  %vm10885_vm11 = vmmov %vm10881_vm6 }
 0x9f0   :  { %3683 = vst [vmem:[#allocation8] sm:$0xf] %v3682_v38  ;;  %3686 = vst [vmem:[#allocation8 + $0x4] sm:$0x1] %v3685_v56  ;;  %v8573_v56 = vld [vmem:[#allocation43] sm:$0xff]  }
 0x9f1   :  { %v3708_v60 = vsel %vm9841_vm10, %v3700_v46, %v3707_v54  ;;  %v3712_v63 = vsel %vm10033_vm2, %v3699_v57, %v3711_v55  ;;  %vm10886_vm14 = vmmov %vm10879_vm3  ;;  %v8574_v57 = vld [vmem:[#allocation43 + $0x8] sm:$0xff]   ;;  %v8575_v46 = vld [vmem:[#allocation43 + $0x20] sm:$0xff]   ;;  %vm4173_vm2 = vcmask 519171  }
 0x9f2   :  { %3713 = vst [vmem:[#allocation8 + $0x4] sm:$0xe] %v3712_v63  ;;  %v3715_v36 = vsel %vm10067_vm9, %v3708_v60, %v3714_v62  ;;  %v8576_v62 = vld [vmem:[#allocation43 + $0x10] sm:$0xff]   ;;  %v8577_v60 = vld [vmem:[#allocation43 + $0x28] sm:$0xff]   ;;  %v8578_v63 = vld [vmem:[#allocation43 + $0x18] sm:$0xff]  }
 0x9f3   :  { %3716 = vst [vmem:[#allocation8 + $0x8] sm:$0x3] %v3715_v36  ;;  %v8579_v36 = vld [vmem:[#allocation43 + $0x30] sm:$0xff]   ;;  %vm4175_vm6 = vmand %vm4173_vm2, %vm4174_vm12 }
 0x9f4   :  { %vm4157_vm3 = vmand %vm10887_vm8, %vm4156_vm7 }
 0x9f7   :  { %v3717_v17 = vld [vmem:[#allocation8] sm:$0xf] }
 0x9f8   :  { %v3976_v61 = vld [vmem:[#allocation8] sm:$0xe] }
 0x9f9   :  { %v3718_v2 = vld [vmem:[#allocation8 + $0x4] sm:$0xf] }
 0x9fa   :  { %v6914_v3 = vcombine.low %v3717_v17, %v3718_v2  ;;  %v8562_v4 = vld [vmem:[#allocation8 + $0x8] ss:$0 sps:$4 sm:$0x33]   ;;  %v6949_v58 = vcombine.low %v3976_v61, %v3718_v2  ;;  %v8582_v17 = vld [vmem:[#allocation43 + $0x38] sm:$0xff]  }
 0x9fb   :  { %v8564_v6 = vld [vmem:[#allocation8 + $0x8] ss:$0 sps:$4 sm:$0x77]  }
 0x9fc   :  { %v3765_v7 = vshll.u32 %v6914_v3, 16  ;;  %8052 = vmatprep.mubr.bf16.mxu1 %v6914_v3  ;;  %v3770_v28 = vshll.u32 %v8564_v6, 16  ;;  %v3763_v59 = vshrl.u32 %v6914_v3, 16  ;;  %v3774_v11 = vshrl.u32 %v8564_v6, 16 }
 0x9fd   :  { %8053 = vmatmul.mubr.bf16.vlgmr.msra.gmra.mrb[116].mxu1 %v8562_v4  ;;  %v3997_v49 = vrot.slane %v6949_v58, 1  ;;  %v3998_v12 = vrot.slane %v8564_v6, 1 }
 0x9fe   :  { %v3767_v29 = vrot.slane %v3765_v7, 1  ;;  %8084 = vmatprep.mubr.msk.bf16.mxu1 %vm9466_vm1, %v9464_v0  ;;  %v3772_v8 = vrot.slane %v3770_v28, 1  ;;  %8077 = vmatpush3.bf16.msra.mxu1 %v8575_v46  ;;  %v8598_v46 = vld [vmem:[%s10888_s19 + $0x60] sm:$0xff]  }
 0x9ff   :  { %v3999_v18 = vsel %vm10886_vm14, %v3997_v49, %v3998_v12  ;;  %8078 = vmatprep.subr.bf16.mxu1 %v9464_v0  ;;  %v4176_v49 = vld [vmem:[#allocation9] sm:$0x8] }
 0xa00   :  { %v3768_v9 = vor.u32 %v3767_v29, %v3763_v59  ;;  %v3776_v14 = vor.u32 %v3774_v11, %v3772_v8 }
 0xa02   :  { %v3773_v13 = vsel %vm10885_vm11, %v3768_v9, %v3772_v8  ;;  %8079 = vmatpush3.bf16.msra.mxu1 %v8577_v60  ;;  %v8600_v60 = vld [vmem:[%s10888_s19 + $0x68] sm:$0xff]   ;;  %vm4462_vm11 = vcmask 1042432  }
 0xa03   :  { %8032 = vmatprep.mubr.bf16.mxu0 %v3773_v13  ;;  %8080 = vmatprep.subr.bf16.mxu1 %v9464_v0  ;;  %vm10557_vm14 = vmand %vm4462_vm11, %vm4156_vm7 }
 0xa04   :  { %8033 = vmatmul.mubr.bf16.vlgmr.msra.gmra.mrb[100].mxu0 %v3776_v14 }
 0xa05   :  { %8057 = vmatpush3.bf16.msra.mxu0 %v10455_v5  ;;  %8072 = vmatprep.mubr.bf16.mxu0 %v3999_v18 }
 0xa06   :  { %8058 = vmatprep.subr.bf16.mxu0 %v8566_v15  ;;  %8081 = vmatpush3.bf16.msra.mxu1 %v8579_v36  ;;  %v8602_v36 = vld [vmem:[%s10888_s19 + $0x70] sm:$0xff]  }
 0xa07   :  { %8082 = vmatprep.subr.bf16.mxu1 %v9464_v0 }
 0xa09   :  { %8059 = vmatpush3.bf16.msra.mxu0 %v8566_v15 }
 0xa0a   :  { %8060 = vmatprep.subr.bf16.mxu0 %v8567_v19  ;;  %8083 = vmatpush3.bf16.msra.mxu1 %v8582_v17  ;;  %v8605_v17 = vld [vmem:[%s10888_s19 + $0x78] sm:$0xff]  }
 0xa0b   :  { %8100 = vmatprep.subr.bf16.mxu1 %v9464_v0 }
 0xa0d   :  { %8061 = vmatpush3.bf16.msra.mxu0 %v8567_v19 }
 0xa0e   :  { %8062 = vmatprep.subr.bf16.mxu0 %v8568_v21 }
 0xa11   :  { %8063 = vmatpush3.bf16.msra.mxu0 %v8568_v21 }
 0xa12   :  { %8064 = vmatprep.subr.bf16.mxu0 %v8569_v22 }
 0xa15   :  { %8065 = vmatpush3.bf16.msra.mxu0 %v8569_v22  ;;  %v4179_v22 = vld [vmem:[#allocation9 + $0x4] sm:$0x3] }
 0xa16   :  { %8066 = vmatprep.subr.bf16.mxu0 %v8570_v24 }
 0xa19   :  { %8067 = vmatpush3.bf16.msra.mxu0 %v8570_v24 }
 0xa1a   :  { %8068 = vmatprep.subr.bf16.mxu0 %v8571_v25 }
 0xa1d   :  { %8069 = vmatpush3.bf16.msra.mxu0 %v8571_v25  ;;  %v4158_v25 = vld [vmem:[#allocation9] sm:$0x7] }
 0xa1e   :  { %8070 = vmatprep.subr.bf16.mxu0 %v8572_v26 }
 0xa21   :  { %8071 = vmatpush3.bf16.msra.mxu0 %v8572_v26 }
 0xa22   :  { %8088 = vmatprep.subr.bf16.mxu0 %v9464_v0 }
 0xa24   :  { %8073 = vmatmul.mubr.bf16.vlgmr.msra.gmra.mrb[104].mxu0 %v3998_v12 }
 0xa25   :  { %8096 = vmatprep.mubr.msk.bf16.mxu0 %vm9466_vm1, %v9464_v0  ;;  %8089 = vmatpush3.bf16.msra.mxu0 %v8573_v56  ;;  %v8596_v56 = vld [vmem:[%s10888_s19 + $0x58] sm:$0xff]  }
 0xa26   :  { %8090 = vmatprep.subr.bf16.mxu0 %v9464_v0 }
 0xa29   :  { %8091 = vmatpush3.bf16.msra.mxu0 %v8574_v57  ;;  %v8597_v57 = vld [vmem:[%s10888_s19 + $0x28] sm:$0xff]  }
 0xa2a   :  { %8092 = vmatprep.subr.bf16.mxu0 %v9464_v0 }
 0xa2d   :  { %8093 = vmatpush3.bf16.msra.mxu0 %v8576_v62  ;;  %v8599_v62 = vld [vmem:[%s10888_s19 + $0x30] sm:$0xff]  }
 0xa2e   :  { %8094 = vmatprep.subr.bf16.mxu0 %v9464_v0 }
 0xa31   :  { %8095 = vmatpush3.bf16.msra.mxu0 %v8578_v63  ;;  %v8601_v63 = vld [vmem:[%s10888_s19 + $0x38] sm:$0xff]  }
 0xa32   :  { %8112 = vmatprep.subr.bf16.mxu0 %v9464_v0 }
 0xad0   :  { %v8054_v5 = vpop.f32.mrb[116].mxu1 }
 0xad1   :  { %v3962_v30 = vpop.f32.mrb[117].mxu1 }
 0xad2   :  { %v8055_v27 = vpop.f32.mrb[118].mxu1 }
 0xad3   :  { %v3965_v32 = vpop.f32.mrb[119].mxu1 }
 0xad7   :  { %v8034_v33 = vpop.f32.mrb[100].mxu0 }
 0xad8   :  { %v3971_v34 = vadd.f32 %v8054_v5, %v8034_v33  ;;  %v3861_v35 = vpop.f32.mrb[101].mxu0 }
 0xad9   :  { %v3963_v37 = vadd.f32 %v3962_v30, %v3861_v35  ;;  %v8035_v40 = vpop.f32.mrb[102].mxu0 }
 0xada   :  { %v3864_v41 = vpop.f32.mrb[103].mxu0 }
 0xadb   :  { %v3966_v16 = vadd.f32 %v3965_v32, %v3864_v41 }
 0xaf7   :  { %v8074_v44 = vpop.f32.mrb[104].mxu0 }
 0xaf8   :  { %v4100_v43 = vadd.f32 %v8074_v44, %v3971_v34  ;;  %v4084_v45 = vpop.f32.mrb[105].mxu0 }
 0xaf9   :  { %v4098_v39 = vadd.f32 %v4084_v45, %v3963_v37  ;;  %v8075_v48 = vpop.f32.mrb[106].mxu0 }
 0xafa   :  { %v4087_v50 = vpop.f32.mrb[107].mxu0  ;;  %v4110_v54 = vadd.f32 %v6958_v47, %v4100_v43  ;;  %v8585_v43 = vld [vmem:[#allocation43 + $0x50] sm:$0xff]  }
 0xafb   :  { %v4099_v20 = vadd.f32 %v4087_v50, %v3966_v16  ;;  %v4108_v51 = vadd.f32 %v6958_v47, %v4098_v39  ;;  %v8583_v16 = vld [vmem:[#allocation43 + $0x40] sm:$0xff]  }
 0xafc   :  { %v4113_v38 = vmax.f32 %v4110_v54, 0.0  ;;  %v8588_v50 = vld [vmem:[%s10888_s19] sm:$0xff]   ;;  %v8593_v54 = vld [vmem:[%s10888_s19 + $0x18] sm:$0xff]  }
 0xafd   :  { %v4111_v52 = vmax.f32 %v4108_v51, 0.0  ;;  %v4109_v53 = vadd.f32 %v6958_v47, %v4099_v20  ;;  %v8586_v47 = vld [vmem:[#allocation43 + $0x58] sm:$0xff]   ;;  %v8589_v20 = vld [vmem:[%s10888_s19 + $0x8] sm:$0xff]  }
 0xafe   :  { %v8590_v51 = vld [vmem:[%s10888_s19 + $0x40] sm:$0xff]  }
 0xaff   :  { %4117 = vrot.lane.b32.xlu0 %v4111_v52, %s9434_s15  ;;  %v4112_v55 = vmax.f32 %v4109_v53, 0.0  ;;  %v8592_v53 = vld [vmem:[%s10888_s19 + $0x48] sm:$0xff]  }
 0xb01   :  { %4119 = vrot.lane.b32.xlu1 %v4112_v55, %s9434_s15 }
 0xb03   :  { %4121 = vrot.lane.b32.xlu0 %v4113_v38, %s9434_s15 }
 0xb71   :  { %v4118_v2 = vpop.permute.xlu0 %4117 }
 0xb72   :  { %v4126_v61 = vmax.f32 %v4111_v52, %v4118_v2  ;;  %v8591_v52 = vld [vmem:[%s10888_s19 + $0x10] sm:$0xff]  }
 0xb73   :  { %v4120_v3 = vpop.permute.xlu1 %4119 }
 0xb74   :  { %4129 = vst.msk [vmem:[#allocation17] sm:$0xff] %vm1809_vm0, %v4126_v61  ;;  %v4127_v4 = vmax.f32 %v4112_v55, %v4120_v3  ;;  %v8594_v55 = vld [vmem:[%s10888_s19 + $0x50] sm:$0xff]  }
 0xb75   :  { %v4122_v6 = vpop.permute.xlu0 %4121 }
 0xb76   :  { %4130 = vst.msk [vmem:[#allocation17 + $0x8] sm:$0xff] %vm1809_vm0, %v4127_v4  ;;  %v4128_v7 = vmax.f32 %v4113_v38, %v4122_v6  ;;  %v8595_v38 = vld [vmem:[%s10888_s19 + $0x20] sm:$0xff]  }
 0xb78   :  { %4131 = vst.msk [vmem:[#allocation17 + $0x10] sm:$0xf] %vm1818_vm15, %v4128_v7 }
 0xb7d   :  { %v4132_v58 = vld [vmem:[#allocation17] ss:$2 sm:$0xff]  ;;  %v4136_v28 = vld [vmem:[#allocation17 + $0x1] ss:$2 sm:$0xff] }
 0xb7e   :  { %v4139_v59 = vmax.f32 %v4132_v58, %v4136_v28 }
 0xb7f   :  { %v4134_v29 = vld [vmem:[#allocation17 + $0x10] ss:$2 sm:$0x3]  ;;  %v4138_v8 = vld [vmem:[#allocation17 + $0x11] ss:$2 sm:$0x3] }
 0xb80   :  { %v7256_v9 = vpack.c.bf16 %v4139_v59, %v4139_v59  ;;  %v4140_v11 = vmax.f32 %v4134_v29, %v4138_v8 }
 0xb82   :  { %v4148_v12 = vshrl.u32 %v7256_v9, 16  ;;  %v4167_v13 = vrot.slane %v7256_v9, 7  ;;  %v7258_v14 = vpack.c.bf16 %v4140_v11, %v4140_v11  ;;  %v4151_v15 = vshll.u32 %v7256_v9, 16  ;;  %v6980_v9 = vld [vmem:[#allocation44] ss:$0 sm:$0xff] }
 0xb84   :  { %v4150_v18 = vrot.slane %v4148_v12, 7  ;;  %v4168_v19 = vrot.slane %v4167_v13, 4  ;;  %v4177_v21 = vsel %vm4175_vm6, %v4167_v13, %v4176_v49  ;;  %v4169_v24 = vrot.slane %v7258_v14, 7 }
 0xb85   :  { %4178 = vst [vmem:[#allocation9] sm:$0x8] %v4177_v21  ;;  %vm6629_vm6 = vcmask 75778  }
 0xb86   :  { %v4153_v26 = vor.u32 %v4151_v15, %v4150_v18  ;;  %v4170_v5 = vsel %vm10279_vm13, %v4168_v19, %v4169_v24  ;;  %vm4490_vm13 = vcmask 1043459  }
 0xb87   :  { %v4180_v30 = vsel %vm10291_vm5, %v4170_v5, %v4179_v22  ;;  %vm10550_vm5 = vmand %vm4490_vm13, %vm4174_vm12  ;;  %vm5287_vm12 = vsmask.f32 1282 }
 0xb88   :  { %4181 = vst [vmem:[#allocation9 + $0x4] sm:$0x3] %v4180_v30  ;;  %v4159_v27 = vsel %vm4157_vm3, %v4153_v26, %v4158_v25  ;;  %v4492_v25 = vld [vmem:[#allocation10] sm:$0x8] }
 0xb89   :  { %4160 = vst [vmem:[#allocation9] sm:$0x7] %v4159_v27 }
 0xb8f   :  { %v4183_v32 = vld [vmem:[#allocation9 + $0x4] sm:$0x3] }
 0xb90   :  { %v4192_v33 = vld [vmem:[#allocation9 + $0x4] sm:$0x7]  ;;  %v4182_v34 = vld [vmem:[#allocation9] sm:$0xf] }
 0xb91   :  { %v6962_v35 = vcombine.low %v4182_v34, %v4192_v33  ;;  %v6968_v37 = vcombine.low %v4182_v34, %v4183_v32  ;;  %v4353_v45 = vld [vmem:[#allocation9] sm:$0xe] }
 0xb92   :  { %v6974_v39 = vcombine.low %v4353_v45, %v4192_v33 }
 0xb93   :  { %8097 = vmatmul.mubr.msk.bf16.vlgmr.msra.gmra.mrb[108].mxu0 %vm1809_vm0, %v6968_v37  ;;  %v4210_v40 = vshll.u32 %v6962_v35, 16  ;;  %v4208_v41 = vshrl.u32 %v6962_v35, 16  ;;  %v4464_v35 = vld [vmem:[#allocation10] sm:$0x7] }
 0xb94   :  { %8128 = vmatprep.mubr.msk.bf16.mxu0 %vm9466_vm1, %v9464_v0  ;;  %v4366_v48 = vrot.slane %v6974_v39, 1  ;;  %8113 = vmatpush3.bf16.msra.mxu0 %v8590_v51 }
 0xb95   :  { %v4212_v42 = vrot.slane %v4210_v40, 1  ;;  %8114 = vmatprep.subr.bf16.mxu0 %v9464_v0 }
 0xb97   :  { %v4213_v44 = vor.u32 %v4212_v42, %v4208_v41 }
 0xb98   :  { %8115 = vmatpush3.bf16.msra.mxu0 %v8592_v53 }
 0xb99   :  { %8085 = vmatmul.mubr.msk.bf16.vlgmr.msra.gmra.mrb[120].mxu1 %vm1809_vm0, %v4213_v44  ;;  %8116 = vmatprep.subr.bf16.mxu0 %v9464_v0 }
 0xb9a   :  { %8101 = vmatpush3.bf16.msra.mxu1 %v8583_v16  ;;  %8108 = vmatprep.mubr.msk.bf16.mxu1 %vm9466_vm1, %v9464_v0 }
 0xb9b   :  { %8102 = vmatprep.subr.bf16.mxu1 %v9464_v0 }
 0xb9c   :  { %8117 = vmatpush3.bf16.msra.mxu0 %v8594_v55 }
 0xb9d   :  { %8118 = vmatprep.subr.bf16.mxu0 %v9464_v0 }
 0xb9e   :  { %8103 = vmatpush3.bf16.msra.mxu1 %v8584_v10  ;;  %v4495_v10 = vld [vmem:[#allocation10 + $0x4] sm:$0x3] }
 0xb9f   :  { %8104 = vmatprep.subr.bf16.mxu1 %v9464_v0 }
 0xba0   :  { %8119 = vmatpush3.bf16.msra.mxu0 %v8596_v56  ;;  %v8608_v56 = vld [vmem:[%s10888_s19 + $0x90] sm:$0xff]  }
 0xba1   :  { %8120 = vmatprep.subr.bf16.mxu0 %v9464_v0 }
 0xba2   :  { %8105 = vmatpush3.bf16.msra.mxu1 %v8585_v43 }
 0xba3   :  { %8106 = vmatprep.subr.bf16.mxu1 %v9464_v0 }
 0xba4   :  { %8121 = vmatpush3.bf16.msra.mxu0 %v8598_v46  ;;  %v8610_v46 = vld [vmem:[%s10888_s19 + $0xa0] sm:$0xff]  }
 0xba5   :  { %8122 = vmatprep.subr.bf16.mxu0 %v9464_v0 }
 0xba6   :  { %8107 = vmatpush3.bf16.msra.mxu1 %v8586_v47 }
 0xba7   :  { %8132 = vmatprep.subr.bf16.mxu1 %v9464_v0 }
 0xba8   :  { %8123 = vmatpush3.bf16.msra.mxu0 %v8600_v60  ;;  %v8612_v60 = vld [vmem:[%s10888_s19 + $0xb0] sm:$0xff]  }
 0xba9   :  { %8109 = vmatmul.mubr.msk.bf16.vlgmr.msra.gmra.mrb[124].mxu1 %vm1809_vm0, %v4366_v48  ;;  %8124 = vmatprep.subr.bf16.mxu0 %v9464_v0 }
 0xbaa   :  { %8148 = vmatprep.mubr.msk.bf16.mxu1 %vm9466_vm1, %v9464_v0  ;;  %8133 = vmatpush3.bf16.msra.mxu1 %v8588_v50 }
 0xbab   :  { %8134 = vmatprep.subr.bf16.mxu1 %v9464_v0 }
 0xbac   :  { %8125 = vmatpush3.bf16.msra.mxu0 %v8602_v36 }
 0xbad   :  { %8126 = vmatprep.subr.bf16.mxu0 %v9464_v0 }
 0xbae   :  { %8135 = vmatpush3.bf16.msra.mxu1 %v8589_v20 }
 0xbaf   :  { %8136 = vmatprep.subr.bf16.mxu1 %v9464_v0 }
 0xbb0   :  { %8127 = vmatpush3.bf16.msra.mxu0 %v8605_v17 }
 0xbb1   :  { %8152 = vmatprep.subr.bf16.mxu0 %v9464_v0 }
 0xbb2   :  { %8137 = vmatpush3.bf16.msra.mxu1 %v8591_v52 }
 0xbb3   :  { %8138 = vmatprep.subr.bf16.mxu1 %v9464_v0 }
 0xbb6   :  { %8139 = vmatpush3.bf16.msra.mxu1 %v8593_v54  ;;  %v8606_v54 = vld [vmem:[%s10888_s19 + $0x80] sm:$0xff]  }
 0xbb7   :  { %8140 = vmatprep.subr.bf16.mxu1 %v9464_v0 }
 0xbba   :  { %8141 = vmatpush3.bf16.msra.mxu1 %v8595_v38  ;;  %v8607_v38 = vld [vmem:[%s10888_s19 + $0x88] sm:$0xff]  }
 0xbbb   :  { %8142 = vmatprep.subr.bf16.mxu1 %v9464_v0 }
 0xbbe   :  { %8143 = vmatpush3.bf16.msra.mxu1 %v8597_v57  ;;  %v8609_v57 = vld [vmem:[%s10888_s19 + $0x98] sm:$0xff]  }
 0xbbf   :  { %8144 = vmatprep.subr.bf16.mxu1 %v9464_v0 }
 0xbc2   :  { %8145 = vmatpush3.bf16.msra.mxu1 %v8599_v62  ;;  %v8611_v62 = vld [vmem:[%s10888_s19 + $0xa8] sm:$0xff]  }
 0xbc3   :  { %8146 = vmatprep.subr.bf16.mxu1 %v9464_v0 }
 0xbc6   :  { %8147 = vmatpush3.bf16.msra.mxu1 %v8601_v63  ;;  %v8613_v63 = vld [vmem:[%s10888_s19 + $0xb8] sm:$0xff]  }
 0xbc7   :  { %8172 = vmatprep.subr.bf16.mxu1 %v9464_v0 }
 0xc66   :  { %v4346_v2 = vpop.f32.mrb[108].mxu0 }
 0xc67   :  { %v8098_v61 = vpop.f32.mrb[109].mxu0 }
 0xc68   :  { %v4349_v3 = vpop.f32.mrb[110].mxu0  ;;  %v8615_v61 = vld [vmem:[%s10893_s25] sm:$0xff]  }
 0xc69   :  { %v8099_v4 = vpop.f32.mrb[111].mxu0 }
 0xc6a   :  { %v8617_v4 = vld [vmem:[%s10893_s25 + $0x40] sm:$0xff]  }
 0xc6c   :  { %v4275_v6 = vpop.f32.mrb[120].mxu1 }
 0xc6d   :  { %v4347_v7 = vadd.f32 %v4346_v2, %v4275_v6  ;;  %v8086_v58 = vpop.f32.mrb[121].mxu1  ;;  %v8618_v6 = vld [vmem:[%s10893_s25 + $0x10] sm:$0xff]  }
 0xc6e   :  { %v4278_v28 = vpop.f32.mrb[122].mxu1  ;;  %v8620_v58 = vld [vmem:[%s10893_s25 + $0x18] sm:$0xff]  }
 0xc6f   :  { %v4350_v59 = vadd.f32 %v4349_v3, %v4278_v28  ;;  %v8087_v29 = vpop.f32.mrb[123].mxu1  ;;  %v8616_v3 = vld [vmem:[%s10893_s25 + $0x8] sm:$0xff]   ;;  %v8621_v28 = vld [vmem:[%s10893_s25 + $0x50] sm:$0xff]  }
 0xc70   :  { %v8623_v29 = vld [vmem:[%s10893_s25 + $0x58] sm:$0xff]  }
 0xc7c   :  { %v4428_v8 = vpop.f32.mrb[124].mxu1 }
 0xc7d   :  { %v4435_v11 = vadd.f32 %v4428_v8, %v4347_v7  ;;  %v8110_v49 = vpop.f32.mrb[125].mxu1  ;;  %v8619_v7 = vld [vmem:[%s10893_s25 + $0x48] sm:$0xff]  }
 0xc7e   :  { %v4431_v12 = vpop.f32.mrb[126].mxu1  ;;  %v8624_v8 = vld [vmem:[%s10893_s25 + $0x28] sm:$0xff]  }
 0xc7f   :  { %v4444_v13 = vadd.f32 %v6980_v9, %v4435_v11  ;;  %v4436_v14 = vadd.f32 %v4431_v12, %v4350_v59  ;;  %v8111_v15 = vpop.f32.mrb[127].mxu1  ;;  %v8622_v59 = vld [vmem:[%s10893_s25 + $0x20] sm:$0xff]   ;;  %v8626_v11 = vld [vmem:[%s10893_s25 + $0x30] sm:$0xff]   ;;  %v8627_v49 = vld [vmem:[%s10893_s25 + $0x68] sm:$0xff]  }
 0xc80   :  { %v8628_v12 = vld [vmem:[%s10893_s25 + $0x38] sm:$0xff]  }
 0xc81   :  { %v4446_v18 = vmax.f32 %v4444_v13, 0.0  ;;  %v4445_v19 = vadd.f32 %v6980_v9, %v4436_v14  ;;  %v8625_v9 = vld [vmem:[%s10893_s25 + $0x60] sm:$0xff]   ;;  %v8629_v13 = vld [vmem:[%s10893_s25 + $0x70] sm:$0xff]   ;;  %v8632_v14 = vld [vmem:[%s10893_s25 + $0x78] sm:$0xff]  }
 0xc83   :  { %v7259_v21 = vpack.c.bf16 %v4446_v18, %v4446_v18  ;;  %v4447_v22 = vmax.f32 %v4445_v19, 0.0 }
 0xc85   :  { %v4455_v26 = vshrl.u32 %v7259_v21, 16  ;;  %v4458_v5 = vshll.u32 %v7259_v21, 16  ;;  %v7261_v30 = vpack.c.bf16 %v4447_v22, %v4447_v22 }
 0xc87   :  { %v4457_v27 = vrot.slane %v4455_v26, 7  ;;  %v4493_v32 = vsel %vm10550_vm5, %v4458_v5, %v4492_v25  ;;  %v4481_v33 = vshrl.u32 %v7261_v30, 16  ;;  %v4484_v41 = vshll.u32 %v7261_v30, 16 }
 0xc88   :  { %4494 = vst [vmem:[#allocation10] sm:$0x8] %v4493_v32  ;;  %v6984_v16 = vrot.slane %v4455_v26, 11 }
 0xc89   :  { %v4460_v37 = vor.u32 %v4458_v5, %v4457_v27  ;;  %v4483_v40 = vrot.slane %v4481_v33, 7  ;;  %v7044_v33 = vld [vmem:[#allocation46] ss:$0 sm:$0xff] }
 0xc8b   :  { %v4465_v42 = vsel %vm10557_vm14, %v4460_v37, %v4464_v35  ;;  %v4486_v44 = vor.u32 %v4484_v41, %v4483_v40 }
 0xc8c   :  { %4466 = vst [vmem:[#allocation10] sm:$0x7] %v4465_v42 }
 0xc8d   :  { %v4487_v43 = vsel %vm9841_vm10, %v6984_v16, %v4486_v44 }
 0xc8e   :  { %v4496_v45 = vsel %vm10067_vm9, %v4487_v43, %v4495_v10 }
 0xc8f   :  { %4497 = vst [vmem:[#allocation10 + $0x4] sm:$0x3] %v4496_v45 }
 0xc93   :  { %v4498_v47 = vld [vmem:[#allocation10] sm:$0xf] }
 0xc94   :  { %v4729_v36 = vld [vmem:[#allocation10] sm:$0xe] }
 0xc96   :  { %v4499_v39 = vld [vmem:[#allocation10 + $0x4] sm:$0x3] }
 0xc97   :  { %v4516_v48 = vld [vmem:[#allocation10 + $0x4] sm:$0x7]  ;;  %v7010_v20 = vcombine.low %v4498_v47, %v4499_v39 }
 0xc98   :  { %v7001_v50 = vcombine.low %v4498_v47, %v4516_v48  ;;  %v7035_v17 = vcombine.low %v4729_v36, %v4516_v48  ;;  %v4894_v47 = vld [vmem:[#allocation11] sm:$0x8] }
 0xc99   :  { %8149 = vmatmul.mubr.bf16.vlgmr.msra.gmra.mrb[128].mxu1 %v7010_v20 }
 0xc9a   :  { %v4542_v51 = vshll.u32 %v7001_v50, 16  ;;  %8188 = vmatprep.mubr.msk.bf16.mxu1 %vm9466_vm1, %v9464_v0  ;;  %v4540_v52 = vshrl.u32 %v7001_v50, 16  ;;  %v4750_v2 = vrot.slane %v7035_v17, 1  ;;  %8173 = vmatpush3.bf16.msra.mxu1 %v8617_v4  ;;  %v8633_v4 = vld [vmem:[%s10893_s25 + $0x80] sm:$0xff]  }
 0xc9b   :  { %8174 = vmatprep.subr.bf16.mxu1 %v9464_v0 }
 0xc9c   :  { %v4544_v53 = vrot.slane %v4542_v51, 1 }
 0xc9e   :  { %v4545_v55 = vor.u32 %v4544_v53, %v4540_v52  ;;  %8175 = vmatpush3.bf16.msra.mxu1 %v8619_v7  ;;  %v4868_v53 = vld [vmem:[#allocation11] sm:$0x7]  ;;  %v8635_v7 = vld [vmem:[%s10893_s25 + $0x90] sm:$0xff]  }
 0xc9f   :  { %8176 = vmatprep.subr.bf16.mxu1 %v9464_v0 }
 0xca0   :  { %8129 = vmatmul.mubr.bf16.vlgmr.msra.gmra.mrb[112].mxu0 %v4545_v55 }
 0xca1   :  { %8153 = vmatpush3.bf16.msra.mxu0 %v8606_v54  ;;  %8168 = vmatprep.mubr.msk.bf16.mxu0 %vm9466_vm1, %v9464_v0 }
 0xca2   :  { %8154 = vmatprep.subr.bf16.mxu0 %v9464_v0  ;;  %8177 = vmatpush3.bf16.msra.mxu1 %v8621_v28  ;;  %v8637_v28 = vld [vmem:[%s10893_s25 + $0xa0] sm:$0xff]  }
 0xca3   :  { %8178 = vmatprep.subr.bf16.mxu1 %v9464_v0 }
 0xca5   :  { %8155 = vmatpush3.bf16.msra.mxu0 %v8607_v38 }
 0xca6   :  { %8156 = vmatprep.subr.bf16.mxu0 %v9464_v0  ;;  %8179 = vmatpush3.bf16.msra.mxu1 %v8623_v29  ;;  %v8639_v29 = vld [vmem:[%s10893_s25 + $0xb0] sm:$0xff]  }
 0xca7   :  { %8180 = vmatprep.subr.bf16.mxu1 %v9464_v0 }
 0xca9   :  { %8157 = vmatpush3.bf16.msra.mxu0 %v8608_v56 }
 0xcaa   :  { %8158 = vmatprep.subr.bf16.mxu0 %v9464_v0  ;;  %8181 = vmatpush3.bf16.msra.mxu1 %v8625_v9 }
 0xcab   :  { %8182 = vmatprep.subr.bf16.mxu1 %v9464_v0 }
 0xcad   :  { %8159 = vmatpush3.bf16.msra.mxu0 %v8609_v57 }
 0xcae   :  { %8160 = vmatprep.subr.bf16.mxu0 %v9464_v0  ;;  %8183 = vmatpush3.bf16.msra.mxu1 %v8627_v49 }
 0xcaf   :  { %8184 = vmatprep.subr.bf16.mxu1 %v9464_v0 }
 0xcb1   :  { %8161 = vmatpush3.bf16.msra.mxu0 %v8610_v46 }
 0xcb2   :  { %8162 = vmatprep.subr.bf16.mxu0 %v9464_v0  ;;  %8185 = vmatpush3.bf16.msra.mxu1 %v8629_v13 }
 0xcb3   :  { %8186 = vmatprep.subr.bf16.mxu1 %v9464_v0 }
 0xcb5   :  { %8163 = vmatpush3.bf16.msra.mxu0 %v8611_v62  ;;  %v4897_v62 = vld [vmem:[#allocation11 + $0x4] sm:$0x3] }
 0xcb6   :  { %8164 = vmatprep.subr.bf16.mxu0 %v9464_v0  ;;  %8187 = vmatpush3.bf16.msra.mxu1 %v8632_v14 }
 0xcb7   :  { %8212 = vmatprep.subr.bf16.mxu1 %v9464_v0 }
 0xcb9   :  { %8165 = vmatpush3.bf16.msra.mxu0 %v8612_v60 }
 0xcba   :  { %8166 = vmatprep.subr.bf16.mxu0 %v9464_v0 }
 0xcbd   :  { %8167 = vmatpush3.bf16.msra.mxu0 %v8613_v63 }
 0xcbe   :  { %8192 = vmatprep.subr.bf16.mxu0 %v9464_v0 }
 0xcc0   :  { %8169 = vmatmul.mubr.bf16.vlgmr.msra.gmra.mrb[116].mxu0 %v4750_v2 }
 0xcc1   :  { %8208 = vmatprep.mubr.msk.bf16.mxu0 %vm9466_vm1, %v9464_v0  ;;  %8193 = vmatpush3.bf16.msra.mxu0 %v8615_v61 }
 0xcc2   :  { %8194 = vmatprep.subr.bf16.mxu0 %v9464_v0 }
 0xcc5   :  { %8195 = vmatpush3.bf16.msra.mxu0 %v8616_v3 }
 0xcc6   :  { %8196 = vmatprep.subr.bf16.mxu0 %v9464_v0 }
 0xcc9   :  { %8197 = vmatpush3.bf16.msra.mxu0 %v8618_v6  ;;  %v8634_v6 = vld [vmem:[%s10893_s25 + $0x88] sm:$0xff]  }
 0xcca   :  { %8198 = vmatprep.subr.bf16.mxu0 %v9464_v0 }
 0xccd   :  { %8199 = vmatpush3.bf16.msra.mxu0 %v8620_v58  ;;  %v8636_v58 = vld [vmem:[%s10893_s25 + $0x98] sm:$0xff]  }
 0xcce   :  { %8200 = vmatprep.subr.bf16.mxu0 %v9464_v0 }
 0xcd1   :  { %8201 = vmatpush3.bf16.msra.mxu0 %v8622_v59  ;;  %v8638_v59 = vld [vmem:[%s10893_s25 + $0xa8] sm:$0xff]  }
 0xcd2   :  { %8202 = vmatprep.subr.bf16.mxu0 %v9464_v0 }
 0xcd5   :  { %8203 = vmatpush3.bf16.msra.mxu0 %v8624_v8  ;;  %v8640_v8 = vld [vmem:[%s10893_s25 + $0xb8] sm:$0xff]  }
 0xcd6   :  { %8204 = vmatprep.subr.bf16.mxu0 %v9464_v0 }
 0xcd9   :  { %8205 = vmatpush3.bf16.msra.mxu0 %v8626_v11 }
 0xcda   :  { %8206 = vmatprep.subr.bf16.mxu0 %v9464_v0 }
 0xcdd   :  { %8207 = vmatpush3.bf16.msra.mxu0 %v8628_v12 }
 0xcde   :  { %8232 = vmatprep.subr.bf16.mxu0 %v9464_v0 }
 0xd6c   :  { %v4722_v15 = vpop.f32.mrb[128].mxu1 }
 0xd6d   :  { %v8150_v18 = vpop.f32.mrb[129].mxu1 }
 0xd6e   :  { %v4725_v19 = vpop.f32.mrb[130].mxu1 }
 0xd6f   :  { %v8151_v21 = vpop.f32.mrb[131].mxu1 }
 0xd73   :  { %v4629_v22 = vpop.f32.mrb[112].mxu0 }
 0xd74   :  { %v4723_v25 = vadd.f32 %v4722_v15, %v4629_v22  ;;  %v8130_v26 = vpop.f32.mrb[113].mxu0 }
 0xd75   :  { %v4632_v5 = vpop.f32.mrb[114].mxu0 }
 0xd76   :  { %v4726_v30 = vadd.f32 %v4725_v19, %v4632_v5  ;;  %v8131_v27 = vpop.f32.mrb[115].mxu0 }
 0xd93   :  { %v4834_v32 = vpop.f32.mrb[116].mxu0 }
 0xd94   :  { %v4841_v35 = vadd.f32 %v4834_v32, %v4723_v25  ;;  %v8170_v37 = vpop.f32.mrb[117].mxu0 }
 0xd95   :  { %v4837_v40 = vpop.f32.mrb[118].mxu0 }
 0xd96   :  { %v4850_v41 = vadd.f32 %v7044_v33, %v4841_v35  ;;  %v4842_v42 = vadd.f32 %v4837_v40, %v4726_v30  ;;  %v8171_v16 = vpop.f32.mrb[119].mxu0  ;;  %v7108_v30 = vld [vmem:[#allocation47] ss:$0 sm:$0xff] }
 0xd98   :  { %v4852_v44 = vmax.f32 %v4850_v41, 0.0  ;;  %v4851_v10 = vadd.f32 %v7044_v33, %v4842_v42 }
 0xd9a   :  { %v7262_v43 = vpack.c.bf16 %v4852_v44, %v4852_v44  ;;  %v4853_v45 = vmax.f32 %v4851_v10, 0.0  ;;  %v8642_v44 = vld [vmem:[#allocation49] sm:$0xff]   ;;  %v8643_v10 = vld [vmem:[#allocation49 + $0x8] sm:$0xff]  }
 0xd9c   :  { %v4861_v39 = vshrl.u32 %v7262_v43, 16  ;;  %v4864_v48 = vshll.u32 %v7262_v43, 16  ;;  %v7264_v50 = vpack.c.bf16 %v4853_v45, %v4853_v45  ;;  %v8644_v43 = vld [vmem:[#allocation49 + $0x20] sm:$0xff]   ;;  %v8645_v45 = vld [vmem:[#allocation49 + $0x10] sm:$0xff]  }
 0xd9e   :  { %v4863_v20 = vrot.slane %v4861_v39, 7  ;;  %v4895_v51 = vsel %vm10550_vm5, %v4864_v48, %v4894_v47  ;;  %v4885_v52 = vshrl.u32 %v7264_v50, 16  ;;  %v4888_v38 = vshll.u32 %v7264_v50, 16  ;;  %v8646_v47 = vld [vmem:[#allocation49 + $0x28] sm:$0xff]   ;;  %v8651_v50 = vld [vmem:[#allocation49 + $0x38] sm:$0xff]  }
 0xd9f   :  { %4896 = vst [vmem:[#allocation11] sm:$0x8] %v4895_v51  ;;  %v7048_v57 = vrot.slane %v4861_v39, 11  ;;  %v8647_v39 = vld [vmem:[#allocation49 + $0x18] sm:$0xff]  }
 0xda0   :  { %v4866_v54 = vor.u32 %v4864_v48, %v4863_v20  ;;  %v4887_v55 = vrot.slane %v4885_v52, 7  ;;  %v8648_v48 = vld [vmem:[#allocation49 + $0x30] sm:$0xff]  }
 0xda2   :  { %v4869_v56 = vsel %vm10557_vm14, %v4866_v54, %v4868_v53  ;;  %v4890_v46 = vor.u32 %v4888_v38, %v4887_v55 }
 0xda3   :  { %4870 = vst [vmem:[#allocation11] sm:$0x7] %v4869_v56 }
 0xda4   :  { %v4891_v60 = vsel %vm9841_vm10, %v7048_v57, %v4890_v46  ;;  %vm5294_vm10 = vcmask 519170   ;;  %v5297_v46 = vld [vmem:[#allocation12] sm:$0xc]  ;;  %v8682_v57 = vld [vmem:[#allocation55 + $0x50] sm:$0xff]  }
 0xda5   :  { %v4898_v24 = vsel %vm10067_vm9, %v4891_v60, %v4897_v62  ;;  %vm5295_vm9 = vsmask.f32 3338 }
 0xda6   :  { %4899 = vst [vmem:[#allocation11 + $0x4] sm:$0x3] %v4898_v24  ;;  %vm10663_vm2 = vmand %vm5294_vm10, %vm5295_vm9 }
 0xdaa   :  { %v4900_v63 = vld [vmem:[#allocation11] sm:$0xf] }
 0xdab   :  { %v5131_v9 = vld [vmem:[#allocation11] sm:$0xe] }
 0xdad   :  { %v4901_v36 = vld [vmem:[#allocation11 + $0x4] sm:$0x3] }
 0xdae   :  { %v4918_v17 = vld [vmem:[#allocation11 + $0x4] sm:$0x7]  ;;  %v7074_v34 = vcombine.low %v4900_v63, %v4901_v36 }
 0xdaf   :  { %v7065_v2 = vcombine.low %v4900_v63, %v4918_v17  ;;  %v7099_v11 = vcombine.low %v5131_v9, %v4918_v17  ;;  %v8655_v9 = vld [vmem:[#allocation49 + $0x58] sm:$0xff]   ;;  %v8681_v17 = vld [vmem:[#allocation55 + $0x48] sm:$0xff]  }
 0xdb0   :  { %8209 = vmatmul.mubr.bf16.vlgmr.msra.gmra.mrb[120].mxu0 %v7074_v34 }
 0xdb1   :  { %v4944_v61 = vshll.u32 %v7065_v2, 16  ;;  %8240 = vmatprep.mubr.msk.bf16.mxu0 %vm9466_vm1, %v9464_v0  ;;  %v4942_v3 = vshrl.u32 %v7065_v2, 16  ;;  %v5152_v49 = vrot.slane %v7099_v11, 1  ;;  %8233 = vmatpush3.bf16.msra.mxu0 %v8644_v43  ;;  %v5289_v2 = vld [vmem:[#allocation12] sm:$0x3] }
 0xdb2   :  { %8234 = vmatprep.subr.bf16.mxu0 %v9464_v0 }
 0xdb3   :  { %v4946_v23 = vrot.slane %v4944_v61, 1 }
 0xdb5   :  { %v4947_v31 = vor.u32 %v4946_v23, %v4942_v3  ;;  %8235 = vmatpush3.bf16.msra.mxu0 %v8646_v47  ;;  %v5309_v3 = vld [vmem:[#allocation12 + $0x4] sm:$0x1] }
 0xdb6   :  { %8236 = vmatprep.subr.bf16.mxu0 %v9464_v0 }
 0xdb7   :  { %8189 = vmatmul.mubr.bf16.vlgmr.msra.gmra.mrb[132].mxu1 %v4947_v31 }
 0xdb8   :  { %8213 = vmatpush3.bf16.msra.mxu1 %v8633_v4  ;;  %8228 = vmatprep.mubr.msk.bf16.mxu1 %vm9466_vm1, %v9464_v0 }
 0xdb9   :  { %8214 = vmatprep.subr.bf16.mxu1 %v9464_v0  ;;  %8237 = vmatpush3.bf16.msra.mxu0 %v8648_v48 }
 0xdba   :  { %8238 = vmatprep.subr.bf16.mxu0 %v9464_v0 }
 0xdbc   :  { %8215 = vmatpush3.bf16.msra.mxu1 %v8634_v6 }
 0xdbd   :  { %8216 = vmatprep.subr.bf16.mxu1 %v9464_v0  ;;  %8239 = vmatpush3.bf16.msra.mxu0 %v8651_v50 }
 0xdbe   :  { %8256 = vmatprep.subr.bf16.mxu0 %v9464_v0 }
 0xdc0   :  { %8217 = vmatpush3.bf16.msra.mxu1 %v8635_v7 }
 0xdc1   :  { %8218 = vmatprep.subr.bf16.mxu1 %v9464_v0 }
 0xdc4   :  { %8219 = vmatpush3.bf16.msra.mxu1 %v8636_v58  ;;  %v8652_v58 = vld [vmem:[#allocation49 + $0x40] sm:$0xff]  }
 0xdc5   :  { %8220 = vmatprep.subr.bf16.mxu1 %v9464_v0 }
 0xdc8   :  { %8221 = vmatpush3.bf16.msra.mxu1 %v8637_v28 }
 0xdc9   :  { %8222 = vmatprep.subr.bf16.mxu1 %v9464_v0 }
 0xdcc   :  { %8223 = vmatpush3.bf16.msra.mxu1 %v8638_v59  ;;  %v8653_v59 = vld [vmem:[#allocation49 + $0x48] sm:$0xff]  }
 0xdcd   :  { %8224 = vmatprep.subr.bf16.mxu1 %v9464_v0 }
 0xdd0   :  { %8225 = vmatpush3.bf16.msra.mxu1 %v8639_v29  ;;  %v8654_v29 = vld [vmem:[#allocation49 + $0x50] sm:$0xff]  }
 0xdd1   :  { %8226 = vmatprep.subr.bf16.mxu1 %v9464_v0 }
 0xdd4   :  { %8227 = vmatpush3.bf16.msra.mxu1 %v8640_v8 }
 0xdd5   :  { %8244 = vmatprep.subr.bf16.mxu1 %v9464_v0 }
 0xdd7   :  { %8229 = vmatmul.mubr.bf16.vlgmr.msra.gmra.mrb[136].mxu1 %v5152_v49 }
 0xdd8   :  { %8252 = vmatprep.mubr.msk.bf16.mxu1 %vm9466_vm1, %v9464_v0  ;;  %8245 = vmatpush3.bf16.msra.mxu1 %v8642_v44 }
 0xdd9   :  { %8246 = vmatprep.subr.bf16.mxu1 %v9464_v0 }
 0xddc   :  { %8247 = vmatpush3.bf16.msra.mxu1 %v8643_v10 }
 0xddd   :  { %8248 = vmatprep.subr.bf16.mxu1 %v9464_v0 }
 0xde0   :  { %8249 = vmatpush3.bf16.msra.mxu1 %v8645_v45 }
 0xde1   :  { %8250 = vmatprep.subr.bf16.mxu1 %v9464_v0 }
 0xde4   :  { %8251 = vmatpush3.bf16.msra.mxu1 %v8647_v39 }
 0xde5   :  { %8268 = vmatprep.subr.bf16.mxu1 %v9464_v0 }
 0xe83   :  { %v5124_v12 = vpop.f32.mrb[120].mxu0 }
 0xe84   :  { %v8210_v13 = vpop.f32.mrb[121].mxu0 }
 0xe85   :  { %v5127_v14 = vpop.f32.mrb[122].mxu0  ;;  %v8657_v13 = vld [vmem:[#allocation52 + $0x8] sm:$0xff]  }
 0xe86   :  { %v8211_v15 = vpop.f32.mrb[123].mxu0 }
 0xe87   :  { %v8659_v15 = vld [vmem:[#allocation52 + $0x10] sm:$0xff]  }
 0xe8a   :  { %v5031_v18 = vpop.f32.mrb[132].mxu1 }
 0xe8b   :  { %v5125_v19 = vadd.f32 %v5124_v12, %v5031_v18  ;;  %v8190_v21 = vpop.f32.mrb[133].mxu1  ;;  %v8656_v12 = vld [vmem:[#allocation52] sm:$0xff]   ;;  %v8660_v18 = vld [vmem:[#allocation52 + $0x28] sm:$0xff]  }
 0xe8c   :  { %v5034_v22 = vpop.f32.mrb[134].mxu1  ;;  %v8662_v21 = vld [vmem:[#allocation52 + $0x30] sm:$0xff]  }
 0xe8d   :  { %v5128_v25 = vadd.f32 %v5127_v14, %v5034_v22  ;;  %v8191_v26 = vpop.f32.mrb[135].mxu1  ;;  %v8658_v14 = vld [vmem:[#allocation52 + $0x20] sm:$0xff]   ;;  %v8665_v22 = vld [vmem:[#allocation52 + $0x38] sm:$0xff]  }
 0xeaa   :  { %v5236_v5 = vpop.f32.mrb[136].mxu1 }
 0xeab   :  { %v5243_v27 = vadd.f32 %v5236_v5, %v5125_v19  ;;  %v8230_v32 = vpop.f32.mrb[137].mxu1  ;;  %v8661_v19 = vld [vmem:[#allocation52 + $0x18] sm:$0xff]  }
 0xeac   :  { %v5239_v33 = vpop.f32.mrb[138].mxu1 }
 0xead   :  { %v5244_v35 = vadd.f32 %v5239_v33, %v5128_v25  ;;  %v8231_v37 = vpop.f32.mrb[139].mxu1  ;;  %v5252_v40 = vadd.f32 %v7108_v30, %v5243_v27 }
 0xeaf   :  { %v5254_v41 = vmax.f32 %v5252_v40, 0.0  ;;  %v5253_v42 = vadd.f32 %v7108_v30, %v5244_v35 }
 0xeb1   :  { %5258 = vrot.lane.b32.xlu1 %v5254_v41, %s9434_s15  ;;  %v5255_v16 = vmax.f32 %v5253_v42, 0.0 }
 0xeb3   :  { %5260 = vrot.lane.b32.xlu0 %v5255_v16, %s9434_s15  ;;  %s10898_s15 = sld [smem:[#allocation91_spill]] }
 0xf23   :  { %v5259_v20 = vpop.permute.xlu1 %5258 }
 0xf24   :  { %v5264_v51 = vmax.f32 %v5254_v41, %v5259_v20  ;;  %v7127_v41 = vld [vmem:[#allocation50] ss:$0 sm:$0xff]  ;;  %v5570_v20 = vld [vmem:[#allocation13] sm:$0x3] }
 0xf25   :  { %v5261_v52 = vpop.permute.xlu0 %5260 }
 0xf26   :  { %5266 = vst.msk [vmem:[#allocation18] sm:$0xff] %vm1809_vm0, %v5264_v51  ;;  %v5265_v53 = vmax.f32 %v5255_v16, %v5261_v52  ;;  %v5573_v51 = vld [vmem:[#allocation13] sm:$0xc] }
 0xf28   :  { %5267 = vst.msk [vmem:[#allocation18 + $0x8] sm:$0xf] %vm1818_vm15, %v5265_v53  ;;  %vm10670_vm15 = vmand %vm1915_vm4, %vm5287_vm12  ;;  %vm6627_vm4 = vcmask 73728  }
 0xf2f   :  { %v5268_v54 = vld [vmem:[#allocation18] ss:$2 sm:$0x3f]  ;;  %v5270_v55 = vld [vmem:[#allocation18 + $0x1] ss:$2 sm:$0x3f] }
 0xf30   :  { %v5271_v38 = vmax.f32 %v5268_v54, %v5270_v55  ;;  %v5585_v55 = vld [vmem:[#allocation13 + $0x4] sm:$0x1] }
 0xf32   :  { %v7265_v56 = vpack.c.bf16 %v5271_v38, %v5271_v38 }
 0xf34   :  { %v5280_v62 = vshrl.u32 %v7265_v56, 16  ;;  %v5292_v60 = vrot.slane %v7265_v56, 7  ;;  %v5283_v63 = vshll.u32 %v7265_v56, 16 }
 0xf36   :  { %v5282_v24 = vrot.slane %v5280_v62, 7  ;;  %v5298_v36 = vsel %vm10663_vm2, %v5292_v60, %v5297_v46 }
 0xf37   :  { %5299 = vst [vmem:[#allocation12] sm:$0xc] %v5298_v36  ;;  %v8667_v36 = vld [vmem:[#allocation52 + $0x48] sm:$0xff]  }
 0xf38   :  { %v5285_v34 = vor.u32 %v5283_v63, %v5282_v24  ;;  %v8666_v24 = vld [vmem:[#allocation52 + $0x40] sm:$0xff]  }
 0xf3a   :  { %v5290_v61 = vsel %vm10670_vm15, %v5285_v34, %v5289_v2  ;;  %v8668_v2 = vld [vmem:[#allocation52 + $0x50] sm:$0xff]  }
 0xf3b   :  { %5291 = vst [vmem:[#allocation12] sm:$0x3] %v5290_v61  ;;  %v8669_v61 = vld [vmem:[#allocation52 + $0x58] sm:$0xff]  }
 0xf42   :  { %v5300_v23 = vld [vmem:[#allocation12] sm:$0xf] }
 0xf43   :  { %v7110_v4 = vcombine.low %v5300_v23, %v5309_v3  ;;  %8253 = vmatmul.mubr.msk.bf16.vlgmr.msra.gmra.mrb[140].mxu1 %vm1809_vm0, %v5300_v23  ;;  %v5465_v8 = vld [vmem:[#allocation12] sm:$0xe] }
 0xf44   :  { %8276 = vmatprep.mubr.msk.bf16.mxu1 %vm9466_vm1, %v9464_v0  ;;  %v7121_v11 = vcombine.low %v5465_v8, %v5309_v3  ;;  %8269 = vmatpush3.bf16.msra.mxu1 %v8658_v14 }
 0xf45   :  { %v5327_v31 = vshll.u32 %v7110_v4, 16  ;;  %v5325_v6 = vshrl.u32 %v7110_v4, 16  ;;  %8270 = vmatprep.subr.bf16.mxu1 %v9464_v0  ;;  %v8670_v4 = vld [vmem:[#allocation55] sm:$0xff]  }
 0xf46   :  { %v5478_v49 = vrot.slane %v7121_v11, 1 }
 0xf47   :  { %v5329_v7 = vrot.slane %v5327_v31, 1  ;;  %v8671_v31 = vld [vmem:[#allocation55 + $0x8] sm:$0xff]  }
 0xf48   :  { %8271 = vmatpush3.bf16.msra.mxu1 %v8660_v18 }
 0xf49   :  { %v5330_v28 = vor.u32 %v5329_v7, %v5325_v6  ;;  %8272 = vmatprep.subr.bf16.mxu1 %v9464_v0  ;;  %v8672_v6 = vld [vmem:[#allocation55 + $0x20] sm:$0xff]   ;;  %v8673_v7 = vld [vmem:[#allocation55 + $0x10] sm:$0xff]  }
 0xf4b   :  { %8241 = vmatmul.mubr.msk.bf16.vlgmr.msra.gmra.mrb[124].mxu0 %vm1809_vm0, %v5330_v28  ;;  %v8675_v28 = vld [vmem:[#allocation55 + $0x18] sm:$0xff]  }
 0xf4c   :  { %8257 = vmatpush3.bf16.msra.mxu0 %v8652_v58  ;;  %8264 = vmatprep.mubr.msk.bf16.mxu0 %vm9466_vm1, %v9464_v0  ;;  %v8674_v58 = vld [vmem:[#allocation55 + $0x28] sm:$0xff]  }
 0xf4d   :  { %8258 = vmatprep.subr.bf16.mxu0 %v9464_v0  ;;  %8273 = vmatpush3.bf16.msra.mxu1 %v8662_v21  ;;  %v7146_v21 = vld [vmem:[#allocation53] ss:$0 sm:$0xff] }
 0xf4e   :  { %8274 = vmatprep.subr.bf16.mxu1 %v9464_v0 }
 0xf50   :  { %8259 = vmatpush3.bf16.msra.mxu0 %v8653_v59  ;;  %v8676_v59 = vld [vmem:[#allocation55 + $0x30] sm:$0xff]  }
 0xf51   :  { %8260 = vmatprep.subr.bf16.mxu0 %v9464_v0  ;;  %8275 = vmatpush3.bf16.msra.mxu1 %v8665_v22 }
 0xf52   :  { %8292 = vmatprep.subr.bf16.mxu1 %v9464_v0 }
 0xf54   :  { %8261 = vmatpush3.bf16.msra.mxu0 %v8654_v29  ;;  %v8679_v29 = vld [vmem:[#allocation55 + $0x38] sm:$0xff]  }
 0xf55   :  { %8262 = vmatprep.subr.bf16.mxu0 %v9464_v0 }
 0xf58   :  { %8263 = vmatpush3.bf16.msra.mxu0 %v8655_v9 }
 0xf59   :  { %8280 = vmatprep.subr.bf16.mxu0 %v9464_v0 }
 0xf5b   :  { %8265 = vmatmul.mubr.msk.bf16.vlgmr.msra.gmra.mrb[128].mxu0 %vm1809_vm0, %v5478_v49 }
 0xf5c   :  { %8288 = vmatprep.mubr.msk.bf16.mxu0 %vm9466_vm1, %v9464_v0  ;;  %8281 = vmatpush3.bf16.msra.mxu0 %v8656_v12 }
 0xf5d   :  { %8282 = vmatprep.subr.bf16.mxu0 %v9464_v0 }
 0xf60   :  { %8283 = vmatpush3.bf16.msra.mxu0 %v8657_v13 }
 0xf61   :  { %8284 = vmatprep.subr.bf16.mxu0 %v9464_v0 }
 0xf64   :  { %8285 = vmatpush3.bf16.msra.mxu0 %v8659_v15 }
 0xf65   :  { %8286 = vmatprep.subr.bf16.mxu0 %v9464_v0 }
 0xf68   :  { %8287 = vmatpush3.bf16.msra.mxu0 %v8661_v19 }
 0xf69   :  { %8304 = vmatprep.subr.bf16.mxu0 %v9464_v0 }
0x1016   :  { %v5459_v25 = vpop.f32.mrb[140].mxu1 }
0x1017   :  { %v8254_v26 = vpop.f32.mrb[141].mxu1 }
0x1018   :  { %v5462_v5 = vpop.f32.mrb[142].mxu1 }
0x1019   :  { %v8255_v30 = vpop.f32.mrb[143].mxu1 }
0x101e   :  { %v5392_v27 = vpop.f32.mrb[124].mxu0 }
0x101f   :  { %v5460_v32 = vadd.f32 %v5459_v25, %v5392_v27  ;;  %v8242_v33 = vpop.f32.mrb[125].mxu0 }
0x1020   :  { %v5395_v35 = vpop.f32.mrb[126].mxu0 }
0x1021   :  { %v8243_v37 = vpop.f32.mrb[127].mxu0 }
0x102e   :  { %v5540_v40 = vpop.f32.mrb[128].mxu0 }
0x102f   :  { %v5546_v42 = vadd.f32 %v5540_v40, %v5460_v32  ;;  %v8266_v16 = vpop.f32.mrb[129].mxu0  ;;  %v5846_v40 = vld [vmem:[#allocation14] sm:$0x3] }
0x1030   :  { %v5543_v44 = vpop.f32.mrb[130].mxu0 }
0x1031   :  { %v5554_v10 = vadd.f32 %v7127_v41, %v5546_v42  ;;  %v8267_v43 = vpop.f32.mrb[131].mxu0  ;;  %v5849_v41 = vld [vmem:[#allocation14] sm:$0xc] }
0x1033   :  { %v5555_v45 = vmax.f32 %v5554_v10, 0.0  ;;  %v5861_v10 = vld [vmem:[#allocation14 + $0x4] sm:$0x1] }
0x1035   :  { %v7266_v47 = vpack.c.bf16 %v5555_v45, %v5555_v45 }
0x1037   :  { %v5563_v39 = vshrl.u32 %v7266_v47, 16  ;;  %v5566_v50 = vshll.u32 %v7266_v47, 16 }
0x1039   :  { %v5565_v48 = vrot.slane %v5563_v39, 7 }
0x103b   :  { %v5568_v52 = vor.u32 %v5566_v50, %v5565_v48  ;;  %v8680_v50 = vld [vmem:[#allocation55 + $0x40] sm:$0xff]  }
0x103d   :  { %v5571_v53 = vsel %vm10670_vm15, %v5568_v52, %v5570_v20  ;;  %v5574_v54 = vsel %vm10663_vm2, %v5568_v52, %v5573_v51 }
0x103e   :  { %5572 = vst [vmem:[#allocation13] sm:$0x3] %v5571_v53  ;;  %5575 = vst [vmem:[#allocation13] sm:$0xc] %v5574_v54 }
0x1045   :  { %v5576_v38 = vld [vmem:[#allocation13] sm:$0xf] }
0x1046   :  { %v7129_v56 = vcombine.low %v5576_v38, %v5585_v55  ;;  %8289 = vmatmul.mubr.msk.bf16.vlgmr.msra.gmra.mrb[132].mxu0 %vm1809_vm0, %v5576_v38  ;;  %v5741_v34 = vld [vmem:[#allocation13] sm:$0xe] }
0x1047   :  { %8312 = vmatprep.mubr.msk.bf16.mxu0 %vm9466_vm1, %v9464_v0  ;;  %v7140_v3 = vcombine.low %v5741_v34, %v5585_v55  ;;  %8305 = vmatpush3.bf16.msra.mxu0 %v8672_v6  ;;  %v8689_v34 = vld [vmem:[%s10898_s15 + $0x14] ss:$8 sps:$4 sm:$0xff]  }
0x1048   :  { %v5603_v46 = vshll.u32 %v7129_v56, 16  ;;  %v5601_v62 = vshrl.u32 %v7129_v56, 16  ;;  %8306 = vmatprep.subr.bf16.mxu0 %v9464_v0 }
0x1049   :  { %v5754_v23 = vrot.slane %v7140_v3, 1  ;;  %v7165_v3 = vld [vmem:[#allocation56] ss:$0 sm:$0xff] }
0x104a   :  { %v5605_v60 = vrot.slane %v5603_v46, 1 }
0x104b   :  { %8307 = vmatpush3.bf16.msra.mxu0 %v8674_v58 }
0x104c   :  { %v5606_v63 = vor.u32 %v5605_v60, %v5601_v62  ;;  %8308 = vmatprep.subr.bf16.mxu0 %v9464_v0 }
0x104e   :  { %8277 = vmatmul.mubr.msk.bf16.vlgmr.msra.gmra.mrb[144].mxu1 %vm1809_vm0, %v5606_v63 }
0x104f   :  { %8293 = vmatpush3.bf16.msra.mxu1 %v8666_v24  ;;  %8300 = vmatprep.mubr.msk.bf16.mxu1 %vm9466_vm1, %v9464_v0 }
0x1050   :  { %8294 = vmatprep.subr.bf16.mxu1 %v9464_v0  ;;  %8309 = vmatpush3.bf16.msra.mxu0 %v8676_v59  ;;  %v8692_v59 = vld [vmem:[%s10899_s12 + $0x4] ss:$8 sps:$4 sm:$0xff]  }
0x1051   :  { %8310 = vmatprep.subr.bf16.mxu0 %v9464_v0 }
0x1053   :  { %8295 = vmatpush3.bf16.msra.mxu1 %v8667_v36  ;;  %v8684_v36 = vld [vmem:[%s10898_s15] ss:$8 sps:$4 sm:$0xff]  }
0x1054   :  { %8296 = vmatprep.subr.bf16.mxu1 %v9464_v0  ;;  %8311 = vmatpush3.bf16.msra.mxu0 %v8679_v29  ;;  %v8695_v29 = vld [vmem:[%s10899_s12 + $0x14] ss:$8 sps:$4 sm:$0xff]  }
0x1055   :  { %8328 = vmatprep.subr.bf16.mxu0 %v9464_v0 }
0x1057   :  { %8297 = vmatpush3.bf16.msra.mxu1 %v8668_v2  ;;  %v8686_v2 = vld [vmem:[%s10898_s15 + $0x4] ss:$8 sps:$4 sm:$0xff]  }
0x1058   :  { %8298 = vmatprep.subr.bf16.mxu1 %v9464_v0 }
0x105b   :  { %8299 = vmatpush3.bf16.msra.mxu1 %v8669_v61 }
0x105c   :  { %8316 = vmatprep.subr.bf16.mxu1 %v9464_v0 }
0x105e   :  { %8301 = vmatmul.mubr.msk.bf16.vlgmr.msra.gmra.mrb[148].mxu1 %vm1809_vm0, %v5754_v23 }
0x105f   :  { %8324 = vmatprep.mubr.msk.bf16.mxu1 %vm9466_vm1, %v9464_v0  ;;  %8317 = vmatpush3.bf16.msra.mxu1 %v8670_v4 }
0x1060   :  { %8318 = vmatprep.subr.bf16.mxu1 %v9464_v0 }
0x1063   :  { %8319 = vmatpush3.bf16.msra.mxu1 %v8671_v31 }
0x1064   :  { %8320 = vmatprep.subr.bf16.mxu1 %v9464_v0 }
0x1067   :  { %8321 = vmatpush3.bf16.msra.mxu1 %v8673_v7 }
0x1068   :  { %8322 = vmatprep.subr.bf16.mxu1 %v9464_v0 }
0x106b   :  { %8323 = vmatpush3.bf16.msra.mxu1 %v8675_v28  ;;  %v8690_v28 = vld [vmem:[%s10899_s12] ss:$8 sps:$4 sm:$0xff]  }
0x106c   :  { %6158 = vmatprep.subr.bf16.mxu1 %v8686_v2  ;;  %v6123_v2 = vld [vmem:[#allocation58] sm:$0x3] }
0x1119   :  { %v5735_v8 = vpop.f32.mrb[132].mxu0 }
0x111a   :  { %v8290_v9 = vpop.f32.mrb[133].mxu0 }
0x111b   :  { %v5738_v11 = vpop.f32.mrb[134].mxu0  ;;  %v8698_v9 = vld [vmem:[%s10899_s12 + $0x24] ss:$8 sps:$4 sm:$0xff]  }
0x111c   :  { %v8291_v49 = vpop.f32.mrb[135].mxu0  ;;  %v8696_v11 = vld [vmem:[%s10899_s12 + $0x20] ss:$8 sps:$4 sm:$0xff]  }
0x111d   :  { %v8701_v49 = vld [vmem:[%s10899_s12 + $0x34] ss:$8 sps:$4 sm:$0xff]  }
0x1121   :  { %v5668_v12 = vpop.f32.mrb[144].mxu1 }
0x1122   :  { %v5736_v13 = vadd.f32 %v5735_v8, %v5668_v12  ;;  %v8278_v14 = vpop.f32.mrb[145].mxu1  ;;  %v8693_v8 = vld [vmem:[%s10899_s12 + $0x10] ss:$8 sps:$4 sm:$0xff]  }
0x1123   :  { %v5671_v15 = vpop.f32.mrb[146].mxu1  ;;  %v8699_v12 = vld [vmem:[%s10899_s12 + $0x30] ss:$8 sps:$4 sm:$0xff]   ;;  %v8702_v14 = vld [vmem:[%s10899_s12 + $0x40] ss:$8 sps:$4 sm:$0xff]  }
0x1124   :  { %v8279_v18 = vpop.f32.mrb[147].mxu1  ;;  %v8707_v15 = vld [vmem:[%s10899_s12 + $0x54] ss:$8 sps:$4 sm:$0xff]  }
0x1125   :  { %v8705_v18 = vld [vmem:[%s10899_s12 + $0x50] ss:$8 sps:$4 sm:$0xff]  }
0x1131   :  { %v5816_v19 = vpop.f32.mrb[148].mxu1 }
0x1132   :  { %v5822_v22 = vadd.f32 %v5816_v19, %v5736_v13  ;;  %v8302_v25 = vpop.f32.mrb[149].mxu1  ;;  %v8704_v13 = vld [vmem:[%s10899_s12 + $0x44] ss:$8 sps:$4 sm:$0xff]  }
0x1133   :  { %v5819_v26 = vpop.f32.mrb[150].mxu1  ;;  %v8710_v19 = vld [vmem:[%s10899_s12 + $0x64] ss:$8 sps:$4 sm:$0xff]   ;;  %v8711_v25 = vld [vmem:[%s10899_s12 + $0x70] ss:$8 sps:$4 sm:$0xff]  }
0x1134   :  { %v5830_v5 = vadd.f32 %v7146_v21, %v5822_v22  ;;  %v8303_v30 = vpop.f32.mrb[151].mxu1  ;;  %v8708_v21 = vld [vmem:[%s10899_s12 + $0x60] ss:$8 sps:$4 sm:$0xff]   ;;  %v8713_v22 = vld [vmem:[%s10899_s12 + $0x74] ss:$8 sps:$4 sm:$0xff]  }
0x1135   :  { %v8716_v26 = vld [vmem:[%s10899_s12 + $0x84] ss:$8 sps:$4 sm:$0xff]   ;;  %v8719_v30 = vld [vmem:[%s10899_s12 + $0x94] ss:$8 sps:$4 sm:$0xff]  }
0x1136   :  { %v5831_v27 = vmax.f32 %v5830_v5, 0.0  ;;  %v8714_v5 = vld [vmem:[%s10899_s12 + $0x80] ss:$8 sps:$4 sm:$0xff]  }
0x1138   :  { %v7267_v32 = vpack.c.bf16 %v5831_v27, %v5831_v27  ;;  %v8717_v27 = vld [vmem:[%s10899_s12 + $0x90] ss:$8 sps:$4 sm:$0xff]  }
0x113a   :  { %v5839_v33 = vshrl.u32 %v7267_v32, 16  ;;  %v5842_v37 = vshll.u32 %v7267_v32, 16  ;;  %v8722_v32 = vld [vmem:[%s10899_s12 + $0xa4] ss:$8 sps:$4 sm:$0xff]  }
0x113c   :  { %v5841_v35 = vrot.slane %v5839_v33, 7  ;;  %v8720_v33 = vld [vmem:[%s10899_s12 + $0xa0] ss:$8 sps:$4 sm:$0xff]  }
0x113e   :  { %v5844_v42 = vor.u32 %v5842_v37, %v5841_v35  ;;  %v8725_v35 = vld [vmem:[%s10899_s12 + $0xb4] ss:$8 sps:$4 sm:$0xff]   ;;  %v8723_v37 = vld [vmem:[%s10899_s12 + $0xb0] ss:$8 sps:$4 sm:$0xff]  }
0x1140   :  { %v5847_v16 = vsel %vm10670_vm15, %v5844_v42, %v5846_v40  ;;  %v5850_v44 = vsel %vm10663_vm2, %v5844_v42, %v5849_v41  ;;  %v8728_v40 = vld [vmem:[%s10899_s12 + $0xc4] ss:$8 sps:$4 sm:$0xff]   ;;  %v8726_v41 = vld [vmem:[%s10899_s12 + $0xc0] ss:$8 sps:$4 sm:$0xff]   ;;  %v8731_v42 = vld [vmem:[%s10899_s12 + $0xd4] ss:$8 sps:$4 sm:$0xff]  }
0x1141   :  { %5848 = vst [vmem:[#allocation14] sm:$0x3] %v5847_v16  ;;  %5851 = vst [vmem:[#allocation14] sm:$0xc] %v5850_v44  ;;  %v8729_v16 = vld [vmem:[%s10899_s12 + $0xd0] ss:$8 sps:$4 sm:$0xff]  }
0x1148   :  { %v5852_v43 = vld [vmem:[#allocation14] sm:$0xf] }
0x1149   :  { %v7148_v45 = vcombine.low %v5852_v43, %v5861_v10  ;;  %8325 = vmatmul.mubr.msk.bf16.vlgmr.msra.gmra.mrb[152].mxu1 %vm1809_vm0, %v5852_v43  ;;  %v6017_v51 = vld [vmem:[#allocation14] sm:$0xe] }
0x114a   :  { %6190 = vmatprep.mubr.bf16.mxu1 %v9465_v1  ;;  %v8683_v1 = vld [vmem:[#allocation55 + $0x58] sm:$0xff]   ;;  %v7159_v52 = vcombine.low %v6017_v51, %v5861_v10  ;;  %6159 = vmatpush1.bf16.msra.mxu1 %v8684_v36 }
0x114b   :  { %v5879_v47 = vshll.u32 %v7148_v45, 16  ;;  %v5877_v39 = vshrl.u32 %v7148_v45, 16  ;;  %6160 = vmatprep.subr.bf16.mxu1 %v8689_v34  ;;  %v8739_v51 = vld [vmem:[%s9632_s20] sm:$0xff]  }
0x114c   :  { %v6030_v53 = vrot.slane %v7159_v52, 1  ;;  %v8741_v52 = vld [vmem:[%s9632_s20 + $0x8] sm:$0xff]  }
0x114d   :  { %v5881_v48 = vrot.slane %v5879_v47, 1 }
0x114f   :  { %v5882_v20 = vor.u32 %v5881_v48, %v5877_v39  ;;  %v8734_v48 = vld [vmem:[%s10899_s12 + $0xe4] ss:$8 sps:$4 sm:$0xff]  }
0x1151   :  { %8313 = vmatmul.mubr.msk.bf16.vlgmr.msra.gmra.mrb[136].mxu0 %vm1809_vm0, %v5882_v20  ;;  %v8737_v20 = vld [vmem:[%s10899_s12 + $0xf4] ss:$8 sps:$4 sm:$0xff]  }
0x1152   :  { %8329 = vmatpush3.bf16.msra.mxu0 %v8680_v50  ;;  %8336 = vmatprep.mubr.msk.bf16.mxu0 %vm9466_vm1, %v9464_v0  ;;  %vm10900_vm1 = vcmask 261120   ;;  %v8732_v50 = vld [vmem:[%s10899_s12 + $0xe0] ss:$8 sps:$4 sm:$0xff]  }
0x1153   :  { %8330 = vmatprep.subr.bf16.mxu0 %v9464_v0 }
0x1156   :  { %8331 = vmatpush3.bf16.msra.mxu0 %v8681_v17  ;;  %v8735_v17 = vld [vmem:[%s10899_s12 + $0xf0] ss:$8 sps:$4 sm:$0xff]  }
0x1157   :  { %8332 = vmatprep.subr.bf16.mxu0 %v9464_v0 }
0x115a   :  { %8333 = vmatpush3.bf16.msra.mxu0 %v8682_v57  ;;  %v8738_v57 = vld [vmem:[%s9632_s20 + $0x40] sm:$0xff]  }
0x115b   :  { %8334 = vmatprep.subr.bf16.mxu0 %v9464_v0  ;;  %v8687_v0 = vld [vmem:[%s10898_s15 + $0x10] ss:$8 sps:$4 sm:$0xff]  }
0x115c   :  { %6161 = vmatpush1.bf16.msra.mxu1 %v8687_v0 }
0x115d   :  { %7574 = vmatprep.subr.bf16.mxu1 %v8738_v57 }
0x115e   :  { %8335 = vmatpush3.bf16.msra.mxu0 %v8683_v1  ;;  %v8740_v1 = vld [vmem:[%s9632_s20 + $0x48] sm:$0xff]  }
0x115f   :  { %6407 = vmatprep.subr.bf16.mxu0 %v8692_v59 }
0x1161   :  { %8337 = vmatmul.mubr.msk.bf16.vlgmr.msra.gmra.mrb[140].mxu0 %vm1809_vm0, %v6030_v53  ;;  %vm10901_vm0 = vmmov %vm10900_vm1  ;;  %v8742_v53 = vld [vmem:[%s9632_s20 + $0x50] sm:$0xff]  }
0x1162   :  { %6408 = vmatpush1.bf16.msra.mxu0 %v8690_v28 }
0x1163   :  { %6409 = vmatprep.subr.bf16.mxu0 %v8695_v29 }
0x1166   :  { %6410 = vmatpush1.bf16.msra.mxu0 %v8693_v8  ;;  %v8750_v8 = vld [vmem:[%s9632_s20 + $0x70] sm:$0xff]  }
0x1167   :  { %6411 = vmatprep.subr.bf16.mxu0 %v8698_v9  ;;  %v8751_v9 = vld [vmem:[%s9632_s20 + $0x30] sm:$0xff]  }
0x116a   :  { %6412 = vmatpush1.bf16.msra.mxu0 %v8696_v11  ;;  %v8752_v11 = vld [vmem:[%s9632_s20 + $0x78] sm:$0xff]  }
0x116b   :  { %6413 = vmatprep.subr.bf16.mxu0 %v8701_v49  ;;  %v8753_v49 = vld [vmem:[%s9632_s20 + $0x38] sm:$0xff]  }
0x116e   :  { %6414 = vmatpush1.bf16.msra.mxu0 %v8699_v12  ;;  %v6235_v12 = vld [vmem:[#allocation59] sm:$0x3] }
0x116f   :  { %6415 = vmatprep.subr.bf16.mxu0 %v8704_v13 }
0x1172   :  { %6416 = vmatpush1.bf16.msra.mxu0 %v8702_v14 }
0x1173   :  { %6417 = vmatprep.subr.bf16.mxu0 %v8707_v15 }
0x1176   :  { %6418 = vmatpush1.bf16.msra.mxu0 %v8705_v18 }
0x1177   :  { %6419 = vmatprep.subr.bf16.mxu0 %v8710_v19 }
0x117a   :  { %6420 = vmatpush1.bf16.msra.mxu0 %v8708_v21 }
0x117b   :  { %6421 = vmatprep.subr.bf16.mxu0 %v8713_v22 }
0x117e   :  { %6422 = vmatpush1.bf16.msra.mxu0 %v8711_v25 }
0x117f   :  { %6423 = vmatprep.subr.bf16.mxu0 %v8716_v26 }
0x1182   :  { %6424 = vmatpush1.bf16.msra.mxu0 %v8714_v5 }
0x1183   :  { %6425 = vmatprep.subr.bf16.mxu0 %v8719_v30 }
0x1186   :  { %6426 = vmatpush1.bf16.msra.mxu0 %v8717_v27 }
0x1187   :  { %6427 = vmatprep.subr.bf16.mxu0 %v8722_v32 }
0x118a   :  { %6428 = vmatpush1.bf16.msra.mxu0 %v8720_v33  ;;  %v7203_v33 = vld [vmem:[#allocation61] ss:$0 sm:$0xff] }
0x118b   :  { %6429 = vmatprep.subr.bf16.mxu0 %v8725_v35 }
0x118e   :  { %6430 = vmatpush1.bf16.msra.mxu0 %v8723_v37 }
0x118f   :  { %6431 = vmatprep.subr.bf16.mxu0 %v8728_v40 }
0x1192   :  { %6432 = vmatpush1.bf16.msra.mxu0 %v8726_v41 }
0x1193   :  { %6433 = vmatprep.subr.bf16.mxu0 %v8731_v42 }
0x1196   :  { %6434 = vmatpush1.bf16.msra.mxu0 %v8729_v16 }
0x1197   :  { %6435 = vmatprep.subr.bf16.mxu0 %v8734_v48 }
0x119a   :  { %6436 = vmatpush1.bf16.msra.mxu0 %v8732_v50 }
0x119b   :  { %6437 = vmatprep.subr.bf16.mxu0 %v8737_v20 }
0x119e   :  { %6438 = vmatpush1.bf16.msra.mxu0 %v8735_v17 }
0x121c   :  { %v6011_v54 = vpop.f32.mrb[152].mxu1 }
0x121d   :  { %v8326_v55 = vpop.f32.mrb[153].mxu1 }
0x121e   :  { %v6014_v38 = vpop.f32.mrb[154].mxu1  ;;  %v8744_v55 = vld [vmem:[%s9632_s20 + $0x58] sm:$0xff]  }
0x121f   :  { %v8327_v56 = vpop.f32.mrb[155].mxu1  ;;  %v8745_v38 = vld [vmem:[%s9632_s20 + $0x18] sm:$0xff]  }
0x1220   :  { %v8746_v56 = vld [vmem:[%s9632_s20 + $0x60] sm:$0xff]  }
0x1224   :  { %v5944_v46 = vpop.f32.mrb[136].mxu0 }
0x1225   :  { %v6012_v62 = vadd.f32 %v6011_v54, %v5944_v46  ;;  %v8314_v60 = vpop.f32.mrb[137].mxu0  ;;  %v8743_v54 = vld [vmem:[%s9632_s20 + $0x10] sm:$0xff]   ;;  %v8747_v46 = vld [vmem:[%s9632_s20 + $0x20] sm:$0xff]  }
0x1226   :  { %v5947_v24 = vpop.f32.mrb[138].mxu0  ;;  %v8749_v60 = vld [vmem:[%s9632_s20 + $0x28] sm:$0xff]  }
0x1227   :  { %v8315_v63 = vpop.f32.mrb[139].mxu0  ;;  %v6125_v24 = vlaneseq }
0x1229   :  { %v6126_v63 = vshrl.u32 %v6125_v24, 7 }
0x122b   :  { %v6127_v36 = vsub.s32 0, %v6126_v63  ;;  %v6131_v34 = vsub.s32 1, %v6126_v63 }
0x122d   :  { %v6128_v0 = vrot.slane %v6123_v2, %v6127_v36  ;;  %v6240_v13 = vrot.slane %v6235_v12, %v6127_v36  ;;  %v6244_v14 = vrot.slane %v6235_v12, %v6131_v34 }
0x1234   :  { %v6092_v61 = vpop.f32.mrb[140].mxu0 }
0x1235   :  { %v6098_v23 = vadd.f32 %v6092_v61, %v6012_v62  ;;  %v8338_v4 = vpop.f32.mrb[141].mxu0  ;;  %v8748_v62 = vld [vmem:[%s9632_s20 + $0x68] sm:$0xff]   ;;  %v6132_v61 = vrot.slane %v6123_v2, %v6131_v34  ;;  %s9468_s20 = smov [#allocation62]  }
0x1236   :  { %v6095_v31 = vpop.f32.mrb[142].mxu0  ;;  %s6637_s22 = sshll.u32 %s9468_s20, 4  ;;  %s6638_s22 = int_to_ptr.vmem [resolvable:$true] %s6637_s22 }
0x1237   :  { %v10738_v6 = vadd.f32 %v7165_v3, %v6098_v23  ;;  %v8339_v7 = vpop.f32.mrb[143].mxu0  ;;  %s9348_s3 = scalar_lea.vmem %s6638_s22, 32  ;;  %p9353_p7 = scmp.lt.s32.totalorder %s6638_s22, %s6638_s22 }
0x1238   :  { %p9349_p6 = scmp.ne.s32.totalorder %s6638_s22, %s9348_s3  ;;  %p9354_p8 = scmp.lt.s32.totalorder %s9348_s3, %s9348_s3 }
0x1239   :  { %v6107_v58 = vmax.f32 %v10738_v6, 0.0 }
0x123a   :  { %p9355_p9 = por %p9354_p8, %p9353_p7 }
0x123b   :  { %6109 = vrot.lane.b32.xlu1 %v6107_v58, %s9467_s8 }
0x123c   :  { %p9356_p10 = pnand %p9355_p9, %p9349_p6 }
0x12ad   :  { %v6110_v44 = vpop.permute.xlu1 %6109 }
0x12ae   :  { %v6112_v10 = vmax.f32 %v6107_v58, %v6110_v44 }
0x12b0   :  { %6113 = vst.msk [vmem:[#allocation19] sm:$0xff] %vm10900_vm1, %v6112_v10 }
0x12b7   :  { %v6114_v43 = vld [vmem:[#allocation19] ss:$2 sm:$0xf]  ;;  %v6116_v45 = vld [vmem:[#allocation19 + $0x1] ss:$2 sm:$0xf] }
0x12b8   :  { %v6117_v47 = vmax.f32 %v6114_v43, %v6116_v45 }
0x12ba   :  { %v6118_v39 = vpack.c.bf16 %v6117_v47, %v6117_v47 }
0x12bc   :  { %7170 = vmatmul.mubr.msk.bf16.vlgmr.msra.gmra.mrb[156].mxu1 %vm10901_vm0, %v6118_v39 }
0x12bd   :  { %7575 = vmatpush3.bf16.msra.mxu1 %v8739_v51 }
0x12be   :  { %7576 = vmatprep.subr.bf16.mxu1 %v8740_v1 }
0x12c1   :  { %7577 = vmatpush3.bf16.msra.mxu1 %v8741_v52 }
0x12c2   :  { %7578 = vmatprep.subr.bf16.mxu1 %v8742_v53 }
0x12c5   :  { %7579 = vmatpush3.bf16.msra.mxu1 %v8743_v54 }
0x12c6   :  { %7580 = vmatprep.subr.bf16.mxu1 %v8744_v55 }
0x12c9   :  { %7581 = vmatpush3.bf16.msra.mxu1 %v8745_v38 }
0x12ca   :  { %7582 = vmatprep.subr.bf16.mxu1 %v8746_v56 }
0x12cd   :  { %7583 = vmatpush3.bf16.msra.mxu1 %v8747_v46 }
0x12ce   :  { %7584 = vmatprep.subr.bf16.mxu1 %v8748_v62 }
0x12d1   :  { %7585 = vmatpush3.bf16.msra.mxu1 %v8749_v60 }
0x12d2   :  { %7586 = vmatprep.subr.bf16.mxu1 %v8750_v8 }
0x12d5   :  { %7587 = vmatpush3.bf16.msra.mxu1 %v8751_v9 }
0x12d6   :  { %7588 = vmatprep.subr.bf16.mxu1 %v8752_v11 }
0x12d9   :  { %7589 = vmatpush3.bf16.msra.mxu1 %v8753_v49 }
0x138f   :  { %v6192_v3 = vpop.f32.mrb[156].mxu1 }
0x1390   :  { %v6193_v23 = vadd.f32 %v6192_v3, %v6128_v0  ;;  %v6194_v4 = vpop.f32.mrb[157].mxu1 }
0x1391   :  { %v6195_v31 = vadd.f32 %v6194_v4, %v6132_v61  ;;  %v6196_v6 = vpop.f32.mrb[158].mxu1 }
0x1392   :  { %v6199_v7 = vmax.f32 %v6193_v23, 0.0  ;;  %v6197_v58 = vpop.f32.mrb[159].mxu1 }
0x1393   :  { %v6200_v28 = vmax.f32 %v6195_v31, 0.0 }
0x1394   :  { %v6201_v29 = vpack.c.bf16 %v6199_v7, %v6199_v7 }
0x1395   :  { %v6202_v59 = vpack.c.bf16 %v6200_v28, %v6200_v28 }
0x1397   :  { %6439 = vmatprep.mubr.bf16.mxu0 %v6202_v59 }
0x1398   :  { %6440 = vmatmul.mubr.bf16.vlgmr.msra.gmra.mrb[144].mxu0 %v6201_v29 }
0x146b   :  { %v6441_v15 = vpop.f32.mrb[144].mxu0 }
0x146c   :  { %v6442_v18 = vadd.f32 %v6441_v15, %v6240_v13  ;;  %v6443_v19 = vpop.f32.mrb[145].mxu0 }
0x146d   :  { %v6444_v21 = vadd.f32 %v6443_v19, %v6244_v14  ;;  %v6445_v22 = vpop.f32.mrb[146].mxu0 }
0x146e   :  { %v6448_v25 = vmax.f32 %v6442_v18, 0.0  ;;  %v6446_v26 = vpop.f32.mrb[147].mxu0 }
0x146f   :  { %v6449_v5 = vmax.f32 %v6444_v21, 0.0 }
0x1470   :  { %v6450_v27 = vpack.c.bf16 %v6448_v25, %v6448_v25 }
0x1471   :  { %v6451_v30 = vpack.c.bf16 %v6449_v5, %v6449_v5 }
0x1473   :  { %6619 = vmatprep.mubr.bf16.mxu1 %v6451_v30 }
0x1474   :  { %6620 = vmatmul.mubr.bf16.vlgmr.msra.gmra.mrb[160].mxu1 %v6450_v27 }
0x1547   :  { %v7590_v32 = vpop.f32.mrb[160].mxu1 }
0x1548   :  { %v7591_v35 = vpop.f32.mrb[161].mxu1 }
0x1549   :  { %v7592_v37 = vadd.f32 %v7591_v35, %v7590_v32  ;;  %v7593_v40 = vpop.f32.mrb[162].mxu1 }
0x154a   :  { %v7594_v41 = vpop.f32.mrb[163].mxu1 }
0x154b   :  { %v6622_v42 = vadd.f32 %v7592_v37, %v7203_v33 }
0x154d   :  { %6628 = vst.msk [vmem:[#allocation62] sm:$0x1] %vm6627_vm4, %v6622_v42 }
0x154e   :  { %6630 = vst.msk [vmem:[#allocation62 - $0x1] sm:$0x4] %vm6629_vm6, %v6622_v42 }
0x154f   :  { %9359 = shalt.err (!%p9356_p10)
}
0x1550   :  { %s9360_s27 = scalar_lea.hbm %s9642_s4, 32 }
0x1551   :  { %p9361_p11 = scmp.ne.s32.totalorder %s9642_s4, %s9360_s27  ;;  %p9364_p12 = scmp.lt.u32.totalorder %s9360_s27, %s9642_s4 }
0x1553   :  { %p9366_p13 = pnand %p9364_p12, %p9361_p11 }
0x1555   :  { %9369 = shalt.err (!%p9366_p13)
}
0x1556   :  { %6640 = dma.vmem_to_hbm [thread:$0]  %s6638_s22, 32, %s9642_s4, [#allocation22]  }
0x1557   :  { %9398 = dma.done.wait [#allocation22], 32  }
0x1558   :  { %9399 = vsyncadd [#allocation22], 4294967264 }
0x1559   :  { %6644 = vsyncpa [#allocation21], 1 }
0x155a   :  { %6645 = vsyncpa [#allocation24], 1 }
0x155b   :  { %6646 = vsyncpa [#allocation27], 1 }
0x155c   :  { %6647 = vsyncpa [#allocation30], 1 }
0x155d   :  { %6648 = vsyncpa [#allocation33], 1 }
0x155e   :  { %6649 = vsyncpa [#allocation36], 1 }
0x155f   :  { %6650 = vsyncpa [#allocation39], 1 }
0x1560   :  { %6651 = vsyncpa [#allocation42], 1 }
0x1561   :  { %6652 = vsyncpa [#allocation45], 1 }
0x1562   :  { %6653 = vsyncpa [#allocation48], 1 }
0x1563   :  { %6654 = vsyncpa [#allocation51], 1 }
0x1564   :  { %6655 = vsyncpa [#allocation54], 1 }
0x1565   :  { %6656 = vsyncpa [#allocation57], 1 }
0x1566   :  { %6657 = vsyncpa [#allocation60], 1 }
0x1567   :  { %6658 = vsyncpa [#allocation22], 1 }

</bundles_post_ra>
